<compile_context>
chip_gen: v5e
topology: v5e:2x2
jax: 0.10.0
libtpu: 0.0.40
codegen_flags: <defaults>
</compile_context>

<pallas_src>
import functools
import math

import jax
import jax.numpy as jnp
from jax import lax
from jax.experimental import pallas as pl
from jax.experimental.pallas import tpu as pltpu


_VMEM_LIMIT = 32 * 1024 * 1024     # explicit scoped-VMEM budget (portable v5e/v6e/v7x)


# ---------------------------------------------------------------------------
# Shared in-kernel helpers
# ---------------------------------------------------------------------------
def _addnorm(s, g, b, E):
    """LayerNorm(s) * g + b  (eps = 1e-5, matches nn.LayerNorm)."""
    mu = jnp.sum(s, axis=-1, keepdims=True) * (1.0 / E)
    d = s - mu
    var = jnp.sum(d * d, axis=-1, keepdims=True) * (1.0 / E)
    return d * lax.rsqrt(var + 1e-5) * g + b


def _mha_fc_core(q, k, xkv_bf, bias, wvfc_ref, heads, head_dim, E, inv_scale):
    """Per-head QK^T -> masked softmax -> attn @ (x_kv W_vfc[sl]) with fc_out folded in.

    q, k       : (Q, E) f32 projected queries / keys
    xkv_bf     : (K, E) bf16 raw key/value-side input
    bias       : additive mask bias, (1, K) or (Q, K) f32 (0 = keep, -1e28 = masked)
    wvfc_ref   : (E, E) bf16 ref holding wv_bd @ wfc^T
    Returns (Q, E) f32 attention output BEFORE the fc bias.
    """
    q_bf = q.astype(jnp.bfloat16)
    k_bf = k.astype(jnp.bfloat16)
    Q = q.shape[0]
    proj = jnp.zeros((Q, E), jnp.float32)
    for h in range(heads):                         # unrolled, static slices
        sl = slice(h * head_dim, (h + 1) * head_dim)
        energy = lax.dot_general(q_bf[:, sl], k_bf[:, sl],
                                 (((1,), (1,)), ((), ())),
                                 preferred_element_type=jnp.float32)      # (Q, K)
        scaled = (energy + bias) * inv_scale       # mask-before-scale (PyTorch)
        m_row = jnp.max(scaled, axis=-1, keepdims=True)
        p = jnp.exp(scaled - m_row)
        denom = jnp.sum(p, axis=-1, keepdims=True)
        r = pl.reciprocal(denom, approx=True)      # EUP slot
        r = r * (2.0 - denom * r)                  # one Newton step -> ~f32 accuracy
        attn = (p * r).astype(jnp.bfloat16)
        # fc_out folded into AV:  vw_h = x_kv[:, sl] @ (Wv^T Wfc^T)[sl, :]  (K, E)
        vw_h = jnp.dot(xkv_bf[:, sl], wvfc_ref[sl, :],
                       preferred_element_type=jnp.float32)
        proj = proj + jnp.dot(attn, vw_h.astype(jnp.bfloat16),
                              preferred_element_type=jnp.float32)
    return proj


# ---------------------------------------------------------------------------
# Fused: self-attention (+ folded fc_out) + residual + LayerNorm
#   causal=False : padding mask (N,1,K) input
#   causal=True  : causal mask generated in-kernel from iota (no mask DMA)
# ---------------------------------------------------------------------------
def fused_self_attention_addnorm(x, pad_mask, ap, embed_size, heads, causal):
    N, S, E = x.shape
    head_dim = E // heads
    inv_scale = 1.0 / math.sqrt(embed_size)

    def kernel(*refs):
        if causal:
            x_ref, wqk_ref, wvfc_ref, bfc_ref, g_ref, beta_ref, o_ref = refs
        else:
            x_ref, m_ref, wqk_ref, wvfc_ref, bfc_ref, g_ref, beta_ref, o_ref = refs

        x_f32 = x_ref[...]                                             # (S, E)
        x_bf = x_f32.astype(jnp.bfloat16)
        # merged Q|K projection: one (S,E)x(E,2E) MXU pass
        qk = jnp.dot(x_bf, wqk_ref[...], preferred_element_type=jnp.float32)
        q = qk[:, :E]
        k = qk[:, E:]

        if causal:
            row = lax.broadcasted_iota(jnp.int32, (S, S), 0)
            col = lax.broadcasted_iota(jnp.int32, (S, S), 1)
            bias = jnp.where(col > row, jnp.float32(-1e28), jnp.float32(0.0))
        else:
            bias = (m_ref[...] == 0).astype(jnp.float32) * (-1e28)     # (1, S)

        proj = _mha_fc_core(q, k, x_bf, bias, wvfc_ref,
                            heads, head_dim, E, inv_scale)
        s = proj + bfc_ref[...] + x_f32       # residual (dropout p=0 is identity)
        o_ref[...] = _addnorm(s, g_ref[...], beta_ref[...], E)

    weight_specs = [
        pl.BlockSpec((E, 2 * E), lambda n: (0, 0)),
        pl.BlockSpec((E, E), lambda n: (0, 0)),
        pl.BlockSpec((1, E), lambda n: (0, 0)),
        pl.BlockSpec((1, E), lambda n: (0, 0)),
        pl.BlockSpec((1, E), lambda n: (0, 0)),
    ]
    x_spec = pl.BlockSpec((None, S, E), lambda n: (n, 0, 0))
    if causal:
        in_specs = [x_spec] + weight_specs
        args = (x, ap["w_qk"], ap["w_vfc"], ap["b_fc"], ap["g"], ap["b"])
    else:
        in_specs = ([x_spec, pl.BlockSpec((None, 1, S), lambda n: (n, 0, 0))]
                    + weight_specs)
        args = (x, pad_mask, ap["w_qk"], ap["w_vfc"], ap["b_fc"], ap["g"], ap["b"])

    return pl.pallas_call(
        kernel,
        out_shape=jax.ShapeDtypeStruct((N, S, E), jnp.float32),
        grid=(N,),
        in_specs=in_specs,
        out_specs=pl.BlockSpec((None, S, E), lambda n: (n, 0, 0)),
        compiler_params=pltpu.CompilerParams(
            dimension_semantics=("parallel",),
            vmem_limit_bytes=_VMEM_LIMIT),
    )(*args)


# ---------------------------------------------------------------------------
# Fused: cross-attention (+ folded fc_out) + residual + LayerNorm
# ---------------------------------------------------------------------------
def fused_cross_attention_addnorm(x_q, x_kv, pad_mask, ap, embed_size, heads):
    N, Q, E = x_q.shape
    K = x_kv.shape[1]
    head_dim = E // heads
    inv_scale = 1.0 / math.sqrt(embed_size)

    def kernel(xq_ref, xkv_ref, m_ref, wq_ref, wk_ref, wvfc_ref,
               bfc_ref, g_ref, beta_ref, o_ref):
        xq_f32 = xq_ref[...]
        xq_bf = xq_f32.astype(jnp.bfloat16)
        xkv_bf = xkv_ref[...].astype(jnp.bfloat16)
        q = jnp.dot(xq_bf, wq_ref[...], preferred_element_type=jnp.float32)
        k = jnp.dot(xkv_bf, wk_ref[...], preferred_element_type=jnp.float32)
        bias = (m_ref[...] == 0).astype(jnp.float32) * (-1e28)         # (1, K)
        proj = _mha_fc_core(q, k, xkv_bf, bias, wvfc_ref,
                            heads, head_dim, E, inv_scale)
        s = proj + bfc_ref[...] + xq_f32
        o_ref[...] = _addnorm(s, g_ref[...], beta_ref[...], E)

    return pl.pallas_call(
        kernel,
        out_shape=jax.ShapeDtypeStruct((N, Q, E), jnp.float32),
        grid=(N,),
        in_specs=[
            pl.BlockSpec((None, Q, E), lambda n: (n, 0, 0)),
            pl.BlockSpec((None, K, E), lambda n: (n, 0, 0)),
            pl.BlockSpec((None, 1, K), lambda n: (n, 0, 0)),
            pl.BlockSpec((E, E), lambda n: (0, 0)),
            pl.BlockSpec((E, E), lambda n: (0, 0)),
            pl.BlockSpec((E, E), lambda n: (0, 0)),
            pl.BlockSpec((1, E), lambda n: (0, 0)),
            pl.BlockSpec((1, E), lambda n: (0, 0)),
            pl.BlockSpec((1, E), lambda n: (0, 0)),
        ],
        out_specs=pl.BlockSpec((None, Q, E), lambda n: (n, 0, 0)),
        compiler_params=pltpu.CompilerParams(
            dimension_semantics=("parallel",),
            vmem_limit_bytes=_VMEM_LIMIT),
    )(x_q, x_kv, pad_mask, ap["w_q"], ap["w_k"], ap["w_vfc"],
      ap["b_fc"], ap["g"], ap["b"])


# ---------------------------------------------------------------------------
# Fused: FeedForward (Linear -> ReLU -> Linear) + residual + LayerNorm
# Row-tiled "parallel" grid so v7x's second TC has work.
# ---------------------------------------------------------------------------
def fused_ffn_addnorm(x, fp):
    N, S, E = x.shape
    R = N * S
    Hf = fp["w1_t"].shape[1]
    x2 = x.reshape(R, E)
    RB = 8 if (R % 8 == 0 and R > 8) else R

    def kernel(x_ref, w1_ref, b1_ref, w2_ref, b2_ref, g_ref, beta_ref, o_ref):
        xv = x_ref[...]
        h = jnp.dot(xv.astype(jnp.bfloat16), w1_ref[...],
                    preferred_element_type=jnp.float32) + b1_ref[...]
        h = jnp.maximum(h, 0.0)
        f = jnp.dot(h.astype(jnp.bfloat16), w2_ref[...],
                    preferred_element_type=jnp.float32) + b2_ref[...]
        s = f + xv                            # residual (dropout p=0 is identity)
        o_ref[...] = _addnorm(s, g_ref[...], beta_ref[...], E)

    out2 = pl.pallas_call(
        kernel,
        out_shape=jax.ShapeDtypeStruct((R, E), jnp.float32),
        grid=(R // RB,),
        in_specs=[
            pl.BlockSpec((RB, E), lambda i: (i, 0)),
            pl.BlockSpec((E, Hf), lambda i: (0, 0)),
            pl.BlockSpec((1, Hf), lambda i: (0, 0)),
            pl.BlockSpec((Hf, E), lambda i: (0, 0)),
            pl.BlockSpec((1, E), lambda i: (0, 0)),
            pl.BlockSpec((1, E), lambda i: (0, 0)),
            pl.BlockSpec((1, E), lambda i: (0, 0)),
        ],
        out_specs=pl.BlockSpec((RB, E), lambda i: (i, 0)),
        compiler_params=pltpu.CompilerParams(
            dimension_semantics=("parallel",),
            vmem_limit_bytes=_VMEM_LIMIT),
    )(x2, fp["w1_t"], fp["b1"], fp["w2_t"], fp["b2"], fp["g"], fp["b"])
    return out2.reshape(N, S, E)


# ---------------------------------------------------------------------------
# Final vocab projection: x @ W^T + b, tiled over rows and lane-dense V chunks.
# ---------------------------------------------------------------------------
def linear_vocab(x, w_t, b):
    N, S, E = x.shape
    V = w_t.shape[1]
    R = N * S
    x2 = x.reshape(R, E)
    RB = 8 if (R % 8 == 0 and R > 8) else R
    VB = 256 if (V % 256 == 0 and V > 256) else V

    def kernel(x_ref, w_ref, b_ref, o_ref):
        o_ref[...] = jnp.dot(x_ref[...].astype(jnp.bfloat16), w_ref[...],
                             preferred_element_type=jnp.float32) + b_ref[...]

    out2 = pl.pallas_call(
        kernel,
        out_shape=jax.ShapeDtypeStruct((R, V), jnp.float32),
        grid=(R // RB, V // VB),
        in_specs=[
            pl.BlockSpec((RB, E), lambda i, j: (i, 0)),
            pl.BlockSpec((E, VB), lambda i, j: (0, j)),
            pl.BlockSpec((1, VB), lambda i, j: (0, j)),
        ],
        out_specs=pl.BlockSpec((RB, VB), lambda i, j: (i, j)),
        compiler_params=pltpu.CompilerParams(
            dimension_semantics=("parallel", "parallel"),
            vmem_limit_bytes=_VMEM_LIMIT),
    )(x2, w_t, b)
    return out2.reshape(N, S, V)


# ---------------------------------------------------------------------------
# One-time parameter preparation (hoisted out of the jitted forward)
# ---------------------------------------------------------------------------
def _prep_attention(ap, embed_size, heads, merge_qk):
    eye_h = jnp.eye(heads, dtype=jnp.float32)
    wq_bd = jnp.kron(eye_h, ap["wq"].T)          # block-diag (E, E)
    wk_bd = jnp.kron(eye_h, ap["wk"].T)
    wv_bd = jnp.kron(eye_h, ap["wv"].T)
    # fc_out folded into the AV matmul
    w_vfc = jnp.dot(wv_bd, ap["w_fc"].T, precision=lax.Precision.HIGHEST)
    out = {"w_vfc": w_vfc.astype(jnp.bfloat16),
           "b_fc": ap["b_fc"].reshape(1, embed_size)}
    if merge_qk:                                 # self-attention: q==k input
        out["w_qk"] = jnp.concatenate([wq_bd, wk_bd], axis=1).astype(jnp.bfloat16)
    else:                                        # cross-attention
        out["w_q"] = wq_bd.astype(jnp.bfloat16)
        out["w_k"] = wk_bd.astype(jnp.bfloat16)
    return out


def _prep_ffn(tb):
    return {"w1_t": tb["ff_w1"].T.astype(jnp.bfloat16),
            "b1": tb["ff_b1"].reshape(1, -1),
            "w2_t": tb["ff_w2"].T.astype(jnp.bfloat16),
            "b2": tb["ff_b2"].reshape(1, -1),
            "g": tb["norm2_g"].reshape(1, -1),
            "b": tb["norm2_b"].reshape(1, -1)}


def prepare_params(params, embed_size, heads):
    p_enc, p_dec = params["encoder"], params["decoder"]

    def prep_tb(tb, self_attn):
        attn = _prep_attention(tb["attn"], embed_size, heads, merge_qk=self_attn)
        attn["g"] = tb["norm1_g"].reshape(1, -1)
        attn["b"] = tb["norm1_b"].reshape(1, -1)
        return {"attn": attn, "ffn": _prep_ffn(tb)}

    enc_layers = [prep_tb(tb, True) for tb in p_enc["layers"]]
    dec_layers = []
    for lp in p_dec["layers"]:
        sa = _prep_attention(lp["attn"], embed_size, heads, merge_qk=True)
        sa["g"] = lp["norm_g"].reshape(1, -1)
        sa["b"] = lp["norm_b"].reshape(1, -1)
        dec_layers.append({"self_attn": sa, "tb": prep_tb(lp["tb"], False)})

    return {
        "enc_word_emb": p_enc["word_emb"], "enc_pos_emb": p_enc["pos_emb"],
        "enc_layers": enc_layers,
        "dec_word_emb": p_dec["word_emb"], "dec_pos_emb": p_dec["pos_emb"],
        "dec_layers": dec_layers,
        "fc_w_t": p_dec["fc_w"].T.astype(jnp.bfloat16),
        "fc_b": p_dec["fc_b"].reshape(1, -1),
    }


# ---------------------------------------------------------------------------
# Model composition (mirrors the PyTorch module structure, dropout = 0)
# ---------------------------------------------------------------------------
def transformer_fwd(src, trg, prep, embed_size, heads, src_pad_idx):
    N, src_len = src.shape
    trg_len = trg.shape[1]
    # padding mask in minimal shape (N,1,K); causal mask is generated in-kernel.
    src_mask = (src != src_pad_idx).astype(jnp.int32)[:, None, :]

    # TODO(synk): embedding gathers + (p=0) dropout stay in XLA; a Pallas gather
    # kernel adds no value for dense lookups at this shape.
    enc_x = (prep["enc_word_emb"][src]
             + prep["enc_pos_emb"][jnp.arange(src_len)][None, :, :])
    for lp in prep["enc_layers"]:
        a = fused_self_attention_addnorm(enc_x, src_mask, lp["attn"],
                                         embed_size, heads, causal=False)
        enc_x = fused_ffn_addnorm(a, lp["ffn"])

    dec_x = (prep["dec_word_emb"][trg]
             + prep["dec_pos_emb"][jnp.arange(trg_len)][None, :, :])
    for lp in prep["dec_layers"]:
        q = fused_self_attention_addnorm(dec_x, None, lp["self_attn"],
                                         embed_size, heads, causal=True)
        a = fused_cross_attention_addnorm(q, enc_x, src_mask, lp["tb"]["attn"],
                                          embed_size, heads)
        dec_x = fused_ffn_addnorm(a, lp["tb"]["ffn"])

    return linear_vocab(dec_x, prep["fc_w_t"], prep["fc_b"])


# ---------------------------------------------------------------------------
# Pure-JAX f32 reference mirroring the PyTorch forward exactly
# ---------------------------------------------------------------------------
_P_HI = lax.Precision.HIGHEST


def _ref_self_attention(values, keys, query, mask4, p, embed_size, heads):
    N, v_len, E = values.shape
    k_len, q_len = keys.shape[1], query.shape[1]
    hd = E // heads
    v = jnp.einsum("nvhd,ed->nvhe", values.reshape(N, v_len, heads, hd),
                   p["wv"], precision=_P_HI)
    k = jnp.einsum("nkhd,ed->nkhe", keys.reshape(N, k_len, heads, hd),
                   p["wk"], precision=_P_HI)
    q = jnp.einsum("nqhd,ed->nqhe", query.reshape(N, q_len, heads, hd),
                   p["wq"], precision=_P_HI)
    energy = jnp.einsum("nqhd,nkhd->nhqk", q, k, precision=_P_HI)
    energy = jnp.where(mask4 == 0, -1e28, energy)
    attn = jax.nn.softmax(energy / (embed_size ** 0.5), axis=3)
    out = jnp.einsum("nhql,nlhd->nqhd", attn, v,
                     precision=_P_HI).reshape(N, q_len, E)
    return jnp.einsum("nqe,fe->nqf", out, p["w_fc"], precision=_P_HI) + p["b_fc"]


def _ref_layernorm(x, g, b):
    mu = x.mean(-1, keepdims=True)
    var = ((x - mu) ** 2).mean(-1, keepdims=True)
    return (x - mu) / jnp.sqrt(var + 1e-5) * g + b


def _ref_transformer_block(value, key_, query, mask4, tb_p, embed_size, heads):
    a = _ref_self_attention(value, key_, query, mask4, tb_p["attn"],
                            embed_size, heads)
    x = _ref_layernorm(a + query, tb_p["norm1_g"], tb_p["norm1_b"])
    h = jnp.maximum(jnp.einsum("nse,he->nsh", x, tb_p["ff_w1"],
                               precision=_P_HI) + tb_p["ff_b1"], 0.0)
    f = jnp.einsum("nsh,eh->nse", h, tb_p["ff_w2"],
                   precision=_P_HI) + tb_p["ff_b2"]
    return _ref_layernorm(f + x, tb_p["norm2_g"], tb_p["norm2_b"])


def _ref_transformer(src, trg, params, embed_size, heads, src_pad_idx):
    N, src_len = src.shape
    trg_len = trg.shape[1]
    src_mask4 = (src != src_pad_idx).astype(jnp.int32)[:, None, None, :]
    trg_mask4 = jnp.tril(jnp.ones((trg_len, trg_len), jnp.int32))[None, None]
    p_enc, p_dec = params["encoder"], params["decoder"]

    enc_x = p_enc["word_emb"][src] + p_enc["pos_emb"][jnp.arange(src_len)][None]
    for tb_p in p_enc["layers"]:
        enc_x = _ref_transformer_block(enc_x, enc_x, enc_x, src_mask4, tb_p,
                                       embed_size, heads)

    dec_x = p_dec["word_emb"][trg] + p_dec["pos_emb"][jnp.arange(trg_len)][None]
    for layer_p in p_dec["layers"]:
        a = _ref_self_attention(dec_x, dec_x, dec_x, trg_mask4,
                                layer_p["attn"], embed_size, heads)
        q = _ref_layernorm(a + dec_x, layer_p["norm_g"], layer_p["norm_b"])
        dec_x = _ref_transformer_block(enc_x, enc_x, q, src_mask4,
                                       layer_p["tb"], embed_size, heads)

    return jnp.einsum("nse,ve->nsv", dec_x, p_dec["fc_w"],
                      precision=_P_HI) + p_dec["fc_b"]


# ---------------------------------------------------------------------------
# Deterministic parameter init (shapes follow the nn.Module definitions)
# ---------------------------------------------------------------------------
def _init_attention(key, embed_size, heads):
    hd = embed_size // heads
    k = jax.random.split(key, 5)
    return {
        "wq": jax.random.normal(k[0], (hd, hd), jnp.float32) * 0.1,
        "wk": jax.random.normal(k[1], (hd, hd), jnp.float32) * 0.1,
        "wv": jax.random.normal(k[2], (hd, hd), jnp.float32) * 0.1,
        "w_fc": jax.random.normal(k[3], (embed_size, embed_size), jnp.float32) * 0.05,
        "b_fc": jax.random.normal(k[4], (embed_size,), jnp.float32) * 0.05,
    }


def _init_transformer_block(key, embed_size, heads, hidden):
    k = jax.random.split(key, 9)
    return {
        "attn": _init_attention(k[0], embed_size, heads),
        "norm1_g": 1.0 + jax.random.normal(k[1], (embed_size,), jnp.float32) * 0.05,
        "norm1_b": jax.random.normal(k[2], (embed_size,), jnp.float32) * 0.05,
        "norm2_g": 1.0 + jax.random.normal(k[3], (embed_size,), jnp.float32) * 0.05,
        "norm2_b": jax.random.normal(k[4], (embed_size,), jnp.float32) * 0.05,
        "ff_w1": jax.random.normal(k[5], (hidden, embed_size), jnp.float32) * 0.05,
        "ff_b1": jax.random.normal(k[6], (hidden,), jnp.float32) * 0.05,
        "ff_w2": jax.random.normal(k[7], (embed_size, hidden), jnp.float32) * 0.05,
        "ff_b2": jax.random.normal(k[8], (embed_size,), jnp.float32) * 0.05,
    }


def _init_decoder_block(key, embed_size, heads, hidden):
    k = jax.random.split(key, 4)
    return {
        "attn": _init_attention(k[0], embed_size, heads),
        "norm_g": 1.0 + jax.random.normal(k[1], (embed_size,), jnp.float32) * 0.05,
        "norm_b": jax.random.normal(k[2], (embed_size,), jnp.float32) * 0.05,
        "tb": _init_transformer_block(k[3], embed_size, heads, hidden),
    }


if __name__ == "__main__":
    embed_size = 128          # lane-dense (multiple of 128)
    heads = 8                 # head_dim = 16
    num_layers = 2
    forward_expansion = 4
    hidden = forward_expansion * embed_size
    vocab_size = 512          # small stand-in for the 30000-word vocabularies
    max_length = 32
    src_pad_idx = 2
    N = 2
    src_len = 8
    trg_len = 8

    root = jax.random.PRNGKey(0)
    k_enc, k_dec, k_src, k_trg = jax.random.split(root, 4)

    ke = jax.random.split(k_enc, 2 + num_layers)
    encoder_params = {
        "word_emb": jax.random.normal(ke[0], (vocab_size, embed_size), jnp.float32) * 0.1,
        "pos_emb": jax.random.normal(ke[1], (max_length, embed_size), jnp.float32) * 0.1,
        "layers": [_init_transformer_block(ke[2 + i], embed_size, heads, hidden)
                   for i in range(num_layers)],
    }
    kd = jax.random.split(k_dec, 4 + num_layers)
    decoder_params = {
        "word_emb": jax.random.normal(kd[0], (vocab_size, embed_size), jnp.float32) * 0.1,
        "pos_emb": jax.random.normal(kd[1], (max_length, embed_size), jnp.float32) * 0.1,
        "layers": [_init_decoder_block(kd[4 + i], embed_size, heads, hidden)
                   for i in range(num_layers)],
        "fc_w": jax.random.normal(kd[2], (vocab_size, embed_size), jnp.float32) * 0.05,
        "fc_b": jax.random.normal(kd[3], (vocab_size,), jnp.float32) * 0.05,
    }
    params = {"encoder": encoder_params, "decoder": decoder_params}

    src = jax.random.randint(k_src, (N, src_len), 3, vocab_size, dtype=jnp.int32)
    trg = jax.random.randint(k_trg, (N, trg_len), 3, vocab_size, dtype=jnp.int32)
    # pad the tail of the source sequences so make_src_mask is non-trivial
    src = src.at[0, -2:].set(src_pad_idx)
    src = src.at[1, -1].set(src_pad_idx)

    # one-time weight preprocessing (kron block-diagonals, QK merge, fc fold,
    # transposes, bf16 casts) — NOT repeated inside the jitted forward.
    prep = prepare_params(params, embed_size, heads)

    fwd = jax.jit(functools.partial(transformer_fwd, embed_size=embed_size,
                                    heads=heads, src_pad_idx=src_pad_idx))
    out = fwd(src, trg, prep)
    out = jax.block_until_ready(out)

    ref = _ref_transformer(src, trg, params, embed_size, heads, src_pad_idx)
    ref = jax.block_until_ready(ref)

    assert out.shape == (N, trg_len, vocab_size), out.shape
    max_err = jnp.max(jnp.abs(out - ref))
    # tolerance covers bf16 MXU inputs (f32 accumulation) vs the f32 reference,
    # plus the EUP approx-reciprocal (+ Newton step) in the softmax.
    assert jnp.allclose(out, ref, atol=1e-1, rtol=1e-1), (
        f"Pallas Transformer forward mismatch vs reference (max abs err {max_err})")
    print("KERNEL_OK")
</pallas_src>

<mosaic_0001>
module attributes {stable_mosaic.version = 11 : i64} {
  func.func @kernel(%arg0: i32, %arg1: memref<1x8x128xf32, #tpu.memory_space<vmem>>, %arg2: memref<1x1x8xi32, #tpu.memory_space<vmem>>, %arg3: memref<128x256xbf16, #tpu.memory_space<vmem>>, %arg4: memref<128x128xbf16, #tpu.memory_space<vmem>>, %arg5: memref<1x128xf32, #tpu.memory_space<vmem>>, %arg6: memref<1x128xf32, #tpu.memory_space<vmem>>, %arg7: memref<1x128xf32, #tpu.memory_space<vmem>>, %arg8: memref<1x8x128xf32, #tpu.memory_space<vmem>>) attributes {dimension_semantics = [#tpu.dimension_semantics<parallel>], iteration_bounds = array<i64: 2>, scalar_prefetch = 0 : i64, scratch_operands = 0 : i64, tpu.core_type = #tpu.core_type<tc>, window_params = [{transform_indices = @transform_0, window_bounds = array<i64: 1, 8, 128>}, {transform_indices = @transform_1, window_bounds = array<i64: 1, 1, 8>}, {pipeline_mode = #tpu.pipeline_mode<synchronous>, transform_indices = @transform_2, window_bounds = array<i64: 128, 256>}, {pipeline_mode = #tpu.pipeline_mode<synchronous>, transform_indices = @transform_3, window_bounds = array<i64: 128, 128>}, {pipeline_mode = #tpu.pipeline_mode<synchronous>, transform_indices = @transform_4, window_bounds = array<i64: 1, 128>}, {pipeline_mode = #tpu.pipeline_mode<synchronous>, transform_indices = @transform_5, window_bounds = array<i64: 1, 128>}, {pipeline_mode = #tpu.pipeline_mode<synchronous>, transform_indices = @transform_6, window_bounds = array<i64: 1, 128>}, {transform_indices = @transform_7, window_bounds = array<i64: 1, 8, 128>}]} {
    %c0 = arith.constant 0 : index
    %c0_0 = arith.constant 0 : index
    %c0_1 = arith.constant 0 : index
    %0 = vector.load %arg1[%c0, %c0_0, %c0_1] : memref<1x8x128xf32, #tpu.memory_space<vmem>>, vector<1x8x128xf32>
    %1 = vector.shape_cast %0 : vector<1x8x128xf32> to vector<8x128xf32>
    %2 = arith.truncf %1 : vector<8x128xf32> to vector<8x128xbf16>
    %c0_2 = arith.constant 0 : index
    %c0_3 = arith.constant 0 : index
    %3 = vector.load %arg3[%c0_2, %c0_3] : memref<128x256xbf16, #tpu.memory_space<vmem>>, vector<128x256xbf16>
    %cst = arith.constant dense<0.000000e+00> : vector<8x256xf32>
    %4 = tpu.matmul %2, %3, %cst {dimension_numbers = #tpu.dot_dimension_numbers<[1], [0], [0], [1], [0, 0, 1, 1], [], []>} : vector<8x128xbf16>, vector<128x256xbf16>, vector<8x256xf32> -> vector<8x256xf32>
    %5 = vector.extract_strided_slice %4 {offsets = [0, 0], sizes = [8, 128], strides = [1, 1]} : vector<8x256xf32> to vector<8x128xf32>
    %6 = vector.extract_strided_slice %4 {offsets = [0, 128], sizes = [8, 128], strides = [1, 1]} : vector<8x256xf32> to vector<8x128xf32>
    %c0_4 = arith.constant 0 : index
    %c0_5 = arith.constant 0 : index
    %c0_6 = arith.constant 0 : index
    %7 = vector.load %arg2[%c0_4, %c0_5, %c0_6] : memref<1x1x8xi32, #tpu.memory_space<vmem>>, vector<1x1x8xi32>
    %8 = vector.shape_cast %7 : vector<1x1x8xi32> to vector<1x8xi32>
    %c0_i32 = arith.constant 0 : i32
    %9 = vector.broadcast %c0_i32 : i32 to vector<1x8xi32>
    %10 = arith.cmpi eq, %8, %9 : vector<1x8xi32>
    %11 = arith.extui %10 : vector<1x8xi1> to vector<1x8xi32>
    %12 = arith.sitofp %11 : vector<1x8xi32> to vector<1x8xf32>
    %cst_7 = arith.constant -9.99999944E+27 : f32
    %13 = vector.broadcast %cst_7 : f32 to vector<1x8xf32>
    %14 = arith.mulf %12, %13 : vector<1x8xf32>
    %15 = arith.truncf %5 : vector<8x128xf32> to vector<8x128xbf16>
    %16 = arith.truncf %6 : vector<8x128xf32> to vector<8x128xbf16>
    %cst_8 = arith.constant 0.000000e+00 : f32
    %17 = vector.broadcast %cst_8 : f32 to vector<8x128xf32>
    %18 = vector.extract_strided_slice %15 {offsets = [0, 0], sizes = [8, 16], strides = [1, 1]} : vector<8x128xbf16> to vector<8x16xbf16>
    %19 = vector.extract_strided_slice %16 {offsets = [0, 0], sizes = [8, 16], strides = [1, 1]} : vector<8x128xbf16> to vector<8x16xbf16>
    %cst_9 = arith.constant dense<0.000000e+00> : vector<8x8xf32>
    %20 = tpu.matmul %18, %19, %cst_9 {dimension_numbers = #tpu.dot_dimension_numbers<[1], [1], [0], [0], [0, 0, 1, 0], [], []>} : vector<8x16xbf16>, vector<8x16xbf16>, vector<8x8xf32> -> vector<8x8xf32>
    %21 = vector.broadcast %14 : vector<1x8xf32> to vector<8x8xf32>
    %22 = arith.addf %20, %21 : vector<8x8xf32>
    %cst_10 = arith.constant 0.0883883461 : f32
    %23 = vector.broadcast %cst_10 : f32 to vector<8x8xf32>
    %24 = arith.mulf %22, %23 : vector<8x8xf32>
    %cst_11 = arith.constant dense<0xFF800000> : vector<8xf32>
    %25 = vector.multi_reduction <maximumf>, %24, %cst_11 [1] : vector<8x8xf32> to vector<8xf32>
    %26 = vector.shape_cast %25 : vector<8xf32> to vector<8x1xf32>
    %27 = vector.broadcast %26 : vector<8x1xf32> to vector<8x8xf32>
    %28 = arith.subf %24, %27 : vector<8x8xf32>
    %29 = math.exp %28 : vector<8x8xf32>
    %cst_12 = arith.constant dense<0.000000e+00> : vector<8xf32>
    %30 = vector.multi_reduction <add>, %29, %cst_12 [1] : vector<8x8xf32> to vector<8xf32>
    %31 = vector.shape_cast %30 : vector<8xf32> to vector<8x1xf32>
    %32 = tpu.reciprocal %31 {approx = true} : vector<8x1xf32> -> vector<8x1xf32>
    %33 = arith.mulf %31, %32 : vector<8x1xf32>
    %cst_13 = arith.constant 2.000000e+00 : f32
    %34 = vector.broadcast %cst_13 : f32 to vector<8x1xf32>
    %35 = arith.subf %34, %33 : vector<8x1xf32>
    %36 = arith.mulf %32, %35 : vector<8x1xf32>
    %37 = vector.broadcast %36 : vector<8x1xf32> to vector<8x8xf32>
    %38 = arith.mulf %29, %37 : vector<8x8xf32>
    %39 = arith.truncf %38 : vector<8x8xf32> to vector<8x8xbf16>
    %40 = vector.extract_strided_slice %2 {offsets = [0, 0], sizes = [8, 16], strides = [1, 1]} : vector<8x128xbf16> to vector<8x16xbf16>
    %c0_14 = arith.constant 0 : index
    %c0_15 = arith.constant 0 : index
    %41 = vector.load %arg4[%c0_14, %c0_15] : memref<128x128xbf16, #tpu.memory_space<vmem>>, vector<16x128xbf16>
    %cst_16 = arith.constant dense<0.000000e+00> : vector<8x128xf32>
    %42 = tpu.matmul %40, %41, %cst_16 {dimension_numbers = #tpu.dot_dimension_numbers<[1], [0], [0], [1], [0, 0, 1, 1], [], []>} : vector<8x16xbf16>, vector<16x128xbf16>, vector<8x128xf32> -> vector<8x128xf32>
    %43 = arith.truncf %42 : vector<8x128xf32> to vector<8x128xbf16>
    %cst_17 = arith.constant dense<0.000000e+00> : vector<8x128xf32>
    %44 = tpu.matmul %39, %43, %cst_17 {dimension_numbers = #tpu.dot_dimension_numbers<[1], [0], [0], [1], [0, 0, 1, 1], [], []>} : vector<8x8xbf16>, vector<8x128xbf16>, vector<8x128xf32> -> vector<8x128xf32>
    %45 = arith.addf %17, %44 : vector<8x128xf32>
    %46 = vector.extract_strided_slice %15 {offsets = [0, 16], sizes = [8, 16], strides = [1, 1]} : vector<8x128xbf16> to vector<8x16xbf16>
    %47 = vector.extract_strided_slice %16 {offsets = [0, 16], sizes = [8, 16], strides = [1, 1]} : vector<8x128xbf16> to vector<8x16xbf16>
    %cst_18 = arith.constant dense<0.000000e+00> : vector<8x8xf32>
    %48 = tpu.matmul %46, %47, %cst_18 {dimension_numbers = #tpu.dot_dimension_numbers<[1], [1], [0], [0], [0, 0, 1, 0], [], []>} : vector<8x16xbf16>, vector<8x16xbf16>, vector<8x8xf32> -> vector<8x8xf32>
    %49 = vector.broadcast %14 : vector<1x8xf32> to vector<8x8xf32>
    %50 = arith.addf %48, %49 : vector<8x8xf32>
    %cst_19 = arith.constant 0.0883883461 : f32
    %51 = vector.broadcast %cst_19 : f32 to vector<8x8xf32>
    %52 = arith.mulf %50, %51 : vector<8x8xf32>
    %cst_20 = arith.constant dense<0xFF800000> : vector<8xf32>
    %53 = vector.multi_reduction <maximumf>, %52, %cst_20 [1] : vector<8x8xf32> to vector<8xf32>
    %54 = vector.shape_cast %53 : vector<8xf32> to vector<8x1xf32>
    %55 = vector.broadcast %54 : vector<8x1xf32> to vector<8x8xf32>
    %56 = arith.subf %52, %55 : vector<8x8xf32>
    %57 = math.exp %56 : vector<8x8xf32>
    %cst_21 = arith.constant dense<0.000000e+00> : vector<8xf32>
    %58 = vector.multi_reduction <add>, %57, %cst_21 [1] : vector<8x8xf32> to vector<8xf32>
    %59 = vector.shape_cast %58 : vector<8xf32> to vector<8x1xf32>
    %60 = tpu.reciprocal %59 {approx = true} : vector<8x1xf32> -> vector<8x1xf32>
    %61 = arith.mulf %59, %60 : vector<8x1xf32>
    %cst_22 = arith.constant 2.000000e+00 : f32
    %62 = vector.broadcast %cst_22 : f32 to vector<8x1xf32>
    %63 = arith.subf %62, %61 : vector<8x1xf32>
    %64 = arith.mulf %60, %63 : vector<8x1xf32>
    %65 = vector.broadcast %64 : vector<8x1xf32> to vector<8x8xf32>
    %66 = arith.mulf %57, %65 : vector<8x8xf32>
    %67 = arith.truncf %66 : vector<8x8xf32> to vector<8x8xbf16>
    %68 = vector.extract_strided_slice %2 {offsets = [0, 16], sizes = [8, 16], strides = [1, 1]} : vector<8x128xbf16> to vector<8x16xbf16>
    %c16 = arith.constant 16 : index
    %c0_23 = arith.constant 0 : index
    %69 = vector.load %arg4[%c16, %c0_23] : memref<128x128xbf16, #tpu.memory_space<vmem>>, vector<16x128xbf16>
    %cst_24 = arith.constant dense<0.000000e+00> : vector<8x128xf32>
    %70 = tpu.matmul %68, %69, %cst_24 {dimension_numbers = #tpu.dot_dimension_numbers<[1], [0], [0], [1], [0, 0, 1, 1], [], []>} : vector<8x16xbf16>, vector<16x128xbf16>, vector<8x128xf32> -> vector<8x128xf32>
    %71 = arith.truncf %70 : vector<8x128xf32> to vector<8x128xbf16>
    %cst_25 = arith.constant dense<0.000000e+00> : vector<8x128xf32>
    %72 = tpu.matmul %67, %71, %cst_25 {dimension_numbers = #tpu.dot_dimension_numbers<[1], [0], [0], [1], [0, 0, 1, 1], [], []>} : vector<8x8xbf16>, vector<8x128xbf16>, vector<8x128xf32> -> vector<8x128xf32>
    %73 = arith.addf %45, %72 : vector<8x128xf32>
    %74 = vector.extract_strided_slice %15 {offsets = [0, 32], sizes = [8, 16], strides = [1, 1]} : vector<8x128xbf16> to vector<8x16xbf16>
    %75 = vector.extract_strided_slice %16 {offsets = [0, 32], sizes = [8, 16], strides = [1, 1]} : vector<8x128xbf16> to vector<8x16xbf16>
    %cst_26 = arith.constant dense<0.000000e+00> : vector<8x8xf32>
    %76 = tpu.matmul %74, %75, %cst_26 {dimension_numbers = #tpu.dot_dimension_numbers<[1], [1], [0], [0], [0, 0, 1, 0], [], []>} : vector<8x16xbf16>, vector<8x16xbf16>, vector<8x8xf32> -> vector<8x8xf32>
    %77 = vector.broadcast %14 : vector<1x8xf32> to vector<8x8xf32>
    %78 = arith.addf %76, %77 : vector<8x8xf32>
    %cst_27 = arith.constant 0.0883883461 : f32
    %79 = vector.broadcast %cst_27 : f32 to vector<8x8xf32>
    %80 = arith.mulf %78, %79 : vector<8x8xf32>
    %cst_28 = arith.constant dense<0xFF800000> : vector<8xf32>
    %81 = vector.multi_reduction <maximumf>, %80, %cst_28 [1] : vector<8x8xf32> to vector<8xf32>
    %82 = vector.shape_cast %81 : vector<8xf32> to vector<8x1xf32>
    %83 = vector.broadcast %82 : vector<8x1xf32> to vector<8x8xf32>
    %84 = arith.subf %80, %83 : vector<8x8xf32>
    %85 = math.exp %84 : vector<8x8xf32>
    %cst_29 = arith.constant dense<0.000000e+00> : vector<8xf32>
    %86 = vector.multi_reduction <add>, %85, %cst_29 [1] : vector<8x8xf32> to vector<8xf32>
    %87 = vector.shape_cast %86 : vector<8xf32> to vector<8x1xf32>
    %88 = tpu.reciprocal %87 {approx = true} : vector<8x1xf32> -> vector<8x1xf32>
    %89 = arith.mulf %87, %88 : vector<8x1xf32>
    %cst_30 = arith.constant 2.000000e+00 : f32
    %90 = vector.broadcast %cst_30 : f32 to vector<8x1xf32>
    %91 = arith.subf %90, %89 : vector<8x1xf32>
    %92 = arith.mulf %88, %91 : vector<8x1xf32>
    %93 = vector.broadcast %92 : vector<8x1xf32> to vector<8x8xf32>
    %94 = arith.mulf %85, %93 : vector<8x8xf32>
    %95 = arith.truncf %94 : vector<8x8xf32> to vector<8x8xbf16>
    %96 = vector.extract_strided_slice %2 {offsets = [0, 32], sizes = [8, 16], strides = [1, 1]} : vector<8x128xbf16> to vector<8x16xbf16>
    %c32 = arith.constant 32 : index
    %c0_31 = arith.constant 0 : index
    %97 = vector.load %arg4[%c32, %c0_31] : memref<128x128xbf16, #tpu.memory_space<vmem>>, vector<16x128xbf16>
    %cst_32 = arith.constant dense<0.000000e+00> : vector<8x128xf32>
    %98 = tpu.matmul %96, %97, %cst_32 {dimension_numbers = #tpu.dot_dimension_numbers<[1], [0], [0], [1], [0, 0, 1, 1], [], []>} : vector<8x16xbf16>, vector<16x128xbf16>, vector<8x128xf32> -> vector<8x128xf32>
    %99 = arith.truncf %98 : vector<8x128xf32> to vector<8x128xbf16>
    %cst_33 = arith.constant dense<0.000000e+00> : vector<8x128xf32>
    %100 = tpu.matmul %95, %99, %cst_33 {dimension_numbers = #tpu.dot_dimension_numbers<[1], [0], [0], [1], [0, 0, 1, 1], [], []>} : vector<8x8xbf16>, vector<8x128xbf16>, vector<8x128xf32> -> vector<8x128xf32>
    %101 = arith.addf %73, %100 : vector<8x128xf32>
    %102 = vector.extract_strided_slice %15 {offsets = [0, 48], sizes = [8, 16], strides = [1, 1]} : vector<8x128xbf16> to vector<8x16xbf16>
    %103 = vector.extract_strided_slice %16 {offsets = [0, 48], sizes = [8, 16], strides = [1, 1]} : vector<8x128xbf16> to vector<8x16xbf16>
    %cst_34 = arith.constant dense<0.000000e+00> : vector<8x8xf32>
    %104 = tpu.matmul %102, %103, %cst_34 {dimension_numbers = #tpu.dot_dimension_numbers<[1], [1], [0], [0], [0, 0, 1, 0], [], []>} : vector<8x16xbf16>, vector<8x16xbf16>, vector<8x8xf32> -> vector<8x8xf32>
    %105 = vector.broadcast %14 : vector<1x8xf32> to vector<8x8xf32>
    %106 = arith.addf %104, %105 : vector<8x8xf32>
    %cst_35 = arith.constant 0.0883883461 : f32
    %107 = vector.broadcast %cst_35 : f32 to vector<8x8xf32>
    %108 = arith.mulf %106, %107 : vector<8x8xf32>
    %cst_36 = arith.constant dense<0xFF800000> : vector<8xf32>
    %109 = vector.multi_reduction <maximumf>, %108, %cst_36 [1] : vector<8x8xf32> to vector<8xf32>
    %110 = vector.shape_cast %109 : vector<8xf32> to vector<8x1xf32>
    %111 = vector.broadcast %110 : vector<8x1xf32> to vector<8x8xf32>
    %112 = arith.subf %108, %111 : vector<8x8xf32>
    %113 = math.exp %112 : vector<8x8xf32>
    %cst_37 = arith.constant dense<0.000000e+00> : vector<8xf32>
    %114 = vector.multi_reduction <add>, %113, %cst_37 [1] : vector<8x8xf32> to vector<8xf32>
    %115 = vector.shape_cast %114 : vector<8xf32> to vector<8x1xf32>
    %116 = tpu.reciprocal %115 {approx = true} : vector<8x1xf32> -> vector<8x1xf32>
    %117 = arith.mulf %115, %116 : vector<8x1xf32>
    %cst_38 = arith.constant 2.000000e+00 : f32
    %118 = vector.broadcast %cst_38 : f32 to vector<8x1xf32>
    %119 = arith.subf %118, %117 : vector<8x1xf32>
    %120 = arith.mulf %116, %119 : vector<8x1xf32>
    %121 = vector.broadcast %120 : vector<8x1xf32> to vector<8x8xf32>
    %122 = arith.mulf %113, %121 : vector<8x8xf32>
    %123 = arith.truncf %122 : vector<8x8xf32> to vector<8x8xbf16>
    %124 = vector.extract_strided_slice %2 {offsets = [0, 48], sizes = [8, 16], strides = [1, 1]} : vector<8x128xbf16> to vector<8x16xbf16>
    %c48 = arith.constant 48 : index
    %c0_39 = arith.constant 0 : index
    %125 = vector.load %arg4[%c48, %c0_39] : memref<128x128xbf16, #tpu.memory_space<vmem>>, vector<16x128xbf16>
    %cst_40 = arith.constant dense<0.000000e+00> : vector<8x128xf32>
    %126 = tpu.matmul %124, %125, %cst_40 {dimension_numbers = #tpu.dot_dimension_numbers<[1], [0], [0], [1], [0, 0, 1, 1], [], []>} : vector<8x16xbf16>, vector<16x128xbf16>, vector<8x128xf32> -> vector<8x128xf32>
    %127 = arith.truncf %126 : vector<8x128xf32> to vector<8x128xbf16>
    %cst_41 = arith.constant dense<0.000000e+00> : vector<8x128xf32>
    %128 = tpu.matmul %123, %127, %cst_41 {dimension_numbers = #tpu.dot_dimension_numbers<[1], [0], [0], [1], [0, 0, 1, 1], [], []>} : vector<8x8xbf16>, vector<8x128xbf16>, vector<8x128xf32> -> vector<8x128xf32>
    %129 = arith.addf %101, %128 : vector<8x128xf32>
    %130 = vector.extract_strided_slice %15 {offsets = [0, 64], sizes = [8, 16], strides = [1, 1]} : vector<8x128xbf16> to vector<8x16xbf16>
    %131 = vector.extract_strided_slice %16 {offsets = [0, 64], sizes = [8, 16], strides = [1, 1]} : vector<8x128xbf16> to vector<8x16xbf16>
    %cst_42 = arith.constant dense<0.000000e+00> : vector<8x8xf32>
    %132 = tpu.matmul %130, %131, %cst_42 {dimension_numbers = #tpu.dot_dimension_numbers<[1], [1], [0], [0], [0, 0, 1, 0], [], []>} : vector<8x16xbf16>, vector<8x16xbf16>, vector<8x8xf32> -> vector<8x8xf32>
    %133 = vector.broadcast %14 : vector<1x8xf32> to vector<8x8xf32>
    %134 = arith.addf %132, %133 : vector<8x8xf32>
    %cst_43 = arith.constant 0.0883883461 : f32
    %135 = vector.broadcast %cst_43 : f32 to vector<8x8xf32>
    %136 = arith.mulf %134, %135 : vector<8x8xf32>
    %cst_44 = arith.constant dense<0xFF800000> : vector<8xf32>
    %137 = vector.multi_reduction <maximumf>, %136, %cst_44 [1] : vector<8x8xf32> to vector<8xf32>
    %138 = vector.shape_cast %137 : vector<8xf32> to vector<8x1xf32>
    %139 = vector.broadcast %138 : vector<8x1xf32> to vector<8x8xf32>
    %140 = arith.subf %136, %139 : vector<8x8xf32>
    %141 = math.exp %140 : vector<8x8xf32>
    %cst_45 = arith.constant dense<0.000000e+00> : vector<8xf32>
    %142 = vector.multi_reduction <add>, %141, %cst_45 [1] : vector<8x8xf32> to vector<8xf32>
    %143 = vector.shape_cast %142 : vector<8xf32> to vector<8x1xf32>
    %144 = tpu.reciprocal %143 {approx = true} : vector<8x1xf32> -> vector<8x1xf32>
    %145 = arith.mulf %143, %144 : vector<8x1xf32>
    %cst_46 = arith.constant 2.000000e+00 : f32
    %146 = vector.broadcast %cst_46 : f32 to vector<8x1xf32>
    %147 = arith.subf %146, %145 : vector<8x1xf32>
    %148 = arith.mulf %144, %147 : vector<8x1xf32>
    %149 = vector.broadcast %148 : vector<8x1xf32> to vector<8x8xf32>
    %150 = arith.mulf %141, %149 : vector<8x8xf32>
    %151 = arith.truncf %150 : vector<8x8xf32> to vector<8x8xbf16>
    %152 = vector.extract_strided_slice %2 {offsets = [0, 64], sizes = [8, 16], strides = [1, 1]} : vector<8x128xbf16> to vector<8x16xbf16>
    %c64 = arith.constant 64 : index
    %c0_47 = arith.constant 0 : index
    %153 = vector.load %arg4[%c64, %c0_47] : memref<128x128xbf16, #tpu.memory_space<vmem>>, vector<16x128xbf16>
    %cst_48 = arith.constant dense<0.000000e+00> : vector<8x128xf32>
    %154 = tpu.matmul %152, %153, %cst_48 {dimension_numbers = #tpu.dot_dimension_numbers<[1], [0], [0], [1], [0, 0, 1, 1], [], []>} : vector<8x16xbf16>, vector<16x128xbf16>, vector<8x128xf32> -> vector<8x128xf32>
    %155 = arith.truncf %154 : vector<8x128xf32> to vector<8x128xbf16>
    %cst_49 = arith.constant dense<0.000000e+00> : vector<8x128xf32>
    %156 = tpu.matmul %151, %155, %cst_49 {dimension_numbers = #tpu.dot_dimension_numbers<[1], [0], [0], [1], [0, 0, 1, 1], [], []>} : vector<8x8xbf16>, vector<8x128xbf16>, vector<8x128xf32> -> vector<8x128xf32>
    %157 = arith.addf %129, %156 : vector<8x128xf32>
    %158 = vector.extract_strided_slice %15 {offsets = [0, 80], sizes = [8, 16], strides = [1, 1]} : vector<8x128xbf16> to vector<8x16xbf16>
    %159 = vector.extract_strided_slice %16 {offsets = [0, 80], sizes = [8, 16], strides = [1, 1]} : vector<8x128xbf16> to vector<8x16xbf16>
    %cst_50 = arith.constant dense<0.000000e+00> : vector<8x8xf32>
    %160 = tpu.matmul %158, %159, %cst_50 {dimension_numbers = #tpu.dot_dimension_numbers<[1], [1], [0], [0], [0, 0, 1, 0], [], []>} : vector<8x16xbf16>, vector<8x16xbf16>, vector<8x8xf32> -> vector<8x8xf32>
    %161 = vector.broadcast %14 : vector<1x8xf32> to vector<8x8xf32>
    %162 = arith.addf %160, %161 : vector<8x8xf32>
    %cst_51 = arith.constant 0.0883883461 : f32
    %163 = vector.broadcast %cst_51 : f32 to vector<8x8xf32>
    %164 = arith.mulf %162, %163 : vector<8x8xf32>
    %cst_52 = arith.constant dense<0xFF800000> : vector<8xf32>
    %165 = vector.multi_reduction <maximumf>, %164, %cst_52 [1] : vector<8x8xf32> to vector<8xf32>
    %166 = vector.shape_cast %165 : vector<8xf32> to vector<8x1xf32>
    %167 = vector.broadcast %166 : vector<8x1xf32> to vector<8x8xf32>
    %168 = arith.subf %164, %167 : vector<8x8xf32>
    %169 = math.exp %168 : vector<8x8xf32>
    %cst_53 = arith.constant dense<0.000000e+00> : vector<8xf32>
    %170 = vector.multi_reduction <add>, %169, %cst_53 [1] : vector<8x8xf32> to vector<8xf32>
    %171 = vector.shape_cast %170 : vector<8xf32> to vector<8x1xf32>
    %172 = tpu.reciprocal %171 {approx = true} : vector<8x1xf32> -> vector<8x1xf32>
    %173 = arith.mulf %171, %172 : vector<8x1xf32>
    %cst_54 = arith.constant 2.000000e+00 : f32
    %174 = vector.broadcast %cst_54 : f32 to vector<8x1xf32>
    %175 = arith.subf %174, %173 : vector<8x1xf32>
    %176 = arith.mulf %172, %175 : vector<8x1xf32>
    %177 = vector.broadcast %176 : vector<8x1xf32> to vector<8x8xf32>
    %178 = arith.mulf %169, %177 : vector<8x8xf32>
    %179 = arith.truncf %178 : vector<8x8xf32> to vector<8x8xbf16>
    %180 = vector.extract_strided_slice %2 {offsets = [0, 80], sizes = [8, 16], strides = [1, 1]} : vector<8x128xbf16> to vector<8x16xbf16>
    %c80 = arith.constant 80 : index
    %c0_55 = arith.constant 0 : index
    %181 = vector.load %arg4[%c80, %c0_55] : memref<128x128xbf16, #tpu.memory_space<vmem>>, vector<16x128xbf16>
    %cst_56 = arith.constant dense<0.000000e+00> : vector<8x128xf32>
    %182 = tpu.matmul %180, %181, %cst_56 {dimension_numbers = #tpu.dot_dimension_numbers<[1], [0], [0], [1], [0, 0, 1, 1], [], []>} : vector<8x16xbf16>, vector<16x128xbf16>, vector<8x128xf32> -> vector<8x128xf32>
    %183 = arith.truncf %182 : vector<8x128xf32> to vector<8x128xbf16>
    %cst_57 = arith.constant dense<0.000000e+00> : vector<8x128xf32>
    %184 = tpu.matmul %179, %183, %cst_57 {dimension_numbers = #tpu.dot_dimension_numbers<[1], [0], [0], [1], [0, 0, 1, 1], [], []>} : vector<8x8xbf16>, vector<8x128xbf16>, vector<8x128xf32> -> vector<8x128xf32>
    %185 = arith.addf %157, %184 : vector<8x128xf32>
    %186 = vector.extract_strided_slice %15 {offsets = [0, 96], sizes = [8, 16], strides = [1, 1]} : vector<8x128xbf16> to vector<8x16xbf16>
    %187 = vector.extract_strided_slice %16 {offsets = [0, 96], sizes = [8, 16], strides = [1, 1]} : vector<8x128xbf16> to vector<8x16xbf16>
    %cst_58 = arith.constant dense<0.000000e+00> : vector<8x8xf32>
    %188 = tpu.matmul %186, %187, %cst_58 {dimension_numbers = #tpu.dot_dimension_numbers<[1], [1], [0], [0], [0, 0, 1, 0], [], []>} : vector<8x16xbf16>, vector<8x16xbf16>, vector<8x8xf32> -> vector<8x8xf32>
    %189 = vector.broadcast %14 : vector<1x8xf32> to vector<8x8xf32>
    %190 = arith.addf %188, %189 : vector<8x8xf32>
    %cst_59 = arith.constant 0.0883883461 : f32
    %191 = vector.broadcast %cst_59 : f32 to vector<8x8xf32>
    %192 = arith.mulf %190, %191 : vector<8x8xf32>
    %cst_60 = arith.constant dense<0xFF800000> : vector<8xf32>
    %193 = vector.multi_reduction <maximumf>, %192, %cst_60 [1] : vector<8x8xf32> to vector<8xf32>
    %194 = vector.shape_cast %193 : vector<8xf32> to vector<8x1xf32>
    %195 = vector.broadcast %194 : vector<8x1xf32> to vector<8x8xf32>
    %196 = arith.subf %192, %195 : vector<8x8xf32>
    %197 = math.exp %196 : vector<8x8xf32>
    %cst_61 = arith.constant dense<0.000000e+00> : vector<8xf32>
    %198 = vector.multi_reduction <add>, %197, %cst_61 [1] : vector<8x8xf32> to vector<8xf32>
    %199 = vector.shape_cast %198 : vector<8xf32> to vector<8x1xf32>
    %200 = tpu.reciprocal %199 {approx = true} : vector<8x1xf32> -> vector<8x1xf32>
    %201 = arith.mulf %199, %200 : vector<8x1xf32>
    %cst_62 = arith.constant 2.000000e+00 : f32
    %202 = vector.broadcast %cst_62 : f32 to vector<8x1xf32>
    %203 = arith.subf %202, %201 : vector<8x1xf32>
    %204 = arith.mulf %200, %203 : vector<8x1xf32>
    %205 = vector.broadcast %204 : vector<8x1xf32> to vector<8x8xf32>
    %206 = arith.mulf %197, %205 : vector<8x8xf32>
    %207 = arith.truncf %206 : vector<8x8xf32> to vector<8x8xbf16>
    %208 = vector.extract_strided_slice %2 {offsets = [0, 96], sizes = [8, 16], strides = [1, 1]} : vector<8x128xbf16> to vector<8x16xbf16>
    %c96 = arith.constant 96 : index
    %c0_63 = arith.constant 0 : index
    %209 = vector.load %arg4[%c96, %c0_63] : memref<128x128xbf16, #tpu.memory_space<vmem>>, vector<16x128xbf16>
    %cst_64 = arith.constant dense<0.000000e+00> : vector<8x128xf32>
    %210 = tpu.matmul %208, %209, %cst_64 {dimension_numbers = #tpu.dot_dimension_numbers<[1], [0], [0], [1], [0, 0, 1, 1], [], []>} : vector<8x16xbf16>, vector<16x128xbf16>, vector<8x128xf32> -> vector<8x128xf32>
    %211 = arith.truncf %210 : vector<8x128xf32> to vector<8x128xbf16>
    %cst_65 = arith.constant dense<0.000000e+00> : vector<8x128xf32>
    %212 = tpu.matmul %207, %211, %cst_65 {dimension_numbers = #tpu.dot_dimension_numbers<[1], [0], [0], [1], [0, 0, 1, 1], [], []>} : vector<8x8xbf16>, vector<8x128xbf16>, vector<8x128xf32> -> vector<8x128xf32>
    %213 = arith.addf %185, %212 : vector<8x128xf32>
    %214 = vector.extract_strided_slice %15 {offsets = [0, 112], sizes = [8, 16], strides = [1, 1]} : vector<8x128xbf16> to vector<8x16xbf16>
    %215 = vector.extract_strided_slice %16 {offsets = [0, 112], sizes = [8, 16], strides = [1, 1]} : vector<8x128xbf16> to vector<8x16xbf16>
    %cst_66 = arith.constant dense<0.000000e+00> : vector<8x8xf32>
    %216 = tpu.matmul %214, %215, %cst_66 {dimension_numbers = #tpu.dot_dimension_numbers<[1], [1], [0], [0], [0, 0, 1, 0], [], []>} : vector<8x16xbf16>, vector<8x16xbf16>, vector<8x8xf32> -> vector<8x8xf32>
    %217 = vector.broadcast %14 : vector<1x8xf32> to vector<8x8xf32>
    %218 = arith.addf %216, %217 : vector<8x8xf32>
    %cst_67 = arith.constant 0.0883883461 : f32
    %219 = vector.broadcast %cst_67 : f32 to vector<8x8xf32>
    %220 = arith.mulf %218, %219 : vector<8x8xf32>
    %cst_68 = arith.constant dense<0xFF800000> : vector<8xf32>
    %221 = vector.multi_reduction <maximumf>, %220, %cst_68 [1] : vector<8x8xf32> to vector<8xf32>
    %222 = vector.shape_cast %221 : vector<8xf32> to vector<8x1xf32>
    %223 = vector.broadcast %222 : vector<8x1xf32> to vector<8x8xf32>
    %224 = arith.subf %220, %223 : vector<8x8xf32>
    %225 = math.exp %224 : vector<8x8xf32>
    %cst_69 = arith.constant dense<0.000000e+00> : vector<8xf32>
    %226 = vector.multi_reduction <add>, %225, %cst_69 [1] : vector<8x8xf32> to vector<8xf32>
    %227 = vector.shape_cast %226 : vector<8xf32> to vector<8x1xf32>
    %228 = tpu.reciprocal %227 {approx = true} : vector<8x1xf32> -> vector<8x1xf32>
    %229 = arith.mulf %227, %228 : vector<8x1xf32>
    %cst_70 = arith.constant 2.000000e+00 : f32
    %230 = vector.broadcast %cst_70 : f32 to vector<8x1xf32>
    %231 = arith.subf %230, %229 : vector<8x1xf32>
    %232 = arith.mulf %228, %231 : vector<8x1xf32>
    %233 = vector.broadcast %232 : vector<8x1xf32> to vector<8x8xf32>
    %234 = arith.mulf %225, %233 : vector<8x8xf32>
    %235 = arith.truncf %234 : vector<8x8xf32> to vector<8x8xbf16>
    %236 = vector.extract_strided_slice %2 {offsets = [0, 112], sizes = [8, 16], strides = [1, 1]} : vector<8x128xbf16> to vector<8x16xbf16>
    %c112 = arith.constant 112 : index
    %c0_71 = arith.constant 0 : index
    %237 = vector.load %arg4[%c112, %c0_71] : memref<128x128xbf16, #tpu.memory_space<vmem>>, vector<16x128xbf16>
    %cst_72 = arith.constant dense<0.000000e+00> : vector<8x128xf32>
    %238 = tpu.matmul %236, %237, %cst_72 {dimension_numbers = #tpu.dot_dimension_numbers<[1], [0], [0], [1], [0, 0, 1, 1], [], []>} : vector<8x16xbf16>, vector<16x128xbf16>, vector<8x128xf32> -> vector<8x128xf32>
    %239 = arith.truncf %238 : vector<8x128xf32> to vector<8x128xbf16>
    %cst_73 = arith.constant dense<0.000000e+00> : vector<8x128xf32>
    %240 = tpu.matmul %235, %239, %cst_73 {dimension_numbers = #tpu.dot_dimension_numbers<[1], [0], [0], [1], [0, 0, 1, 1], [], []>} : vector<8x8xbf16>, vector<8x128xbf16>, vector<8x128xf32> -> vector<8x128xf32>
    %241 = arith.addf %213, %240 : vector<8x128xf32>
    %c0_74 = arith.constant 0 : index
    %c0_75 = arith.constant 0 : index
    %242 = vector.load %arg5[%c0_74, %c0_75] : memref<1x128xf32, #tpu.memory_space<vmem>>, vector<1x128xf32>
    %243 = vector.broadcast %242 : vector<1x128xf32> to vector<8x128xf32>
    %244 = arith.addf %241, %243 : vector<8x128xf32>
    %245 = arith.addf %244, %1 : vector<8x128xf32>
    %c0_76 = arith.constant 0 : index
    %c0_77 = arith.constant 0 : index
    %246 = vector.load %arg6[%c0_76, %c0_77] : memref<1x128xf32, #tpu.memory_space<vmem>>, vector<1x128xf32>
    %c0_78 = arith.constant 0 : index
    %c0_79 = arith.constant 0 : index
    %247 = vector.load %arg7[%c0_78, %c0_79] : memref<1x128xf32, #tpu.memory_space<vmem>>, vector<1x128xf32>
    %cst_80 = arith.constant dense<0.000000e+00> : vector<8xf32>
    %248 = vector.multi_reduction <add>, %245, %cst_80 [1] : vector<8x128xf32> to vector<8xf32>
    %249 = vector.shape_cast %248 : vector<8xf32> to vector<8x1xf32>
    %cst_81 = arith.constant 7.812500e-03 : f32
    %250 = vector.broadcast %cst_81 : f32 to vector<8x1xf32>
    %251 = arith.mulf %249, %250 : vector<8x1xf32>
    %252 = vector.broadcast %251 : vector<8x1xf32> to vector<8x128xf32>
    %253 = arith.subf %245, %252 : vector<8x128xf32>
    %254 = arith.mulf %253, %253 : vector<8x128xf32>
    %cst_82 = arith.constant dense<0.000000e+00> : vector<8xf32>
    %255 = vector.multi_reduction <add>, %254, %cst_82 [1] : vector<8x128xf32> to vector<8xf32>
    %256 = vector.shape_cast %255 : vector<8xf32> to vector<8x1xf32>
    %cst_83 = arith.constant 7.812500e-03 : f32
    %257 = vector.broadcast %cst_83 : f32 to vector<8x1xf32>
    %258 = arith.mulf %256, %257 : vector<8x1xf32>
    %cst_84 = arith.constant 9.99999974E-6 : f32
    %259 = vector.broadcast %cst_84 : f32 to vector<8x1xf32>
    %260 = arith.addf %258, %259 : vector<8x1xf32>
    %261 = math.rsqrt %260 : vector<8x1xf32>
    %262 = vector.broadcast %261 : vector<8x1xf32> to vector<8x128xf32>
    %263 = arith.mulf %253, %262 : vector<8x128xf32>
    %264 = vector.broadcast %246 : vector<1x128xf32> to vector<8x128xf32>
    %265 = arith.mulf %263, %264 : vector<8x128xf32>
    %266 = vector.broadcast %247 : vector<1x128xf32> to vector<8x128xf32>
    %267 = arith.addf %265, %266 : vector<8x128xf32>
    %c0_85 = arith.constant 0 : index
    %c0_86 = arith.constant 0 : index
    %c0_87 = arith.constant 0 : index
    %268 = vector.load %arg8[%c0_85, %c0_86, %c0_87] : memref<1x8x128xf32, #tpu.memory_space<vmem>>, vector<1x8x128xf32>
    %269 = vector.shape_cast %268 : vector<1x8x128xf32> to vector<8x128xf32>
    %270 = vector.shape_cast %267 : vector<8x128xf32> to vector<1x8x128xf32>
    tpu.vector_store %arg8[%c0_85, %c0_86, %c0_87], %270 {strides = array<i32>} : memref<1x8x128xf32, #tpu.memory_space<vmem>>, vector<1x8x128xf32>,
    return
  }
  func.func @transform_0(%arg0: i32) -> (i32, i32, i32) {
    %c0_i32 = arith.constant 0 : i32
    %c0_i32_0 = arith.constant 0 : i32
    %c0_i32_1 = arith.constant 0 : i32
    return %arg0, %c0_i32, %c0_i32_0 : i32, i32, i32
  }
  func.func @transform_1(%arg0: i32) -> (i32, i32, i32) {
    %c0_i32 = arith.constant 0 : i32
    %c0_i32_0 = arith.constant 0 : i32
    %c0_i32_1 = arith.constant 0 : i32
    return %arg0, %c0_i32, %c0_i32_0 : i32, i32, i32
  }
  func.func @transform_2(%arg0: i32) -> (i32, i32) {
    %c0_i32 = arith.constant 0 : i32
    %c0_i32_0 = arith.constant 0 : i32
    %c0_i32_1 = arith.constant 0 : i32
    return %c0_i32, %c0_i32_0 : i32, i32
  }
  func.func @transform_3(%arg0: i32) -> (i32, i32) {
    %c0_i32 = arith.constant 0 : i32
    %c0_i32_0 = arith.constant 0 : i32
    %c0_i32_1 = arith.constant 0 : i32
    return %c0_i32, %c0_i32_0 : i32, i32
  }
  func.func @transform_4(%arg0: i32) -> (i32, i32) {
    %c0_i32 = arith.constant 0 : i32
    %c0_i32_0 = arith.constant 0 : i32
    %c0_i32_1 = arith.constant 0 : i32
    return %c0_i32, %c0_i32_0 : i32, i32
  }
  func.func @transform_5(%arg0: i32) -> (i32, i32) {
    %c0_i32 = arith.constant 0 : i32
    %c0_i32_0 = arith.constant 0 : i32
    %c0_i32_1 = arith.constant 0 : i32
    return %c0_i32, %c0_i32_0 : i32, i32
  }
  func.func @transform_6(%arg0: i32) -> (i32, i32) {
    %c0_i32 = arith.constant 0 : i32
    %c0_i32_0 = arith.constant 0 : i32
    %c0_i32_1 = arith.constant 0 : i32
    return %c0_i32, %c0_i32_0 : i32, i32
  }
  func.func @transform_7(%arg0: i32) -> (i32, i32, i32) {
    %c0_i32 = arith.constant 0 : i32
    %c0_i32_0 = arith.constant 0 : i32
    %c0_i32_1 = arith.constant 0 : i32
    return %arg0, %c0_i32, %c0_i32_0 : i32, i32, i32
  }
}

module attributes {stable_mosaic.version = 11 : i64} {
  func.func @kernel(%arg0: i32, %arg1: memref<8x128xf32, #tpu.memory_space<vmem>>, %arg2: memref<128x512xbf16, #tpu.memory_space<vmem>>, %arg3: memref<1x512xf32, #tpu.memory_space<vmem>>, %arg4: memref<512x128xbf16, #tpu.memory_space<vmem>>, %arg5: memref<1x128xf32, #tpu.memory_space<vmem>>, %arg6: memref<1x128xf32, #tpu.memory_space<vmem>>, %arg7: memref<1x128xf32, #tpu.memory_space<vmem>>, %arg8: memref<8x128xf32, #tpu.memory_space<vmem>>) attributes {dimension_semantics = [#tpu.dimension_semantics<parallel>], iteration_bounds = array<i64: 2>, scalar_prefetch = 0 : i64, scratch_operands = 0 : i64, tpu.core_type = #tpu.core_type<tc>, window_params = [{transform_indices = @transform_0, window_bounds = array<i64: 8, 128>}, {pipeline_mode = #tpu.pipeline_mode<synchronous>, transform_indices = @transform_1, window_bounds = array<i64: 128, 512>}, {pipeline_mode = #tpu.pipeline_mode<synchronous>, transform_indices = @transform_2, window_bounds = array<i64: 1, 512>}, {pipeline_mode = #tpu.pipeline_mode<synchronous>, transform_indices = @transform_3, window_bounds = array<i64: 512, 128>}, {pipeline_mode = #tpu.pipeline_mode<synchronous>, transform_indices = @transform_4, window_bounds = array<i64: 1, 128>}, {pipeline_mode = #tpu.pipeline_mode<synchronous>, transform_indices = @transform_5, window_bounds = array<i64: 1, 128>}, {pipeline_mode = #tpu.pipeline_mode<synchronous>, transform_indices = @transform_6, window_bounds = array<i64: 1, 128>}, {transform_indices = @transform_7, window_bounds = array<i64: 8, 128>}]} {
    %c0 = arith.constant 0 : index
    %c0_0 = arith.constant 0 : index
    %0 = vector.load %arg1[%c0, %c0_0] : memref<8x128xf32, #tpu.memory_space<vmem>>, vector<8x128xf32>
    %1 = arith.truncf %0 : vector<8x128xf32> to vector<8x128xbf16>
    %c0_1 = arith.constant 0 : index
    %c0_2 = arith.constant 0 : index
    %2 = vector.load %arg2[%c0_1, %c0_2] : memref<128x512xbf16, #tpu.memory_space<vmem>>, vector<128x512xbf16>
    %cst = arith.constant dense<0.000000e+00> : vector<8x512xf32>
    %3 = tpu.matmul %1, %2, %cst {dimension_numbers = #tpu.dot_dimension_numbers<[1], [0], [0], [1], [0, 0, 1, 1], [], []>} : vector<8x128xbf16>, vector<128x512xbf16>, vector<8x512xf32> -> vector<8x512xf32>
    %c0_3 = arith.constant 0 : index
    %c0_4 = arith.constant 0 : index
    %4 = vector.load %arg3[%c0_3, %c0_4] : memref<1x512xf32, #tpu.memory_space<vmem>>, vector<1x512xf32>
    %5 = vector.broadcast %4 : vector<1x512xf32> to vector<8x512xf32>
    %6 = arith.addf %3, %5 : vector<8x512xf32>
    %cst_5 = arith.constant 0.000000e+00 : f32
    %7 = vector.broadcast %cst_5 : f32 to vector<8x512xf32>
    %8 = arith.maximumf %6, %7 : vector<8x512xf32>
    %9 = arith.truncf %8 : vector<8x512xf32> to vector<8x512xbf16>
    %c0_6 = arith.constant 0 : index
    %c0_7 = arith.constant 0 : index
    %10 = vector.load %arg4[%c0_6, %c0_7] : memref<512x128xbf16, #tpu.memory_space<vmem>>, vector<512x128xbf16>
    %cst_8 = arith.constant dense<0.000000e+00> : vector<8x128xf32>
    %11 = tpu.matmul %9, %10, %cst_8 {dimension_numbers = #tpu.dot_dimension_numbers<[1], [0], [0], [1], [0, 0, 1, 1], [], []>} : vector<8x512xbf16>, vector<512x128xbf16>, vector<8x128xf32> -> vector<8x128xf32>
    %c0_9 = arith.constant 0 : index
    %c0_10 = arith.constant 0 : index
    %12 = vector.load %arg5[%c0_9, %c0_10] : memref<1x128xf32, #tpu.memory_space<vmem>>, vector<1x128xf32>
    %13 = vector.broadcast %12 : vector<1x128xf32> to vector<8x128xf32>
    %14 = arith.addf %11, %13 : vector<8x128xf32>
    %15 = arith.addf %14, %0 : vector<8x128xf32>
    %c0_11 = arith.constant 0 : index
    %c0_12 = arith.constant 0 : index
    %16 = vector.load %arg6[%c0_11, %c0_12] : memref<1x128xf32, #tpu.memory_space<vmem>>, vector<1x128xf32>
    %c0_13 = arith.constant 0 : index
    %c0_14 = arith.constant 0 : index
    %17 = vector.load %arg7[%c0_13, %c0_14] : memref<1x128xf32, #tpu.memory_space<vmem>>, vector<1x128xf32>
    %cst_15 = arith.constant dense<0.000000e+00> : vector<8xf32>
    %18 = vector.multi_reduction <add>, %15, %cst_15 [1] : vector<8x128xf32> to vector<8xf32>
    %19 = vector.shape_cast %18 : vector<8xf32> to vector<8x1xf32>
    %cst_16 = arith.constant 7.812500e-03 : f32
    %20 = vector.broadcast %cst_16 : f32 to vector<8x1xf32>
    %21 = arith.mulf %19, %20 : vector<8x1xf32>
    %22 = vector.broadcast %21 : vector<8x1xf32> to vector<8x128xf32>
    %23 = arith.subf %15, %22 : vector<8x128xf32>
    %24 = arith.mulf %23, %23 : vector<8x128xf32>
    %cst_17 = arith.constant dense<0.000000e+00> : vector<8xf32>
    %25 = vector.multi_reduction <add>, %24, %cst_17 [1] : vector<8x128xf32> to vector<8xf32>
    %26 = vector.shape_cast %25 : vector<8xf32> to vector<8x1xf32>
    %cst_18 = arith.constant 7.812500e-03 : f32
    %27 = vector.broadcast %cst_18 : f32 to vector<8x1xf32>
    %28 = arith.mulf %26, %27 : vector<8x1xf32>
    %cst_19 = arith.constant 9.99999974E-6 : f32
    %29 = vector.broadcast %cst_19 : f32 to vector<8x1xf32>
    %30 = arith.addf %28, %29 : vector<8x1xf32>
    %31 = math.rsqrt %30 : vector<8x1xf32>
    %32 = vector.broadcast %31 : vector<8x1xf32> to vector<8x128xf32>
    %33 = arith.mulf %23, %32 : vector<8x128xf32>
    %34 = vector.broadcast %16 : vector<1x128xf32> to vector<8x128xf32>
    %35 = arith.mulf %33, %34 : vector<8x128xf32>
    %36 = vector.broadcast %17 : vector<1x128xf32> to vector<8x128xf32>
    %37 = arith.addf %35, %36 : vector<8x128xf32>
    %c0_20 = arith.constant 0 : index
    %c0_21 = arith.constant 0 : index
    %38 = vector.load %arg8[%c0_20, %c0_21] : memref<8x128xf32, #tpu.memory_space<vmem>>, vector<8x128xf32>
    tpu.vector_store %arg8[%c0_20, %c0_21], %37 {strides = array<i32>} : memref<8x128xf32, #tpu.memory_space<vmem>>, vector<8x128xf32>,
    return
  }
  func.func @transform_0(%arg0: i32) -> (i32, i32) {
    %c0_i32 = arith.constant 0 : i32
    %c0_i32_0 = arith.constant 0 : i32
    return %arg0, %c0_i32 : i32, i32
  }
  func.func @transform_1(%arg0: i32) -> (i32, i32) {
    %c0_i32 = arith.constant 0 : i32
    %c0_i32_0 = arith.constant 0 : i32
    %c0_i32_1 = arith.constant 0 : i32
    return %c0_i32, %c0_i32_0 : i32, i32
  }
  func.func @transform_2(%arg0: i32) -> (i32, i32) {
    %c0_i32 = arith.constant 0 : i32
    %c0_i32_0 = arith.constant 0 : i32
    %c0_i32_1 = arith.constant 0 : i32
    return %c0_i32, %c0_i32_0 : i32, i32
  }
  func.func @transform_3(%arg0: i32) -> (i32, i32) {
    %c0_i32 = arith.constant 0 : i32
    %c0_i32_0 = arith.constant 0 : i32
    %c0_i32_1 = arith.constant 0 : i32
    return %c0_i32, %c0_i32_0 : i32, i32
  }
  func.func @transform_4(%arg0: i32) -> (i32, i32) {
    %c0_i32 = arith.constant 0 : i32
    %c0_i32_0 = arith.constant 0 : i32
    %c0_i32_1 = arith.constant 0 : i32
    return %c0_i32, %c0_i32_0 : i32, i32
  }
  func.func @transform_5(%arg0: i32) -> (i32, i32) {
    %c0_i32 = arith.constant 0 : i32
    %c0_i32_0 = arith.constant 0 : i32
    %c0_i32_1 = arith.constant 0 : i32
    return %c0_i32, %c0_i32_0 : i32, i32
  }
  func.func @transform_6(%arg0: i32) -> (i32, i32) {
    %c0_i32 = arith.constant 0 : i32
    %c0_i32_0 = arith.constant 0 : i32
    %c0_i32_1 = arith.constant 0 : i32
    return %c0_i32, %c0_i32_0 : i32, i32
  }
  func.func @transform_7(%arg0: i32) -> (i32, i32) {
    %c0_i32 = arith.constant 0 : i32
    %c0_i32_0 = arith.constant 0 : i32
    return %arg0, %c0_i32 : i32, i32
  }
}

module attributes {stable_mosaic.version = 11 : i64} {
  func.func @kernel(%arg0: i32, %arg1: memref<8x128xf32, #tpu.memory_space<vmem>>, %arg2: memref<128x512xbf16, #tpu.memory_space<vmem>>, %arg3: memref<1x512xf32, #tpu.memory_space<vmem>>, %arg4: memref<512x128xbf16, #tpu.memory_space<vmem>>, %arg5: memref<1x128xf32, #tpu.memory_space<vmem>>, %arg6: memref<1x128xf32, #tpu.memory_space<vmem>>, %arg7: memref<1x128xf32, #tpu.memory_space<vmem>>, %arg8: memref<8x128xf32, #tpu.memory_space<vmem>>) attributes {dimension_semantics = [#tpu.dimension_semantics<parallel>], iteration_bounds = array<i64: 2>, scalar_prefetch = 0 : i64, scratch_operands = 0 : i64, tpu.core_type = #tpu.core_type<tc>, window_params = [{transform_indices = @transform_0, window_bounds = array<i64: 8, 128>}, {pipeline_mode = #tpu.pipeline_mode<synchronous>, transform_indices = @transform_1, window_bounds = array<i64: 128, 512>}, {pipeline_mode = #tpu.pipeline_mode<synchronous>, transform_indices = @transform_2, window_bounds = array<i64: 1, 512>}, {pipeline_mode = #tpu.pipeline_mode<synchronous>, transform_indices = @transform_3, window_bounds = array<i64: 512, 128>}, {pipeline_mode = #tpu.pipeline_mode<synchronous>, transform_indices = @transform_4, window_bounds = array<i64: 1, 128>}, {pipeline_mode = #tpu.pipeline_mode<synchronous>, transform_indices = @transform_5, window_bounds = array<i64: 1, 128>}, {pipeline_mode = #tpu.pipeline_mode<synchronous>, transform_indices = @transform_6, window_bounds = array<i64: 1, 128>}, {transform_indices = @transform_7, window_bounds = array<i64: 8, 128>}]} {
    %c0 = arith.constant 0 : index
    %c0_0 = arith.constant 0 : index
    %0 = vector.load %arg1[%c0, %c0_0] : memref<8x128xf32, #tpu.memory_space<vmem>>, vector<8x128xf32>
    %1 = arith.truncf %0 : vector<8x128xf32> to vector<8x128xbf16>
    %c0_1 = arith.constant 0 : index
    %c0_2 = arith.constant 0 : index
    %2 = vector.load %arg2[%c0_1, %c0_2] : memref<128x512xbf16, #tpu.memory_space<vmem>>, vector<128x512xbf16>
    %cst = arith.constant dense<0.000000e+00> : vector<8x512xf32>
    %3 = tpu.matmul %1, %2, %cst {dimension_numbers = #tpu.dot_dimension_numbers<[1], [0], [0], [1], [0, 0, 1, 1], [], []>} : vector<8x128xbf16>, vector<128x512xbf16>, vector<8x512xf32> -> vector<8x512xf32>
    %c0_3 = arith.constant 0 : index
    %c0_4 = arith.constant 0 : index
    %4 = vector.load %arg3[%c0_3, %c0_4] : memref<1x512xf32, #tpu.memory_space<vmem>>, vector<1x512xf32>
    %5 = vector.broadcast %4 : vector<1x512xf32> to vector<8x512xf32>
    %6 = arith.addf %3, %5 : vector<8x512xf32>
    %cst_5 = arith.constant 0.000000e+00 : f32
    %7 = vector.broadcast %cst_5 : f32 to vector<8x512xf32>
    %8 = arith.maximumf %6, %7 : vector<8x512xf32>
    %9 = arith.truncf %8 : vector<8x512xf32> to vector<8x512xbf16>
    %c0_6 = arith.constant 0 : index
    %c0_7 = arith.constant 0 : index
    %10 = vector.load %arg4[%c0_6, %c0_7] : memref<512x128xbf16, #tpu.memory_space<vmem>>, vector<512x128xbf16>
    %cst_8 = arith.constant dense<0.000000e+00> : vector<8x128xf32>
    %11 = tpu.matmul %9, %10, %cst_8 {dimension_numbers = #tpu.dot_dimension_numbers<[1], [0], [0], [1], [0, 0, 1, 1], [], []>} : vector<8x512xbf16>, vector<512x128xbf16>, vector<8x128xf32> -> vector<8x128xf32>
    %c0_9 = arith.constant 0 : index
    %c0_10 = arith.constant 0 : index
    %12 = vector.load %arg5[%c0_9, %c0_10] : memref<1x128xf32, #tpu.memory_space<vmem>>, vector<1x128xf32>
    %13 = vector.broadcast %12 : vector<1x128xf32> to vector<8x128xf32>
    %14 = arith.addf %11, %13 : vector<8x128xf32>
    %15 = arith.addf %14, %0 : vector<8x128xf32>
    %c0_11 = arith.constant 0 : index
    %c0_12 = arith.constant 0 : index
    %16 = vector.load %arg6[%c0_11, %c0_12] : memref<1x128xf32, #tpu.memory_space<vmem>>, vector<1x128xf32>
    %c0_13 = arith.constant 0 : index
    %c0_14 = arith.constant 0 : index
    %17 = vector.load %arg7[%c0_13, %c0_14] : memref<1x128xf32, #tpu.memory_space<vmem>>, vector<1x128xf32>
    %cst_15 = arith.constant dense<0.000000e+00> : vector<8xf32>
    %18 = vector.multi_reduction <add>, %15, %cst_15 [1] : vector<8x128xf32> to vector<8xf32>
    %19 = vector.shape_cast %18 : vector<8xf32> to vector<8x1xf32>
    %cst_16 = arith.constant 7.812500e-03 : f32
    %20 = vector.broadcast %cst_16 : f32 to vector<8x1xf32>
    %21 = arith.mulf %19, %20 : vector<8x1xf32>
    %22 = vector.broadcast %21 : vector<8x1xf32> to vector<8x128xf32>
    %23 = arith.subf %15, %22 : vector<8x128xf32>
    %24 = arith.mulf %23, %23 : vector<8x128xf32>
    %cst_17 = arith.constant dense<0.000000e+00> : vector<8xf32>
    %25 = vector.multi_reduction <add>, %24, %cst_17 [1] : vector<8x128xf32> to vector<8xf32>
    %26 = vector.shape_cast %25 : vector<8xf32> to vector<8x1xf32>
    %cst_18 = arith.constant 7.812500e-03 : f32
    %27 = vector.broadcast %cst_18 : f32 to vector<8x1xf32>
    %28 = arith.mulf %26, %27 : vector<8x1xf32>
    %cst_19 = arith.constant 9.99999974E-6 : f32
    %29 = vector.broadcast %cst_19 : f32 to vector<8x1xf32>
    %30 = arith.addf %28, %29 : vector<8x1xf32>
    %31 = math.rsqrt %30 : vector<8x1xf32>
    %32 = vector.broadcast %31 : vector<8x1xf32> to vector<8x128xf32>
    %33 = arith.mulf %23, %32 : vector<8x128xf32>
    %34 = vector.broadcast %16 : vector<1x128xf32> to vector<8x128xf32>
    %35 = arith.mulf %33, %34 : vector<8x128xf32>
    %36 = vector.broadcast %17 : vector<1x128xf32> to vector<8x128xf32>
    %37 = arith.addf %35, %36 : vector<8x128xf32>
    %c0_20 = arith.constant 0 : index
    %c0_21 = arith.constant 0 : index
    %38 = vector.load %arg8[%c0_20, %c0_21] : memref<8x128xf32, #tpu.memory_space<vmem>>, vector<8x128xf32>
    tpu.vector_store %arg8[%c0_20, %c0_21], %37 {strides = array<i32>} : memref<8x128xf32, #tpu.memory_space<vmem>>, vector<8x128xf32>,
    return
  }
  func.func @transform_0(%arg0: i32) -> (i32, i32) {
    %c0_i32 = arith.constant 0 : i32
    %c0_i32_0 = arith.constant 0 : i32
    return %arg0, %c0_i32 : i32, i32
  }
  func.func @transform_1(%arg0: i32) -> (i32, i32) {
    %c0_i32 = arith.constant 0 : i32
    %c0_i32_0 = arith.constant 0 : i32
    %c0_i32_1 = arith.constant 0 : i32
    return %c0_i32, %c0_i32_0 : i32, i32
  }
  func.func @transform_2(%arg0: i32) -> (i32, i32) {
    %c0_i32 = arith.constant 0 : i32
    %c0_i32_0 = arith.constant 0 : i32
    %c0_i32_1 = arith.constant 0 : i32
    return %c0_i32, %c0_i32_0 : i32, i32
  }
  func.func @transform_3(%arg0: i32) -> (i32, i32) {
    %c0_i32 = arith.constant 0 : i32
    %c0_i32_0 = arith.constant 0 : i32
    %c0_i32_1 = arith.constant 0 : i32
    return %c0_i32, %c0_i32_0 : i32, i32
  }
  func.func @transform_4(%arg0: i32) -> (i32, i32) {
    %c0_i32 = arith.constant 0 : i32
    %c0_i32_0 = arith.constant 0 : i32
    %c0_i32_1 = arith.constant 0 : i32
    return %c0_i32, %c0_i32_0 : i32, i32
  }
  func.func @transform_5(%arg0: i32) -> (i32, i32) {
    %c0_i32 = arith.constant 0 : i32
    %c0_i32_0 = arith.constant 0 : i32
    %c0_i32_1 = arith.constant 0 : i32
    return %c0_i32, %c0_i32_0 : i32, i32
  }
  func.func @transform_6(%arg0: i32) -> (i32, i32) {
    %c0_i32 = arith.constant 0 : i32
    %c0_i32_0 = arith.constant 0 : i32
    %c0_i32_1 = arith.constant 0 : i32
    return %c0_i32, %c0_i32_0 : i32, i32
  }
  func.func @transform_7(%arg0: i32) -> (i32, i32) {
    %c0_i32 = arith.constant 0 : i32
    %c0_i32_0 = arith.constant 0 : i32
    return %arg0, %c0_i32 : i32, i32
  }
}

module attributes {stable_mosaic.version = 11 : i64} {
  func.func @kernel(%arg0: i32, %arg1: memref<1x8x128xf32, #tpu.memory_space<vmem>>, %arg2: memref<1x1x8xi32, #tpu.memory_space<vmem>>, %arg3: memref<128x256xbf16, #tpu.memory_space<vmem>>, %arg4: memref<128x128xbf16, #tpu.memory_space<vmem>>, %arg5: memref<1x128xf32, #tpu.memory_space<vmem>>, %arg6: memref<1x128xf32, #tpu.memory_space<vmem>>, %arg7: memref<1x128xf32, #tpu.memory_space<vmem>>, %arg8: memref<1x8x128xf32, #tpu.memory_space<vmem>>) attributes {dimension_semantics = [#tpu.dimension_semantics<parallel>], iteration_bounds = array<i64: 2>, scalar_prefetch = 0 : i64, scratch_operands = 0 : i64, tpu.core_type = #tpu.core_type<tc>, window_params = [{transform_indices = @transform_0, window_bounds = array<i64: 1, 8, 128>}, {transform_indices = @transform_1, window_bounds = array<i64: 1, 1, 8>}, {pipeline_mode = #tpu.pipeline_mode<synchronous>, transform_indices = @transform_2, window_bounds = array<i64: 128, 256>}, {pipeline_mode = #tpu.pipeline_mode<synchronous>, transform_indices = @transform_3, window_bounds = array<i64: 128, 128>}, {pipeline_mode = #tpu.pipeline_mode<synchronous>, transform_indices = @transform_4, window_bounds = array<i64: 1, 128>}, {pipeline_mode = #tpu.pipeline_mode<synchronous>, transform_indices = @transform_5, window_bounds = array<i64: 1, 128>}, {pipeline_mode = #tpu.pipeline_mode<synchronous>, transform_indices = @transform_6, window_bounds = array<i64: 1, 128>}, {transform_indices = @transform_7, window_bounds = array<i64: 1, 8, 128>}]} {
    %c0 = arith.constant 0 : index
    %c0_0 = arith.constant 0 : index
    %c0_1 = arith.constant 0 : index
    %0 = vector.load %arg1[%c0, %c0_0, %c0_1] : memref<1x8x128xf32, #tpu.memory_space<vmem>>, vector<1x8x128xf32>
    %1 = vector.shape_cast %0 : vector<1x8x128xf32> to vector<8x128xf32>
    %2 = arith.truncf %1 : vector<8x128xf32> to vector<8x128xbf16>
    %c0_2 = arith.constant 0 : index
    %c0_3 = arith.constant 0 : index
    %3 = vector.load %arg3[%c0_2, %c0_3] : memref<128x256xbf16, #tpu.memory_space<vmem>>, vector<128x256xbf16>
    %cst = arith.constant dense<0.000000e+00> : vector<8x256xf32>
    %4 = tpu.matmul %2, %3, %cst {dimension_numbers = #tpu.dot_dimension_numbers<[1], [0], [0], [1], [0, 0, 1, 1], [], []>} : vector<8x128xbf16>, vector<128x256xbf16>, vector<8x256xf32> -> vector<8x256xf32>
    %5 = vector.extract_strided_slice %4 {offsets = [0, 0], sizes = [8, 128], strides = [1, 1]} : vector<8x256xf32> to vector<8x128xf32>
    %6 = vector.extract_strided_slice %4 {offsets = [0, 128], sizes = [8, 128], strides = [1, 1]} : vector<8x256xf32> to vector<8x128xf32>
    %c0_4 = arith.constant 0 : index
    %c0_5 = arith.constant 0 : index
    %c0_6 = arith.constant 0 : index
    %7 = vector.load %arg2[%c0_4, %c0_5, %c0_6] : memref<1x1x8xi32, #tpu.memory_space<vmem>>, vector<1x1x8xi32>
    %8 = vector.shape_cast %7 : vector<1x1x8xi32> to vector<1x8xi32>
    %c0_i32 = arith.constant 0 : i32
    %9 = vector.broadcast %c0_i32 : i32 to vector<1x8xi32>
    %10 = arith.cmpi eq, %8, %9 : vector<1x8xi32>
    %11 = arith.extui %10 : vector<1x8xi1> to vector<1x8xi32>
    %12 = arith.sitofp %11 : vector<1x8xi32> to vector<1x8xf32>
    %cst_7 = arith.constant -9.99999944E+27 : f32
    %13 = vector.broadcast %cst_7 : f32 to vector<1x8xf32>
    %14 = arith.mulf %12, %13 : vector<1x8xf32>
    %15 = arith.truncf %5 : vector<8x128xf32> to vector<8x128xbf16>
    %16 = arith.truncf %6 : vector<8x128xf32> to vector<8x128xbf16>
    %cst_8 = arith.constant 0.000000e+00 : f32
    %17 = vector.broadcast %cst_8 : f32 to vector<8x128xf32>
    %18 = vector.extract_strided_slice %15 {offsets = [0, 0], sizes = [8, 16], strides = [1, 1]} : vector<8x128xbf16> to vector<8x16xbf16>
    %19 = vector.extract_strided_slice %16 {offsets = [0, 0], sizes = [8, 16], strides = [1, 1]} : vector<8x128xbf16> to vector<8x16xbf16>
    %cst_9 = arith.constant dense<0.000000e+00> : vector<8x8xf32>
    %20 = tpu.matmul %18, %19, %cst_9 {dimension_numbers = #tpu.dot_dimension_numbers<[1], [1], [0], [0], [0, 0, 1, 0], [], []>} : vector<8x16xbf16>, vector<8x16xbf16>, vector<8x8xf32> -> vector<8x8xf32>
    %21 = vector.broadcast %14 : vector<1x8xf32> to vector<8x8xf32>
    %22 = arith.addf %20, %21 : vector<8x8xf32>
    %cst_10 = arith.constant 0.0883883461 : f32
    %23 = vector.broadcast %cst_10 : f32 to vector<8x8xf32>
    %24 = arith.mulf %22, %23 : vector<8x8xf32>
    %cst_11 = arith.constant dense<0xFF800000> : vector<8xf32>
    %25 = vector.multi_reduction <maximumf>, %24, %cst_11 [1] : vector<8x8xf32> to vector<8xf32>
    %26 = vector.shape_cast %25 : vector<8xf32> to vector<8x1xf32>
    %27 = vector.broadcast %26 : vector<8x1xf32> to vector<8x8xf32>
    %28 = arith.subf %24, %27 : vector<8x8xf32>
    %29 = math.exp %28 : vector<8x8xf32>
    %cst_12 = arith.constant dense<0.000000e+00> : vector<8xf32>
    %30 = vector.multi_reduction <add>, %29, %cst_12 [1] : vector<8x8xf32> to vector<8xf32>
    %31 = vector.shape_cast %30 : vector<8xf32> to vector<8x1xf32>
    %32 = tpu.reciprocal %31 {approx = true} : vector<8x1xf32> -> vector<8x1xf32>
    %33 = arith.mulf %31, %32 : vector<8x1xf32>
    %cst_13 = arith.constant 2.000000e+00 : f32
    %34 = vector.broadcast %cst_13 : f32 to vector<8x1xf32>
    %35 = arith.subf %34, %33 : vector<8x1xf32>
    %36 = arith.mulf %32, %35 : vector<8x1xf32>
    %37 = vector.broadcast %36 : vector<8x1xf32> to vector<8x8xf32>
    %38 = arith.mulf %29, %37 : vector<8x8xf32>
    %39 = arith.truncf %38 : vector<8x8xf32> to vector<8x8xbf16>
    %40 = vector.extract_strided_slice %2 {offsets = [0, 0], sizes = [8, 16], strides = [1, 1]} : vector<8x128xbf16> to vector<8x16xbf16>
    %c0_14 = arith.constant 0 : index
    %c0_15 = arith.constant 0 : index
    %41 = vector.load %arg4[%c0_14, %c0_15] : memref<128x128xbf16, #tpu.memory_space<vmem>>, vector<16x128xbf16>
    %cst_16 = arith.constant dense<0.000000e+00> : vector<8x128xf32>
    %42 = tpu.matmul %40, %41, %cst_16 {dimension_numbers = #tpu.dot_dimension_numbers<[1], [0], [0], [1], [0, 0, 1, 1], [], []>} : vector<8x16xbf16>, vector<16x128xbf16>, vector<8x128xf32> -> vector<8x128xf32>
    %43 = arith.truncf %42 : vector<8x128xf32> to vector<8x128xbf16>
    %cst_17 = arith.constant dense<0.000000e+00> : vector<8x128xf32>
    %44 = tpu.matmul %39, %43, %cst_17 {dimension_numbers = #tpu.dot_dimension_numbers<[1], [0], [0], [1], [0, 0, 1, 1], [], []>} : vector<8x8xbf16>, vector<8x128xbf16>, vector<8x128xf32> -> vector<8x128xf32>
    %45 = arith.addf %17, %44 : vector<8x128xf32>
    %46 = vector.extract_strided_slice %15 {offsets = [0, 16], sizes = [8, 16], strides = [1, 1]} : vector<8x128xbf16> to vector<8x16xbf16>
    %47 = vector.extract_strided_slice %16 {offsets = [0, 16], sizes = [8, 16], strides = [1, 1]} : vector<8x128xbf16> to vector<8x16xbf16>
    %cst_18 = arith.constant dense<0.000000e+00> : vector<8x8xf32>
    %48 = tpu.matmul %46, %47, %cst_18 {dimension_numbers = #tpu.dot_dimension_numbers<[1], [1], [0], [0], [0, 0, 1, 0], [], []>} : vector<8x16xbf16>, vector<8x16xbf16>, vector<8x8xf32> -> vector<8x8xf32>
    %49 = vector.broadcast %14 : vector<1x8xf32> to vector<8x8xf32>
    %50 = arith.addf %48, %49 : vector<8x8xf32>
    %cst_19 = arith.constant 0.0883883461 : f32
    %51 = vector.broadcast %cst_19 : f32 to vector<8x8xf32>
    %52 = arith.mulf %50, %51 : vector<8x8xf32>
    %cst_20 = arith.constant dense<0xFF800000> : vector<8xf32>
    %53 = vector.multi_reduction <maximumf>, %52, %cst_20 [1] : vector<8x8xf32> to vector<8xf32>
    %54 = vector.shape_cast %53 : vector<8xf32> to vector<8x1xf32>
    %55 = vector.broadcast %54 : vector<8x1xf32> to vector<8x8xf32>
    %56 = arith.subf %52, %55 : vector<8x8xf32>
    %57 = math.exp %56 : vector<8x8xf32>
    %cst_21 = arith.constant dense<0.000000e+00> : vector<8xf32>
    %58 = vector.multi_reduction <add>, %57, %cst_21 [1] : vector<8x8xf32> to vector<8xf32>
    %59 = vector.shape_cast %58 : vector<8xf32> to vector<8x1xf32>
    %60 = tpu.reciprocal %59 {approx = true} : vector<8x1xf32> -> vector<8x1xf32>
    %61 = arith.mulf %59, %60 : vector<8x1xf32>
    %cst_22 = arith.constant 2.000000e+00 : f32
    %62 = vector.broadcast %cst_22 : f32 to vector<8x1xf32>
    %63 = arith.subf %62, %61 : vector<8x1xf32>
    %64 = arith.mulf %60, %63 : vector<8x1xf32>
    %65 = vector.broadcast %64 : vector<8x1xf32> to vector<8x8xf32>
    %66 = arith.mulf %57, %65 : vector<8x8xf32>
    %67 = arith.truncf %66 : vector<8x8xf32> to vector<8x8xbf16>
    %68 = vector.extract_strided_slice %2 {offsets = [0, 16], sizes = [8, 16], strides = [1, 1]} : vector<8x128xbf16> to vector<8x16xbf16>
    %c16 = arith.constant 16 : index
    %c0_23 = arith.constant 0 : index
    %69 = vector.load %arg4[%c16, %c0_23] : memref<128x128xbf16, #tpu.memory_space<vmem>>, vector<16x128xbf16>
    %cst_24 = arith.constant dense<0.000000e+00> : vector<8x128xf32>
    %70 = tpu.matmul %68, %69, %cst_24 {dimension_numbers = #tpu.dot_dimension_numbers<[1], [0], [0], [1], [0, 0, 1, 1], [], []>} : vector<8x16xbf16>, vector<16x128xbf16>, vector<8x128xf32> -> vector<8x128xf32>
    %71 = arith.truncf %70 : vector<8x128xf32> to vector<8x128xbf16>
    %cst_25 = arith.constant dense<0.000000e+00> : vector<8x128xf32>
    %72 = tpu.matmul %67, %71, %cst_25 {dimension_numbers = #tpu.dot_dimension_numbers<[1], [0], [0], [1], [0, 0, 1, 1], [], []>} : vector<8x8xbf16>, vector<8x128xbf16>, vector<8x128xf32> -> vector<8x128xf32>
    %73 = arith.addf %45, %72 : vector<8x128xf32>
    %74 = vector.extract_strided_slice %15 {offsets = [0, 32], sizes = [8, 16], strides = [1, 1]} : vector<8x128xbf16> to vector<8x16xbf16>
    %75 = vector.extract_strided_slice %16 {offsets = [0, 32], sizes = [8, 16], strides = [1, 1]} : vector<8x128xbf16> to vector<8x16xbf16>
    %cst_26 = arith.constant dense<0.000000e+00> : vector<8x8xf32>
    %76 = tpu.matmul %74, %75, %cst_26 {dimension_numbers = #tpu.dot_dimension_numbers<[1], [1], [0], [0], [0, 0, 1, 0], [], []>} : vector<8x16xbf16>, vector<8x16xbf16>, vector<8x8xf32> -> vector<8x8xf32>
    %77 = vector.broadcast %14 : vector<1x8xf32> to vector<8x8xf32>
    %78 = arith.addf %76, %77 : vector<8x8xf32>
    %cst_27 = arith.constant 0.0883883461 : f32
    %79 = vector.broadcast %cst_27 : f32 to vector<8x8xf32>
    %80 = arith.mulf %78, %79 : vector<8x8xf32>
    %cst_28 = arith.constant dense<0xFF800000> : vector<8xf32>
    %81 = vector.multi_reduction <maximumf>, %80, %cst_28 [1] : vector<8x8xf32> to vector<8xf32>
    %82 = vector.shape_cast %81 : vector<8xf32> to vector<8x1xf32>
    %83 = vector.broadcast %82 : vector<8x1xf32> to vector<8x8xf32>
    %84 = arith.subf %80, %83 : vector<8x8xf32>
    %85 = math.exp %84 : vector<8x8xf32>
    %cst_29 = arith.constant dense<0.000000e+00> : vector<8xf32>
    %86 = vector.multi_reduction <add>, %85, %cst_29 [1] : vector<8x8xf32> to vector<8xf32>
    %87 = vector.shape_cast %86 : vector<8xf32> to vector<8x1xf32>
    %88 = tpu.reciprocal %87 {approx = true} : vector<8x1xf32> -> vector<8x1xf32>
    %89 = arith.mulf %87, %88 : vector<8x1xf32>
    %cst_30 = arith.constant 2.000000e+00 : f32
    %90 = vector.broadcast %cst_30 : f32 to vector<8x1xf32>
    %91 = arith.subf %90, %89 : vector<8x1xf32>
    %92 = arith.mulf %88, %91 : vector<8x1xf32>
    %93 = vector.broadcast %92 : vector<8x1xf32> to vector<8x8xf32>
    %94 = arith.mulf %85, %93 : vector<8x8xf32>
    %95 = arith.truncf %94 : vector<8x8xf32> to vector<8x8xbf16>
    %96 = vector.extract_strided_slice %2 {offsets = [0, 32], sizes = [8, 16], strides = [1, 1]} : vector<8x128xbf16> to vector<8x16xbf16>
    %c32 = arith.constant 32 : index
    %c0_31 = arith.constant 0 : index
    %97 = vector.load %arg4[%c32, %c0_31] : memref<128x128xbf16, #tpu.memory_space<vmem>>, vector<16x128xbf16>
    %cst_32 = arith.constant dense<0.000000e+00> : vector<8x128xf32>
    %98 = tpu.matmul %96, %97, %cst_32 {dimension_numbers = #tpu.dot_dimension_numbers<[1], [0], [0], [1], [0, 0, 1, 1], [], []>} : vector<8x16xbf16>, vector<16x128xbf16>, vector<8x128xf32> -> vector<8x128xf32>
    %99 = arith.truncf %98 : vector<8x128xf32> to vector<8x128xbf16>
    %cst_33 = arith.constant dense<0.000000e+00> : vector<8x128xf32>
    %100 = tpu.matmul %95, %99, %cst_33 {dimension_numbers = #tpu.dot_dimension_numbers<[1], [0], [0], [1], [0, 0, 1, 1], [], []>} : vector<8x8xbf16>, vector<8x128xbf16>, vector<8x128xf32> -> vector<8x128xf32>
    %101 = arith.addf %73, %100 : vector<8x128xf32>
    %102 = vector.extract_strided_slice %15 {offsets = [0, 48], sizes = [8, 16], strides = [1, 1]} : vector<8x128xbf16> to vector<8x16xbf16>
    %103 = vector.extract_strided_slice %16 {offsets = [0, 48], sizes = [8, 16], strides = [1, 1]} : vector<8x128xbf16> to vector<8x16xbf16>
    %cst_34 = arith.constant dense<0.000000e+00> : vector<8x8xf32>
    %104 = tpu.matmul %102, %103, %cst_34 {dimension_numbers = #tpu.dot_dimension_numbers<[1], [1], [0], [0], [0, 0, 1, 0], [], []>} : vector<8x16xbf16>, vector<8x16xbf16>, vector<8x8xf32> -> vector<8x8xf32>
    %105 = vector.broadcast %14 : vector<1x8xf32> to vector<8x8xf32>
    %106 = arith.addf %104, %105 : vector<8x8xf32>
    %cst_35 = arith.constant 0.0883883461 : f32
    %107 = vector.broadcast %cst_35 : f32 to vector<8x8xf32>
    %108 = arith.mulf %106, %107 : vector<8x8xf32>
    %cst_36 = arith.constant dense<0xFF800000> : vector<8xf32>
    %109 = vector.multi_reduction <maximumf>, %108, %cst_36 [1] : vector<8x8xf32> to vector<8xf32>
    %110 = vector.shape_cast %109 : vector<8xf32> to vector<8x1xf32>
    %111 = vector.broadcast %110 : vector<8x1xf32> to vector<8x8xf32>
    %112 = arith.subf %108, %111 : vector<8x8xf32>
    %113 = math.exp %112 : vector<8x8xf32>
    %cst_37 = arith.constant dense<0.000000e+00> : vector<8xf32>
    %114 = vector.multi_reduction <add>, %113, %cst_37 [1] : vector<8x8xf32> to vector<8xf32>
    %115 = vector.shape_cast %114 : vector<8xf32> to vector<8x1xf32>
    %116 = tpu.reciprocal %115 {approx = true} : vector<8x1xf32> -> vector<8x1xf32>
    %117 = arith.mulf %115, %116 : vector<8x1xf32>
    %cst_38 = arith.constant 2.000000e+00 : f32
    %118 = vector.broadcast %cst_38 : f32 to vector<8x1xf32>
    %119 = arith.subf %118, %117 : vector<8x1xf32>
    %120 = arith.mulf %116, %119 : vector<8x1xf32>
    %121 = vector.broadcast %120 : vector<8x1xf32> to vector<8x8xf32>
    %122 = arith.mulf %113, %121 : vector<8x8xf32>
    %123 = arith.truncf %122 : vector<8x8xf32> to vector<8x8xbf16>
    %124 = vector.extract_strided_slice %2 {offsets = [0, 48], sizes = [8, 16], strides = [1, 1]} : vector<8x128xbf16> to vector<8x16xbf16>
    %c48 = arith.constant 48 : index
    %c0_39 = arith.constant 0 : index
    %125 = vector.load %arg4[%c48, %c0_39] : memref<128x128xbf16, #tpu.memory_space<vmem>>, vector<16x128xbf16>
    %cst_40 = arith.constant dense<0.000000e+00> : vector<8x128xf32>
    %126 = tpu.matmul %124, %125, %cst_40 {dimension_numbers = #tpu.dot_dimension_numbers<[1], [0], [0], [1], [0, 0, 1, 1], [], []>} : vector<8x16xbf16>, vector<16x128xbf16>, vector<8x128xf32> -> vector<8x128xf32>
    %127 = arith.truncf %126 : vector<8x128xf32> to vector<8x128xbf16>
    %cst_41 = arith.constant dense<0.000000e+00> : vector<8x128xf32>
    %128 = tpu.matmul %123, %127, %cst_41 {dimension_numbers = #tpu.dot_dimension_numbers<[1], [0], [0], [1], [0, 0, 1, 1], [], []>} : vector<8x8xbf16>, vector<8x128xbf16>, vector<8x128xf32> -> vector<8x128xf32>
    %129 = arith.addf %101, %128 : vector<8x128xf32>
    %130 = vector.extract_strided_slice %15 {offsets = [0, 64], sizes = [8, 16], strides = [1, 1]} : vector<8x128xbf16> to vector<8x16xbf16>
    %131 = vector.extract_strided_slice %16 {offsets = [0, 64], sizes = [8, 16], strides = [1, 1]} : vector<8x128xbf16> to vector<8x16xbf16>
    %cst_42 = arith.constant dense<0.000000e+00> : vector<8x8xf32>
    %132 = tpu.matmul %130, %131, %cst_42 {dimension_numbers = #tpu.dot_dimension_numbers<[1], [1], [0], [0], [0, 0, 1, 0], [], []>} : vector<8x16xbf16>, vector<8x16xbf16>, vector<8x8xf32> -> vector<8x8xf32>
    %133 = vector.broadcast %14 : vector<1x8xf32> to vector<8x8xf32>
    %134 = arith.addf %132, %133 : vector<8x8xf32>
    %cst_43 = arith.constant 0.0883883461 : f32
    %135 = vector.broadcast %cst_43 : f32 to vector<8x8xf32>
    %136 = arith.mulf %134, %135 : vector<8x8xf32>
    %cst_44 = arith.constant dense<0xFF800000> : vector<8xf32>
    %137 = vector.multi_reduction <maximumf>, %136, %cst_44 [1] : vector<8x8xf32> to vector<8xf32>
    %138 = vector.shape_cast %137 : vector<8xf32> to vector<8x1xf32>
    %139 = vector.broadcast %138 : vector<8x1xf32> to vector<8x8xf32>
    %140 = arith.subf %136, %139 : vector<8x8xf32>
    %141 = math.exp %140 : vector<8x8xf32>
    %cst_45 = arith.constant dense<0.000000e+00> : vector<8xf32>
    %142 = vector.multi_reduction <add>, %141, %cst_45 [1] : vector<8x8xf32> to vector<8xf32>
    %143 = vector.shape_cast %142 : vector<8xf32> to vector<8x1xf32>
    %144 = tpu.reciprocal %143 {approx = true} : vector<8x1xf32> -> vector<8x1xf32>
    %145 = arith.mulf %143, %144 : vector<8x1xf32>
    %cst_46 = arith.constant 2.000000e+00 : f32
    %146 = vector.broadcast %cst_46 : f32 to vector<8x1xf32>
    %147 = arith.subf %146, %145 : vector<8x1xf32>
    %148 = arith.mulf %144, %147 : vector<8x1xf32>
    %149 = vector.broadcast %148 : vector<8x1xf32> to vector<8x8xf32>
    %150 = arith.mulf %141, %149 : vector<8x8xf32>
    %151 = arith.truncf %150 : vector<8x8xf32> to vector<8x8xbf16>
    %152 = vector.extract_strided_slice %2 {offsets = [0, 64], sizes = [8, 16], strides = [1, 1]} : vector<8x128xbf16> to vector<8x16xbf16>
    %c64 = arith.constant 64 : index
    %c0_47 = arith.constant 0 : index
    %153 = vector.load %arg4[%c64, %c0_47] : memref<128x128xbf16, #tpu.memory_space<vmem>>, vector<16x128xbf16>
    %cst_48 = arith.constant dense<0.000000e+00> : vector<8x128xf32>
    %154 = tpu.matmul %152, %153, %cst_48 {dimension_numbers = #tpu.dot_dimension_numbers<[1], [0], [0], [1], [0, 0, 1, 1], [], []>} : vector<8x16xbf16>, vector<16x128xbf16>, vector<8x128xf32> -> vector<8x128xf32>
    %155 = arith.truncf %154 : vector<8x128xf32> to vector<8x128xbf16>
    %cst_49 = arith.constant dense<0.000000e+00> : vector<8x128xf32>
    %156 = tpu.matmul %151, %155, %cst_49 {dimension_numbers = #tpu.dot_dimension_numbers<[1], [0], [0], [1], [0, 0, 1, 1], [], []>} : vector<8x8xbf16>, vector<8x128xbf16>, vector<8x128xf32> -> vector<8x128xf32>
    %157 = arith.addf %129, %156 : vector<8x128xf32>
    %158 = vector.extract_strided_slice %15 {offsets = [0, 80], sizes = [8, 16], strides = [1, 1]} : vector<8x128xbf16> to vector<8x16xbf16>
    %159 = vector.extract_strided_slice %16 {offsets = [0, 80], sizes = [8, 16], strides = [1, 1]} : vector<8x128xbf16> to vector<8x16xbf16>
    %cst_50 = arith.constant dense<0.000000e+00> : vector<8x8xf32>
    %160 = tpu.matmul %158, %159, %cst_50 {dimension_numbers = #tpu.dot_dimension_numbers<[1], [1], [0], [0], [0, 0, 1, 0], [], []>} : vector<8x16xbf16>, vector<8x16xbf16>, vector<8x8xf32> -> vector<8x8xf32>
    %161 = vector.broadcast %14 : vector<1x8xf32> to vector<8x8xf32>
    %162 = arith.addf %160, %161 : vector<8x8xf32>
    %cst_51 = arith.constant 0.0883883461 : f32
    %163 = vector.broadcast %cst_51 : f32 to vector<8x8xf32>
    %164 = arith.mulf %162, %163 : vector<8x8xf32>
    %cst_52 = arith.constant dense<0xFF800000> : vector<8xf32>
    %165 = vector.multi_reduction <maximumf>, %164, %cst_52 [1] : vector<8x8xf32> to vector<8xf32>
    %166 = vector.shape_cast %165 : vector<8xf32> to vector<8x1xf32>
    %167 = vector.broadcast %166 : vector<8x1xf32> to vector<8x8xf32>
    %168 = arith.subf %164, %167 : vector<8x8xf32>
    %169 = math.exp %168 : vector<8x8xf32>
    %cst_53 = arith.constant dense<0.000000e+00> : vector<8xf32>
    %170 = vector.multi_reduction <add>, %169, %cst_53 [1] : vector<8x8xf32> to vector<8xf32>
    %171 = vector.shape_cast %170 : vector<8xf32> to vector<8x1xf32>
    %172 = tpu.reciprocal %171 {approx = true} : vector<8x1xf32> -> vector<8x1xf32>
    %173 = arith.mulf %171, %172 : vector<8x1xf32>
    %cst_54 = arith.constant 2.000000e+00 : f32
    %174 = vector.broadcast %cst_54 : f32 to vector<8x1xf32>
    %175 = arith.subf %174, %173 : vector<8x1xf32>
    %176 = arith.mulf %172, %175 : vector<8x1xf32>
    %177 = vector.broadcast %176 : vector<8x1xf32> to vector<8x8xf32>
    %178 = arith.mulf %169, %177 : vector<8x8xf32>
    %179 = arith.truncf %178 : vector<8x8xf32> to vector<8x8xbf16>
    %180 = vector.extract_strided_slice %2 {offsets = [0, 80], sizes = [8, 16], strides = [1, 1]} : vector<8x128xbf16> to vector<8x16xbf16>
    %c80 = arith.constant 80 : index
    %c0_55 = arith.constant 0 : index
    %181 = vector.load %arg4[%c80, %c0_55] : memref<128x128xbf16, #tpu.memory_space<vmem>>, vector<16x128xbf16>
    %cst_56 = arith.constant dense<0.000000e+00> : vector<8x128xf32>
    %182 = tpu.matmul %180, %181, %cst_56 {dimension_numbers = #tpu.dot_dimension_numbers<[1], [0], [0], [1], [0, 0, 1, 1], [], []>} : vector<8x16xbf16>, vector<16x128xbf16>, vector<8x128xf32> -> vector<8x128xf32>
    %183 = arith.truncf %182 : vector<8x128xf32> to vector<8x128xbf16>
    %cst_57 = arith.constant dense<0.000000e+00> : vector<8x128xf32>
    %184 = tpu.matmul %179, %183, %cst_57 {dimension_numbers = #tpu.dot_dimension_numbers<[1], [0], [0], [1], [0, 0, 1, 1], [], []>} : vector<8x8xbf16>, vector<8x128xbf16>, vector<8x128xf32> -> vector<8x128xf32>
    %185 = arith.addf %157, %184 : vector<8x128xf32>
    %186 = vector.extract_strided_slice %15 {offsets = [0, 96], sizes = [8, 16], strides = [1, 1]} : vector<8x128xbf16> to vector<8x16xbf16>
    %187 = vector.extract_strided_slice %16 {offsets = [0, 96], sizes = [8, 16], strides = [1, 1]} : vector<8x128xbf16> to vector<8x16xbf16>
    %cst_58 = arith.constant dense<0.000000e+00> : vector<8x8xf32>
    %188 = tpu.matmul %186, %187, %cst_58 {dimension_numbers = #tpu.dot_dimension_numbers<[1], [1], [0], [0], [0, 0, 1, 0], [], []>} : vector<8x16xbf16>, vector<8x16xbf16>, vector<8x8xf32> -> vector<8x8xf32>
    %189 = vector.broadcast %14 : vector<1x8xf32> to vector<8x8xf32>
    %190 = arith.addf %188, %189 : vector<8x8xf32>
    %cst_59 = arith.constant 0.0883883461 : f32
    %191 = vector.broadcast %cst_59 : f32 to vector<8x8xf32>
    %192 = arith.mulf %190, %191 : vector<8x8xf32>
    %cst_60 = arith.constant dense<0xFF800000> : vector<8xf32>
    %193 = vector.multi_reduction <maximumf>, %192, %cst_60 [1] : vector<8x8xf32> to vector<8xf32>
    %194 = vector.shape_cast %193 : vector<8xf32> to vector<8x1xf32>
    %195 = vector.broadcast %194 : vector<8x1xf32> to vector<8x8xf32>
    %196 = arith.subf %192, %195 : vector<8x8xf32>
    %197 = math.exp %196 : vector<8x8xf32>
    %cst_61 = arith.constant dense<0.000000e+00> : vector<8xf32>
    %198 = vector.multi_reduction <add>, %197, %cst_61 [1] : vector<8x8xf32> to vector<8xf32>
    %199 = vector.shape_cast %198 : vector<8xf32> to vector<8x1xf32>
    %200 = tpu.reciprocal %199 {approx = true} : vector<8x1xf32> -> vector<8x1xf32>
    %201 = arith.mulf %199, %200 : vector<8x1xf32>
    %cst_62 = arith.constant 2.000000e+00 : f32
    %202 = vector.broadcast %cst_62 : f32 to vector<8x1xf32>
    %203 = arith.subf %202, %201 : vector<8x1xf32>
    %204 = arith.mulf %200, %203 : vector<8x1xf32>
    %205 = vector.broadcast %204 : vector<8x1xf32> to vector<8x8xf32>
    %206 = arith.mulf %197, %205 : vector<8x8xf32>
    %207 = arith.truncf %206 : vector<8x8xf32> to vector<8x8xbf16>
    %208 = vector.extract_strided_slice %2 {offsets = [0, 96], sizes = [8, 16], strides = [1, 1]} : vector<8x128xbf16> to vector<8x16xbf16>
    %c96 = arith.constant 96 : index
    %c0_63 = arith.constant 0 : index
    %209 = vector.load %arg4[%c96, %c0_63] : memref<128x128xbf16, #tpu.memory_space<vmem>>, vector<16x128xbf16>
    %cst_64 = arith.constant dense<0.000000e+00> : vector<8x128xf32>
    %210 = tpu.matmul %208, %209, %cst_64 {dimension_numbers = #tpu.dot_dimension_numbers<[1], [0], [0], [1], [0, 0, 1, 1], [], []>} : vector<8x16xbf16>, vector<16x128xbf16>, vector<8x128xf32> -> vector<8x128xf32>
    %211 = arith.truncf %210 : vector<8x128xf32> to vector<8x128xbf16>
    %cst_65 = arith.constant dense<0.000000e+00> : vector<8x128xf32>
    %212 = tpu.matmul %207, %211, %cst_65 {dimension_numbers = #tpu.dot_dimension_numbers<[1], [0], [0], [1], [0, 0, 1, 1], [], []>} : vector<8x8xbf16>, vector<8x128xbf16>, vector<8x128xf32> -> vector<8x128xf32>
    %213 = arith.addf %185, %212 : vector<8x128xf32>
    %214 = vector.extract_strided_slice %15 {offsets = [0, 112], sizes = [8, 16], strides = [1, 1]} : vector<8x128xbf16> to vector<8x16xbf16>
    %215 = vector.extract_strided_slice %16 {offsets = [0, 112], sizes = [8, 16], strides = [1, 1]} : vector<8x128xbf16> to vector<8x16xbf16>
    %cst_66 = arith.constant dense<0.000000e+00> : vector<8x8xf32>
    %216 = tpu.matmul %214, %215, %cst_66 {dimension_numbers = #tpu.dot_dimension_numbers<[1], [1], [0], [0], [0, 0, 1, 0], [], []>} : vector<8x16xbf16>, vector<8x16xbf16>, vector<8x8xf32> -> vector<8x8xf32>
    %217 = vector.broadcast %14 : vector<1x8xf32> to vector<8x8xf32>
    %218 = arith.addf %216, %217 : vector<8x8xf32>
    %cst_67 = arith.constant 0.0883883461 : f32
    %219 = vector.broadcast %cst_67 : f32 to vector<8x8xf32>
    %220 = arith.mulf %218, %219 : vector<8x8xf32>
    %cst_68 = arith.constant dense<0xFF800000> : vector<8xf32>
    %221 = vector.multi_reduction <maximumf>, %220, %cst_68 [1] : vector<8x8xf32> to vector<8xf32>
    %222 = vector.shape_cast %221 : vector<8xf32> to vector<8x1xf32>
    %223 = vector.broadcast %222 : vector<8x1xf32> to vector<8x8xf32>
    %224 = arith.subf %220, %223 : vector<8x8xf32>
    %225 = math.exp %224 : vector<8x8xf32>
    %cst_69 = arith.constant dense<0.000000e+00> : vector<8xf32>
    %226 = vector.multi_reduction <add>, %225, %cst_69 [1] : vector<8x8xf32> to vector<8xf32>
    %227 = vector.shape_cast %226 : vector<8xf32> to vector<8x1xf32>
    %228 = tpu.reciprocal %227 {approx = true} : vector<8x1xf32> -> vector<8x1xf32>
    %229 = arith.mulf %227, %228 : vector<8x1xf32>
    %cst_70 = arith.constant 2.000000e+00 : f32
    %230 = vector.broadcast %cst_70 : f32 to vector<8x1xf32>
    %231 = arith.subf %230, %229 : vector<8x1xf32>
    %232 = arith.mulf %228, %231 : vector<8x1xf32>
    %233 = vector.broadcast %232 : vector<8x1xf32> to vector<8x8xf32>
    %234 = arith.mulf %225, %233 : vector<8x8xf32>
    %235 = arith.truncf %234 : vector<8x8xf32> to vector<8x8xbf16>
    %236 = vector.extract_strided_slice %2 {offsets = [0, 112], sizes = [8, 16], strides = [1, 1]} : vector<8x128xbf16> to vector<8x16xbf16>
    %c112 = arith.constant 112 : index
    %c0_71 = arith.constant 0 : index
    %237 = vector.load %arg4[%c112, %c0_71] : memref<128x128xbf16, #tpu.memory_space<vmem>>, vector<16x128xbf16>
    %cst_72 = arith.constant dense<0.000000e+00> : vector<8x128xf32>
    %238 = tpu.matmul %236, %237, %cst_72 {dimension_numbers = #tpu.dot_dimension_numbers<[1], [0], [0], [1], [0, 0, 1, 1], [], []>} : vector<8x16xbf16>, vector<16x128xbf16>, vector<8x128xf32> -> vector<8x128xf32>
    %239 = arith.truncf %238 : vector<8x128xf32> to vector<8x128xbf16>
    %cst_73 = arith.constant dense<0.000000e+00> : vector<8x128xf32>
    %240 = tpu.matmul %235, %239, %cst_73 {dimension_numbers = #tpu.dot_dimension_numbers<[1], [0], [0], [1], [0, 0, 1, 1], [], []>} : vector<8x8xbf16>, vector<8x128xbf16>, vector<8x128xf32> -> vector<8x128xf32>
    %241 = arith.addf %213, %240 : vector<8x128xf32>
    %c0_74 = arith.constant 0 : index
    %c0_75 = arith.constant 0 : index
    %242 = vector.load %arg5[%c0_74, %c0_75] : memref<1x128xf32, #tpu.memory_space<vmem>>, vector<1x128xf32>
    %243 = vector.broadcast %242 : vector<1x128xf32> to vector<8x128xf32>
    %244 = arith.addf %241, %243 : vector<8x128xf32>
    %245 = arith.addf %244, %1 : vector<8x128xf32>
    %c0_76 = arith.constant 0 : index
    %c0_77 = arith.constant 0 : index
    %246 = vector.load %arg6[%c0_76, %c0_77] : memref<1x128xf32, #tpu.memory_space<vmem>>, vector<1x128xf32>
    %c0_78 = arith.constant 0 : index
    %c0_79 = arith.constant 0 : index
    %247 = vector.load %arg7[%c0_78, %c0_79] : memref<1x128xf32, #tpu.memory_space<vmem>>, vector<1x128xf32>
    %cst_80 = arith.constant dense<0.000000e+00> : vector<8xf32>
    %248 = vector.multi_reduction <add>, %245, %cst_80 [1] : vector<8x128xf32> to vector<8xf32>
    %249 = vector.shape_cast %248 : vector<8xf32> to vector<8x1xf32>
    %cst_81 = arith.constant 7.812500e-03 : f32
    %250 = vector.broadcast %cst_81 : f32 to vector<8x1xf32>
    %251 = arith.mulf %249, %250 : vector<8x1xf32>
    %252 = vector.broadcast %251 : vector<8x1xf32> to vector<8x128xf32>
    %253 = arith.subf %245, %252 : vector<8x128xf32>
    %254 = arith.mulf %253, %253 : vector<8x128xf32>
    %cst_82 = arith.constant dense<0.000000e+00> : vector<8xf32>
    %255 = vector.multi_reduction <add>, %254, %cst_82 [1] : vector<8x128xf32> to vector<8xf32>
    %256 = vector.shape_cast %255 : vector<8xf32> to vector<8x1xf32>
    %cst_83 = arith.constant 7.812500e-03 : f32
    %257 = vector.broadcast %cst_83 : f32 to vector<8x1xf32>
    %258 = arith.mulf %256, %257 : vector<8x1xf32>
    %cst_84 = arith.constant 9.99999974E-6 : f32
    %259 = vector.broadcast %cst_84 : f32 to vector<8x1xf32>
    %260 = arith.addf %258, %259 : vector<8x1xf32>
    %261 = math.rsqrt %260 : vector<8x1xf32>
    %262 = vector.broadcast %261 : vector<8x1xf32> to vector<8x128xf32>
    %263 = arith.mulf %253, %262 : vector<8x128xf32>
    %264 = vector.broadcast %246 : vector<1x128xf32> to vector<8x128xf32>
    %265 = arith.mulf %263, %264 : vector<8x128xf32>
    %266 = vector.broadcast %247 : vector<1x128xf32> to vector<8x128xf32>
    %267 = arith.addf %265, %266 : vector<8x128xf32>
    %c0_85 = arith.constant 0 : index
    %c0_86 = arith.constant 0 : index
    %c0_87 = arith.constant 0 : index
    %268 = vector.load %arg8[%c0_85, %c0_86, %c0_87] : memref<1x8x128xf32, #tpu.memory_space<vmem>>, vector<1x8x128xf32>
    %269 = vector.shape_cast %268 : vector<1x8x128xf32> to vector<8x128xf32>
    %270 = vector.shape_cast %267 : vector<8x128xf32> to vector<1x8x128xf32>
    tpu.vector_store %arg8[%c0_85, %c0_86, %c0_87], %270 {strides = array<i32>} : memref<1x8x128xf32, #tpu.memory_space<vmem>>, vector<1x8x128xf32>,
    return
  }
  func.func @transform_0(%arg0: i32) -> (i32, i32, i32) {
    %c0_i32 = arith.constant 0 : i32
    %c0_i32_0 = arith.constant 0 : i32
    %c0_i32_1 = arith.constant 0 : i32
    return %arg0, %c0_i32, %c0_i32_0 : i32, i32, i32
  }
  func.func @transform_1(%arg0: i32) -> (i32, i32, i32) {
    %c0_i32 = arith.constant 0 : i32
    %c0_i32_0 = arith.constant 0 : i32
    %c0_i32_1 = arith.constant 0 : i32
    return %arg0, %c0_i32, %c0_i32_0 : i32, i32, i32
  }
  func.func @transform_2(%arg0: i32) -> (i32, i32) {
    %c0_i32 = arith.constant 0 : i32
    %c0_i32_0 = arith.constant 0 : i32
    %c0_i32_1 = arith.constant 0 : i32
    return %c0_i32, %c0_i32_0 : i32, i32
  }
  func.func @transform_3(%arg0: i32) -> (i32, i32) {
    %c0_i32 = arith.constant 0 : i32
    %c0_i32_0 = arith.constant 0 : i32
    %c0_i32_1 = arith.constant 0 : i32
    return %c0_i32, %c0_i32_0 : i32, i32
  }
  func.func @transform_4(%arg0: i32) -> (i32, i32) {
    %c0_i32 = arith.constant 0 : i32
    %c0_i32_0 = arith.constant 0 : i32
    %c0_i32_1 = arith.constant 0 : i32
    return %c0_i32, %c0_i32_0 : i32, i32
  }
  func.func @transform_5(%arg0: i32) -> (i32, i32) {
    %c0_i32 = arith.constant 0 : i32
    %c0_i32_0 = arith.constant 0 : i32
    %c0_i32_1 = arith.constant 0 : i32
    return %c0_i32, %c0_i32_0 : i32, i32
  }
  func.func @transform_6(%arg0: i32) -> (i32, i32) {
    %c0_i32 = arith.constant 0 : i32
    %c0_i32_0 = arith.constant 0 : i32
    %c0_i32_1 = arith.constant 0 : i32
    return %c0_i32, %c0_i32_0 : i32, i32
  }
  func.func @transform_7(%arg0: i32) -> (i32, i32, i32) {
    %c0_i32 = arith.constant 0 : i32
    %c0_i32_0 = arith.constant 0 : i32
    %c0_i32_1 = arith.constant 0 : i32
    return %arg0, %c0_i32, %c0_i32_0 : i32, i32, i32
  }
}

module attributes {stable_mosaic.version = 11 : i64} {
  func.func @kernel(%arg0: i32, %arg1: i32, %arg2: memref<8x128xf32, #tpu.memory_space<vmem>>, %arg3: memref<128x256xbf16, #tpu.memory_space<vmem>>, %arg4: memref<1x256xf32, #tpu.memory_space<vmem>>, %arg5: memref<8x256xf32, #tpu.memory_space<vmem>>) attributes {dimension_semantics = [#tpu.dimension_semantics<parallel>, #tpu.dimension_semantics<parallel>], iteration_bounds = array<i64: 2, 2>, scalar_prefetch = 0 : i64, scratch_operands = 0 : i64, tpu.core_type = #tpu.core_type<tc>, window_params = [{transform_indices = @transform_0, window_bounds = array<i64: 8, 128>}, {transform_indices = @transform_1, window_bounds = array<i64: 128, 256>}, {transform_indices = @transform_2, window_bounds = array<i64: 1, 256>}, {transform_indices = @transform_3, window_bounds = array<i64: 8, 256>}]} {
    %c0 = arith.constant 0 : index
    %c0_0 = arith.constant 0 : index
    %0 = vector.load %arg2[%c0, %c0_0] : memref<8x128xf32, #tpu.memory_space<vmem>>, vector<8x128xf32>
    %1 = arith.truncf %0 : vector<8x128xf32> to vector<8x128xbf16>
    %c0_1 = arith.constant 0 : index
    %c0_2 = arith.constant 0 : index
    %2 = vector.load %arg3[%c0_1, %c0_2] : memref<128x256xbf16, #tpu.memory_space<vmem>>, vector<128x256xbf16>
    %cst = arith.constant dense<0.000000e+00> : vector<8x256xf32>
    %3 = tpu.matmul %1, %2, %cst {dimension_numbers = #tpu.dot_dimension_numbers<[1], [0], [0], [1], [0, 0, 1, 1], [], []>} : vector<8x128xbf16>, vector<128x256xbf16>, vector<8x256xf32> -> vector<8x256xf32>
    %c0_3 = arith.constant 0 : index
    %c0_4 = arith.constant 0 : index
    %4 = vector.load %arg4[%c0_3, %c0_4] : memref<1x256xf32, #tpu.memory_space<vmem>>, vector<1x256xf32>
    %5 = vector.broadcast %4 : vector<1x256xf32> to vector<8x256xf32>
    %6 = arith.addf %3, %5 : vector<8x256xf32>
    %c0_5 = arith.constant 0 : index
    %c0_6 = arith.constant 0 : index
    %7 = vector.load %arg5[%c0_5, %c0_6] : memref<8x256xf32, #tpu.memory_space<vmem>>, vector<8x256xf32>
    tpu.vector_store %arg5[%c0_5, %c0_6], %6 {strides = array<i32>} : memref<8x256xf32, #tpu.memory_space<vmem>>, vector<8x256xf32>,
    return
  }
  func.func @transform_0(%arg0: i32, %arg1: i32) -> (i32, i32) {
    %c0_i32 = arith.constant 0 : i32
    %c0_i32_0 = arith.constant 0 : i32
    return %arg0, %c0_i32 : i32, i32
  }
  func.func @transform_1(%arg0: i32, %arg1: i32) -> (i32, i32) {
    %c0_i32 = arith.constant 0 : i32
    %c0_i32_0 = arith.constant 0 : i32
    return %c0_i32, %arg1 : i32, i32
  }
  func.func @transform_2(%arg0: i32, %arg1: i32) -> (i32, i32) {
    %c0_i32 = arith.constant 0 : i32
    %c0_i32_0 = arith.constant 0 : i32
    return %c0_i32, %arg1 : i32, i32
  }
  func.func @transform_3(%arg0: i32, %arg1: i32) -> (i32, i32) {
    %c0_i32 = arith.constant 0 : i32
    return %arg0, %arg1 : i32, i32
  }
}

module attributes {stable_mosaic.version = 11 : i64} {
  func.func @kernel(%arg0: i32, %arg1: memref<1x8x128xf32, #tpu.memory_space<vmem>>, %arg2: memref<128x256xbf16, #tpu.memory_space<vmem>>, %arg3: memref<128x128xbf16, #tpu.memory_space<vmem>>, %arg4: memref<1x128xf32, #tpu.memory_space<vmem>>, %arg5: memref<1x128xf32, #tpu.memory_space<vmem>>, %arg6: memref<1x128xf32, #tpu.memory_space<vmem>>, %arg7: memref<1x8x128xf32, #tpu.memory_space<vmem>>) attributes {dimension_semantics = [#tpu.dimension_semantics<parallel>], iteration_bounds = array<i64: 2>, scalar_prefetch = 0 : i64, scratch_operands = 0 : i64, tpu.core_type = #tpu.core_type<tc>, window_params = [{transform_indices = @transform_0, window_bounds = array<i64: 1, 8, 128>}, {pipeline_mode = #tpu.pipeline_mode<synchronous>, transform_indices = @transform_1, window_bounds = array<i64: 128, 256>}, {pipeline_mode = #tpu.pipeline_mode<synchronous>, transform_indices = @transform_2, window_bounds = array<i64: 128, 128>}, {pipeline_mode = #tpu.pipeline_mode<synchronous>, transform_indices = @transform_3, window_bounds = array<i64: 1, 128>}, {pipeline_mode = #tpu.pipeline_mode<synchronous>, transform_indices = @transform_4, window_bounds = array<i64: 1, 128>}, {pipeline_mode = #tpu.pipeline_mode<synchronous>, transform_indices = @transform_5, window_bounds = array<i64: 1, 128>}, {transform_indices = @transform_6, window_bounds = array<i64: 1, 8, 128>}]} {
    %c0 = arith.constant 0 : index
    %c0_0 = arith.constant 0 : index
    %c0_1 = arith.constant 0 : index
    %0 = vector.load %arg1[%c0, %c0_0, %c0_1] : memref<1x8x128xf32, #tpu.memory_space<vmem>>, vector<1x8x128xf32>
    %1 = vector.shape_cast %0 : vector<1x8x128xf32> to vector<8x128xf32>
    %2 = arith.truncf %1 : vector<8x128xf32> to vector<8x128xbf16>
    %c0_2 = arith.constant 0 : index
    %c0_3 = arith.constant 0 : index
    %3 = vector.load %arg2[%c0_2, %c0_3] : memref<128x256xbf16, #tpu.memory_space<vmem>>, vector<128x256xbf16>
    %cst = arith.constant dense<0.000000e+00> : vector<8x256xf32>
    %4 = tpu.matmul %2, %3, %cst {dimension_numbers = #tpu.dot_dimension_numbers<[1], [0], [0], [1], [0, 0, 1, 1], [], []>} : vector<8x128xbf16>, vector<128x256xbf16>, vector<8x256xf32> -> vector<8x256xf32>
    %5 = vector.extract_strided_slice %4 {offsets = [0, 0], sizes = [8, 128], strides = [1, 1]} : vector<8x256xf32> to vector<8x128xf32>
    %6 = vector.extract_strided_slice %4 {offsets = [0, 128], sizes = [8, 128], strides = [1, 1]} : vector<8x256xf32> to vector<8x128xf32>
    %7 = tpu.iota {dimensions = array<i32: 0>} : vector<8x8xi32>
    %8 = tpu.iota {dimensions = array<i32: 1>} : vector<8x8xi32>
    %9 = arith.cmpi sgt, %8, %7 : vector<8x8xi32>
    %cst_4 = arith.constant -9.99999944E+27 : f32
    %cst_5 = arith.constant 0.000000e+00 : f32
    %10 = vector.broadcast %cst_4 : f32 to vector<8x8xf32>
    %11 = vector.broadcast %cst_5 : f32 to vector<8x8xf32>
    %12 = arith.select %9, %10, %11 : vector<8x8xi1>, vector<8x8xf32>
    %13 = arith.truncf %5 : vector<8x128xf32> to vector<8x128xbf16>
    %14 = arith.truncf %6 : vector<8x128xf32> to vector<8x128xbf16>
    %cst_6 = arith.constant 0.000000e+00 : f32
    %15 = vector.broadcast %cst_6 : f32 to vector<8x128xf32>
    %16 = vector.extract_strided_slice %13 {offsets = [0, 0], sizes = [8, 16], strides = [1, 1]} : vector<8x128xbf16> to vector<8x16xbf16>
    %17 = vector.extract_strided_slice %14 {offsets = [0, 0], sizes = [8, 16], strides = [1, 1]} : vector<8x128xbf16> to vector<8x16xbf16>
    %cst_7 = arith.constant dense<0.000000e+00> : vector<8x8xf32>
    %18 = tpu.matmul %16, %17, %cst_7 {dimension_numbers = #tpu.dot_dimension_numbers<[1], [1], [0], [0], [0, 0, 1, 0], [], []>} : vector<8x16xbf16>, vector<8x16xbf16>, vector<8x8xf32> -> vector<8x8xf32>
    %19 = arith.addf %18, %12 : vector<8x8xf32>
    %cst_8 = arith.constant 0.0883883461 : f32
    %20 = vector.broadcast %cst_8 : f32 to vector<8x8xf32>
    %21 = arith.mulf %19, %20 : vector<8x8xf32>
    %cst_9 = arith.constant dense<0xFF800000> : vector<8xf32>
    %22 = vector.multi_reduction <maximumf>, %21, %cst_9 [1] : vector<8x8xf32> to vector<8xf32>
    %23 = vector.shape_cast %22 : vector<8xf32> to vector<8x1xf32>
    %24 = vector.broadcast %23 : vector<8x1xf32> to vector<8x8xf32>
    %25 = arith.subf %21, %24 : vector<8x8xf32>
    %26 = math.exp %25 : vector<8x8xf32>
    %cst_10 = arith.constant dense<0.000000e+00> : vector<8xf32>
    %27 = vector.multi_reduction <add>, %26, %cst_10 [1] : vector<8x8xf32> to vector<8xf32>
    %28 = vector.shape_cast %27 : vector<8xf32> to vector<8x1xf32>
    %29 = tpu.reciprocal %28 {approx = true} : vector<8x1xf32> -> vector<8x1xf32>
    %30 = arith.mulf %28, %29 : vector<8x1xf32>
    %cst_11 = arith.constant 2.000000e+00 : f32
    %31 = vector.broadcast %cst_11 : f32 to vector<8x1xf32>
    %32 = arith.subf %31, %30 : vector<8x1xf32>
    %33 = arith.mulf %29, %32 : vector<8x1xf32>
    %34 = vector.broadcast %33 : vector<8x1xf32> to vector<8x8xf32>
    %35 = arith.mulf %26, %34 : vector<8x8xf32>
    %36 = arith.truncf %35 : vector<8x8xf32> to vector<8x8xbf16>
    %37 = vector.extract_strided_slice %2 {offsets = [0, 0], sizes = [8, 16], strides = [1, 1]} : vector<8x128xbf16> to vector<8x16xbf16>
    %c0_12 = arith.constant 0 : index
    %c0_13 = arith.constant 0 : index
    %38 = vector.load %arg3[%c0_12, %c0_13] : memref<128x128xbf16, #tpu.memory_space<vmem>>, vector<16x128xbf16>
    %cst_14 = arith.constant dense<0.000000e+00> : vector<8x128xf32>
    %39 = tpu.matmul %37, %38, %cst_14 {dimension_numbers = #tpu.dot_dimension_numbers<[1], [0], [0], [1], [0, 0, 1, 1], [], []>} : vector<8x16xbf16>, vector<16x128xbf16>, vector<8x128xf32> -> vector<8x128xf32>
    %40 = arith.truncf %39 : vector<8x128xf32> to vector<8x128xbf16>
    %cst_15 = arith.constant dense<0.000000e+00> : vector<8x128xf32>
    %41 = tpu.matmul %36, %40, %cst_15 {dimension_numbers = #tpu.dot_dimension_numbers<[1], [0], [0], [1], [0, 0, 1, 1], [], []>} : vector<8x8xbf16>, vector<8x128xbf16>, vector<8x128xf32> -> vector<8x128xf32>
    %42 = arith.addf %15, %41 : vector<8x128xf32>
    %43 = vector.extract_strided_slice %13 {offsets = [0, 16], sizes = [8, 16], strides = [1, 1]} : vector<8x128xbf16> to vector<8x16xbf16>
    %44 = vector.extract_strided_slice %14 {offsets = [0, 16], sizes = [8, 16], strides = [1, 1]} : vector<8x128xbf16> to vector<8x16xbf16>
    %cst_16 = arith.constant dense<0.000000e+00> : vector<8x8xf32>
    %45 = tpu.matmul %43, %44, %cst_16 {dimension_numbers = #tpu.dot_dimension_numbers<[1], [1], [0], [0], [0, 0, 1, 0], [], []>} : vector<8x16xbf16>, vector<8x16xbf16>, vector<8x8xf32> -> vector<8x8xf32>
    %46 = arith.addf %45, %12 : vector<8x8xf32>
    %cst_17 = arith.constant 0.0883883461 : f32
    %47 = vector.broadcast %cst_17 : f32 to vector<8x8xf32>
    %48 = arith.mulf %46, %47 : vector<8x8xf32>
    %cst_18 = arith.constant dense<0xFF800000> : vector<8xf32>
    %49 = vector.multi_reduction <maximumf>, %48, %cst_18 [1] : vector<8x8xf32> to vector<8xf32>
    %50 = vector.shape_cast %49 : vector<8xf32> to vector<8x1xf32>
    %51 = vector.broadcast %50 : vector<8x1xf32> to vector<8x8xf32>
    %52 = arith.subf %48, %51 : vector<8x8xf32>
    %53 = math.exp %52 : vector<8x8xf32>
    %cst_19 = arith.constant dense<0.000000e+00> : vector<8xf32>
    %54 = vector.multi_reduction <add>, %53, %cst_19 [1] : vector<8x8xf32> to vector<8xf32>
    %55 = vector.shape_cast %54 : vector<8xf32> to vector<8x1xf32>
    %56 = tpu.reciprocal %55 {approx = true} : vector<8x1xf32> -> vector<8x1xf32>
    %57 = arith.mulf %55, %56 : vector<8x1xf32>
    %cst_20 = arith.constant 2.000000e+00 : f32
    %58 = vector.broadcast %cst_20 : f32 to vector<8x1xf32>
    %59 = arith.subf %58, %57 : vector<8x1xf32>
    %60 = arith.mulf %56, %59 : vector<8x1xf32>
    %61 = vector.broadcast %60 : vector<8x1xf32> to vector<8x8xf32>
    %62 = arith.mulf %53, %61 : vector<8x8xf32>
    %63 = arith.truncf %62 : vector<8x8xf32> to vector<8x8xbf16>
    %64 = vector.extract_strided_slice %2 {offsets = [0, 16], sizes = [8, 16], strides = [1, 1]} : vector<8x128xbf16> to vector<8x16xbf16>
    %c16 = arith.constant 16 : index
    %c0_21 = arith.constant 0 : index
    %65 = vector.load %arg3[%c16, %c0_21] : memref<128x128xbf16, #tpu.memory_space<vmem>>, vector<16x128xbf16>
    %cst_22 = arith.constant dense<0.000000e+00> : vector<8x128xf32>
    %66 = tpu.matmul %64, %65, %cst_22 {dimension_numbers = #tpu.dot_dimension_numbers<[1], [0], [0], [1], [0, 0, 1, 1], [], []>} : vector<8x16xbf16>, vector<16x128xbf16>, vector<8x128xf32> -> vector<8x128xf32>
    %67 = arith.truncf %66 : vector<8x128xf32> to vector<8x128xbf16>
    %cst_23 = arith.constant dense<0.000000e+00> : vector<8x128xf32>
    %68 = tpu.matmul %63, %67, %cst_23 {dimension_numbers = #tpu.dot_dimension_numbers<[1], [0], [0], [1], [0, 0, 1, 1], [], []>} : vector<8x8xbf16>, vector<8x128xbf16>, vector<8x128xf32> -> vector<8x128xf32>
    %69 = arith.addf %42, %68 : vector<8x128xf32>
    %70 = vector.extract_strided_slice %13 {offsets = [0, 32], sizes = [8, 16], strides = [1, 1]} : vector<8x128xbf16> to vector<8x16xbf16>
    %71 = vector.extract_strided_slice %14 {offsets = [0, 32], sizes = [8, 16], strides = [1, 1]} : vector<8x128xbf16> to vector<8x16xbf16>
    %cst_24 = arith.constant dense<0.000000e+00> : vector<8x8xf32>
    %72 = tpu.matmul %70, %71, %cst_24 {dimension_numbers = #tpu.dot_dimension_numbers<[1], [1], [0], [0], [0, 0, 1, 0], [], []>} : vector<8x16xbf16>, vector<8x16xbf16>, vector<8x8xf32> -> vector<8x8xf32>
    %73 = arith.addf %72, %12 : vector<8x8xf32>
    %cst_25 = arith.constant 0.0883883461 : f32
    %74 = vector.broadcast %cst_25 : f32 to vector<8x8xf32>
    %75 = arith.mulf %73, %74 : vector<8x8xf32>
    %cst_26 = arith.constant dense<0xFF800000> : vector<8xf32>
    %76 = vector.multi_reduction <maximumf>, %75, %cst_26 [1] : vector<8x8xf32> to vector<8xf32>
    %77 = vector.shape_cast %76 : vector<8xf32> to vector<8x1xf32>
    %78 = vector.broadcast %77 : vector<8x1xf32> to vector<8x8xf32>
    %79 = arith.subf %75, %78 : vector<8x8xf32>
    %80 = math.exp %79 : vector<8x8xf32>
    %cst_27 = arith.constant dense<0.000000e+00> : vector<8xf32>
    %81 = vector.multi_reduction <add>, %80, %cst_27 [1] : vector<8x8xf32> to vector<8xf32>
    %82 = vector.shape_cast %81 : vector<8xf32> to vector<8x1xf32>
    %83 = tpu.reciprocal %82 {approx = true} : vector<8x1xf32> -> vector<8x1xf32>
    %84 = arith.mulf %82, %83 : vector<8x1xf32>
    %cst_28 = arith.constant 2.000000e+00 : f32
    %85 = vector.broadcast %cst_28 : f32 to vector<8x1xf32>
    %86 = arith.subf %85, %84 : vector<8x1xf32>
    %87 = arith.mulf %83, %86 : vector<8x1xf32>
    %88 = vector.broadcast %87 : vector<8x1xf32> to vector<8x8xf32>
    %89 = arith.mulf %80, %88 : vector<8x8xf32>
    %90 = arith.truncf %89 : vector<8x8xf32> to vector<8x8xbf16>
    %91 = vector.extract_strided_slice %2 {offsets = [0, 32], sizes = [8, 16], strides = [1, 1]} : vector<8x128xbf16> to vector<8x16xbf16>
    %c32 = arith.constant 32 : index
    %c0_29 = arith.constant 0 : index
    %92 = vector.load %arg3[%c32, %c0_29] : memref<128x128xbf16, #tpu.memory_space<vmem>>, vector<16x128xbf16>
    %cst_30 = arith.constant dense<0.000000e+00> : vector<8x128xf32>
    %93 = tpu.matmul %91, %92, %cst_30 {dimension_numbers = #tpu.dot_dimension_numbers<[1], [0], [0], [1], [0, 0, 1, 1], [], []>} : vector<8x16xbf16>, vector<16x128xbf16>, vector<8x128xf32> -> vector<8x128xf32>
    %94 = arith.truncf %93 : vector<8x128xf32> to vector<8x128xbf16>
    %cst_31 = arith.constant dense<0.000000e+00> : vector<8x128xf32>
    %95 = tpu.matmul %90, %94, %cst_31 {dimension_numbers = #tpu.dot_dimension_numbers<[1], [0], [0], [1], [0, 0, 1, 1], [], []>} : vector<8x8xbf16>, vector<8x128xbf16>, vector<8x128xf32> -> vector<8x128xf32>
    %96 = arith.addf %69, %95 : vector<8x128xf32>
    %97 = vector.extract_strided_slice %13 {offsets = [0, 48], sizes = [8, 16], strides = [1, 1]} : vector<8x128xbf16> to vector<8x16xbf16>
    %98 = vector.extract_strided_slice %14 {offsets = [0, 48], sizes = [8, 16], strides = [1, 1]} : vector<8x128xbf16> to vector<8x16xbf16>
    %cst_32 = arith.constant dense<0.000000e+00> : vector<8x8xf32>
    %99 = tpu.matmul %97, %98, %cst_32 {dimension_numbers = #tpu.dot_dimension_numbers<[1], [1], [0], [0], [0, 0, 1, 0], [], []>} : vector<8x16xbf16>, vector<8x16xbf16>, vector<8x8xf32> -> vector<8x8xf32>
    %100 = arith.addf %99, %12 : vector<8x8xf32>
    %cst_33 = arith.constant 0.0883883461 : f32
    %101 = vector.broadcast %cst_33 : f32 to vector<8x8xf32>
    %102 = arith.mulf %100, %101 : vector<8x8xf32>
    %cst_34 = arith.constant dense<0xFF800000> : vector<8xf32>
    %103 = vector.multi_reduction <maximumf>, %102, %cst_34 [1] : vector<8x8xf32> to vector<8xf32>
    %104 = vector.shape_cast %103 : vector<8xf32> to vector<8x1xf32>
    %105 = vector.broadcast %104 : vector<8x1xf32> to vector<8x8xf32>
    %106 = arith.subf %102, %105 : vector<8x8xf32>
    %107 = math.exp %106 : vector<8x8xf32>
    %cst_35 = arith.constant dense<0.000000e+00> : vector<8xf32>
    %108 = vector.multi_reduction <add>, %107, %cst_35 [1] : vector<8x8xf32> to vector<8xf32>
    %109 = vector.shape_cast %108 : vector<8xf32> to vector<8x1xf32>
    %110 = tpu.reciprocal %109 {approx = true} : vector<8x1xf32> -> vector<8x1xf32>
    %111 = arith.mulf %109, %110 : vector<8x1xf32>
    %cst_36 = arith.constant 2.000000e+00 : f32
    %112 = vector.broadcast %cst_36 : f32 to vector<8x1xf32>
    %113 = arith.subf %112, %111 : vector<8x1xf32>
    %114 = arith.mulf %110, %113 : vector<8x1xf32>
    %115 = vector.broadcast %114 : vector<8x1xf32> to vector<8x8xf32>
    %116 = arith.mulf %107, %115 : vector<8x8xf32>
    %117 = arith.truncf %116 : vector<8x8xf32> to vector<8x8xbf16>
    %118 = vector.extract_strided_slice %2 {offsets = [0, 48], sizes = [8, 16], strides = [1, 1]} : vector<8x128xbf16> to vector<8x16xbf16>
    %c48 = arith.constant 48 : index
    %c0_37 = arith.constant 0 : index
    %119 = vector.load %arg3[%c48, %c0_37] : memref<128x128xbf16, #tpu.memory_space<vmem>>, vector<16x128xbf16>
    %cst_38 = arith.constant dense<0.000000e+00> : vector<8x128xf32>
    %120 = tpu.matmul %118, %119, %cst_38 {dimension_numbers = #tpu.dot_dimension_numbers<[1], [0], [0], [1], [0, 0, 1, 1], [], []>} : vector<8x16xbf16>, vector<16x128xbf16>, vector<8x128xf32> -> vector<8x128xf32>
    %121 = arith.truncf %120 : vector<8x128xf32> to vector<8x128xbf16>
    %cst_39 = arith.constant dense<0.000000e+00> : vector<8x128xf32>
    %122 = tpu.matmul %117, %121, %cst_39 {dimension_numbers = #tpu.dot_dimension_numbers<[1], [0], [0], [1], [0, 0, 1, 1], [], []>} : vector<8x8xbf16>, vector<8x128xbf16>, vector<8x128xf32> -> vector<8x128xf32>
    %123 = arith.addf %96, %122 : vector<8x128xf32>
    %124 = vector.extract_strided_slice %13 {offsets = [0, 64], sizes = [8, 16], strides = [1, 1]} : vector<8x128xbf16> to vector<8x16xbf16>
    %125 = vector.extract_strided_slice %14 {offsets = [0, 64], sizes = [8, 16], strides = [1, 1]} : vector<8x128xbf16> to vector<8x16xbf16>
    %cst_40 = arith.constant dense<0.000000e+00> : vector<8x8xf32>
    %126 = tpu.matmul %124, %125, %cst_40 {dimension_numbers = #tpu.dot_dimension_numbers<[1], [1], [0], [0], [0, 0, 1, 0], [], []>} : vector<8x16xbf16>, vector<8x16xbf16>, vector<8x8xf32> -> vector<8x8xf32>
    %127 = arith.addf %126, %12 : vector<8x8xf32>
    %cst_41 = arith.constant 0.0883883461 : f32
    %128 = vector.broadcast %cst_41 : f32 to vector<8x8xf32>
    %129 = arith.mulf %127, %128 : vector<8x8xf32>
    %cst_42 = arith.constant dense<0xFF800000> : vector<8xf32>
    %130 = vector.multi_reduction <maximumf>, %129, %cst_42 [1] : vector<8x8xf32> to vector<8xf32>
    %131 = vector.shape_cast %130 : vector<8xf32> to vector<8x1xf32>
    %132 = vector.broadcast %131 : vector<8x1xf32> to vector<8x8xf32>
    %133 = arith.subf %129, %132 : vector<8x8xf32>
    %134 = math.exp %133 : vector<8x8xf32>
    %cst_43 = arith.constant dense<0.000000e+00> : vector<8xf32>
    %135 = vector.multi_reduction <add>, %134, %cst_43 [1] : vector<8x8xf32> to vector<8xf32>
    %136 = vector.shape_cast %135 : vector<8xf32> to vector<8x1xf32>
    %137 = tpu.reciprocal %136 {approx = true} : vector<8x1xf32> -> vector<8x1xf32>
    %138 = arith.mulf %136, %137 : vector<8x1xf32>
    %cst_44 = arith.constant 2.000000e+00 : f32
    %139 = vector.broadcast %cst_44 : f32 to vector<8x1xf32>
    %140 = arith.subf %139, %138 : vector<8x1xf32>
    %141 = arith.mulf %137, %140 : vector<8x1xf32>
    %142 = vector.broadcast %141 : vector<8x1xf32> to vector<8x8xf32>
    %143 = arith.mulf %134, %142 : vector<8x8xf32>
    %144 = arith.truncf %143 : vector<8x8xf32> to vector<8x8xbf16>
    %145 = vector.extract_strided_slice %2 {offsets = [0, 64], sizes = [8, 16], strides = [1, 1]} : vector<8x128xbf16> to vector<8x16xbf16>
    %c64 = arith.constant 64 : index
    %c0_45 = arith.constant 0 : index
    %146 = vector.load %arg3[%c64, %c0_45] : memref<128x128xbf16, #tpu.memory_space<vmem>>, vector<16x128xbf16>
    %cst_46 = arith.constant dense<0.000000e+00> : vector<8x128xf32>
    %147 = tpu.matmul %145, %146, %cst_46 {dimension_numbers = #tpu.dot_dimension_numbers<[1], [0], [0], [1], [0, 0, 1, 1], [], []>} : vector<8x16xbf16>, vector<16x128xbf16>, vector<8x128xf32> -> vector<8x128xf32>
    %148 = arith.truncf %147 : vector<8x128xf32> to vector<8x128xbf16>
    %cst_47 = arith.constant dense<0.000000e+00> : vector<8x128xf32>
    %149 = tpu.matmul %144, %148, %cst_47 {dimension_numbers = #tpu.dot_dimension_numbers<[1], [0], [0], [1], [0, 0, 1, 1], [], []>} : vector<8x8xbf16>, vector<8x128xbf16>, vector<8x128xf32> -> vector<8x128xf32>
    %150 = arith.addf %123, %149 : vector<8x128xf32>
    %151 = vector.extract_strided_slice %13 {offsets = [0, 80], sizes = [8, 16], strides = [1, 1]} : vector<8x128xbf16> to vector<8x16xbf16>
    %152 = vector.extract_strided_slice %14 {offsets = [0, 80], sizes = [8, 16], strides = [1, 1]} : vector<8x128xbf16> to vector<8x16xbf16>
    %cst_48 = arith.constant dense<0.000000e+00> : vector<8x8xf32>
    %153 = tpu.matmul %151, %152, %cst_48 {dimension_numbers = #tpu.dot_dimension_numbers<[1], [1], [0], [0], [0, 0, 1, 0], [], []>} : vector<8x16xbf16>, vector<8x16xbf16>, vector<8x8xf32> -> vector<8x8xf32>
    %154 = arith.addf %153, %12 : vector<8x8xf32>
    %cst_49 = arith.constant 0.0883883461 : f32
    %155 = vector.broadcast %cst_49 : f32 to vector<8x8xf32>
    %156 = arith.mulf %154, %155 : vector<8x8xf32>
    %cst_50 = arith.constant dense<0xFF800000> : vector<8xf32>
    %157 = vector.multi_reduction <maximumf>, %156, %cst_50 [1] : vector<8x8xf32> to vector<8xf32>
    %158 = vector.shape_cast %157 : vector<8xf32> to vector<8x1xf32>
    %159 = vector.broadcast %158 : vector<8x1xf32> to vector<8x8xf32>
    %160 = arith.subf %156, %159 : vector<8x8xf32>
    %161 = math.exp %160 : vector<8x8xf32>
    %cst_51 = arith.constant dense<0.000000e+00> : vector<8xf32>
    %162 = vector.multi_reduction <add>, %161, %cst_51 [1] : vector<8x8xf32> to vector<8xf32>
    %163 = vector.shape_cast %162 : vector<8xf32> to vector<8x1xf32>
    %164 = tpu.reciprocal %163 {approx = true} : vector<8x1xf32> -> vector<8x1xf32>
    %165 = arith.mulf %163, %164 : vector<8x1xf32>
    %cst_52 = arith.constant 2.000000e+00 : f32
    %166 = vector.broadcast %cst_52 : f32 to vector<8x1xf32>
    %167 = arith.subf %166, %165 : vector<8x1xf32>
    %168 = arith.mulf %164, %167 : vector<8x1xf32>
    %169 = vector.broadcast %168 : vector<8x1xf32> to vector<8x8xf32>
    %170 = arith.mulf %161, %169 : vector<8x8xf32>
    %171 = arith.truncf %170 : vector<8x8xf32> to vector<8x8xbf16>
    %172 = vector.extract_strided_slice %2 {offsets = [0, 80], sizes = [8, 16], strides = [1, 1]} : vector<8x128xbf16> to vector<8x16xbf16>
    %c80 = arith.constant 80 : index
    %c0_53 = arith.constant 0 : index
    %173 = vector.load %arg3[%c80, %c0_53] : memref<128x128xbf16, #tpu.memory_space<vmem>>, vector<16x128xbf16>
    %cst_54 = arith.constant dense<0.000000e+00> : vector<8x128xf32>
    %174 = tpu.matmul %172, %173, %cst_54 {dimension_numbers = #tpu.dot_dimension_numbers<[1], [0], [0], [1], [0, 0, 1, 1], [], []>} : vector<8x16xbf16>, vector<16x128xbf16>, vector<8x128xf32> -> vector<8x128xf32>
    %175 = arith.truncf %174 : vector<8x128xf32> to vector<8x128xbf16>
    %cst_55 = arith.constant dense<0.000000e+00> : vector<8x128xf32>
    %176 = tpu.matmul %171, %175, %cst_55 {dimension_numbers = #tpu.dot_dimension_numbers<[1], [0], [0], [1], [0, 0, 1, 1], [], []>} : vector<8x8xbf16>, vector<8x128xbf16>, vector<8x128xf32> -> vector<8x128xf32>
    %177 = arith.addf %150, %176 : vector<8x128xf32>
    %178 = vector.extract_strided_slice %13 {offsets = [0, 96], sizes = [8, 16], strides = [1, 1]} : vector<8x128xbf16> to vector<8x16xbf16>
    %179 = vector.extract_strided_slice %14 {offsets = [0, 96], sizes = [8, 16], strides = [1, 1]} : vector<8x128xbf16> to vector<8x16xbf16>
    %cst_56 = arith.constant dense<0.000000e+00> : vector<8x8xf32>
    %180 = tpu.matmul %178, %179, %cst_56 {dimension_numbers = #tpu.dot_dimension_numbers<[1], [1], [0], [0], [0, 0, 1, 0], [], []>} : vector<8x16xbf16>, vector<8x16xbf16>, vector<8x8xf32> -> vector<8x8xf32>
    %181 = arith.addf %180, %12 : vector<8x8xf32>
    %cst_57 = arith.constant 0.0883883461 : f32
    %182 = vector.broadcast %cst_57 : f32 to vector<8x8xf32>
    %183 = arith.mulf %181, %182 : vector<8x8xf32>
    %cst_58 = arith.constant dense<0xFF800000> : vector<8xf32>
    %184 = vector.multi_reduction <maximumf>, %183, %cst_58 [1] : vector<8x8xf32> to vector<8xf32>
    %185 = vector.shape_cast %184 : vector<8xf32> to vector<8x1xf32>
    %186 = vector.broadcast %185 : vector<8x1xf32> to vector<8x8xf32>
    %187 = arith.subf %183, %186 : vector<8x8xf32>
    %188 = math.exp %187 : vector<8x8xf32>
    %cst_59 = arith.constant dense<0.000000e+00> : vector<8xf32>
    %189 = vector.multi_reduction <add>, %188, %cst_59 [1] : vector<8x8xf32> to vector<8xf32>
    %190 = vector.shape_cast %189 : vector<8xf32> to vector<8x1xf32>
    %191 = tpu.reciprocal %190 {approx = true} : vector<8x1xf32> -> vector<8x1xf32>
    %192 = arith.mulf %190, %191 : vector<8x1xf32>
    %cst_60 = arith.constant 2.000000e+00 : f32
    %193 = vector.broadcast %cst_60 : f32 to vector<8x1xf32>
    %194 = arith.subf %193, %192 : vector<8x1xf32>
    %195 = arith.mulf %191, %194 : vector<8x1xf32>
    %196 = vector.broadcast %195 : vector<8x1xf32> to vector<8x8xf32>
    %197 = arith.mulf %188, %196 : vector<8x8xf32>
    %198 = arith.truncf %197 : vector<8x8xf32> to vector<8x8xbf16>
    %199 = vector.extract_strided_slice %2 {offsets = [0, 96], sizes = [8, 16], strides = [1, 1]} : vector<8x128xbf16> to vector<8x16xbf16>
    %c96 = arith.constant 96 : index
    %c0_61 = arith.constant 0 : index
    %200 = vector.load %arg3[%c96, %c0_61] : memref<128x128xbf16, #tpu.memory_space<vmem>>, vector<16x128xbf16>
    %cst_62 = arith.constant dense<0.000000e+00> : vector<8x128xf32>
    %201 = tpu.matmul %199, %200, %cst_62 {dimension_numbers = #tpu.dot_dimension_numbers<[1], [0], [0], [1], [0, 0, 1, 1], [], []>} : vector<8x16xbf16>, vector<16x128xbf16>, vector<8x128xf32> -> vector<8x128xf32>
    %202 = arith.truncf %201 : vector<8x128xf32> to vector<8x128xbf16>
    %cst_63 = arith.constant dense<0.000000e+00> : vector<8x128xf32>
    %203 = tpu.matmul %198, %202, %cst_63 {dimension_numbers = #tpu.dot_dimension_numbers<[1], [0], [0], [1], [0, 0, 1, 1], [], []>} : vector<8x8xbf16>, vector<8x128xbf16>, vector<8x128xf32> -> vector<8x128xf32>
    %204 = arith.addf %177, %203 : vector<8x128xf32>
    %205 = vector.extract_strided_slice %13 {offsets = [0, 112], sizes = [8, 16], strides = [1, 1]} : vector<8x128xbf16> to vector<8x16xbf16>
    %206 = vector.extract_strided_slice %14 {offsets = [0, 112], sizes = [8, 16], strides = [1, 1]} : vector<8x128xbf16> to vector<8x16xbf16>
    %cst_64 = arith.constant dense<0.000000e+00> : vector<8x8xf32>
    %207 = tpu.matmul %205, %206, %cst_64 {dimension_numbers = #tpu.dot_dimension_numbers<[1], [1], [0], [0], [0, 0, 1, 0], [], []>} : vector<8x16xbf16>, vector<8x16xbf16>, vector<8x8xf32> -> vector<8x8xf32>
    %208 = arith.addf %207, %12 : vector<8x8xf32>
    %cst_65 = arith.constant 0.0883883461 : f32
    %209 = vector.broadcast %cst_65 : f32 to vector<8x8xf32>
    %210 = arith.mulf %208, %209 : vector<8x8xf32>
    %cst_66 = arith.constant dense<0xFF800000> : vector<8xf32>
    %211 = vector.multi_reduction <maximumf>, %210, %cst_66 [1] : vector<8x8xf32> to vector<8xf32>
    %212 = vector.shape_cast %211 : vector<8xf32> to vector<8x1xf32>
    %213 = vector.broadcast %212 : vector<8x1xf32> to vector<8x8xf32>
    %214 = arith.subf %210, %213 : vector<8x8xf32>
    %215 = math.exp %214 : vector<8x8xf32>
    %cst_67 = arith.constant dense<0.000000e+00> : vector<8xf32>
    %216 = vector.multi_reduction <add>, %215, %cst_67 [1] : vector<8x8xf32> to vector<8xf32>
    %217 = vector.shape_cast %216 : vector<8xf32> to vector<8x1xf32>
    %218 = tpu.reciprocal %217 {approx = true} : vector<8x1xf32> -> vector<8x1xf32>
    %219 = arith.mulf %217, %218 : vector<8x1xf32>
    %cst_68 = arith.constant 2.000000e+00 : f32
    %220 = vector.broadcast %cst_68 : f32 to vector<8x1xf32>
    %221 = arith.subf %220, %219 : vector<8x1xf32>
    %222 = arith.mulf %218, %221 : vector<8x1xf32>
    %223 = vector.broadcast %222 : vector<8x1xf32> to vector<8x8xf32>
    %224 = arith.mulf %215, %223 : vector<8x8xf32>
    %225 = arith.truncf %224 : vector<8x8xf32> to vector<8x8xbf16>
    %226 = vector.extract_strided_slice %2 {offsets = [0, 112], sizes = [8, 16], strides = [1, 1]} : vector<8x128xbf16> to vector<8x16xbf16>
    %c112 = arith.constant 112 : index
    %c0_69 = arith.constant 0 : index
    %227 = vector.load %arg3[%c112, %c0_69] : memref<128x128xbf16, #tpu.memory_space<vmem>>, vector<16x128xbf16>
    %cst_70 = arith.constant dense<0.000000e+00> : vector<8x128xf32>
    %228 = tpu.matmul %226, %227, %cst_70 {dimension_numbers = #tpu.dot_dimension_numbers<[1], [0], [0], [1], [0, 0, 1, 1], [], []>} : vector<8x16xbf16>, vector<16x128xbf16>, vector<8x128xf32> -> vector<8x128xf32>
    %229 = arith.truncf %228 : vector<8x128xf32> to vector<8x128xbf16>
    %cst_71 = arith.constant dense<0.000000e+00> : vector<8x128xf32>
    %230 = tpu.matmul %225, %229, %cst_71 {dimension_numbers = #tpu.dot_dimension_numbers<[1], [0], [0], [1], [0, 0, 1, 1], [], []>} : vector<8x8xbf16>, vector<8x128xbf16>, vector<8x128xf32> -> vector<8x128xf32>
    %231 = arith.addf %204, %230 : vector<8x128xf32>
    %c0_72 = arith.constant 0 : index
    %c0_73 = arith.constant 0 : index
    %232 = vector.load %arg4[%c0_72, %c0_73] : memref<1x128xf32, #tpu.memory_space<vmem>>, vector<1x128xf32>
    %233 = vector.broadcast %232 : vector<1x128xf32> to vector<8x128xf32>
    %234 = arith.addf %231, %233 : vector<8x128xf32>
    %235 = arith.addf %234, %1 : vector<8x128xf32>
    %c0_74 = arith.constant 0 : index
    %c0_75 = arith.constant 0 : index
    %236 = vector.load %arg5[%c0_74, %c0_75] : memref<1x128xf32, #tpu.memory_space<vmem>>, vector<1x128xf32>
    %c0_76 = arith.constant 0 : index
    %c0_77 = arith.constant 0 : index
    %237 = vector.load %arg6[%c0_76, %c0_77] : memref<1x128xf32, #tpu.memory_space<vmem>>, vector<1x128xf32>
    %cst_78 = arith.constant dense<0.000000e+00> : vector<8xf32>
    %238 = vector.multi_reduction <add>, %235, %cst_78 [1] : vector<8x128xf32> to vector<8xf32>
    %239 = vector.shape_cast %238 : vector<8xf32> to vector<8x1xf32>
    %cst_79 = arith.constant 7.812500e-03 : f32
    %240 = vector.broadcast %cst_79 : f32 to vector<8x1xf32>
    %241 = arith.mulf %239, %240 : vector<8x1xf32>
    %242 = vector.broadcast %241 : vector<8x1xf32> to vector<8x128xf32>
    %243 = arith.subf %235, %242 : vector<8x128xf32>
    %244 = arith.mulf %243, %243 : vector<8x128xf32>
    %cst_80 = arith.constant dense<0.000000e+00> : vector<8xf32>
    %245 = vector.multi_reduction <add>, %244, %cst_80 [1] : vector<8x128xf32> to vector<8xf32>
    %246 = vector.shape_cast %245 : vector<8xf32> to vector<8x1xf32>
    %cst_81 = arith.constant 7.812500e-03 : f32
    %247 = vector.broadcast %cst_81 : f32 to vector<8x1xf32>
    %248 = arith.mulf %246, %247 : vector<8x1xf32>
    %cst_82 = arith.constant 9.99999974E-6 : f32
    %249 = vector.broadcast %cst_82 : f32 to vector<8x1xf32>
    %250 = arith.addf %248, %249 : vector<8x1xf32>
    %251 = math.rsqrt %250 : vector<8x1xf32>
    %252 = vector.broadcast %251 : vector<8x1xf32> to vector<8x128xf32>
    %253 = arith.mulf %243, %252 : vector<8x128xf32>
    %254 = vector.broadcast %236 : vector<1x128xf32> to vector<8x128xf32>
    %255 = arith.mulf %253, %254 : vector<8x128xf32>
    %256 = vector.broadcast %237 : vector<1x128xf32> to vector<8x128xf32>
    %257 = arith.addf %255, %256 : vector<8x128xf32>
    %c0_83 = arith.constant 0 : index
    %c0_84 = arith.constant 0 : index
    %c0_85 = arith.constant 0 : index
    %258 = vector.load %arg7[%c0_83, %c0_84, %c0_85] : memref<1x8x128xf32, #tpu.memory_space<vmem>>, vector<1x8x128xf32>
    %259 = vector.shape_cast %258 : vector<1x8x128xf32> to vector<8x128xf32>
    %260 = vector.shape_cast %257 : vector<8x128xf32> to vector<1x8x128xf32>
    tpu.vector_store %arg7[%c0_83, %c0_84, %c0_85], %260 {strides = array<i32>} : memref<1x8x128xf32, #tpu.memory_space<vmem>>, vector<1x8x128xf32>,
    return
  }
  func.func @transform_0(%arg0: i32) -> (i32, i32, i32) {
    %c0_i32 = arith.constant 0 : i32
    %c0_i32_0 = arith.constant 0 : i32
    %c0_i32_1 = arith.constant 0 : i32
    return %arg0, %c0_i32, %c0_i32_0 : i32, i32, i32
  }
  func.func @transform_1(%arg0: i32) -> (i32, i32) {
    %c0_i32 = arith.constant 0 : i32
    %c0_i32_0 = arith.constant 0 : i32
    %c0_i32_1 = arith.constant 0 : i32
    return %c0_i32, %c0_i32_0 : i32, i32
  }
  func.func @transform_2(%arg0: i32) -> (i32, i32) {
    %c0_i32 = arith.constant 0 : i32
    %c0_i32_0 = arith.constant 0 : i32
    %c0_i32_1 = arith.constant 0 : i32
    return %c0_i32, %c0_i32_0 : i32, i32
  }
  func.func @transform_3(%arg0: i32) -> (i32, i32) {
    %c0_i32 = arith.constant 0 : i32
    %c0_i32_0 = arith.constant 0 : i32
    %c0_i32_1 = arith.constant 0 : i32
    return %c0_i32, %c0_i32_0 : i32, i32
  }
  func.func @transform_4(%arg0: i32) -> (i32, i32) {
    %c0_i32 = arith.constant 0 : i32
    %c0_i32_0 = arith.constant 0 : i32
    %c0_i32_1 = arith.constant 0 : i32
    return %c0_i32, %c0_i32_0 : i32, i32
  }
  func.func @transform_5(%arg0: i32) -> (i32, i32) {
    %c0_i32 = arith.constant 0 : i32
    %c0_i32_0 = arith.constant 0 : i32
    %c0_i32_1 = arith.constant 0 : i32
    return %c0_i32, %c0_i32_0 : i32, i32
  }
  func.func @transform_6(%arg0: i32) -> (i32, i32, i32) {
    %c0_i32 = arith.constant 0 : i32
    %c0_i32_0 = arith.constant 0 : i32
    %c0_i32_1 = arith.constant 0 : i32
    return %arg0, %c0_i32, %c0_i32_0 : i32, i32, i32
  }
}

module attributes {stable_mosaic.version = 11 : i64} {
  func.func @kernel(%arg0: i32, %arg1: memref<1x8x128xf32, #tpu.memory_space<vmem>>, %arg2: memref<1x8x128xf32, #tpu.memory_space<vmem>>, %arg3: memref<1x1x8xi32, #tpu.memory_space<vmem>>, %arg4: memref<128x128xbf16, #tpu.memory_space<vmem>>, %arg5: memref<128x128xbf16, #tpu.memory_space<vmem>>, %arg6: memref<128x128xbf16, #tpu.memory_space<vmem>>, %arg7: memref<1x128xf32, #tpu.memory_space<vmem>>, %arg8: memref<1x128xf32, #tpu.memory_space<vmem>>, %arg9: memref<1x128xf32, #tpu.memory_space<vmem>>, %arg10: memref<1x8x128xf32, #tpu.memory_space<vmem>>) attributes {dimension_semantics = [#tpu.dimension_semantics<parallel>], iteration_bounds = array<i64: 2>, scalar_prefetch = 0 : i64, scratch_operands = 0 : i64, tpu.core_type = #tpu.core_type<tc>, window_params = [{transform_indices = @transform_0, window_bounds = array<i64: 1, 8, 128>}, {transform_indices = @transform_1, window_bounds = array<i64: 1, 8, 128>}, {transform_indices = @transform_2, window_bounds = array<i64: 1, 1, 8>}, {pipeline_mode = #tpu.pipeline_mode<synchronous>, transform_indices = @transform_3, window_bounds = array<i64: 128, 128>}, {pipeline_mode = #tpu.pipeline_mode<synchronous>, transform_indices = @transform_4, window_bounds = array<i64: 128, 128>}, {pipeline_mode = #tpu.pipeline_mode<synchronous>, transform_indices = @transform_5, window_bounds = array<i64: 128, 128>}, {pipeline_mode = #tpu.pipeline_mode<synchronous>, transform_indices = @transform_6, window_bounds = array<i64: 1, 128>}, {pipeline_mode = #tpu.pipeline_mode<synchronous>, transform_indices = @transform_7, window_bounds = array<i64: 1, 128>}, {pipeline_mode = #tpu.pipeline_mode<synchronous>, transform_indices = @transform_8, window_bounds = array<i64: 1, 128>}, {transform_indices = @transform_9, window_bounds = array<i64: 1, 8, 128>}]} {
    %c0 = arith.constant 0 : index
    %c0_0 = arith.constant 0 : index
    %c0_1 = arith.constant 0 : index
    %0 = vector.load %arg1[%c0, %c0_0, %c0_1] : memref<1x8x128xf32, #tpu.memory_space<vmem>>, vector<1x8x128xf32>
    %1 = vector.shape_cast %0 : vector<1x8x128xf32> to vector<8x128xf32>
    %2 = arith.truncf %1 : vector<8x128xf32> to vector<8x128xbf16>
    %c0_2 = arith.constant 0 : index
    %c0_3 = arith.constant 0 : index
    %c0_4 = arith.constant 0 : index
    %3 = vector.load %arg2[%c0_2, %c0_3, %c0_4] : memref<1x8x128xf32, #tpu.memory_space<vmem>>, vector<1x8x128xf32>
    %4 = vector.shape_cast %3 : vector<1x8x128xf32> to vector<8x128xf32>
    %5 = arith.truncf %4 : vector<8x128xf32> to vector<8x128xbf16>
    %c0_5 = arith.constant 0 : index
    %c0_6 = arith.constant 0 : index
    %6 = vector.load %arg4[%c0_5, %c0_6] : memref<128x128xbf16, #tpu.memory_space<vmem>>, vector<128x128xbf16>
    %cst = arith.constant dense<0.000000e+00> : vector<8x128xf32>
    %7 = tpu.matmul %2, %6, %cst {dimension_numbers = #tpu.dot_dimension_numbers<[1], [0], [0], [1], [0, 0, 1, 1], [], []>} : vector<8x128xbf16>, vector<128x128xbf16>, vector<8x128xf32> -> vector<8x128xf32>
    %c0_7 = arith.constant 0 : index
    %c0_8 = arith.constant 0 : index
    %8 = vector.load %arg5[%c0_7, %c0_8] : memref<128x128xbf16, #tpu.memory_space<vmem>>, vector<128x128xbf16>
    %cst_9 = arith.constant dense<0.000000e+00> : vector<8x128xf32>
    %9 = tpu.matmul %5, %8, %cst_9 {dimension_numbers = #tpu.dot_dimension_numbers<[1], [0], [0], [1], [0, 0, 1, 1], [], []>} : vector<8x128xbf16>, vector<128x128xbf16>, vector<8x128xf32> -> vector<8x128xf32>
    %c0_10 = arith.constant 0 : index
    %c0_11 = arith.constant 0 : index
    %c0_12 = arith.constant 0 : index
    %10 = vector.load %arg3[%c0_10, %c0_11, %c0_12] : memref<1x1x8xi32, #tpu.memory_space<vmem>>, vector<1x1x8xi32>
    %11 = vector.shape_cast %10 : vector<1x1x8xi32> to vector<1x8xi32>
    %c0_i32 = arith.constant 0 : i32
    %12 = vector.broadcast %c0_i32 : i32 to vector<1x8xi32>
    %13 = arith.cmpi eq, %11, %12 : vector<1x8xi32>
    %14 = arith.extui %13 : vector<1x8xi1> to vector<1x8xi32>
    %15 = arith.sitofp %14 : vector<1x8xi32> to vector<1x8xf32>
    %cst_13 = arith.constant -9.99999944E+27 : f32
    %16 = vector.broadcast %cst_13 : f32 to vector<1x8xf32>
    %17 = arith.mulf %15, %16 : vector<1x8xf32>
    %18 = arith.truncf %7 : vector<8x128xf32> to vector<8x128xbf16>
    %19 = arith.truncf %9 : vector<8x128xf32> to vector<8x128xbf16>
    %cst_14 = arith.constant 0.000000e+00 : f32
    %20 = vector.broadcast %cst_14 : f32 to vector<8x128xf32>
    %21 = vector.extract_strided_slice %18 {offsets = [0, 0], sizes = [8, 16], strides = [1, 1]} : vector<8x128xbf16> to vector<8x16xbf16>
    %22 = vector.extract_strided_slice %19 {offsets = [0, 0], sizes = [8, 16], strides = [1, 1]} : vector<8x128xbf16> to vector<8x16xbf16>
    %cst_15 = arith.constant dense<0.000000e+00> : vector<8x8xf32>
    %23 = tpu.matmul %21, %22, %cst_15 {dimension_numbers = #tpu.dot_dimension_numbers<[1], [1], [0], [0], [0, 0, 1, 0], [], []>} : vector<8x16xbf16>, vector<8x16xbf16>, vector<8x8xf32> -> vector<8x8xf32>
    %24 = vector.broadcast %17 : vector<1x8xf32> to vector<8x8xf32>
    %25 = arith.addf %23, %24 : vector<8x8xf32>
    %cst_16 = arith.constant 0.0883883461 : f32
    %26 = vector.broadcast %cst_16 : f32 to vector<8x8xf32>
    %27 = arith.mulf %25, %26 : vector<8x8xf32>
    %cst_17 = arith.constant dense<0xFF800000> : vector<8xf32>
    %28 = vector.multi_reduction <maximumf>, %27, %cst_17 [1] : vector<8x8xf32> to vector<8xf32>
    %29 = vector.shape_cast %28 : vector<8xf32> to vector<8x1xf32>
    %30 = vector.broadcast %29 : vector<8x1xf32> to vector<8x8xf32>
    %31 = arith.subf %27, %30 : vector<8x8xf32>
    %32 = math.exp %31 : vector<8x8xf32>
    %cst_18 = arith.constant dense<0.000000e+00> : vector<8xf32>
    %33 = vector.multi_reduction <add>, %32, %cst_18 [1] : vector<8x8xf32> to vector<8xf32>
    %34 = vector.shape_cast %33 : vector<8xf32> to vector<8x1xf32>
    %35 = tpu.reciprocal %34 {approx = true} : vector<8x1xf32> -> vector<8x1xf32>
    %36 = arith.mulf %34, %35 : vector<8x1xf32>
    %cst_19 = arith.constant 2.000000e+00 : f32
    %37 = vector.broadcast %cst_19 : f32 to vector<8x1xf32>
    %38 = arith.subf %37, %36 : vector<8x1xf32>
    %39 = arith.mulf %35, %38 : vector<8x1xf32>
    %40 = vector.broadcast %39 : vector<8x1xf32> to vector<8x8xf32>
    %41 = arith.mulf %32, %40 : vector<8x8xf32>
    %42 = arith.truncf %41 : vector<8x8xf32> to vector<8x8xbf16>
    %43 = vector.extract_strided_slice %5 {offsets = [0, 0], sizes = [8, 16], strides = [1, 1]} : vector<8x128xbf16> to vector<8x16xbf16>
    %c0_20 = arith.constant 0 : index
    %c0_21 = arith.constant 0 : index
    %44 = vector.load %arg6[%c0_20, %c0_21] : memref<128x128xbf16, #tpu.memory_space<vmem>>, vector<16x128xbf16>
    %cst_22 = arith.constant dense<0.000000e+00> : vector<8x128xf32>
    %45 = tpu.matmul %43, %44, %cst_22 {dimension_numbers = #tpu.dot_dimension_numbers<[1], [0], [0], [1], [0, 0, 1, 1], [], []>} : vector<8x16xbf16>, vector<16x128xbf16>, vector<8x128xf32> -> vector<8x128xf32>
    %46 = arith.truncf %45 : vector<8x128xf32> to vector<8x128xbf16>
    %cst_23 = arith.constant dense<0.000000e+00> : vector<8x128xf32>
    %47 = tpu.matmul %42, %46, %cst_23 {dimension_numbers = #tpu.dot_dimension_numbers<[1], [0], [0], [1], [0, 0, 1, 1], [], []>} : vector<8x8xbf16>, vector<8x128xbf16>, vector<8x128xf32> -> vector<8x128xf32>
    %48 = arith.addf %20, %47 : vector<8x128xf32>
    %49 = vector.extract_strided_slice %18 {offsets = [0, 16], sizes = [8, 16], strides = [1, 1]} : vector<8x128xbf16> to vector<8x16xbf16>
    %50 = vector.extract_strided_slice %19 {offsets = [0, 16], sizes = [8, 16], strides = [1, 1]} : vector<8x128xbf16> to vector<8x16xbf16>
    %cst_24 = arith.constant dense<0.000000e+00> : vector<8x8xf32>
    %51 = tpu.matmul %49, %50, %cst_24 {dimension_numbers = #tpu.dot_dimension_numbers<[1], [1], [0], [0], [0, 0, 1, 0], [], []>} : vector<8x16xbf16>, vector<8x16xbf16>, vector<8x8xf32> -> vector<8x8xf32>
    %52 = vector.broadcast %17 : vector<1x8xf32> to vector<8x8xf32>
    %53 = arith.addf %51, %52 : vector<8x8xf32>
    %cst_25 = arith.constant 0.0883883461 : f32
    %54 = vector.broadcast %cst_25 : f32 to vector<8x8xf32>
    %55 = arith.mulf %53, %54 : vector<8x8xf32>
    %cst_26 = arith.constant dense<0xFF800000> : vector<8xf32>
    %56 = vector.multi_reduction <maximumf>, %55, %cst_26 [1] : vector<8x8xf32> to vector<8xf32>
    %57 = vector.shape_cast %56 : vector<8xf32> to vector<8x1xf32>
    %58 = vector.broadcast %57 : vector<8x1xf32> to vector<8x8xf32>
    %59 = arith.subf %55, %58 : vector<8x8xf32>
    %60 = math.exp %59 : vector<8x8xf32>
    %cst_27 = arith.constant dense<0.000000e+00> : vector<8xf32>
    %61 = vector.multi_reduction <add>, %60, %cst_27 [1] : vector<8x8xf32> to vector<8xf32>
    %62 = vector.shape_cast %61 : vector<8xf32> to vector<8x1xf32>
    %63 = tpu.reciprocal %62 {approx = true} : vector<8x1xf32> -> vector<8x1xf32>
    %64 = arith.mulf %62, %63 : vector<8x1xf32>
    %cst_28 = arith.constant 2.000000e+00 : f32
    %65 = vector.broadcast %cst_28 : f32 to vector<8x1xf32>
    %66 = arith.subf %65, %64 : vector<8x1xf32>
    %67 = arith.mulf %63, %66 : vector<8x1xf32>
    %68 = vector.broadcast %67 : vector<8x1xf32> to vector<8x8xf32>
    %69 = arith.mulf %60, %68 : vector<8x8xf32>
    %70 = arith.truncf %69 : vector<8x8xf32> to vector<8x8xbf16>
    %71 = vector.extract_strided_slice %5 {offsets = [0, 16], sizes = [8, 16], strides = [1, 1]} : vector<8x128xbf16> to vector<8x16xbf16>
    %c16 = arith.constant 16 : index
    %c0_29 = arith.constant 0 : index
    %72 = vector.load %arg6[%c16, %c0_29] : memref<128x128xbf16, #tpu.memory_space<vmem>>, vector<16x128xbf16>
    %cst_30 = arith.constant dense<0.000000e+00> : vector<8x128xf32>
    %73 = tpu.matmul %71, %72, %cst_30 {dimension_numbers = #tpu.dot_dimension_numbers<[1], [0], [0], [1], [0, 0, 1, 1], [], []>} : vector<8x16xbf16>, vector<16x128xbf16>, vector<8x128xf32> -> vector<8x128xf32>
    %74 = arith.truncf %73 : vector<8x128xf32> to vector<8x128xbf16>
    %cst_31 = arith.constant dense<0.000000e+00> : vector<8x128xf32>
    %75 = tpu.matmul %70, %74, %cst_31 {dimension_numbers = #tpu.dot_dimension_numbers<[1], [0], [0], [1], [0, 0, 1, 1], [], []>} : vector<8x8xbf16>, vector<8x128xbf16>, vector<8x128xf32> -> vector<8x128xf32>
    %76 = arith.addf %48, %75 : vector<8x128xf32>
    %77 = vector.extract_strided_slice %18 {offsets = [0, 32], sizes = [8, 16], strides = [1, 1]} : vector<8x128xbf16> to vector<8x16xbf16>
    %78 = vector.extract_strided_slice %19 {offsets = [0, 32], sizes = [8, 16], strides = [1, 1]} : vector<8x128xbf16> to vector<8x16xbf16>
    %cst_32 = arith.constant dense<0.000000e+00> : vector<8x8xf32>
    %79 = tpu.matmul %77, %78, %cst_32 {dimension_numbers = #tpu.dot_dimension_numbers<[1], [1], [0], [0], [0, 0, 1, 0], [], []>} : vector<8x16xbf16>, vector<8x16xbf16>, vector<8x8xf32> -> vector<8x8xf32>
    %80 = vector.broadcast %17 : vector<1x8xf32> to vector<8x8xf32>
    %81 = arith.addf %79, %80 : vector<8x8xf32>
    %cst_33 = arith.constant 0.0883883461 : f32
    %82 = vector.broadcast %cst_33 : f32 to vector<8x8xf32>
    %83 = arith.mulf %81, %82 : vector<8x8xf32>
    %cst_34 = arith.constant dense<0xFF800000> : vector<8xf32>
    %84 = vector.multi_reduction <maximumf>, %83, %cst_34 [1] : vector<8x8xf32> to vector<8xf32>
    %85 = vector.shape_cast %84 : vector<8xf32> to vector<8x1xf32>
    %86 = vector.broadcast %85 : vector<8x1xf32> to vector<8x8xf32>
    %87 = arith.subf %83, %86 : vector<8x8xf32>
    %88 = math.exp %87 : vector<8x8xf32>
    %cst_35 = arith.constant dense<0.000000e+00> : vector<8xf32>
    %89 = vector.multi_reduction <add>, %88, %cst_35 [1] : vector<8x8xf32> to vector<8xf32>
    %90 = vector.shape_cast %89 : vector<8xf32> to vector<8x1xf32>
    %91 = tpu.reciprocal %90 {approx = true} : vector<8x1xf32> -> vector<8x1xf32>
    %92 = arith.mulf %90, %91 : vector<8x1xf32>
    %cst_36 = arith.constant 2.000000e+00 : f32
    %93 = vector.broadcast %cst_36 : f32 to vector<8x1xf32>
    %94 = arith.subf %93, %92 : vector<8x1xf32>
    %95 = arith.mulf %91, %94 : vector<8x1xf32>
    %96 = vector.broadcast %95 : vector<8x1xf32> to vector<8x8xf32>
    %97 = arith.mulf %88, %96 : vector<8x8xf32>
    %98 = arith.truncf %97 : vector<8x8xf32> to vector<8x8xbf16>
    %99 = vector.extract_strided_slice %5 {offsets = [0, 32], sizes = [8, 16], strides = [1, 1]} : vector<8x128xbf16> to vector<8x16xbf16>
    %c32 = arith.constant 32 : index
    %c0_37 = arith.constant 0 : index
    %100 = vector.load %arg6[%c32, %c0_37] : memref<128x128xbf16, #tpu.memory_space<vmem>>, vector<16x128xbf16>
    %cst_38 = arith.constant dense<0.000000e+00> : vector<8x128xf32>
    %101 = tpu.matmul %99, %100, %cst_38 {dimension_numbers = #tpu.dot_dimension_numbers<[1], [0], [0], [1], [0, 0, 1, 1], [], []>} : vector<8x16xbf16>, vector<16x128xbf16>, vector<8x128xf32> -> vector<8x128xf32>
    %102 = arith.truncf %101 : vector<8x128xf32> to vector<8x128xbf16>
    %cst_39 = arith.constant dense<0.000000e+00> : vector<8x128xf32>
    %103 = tpu.matmul %98, %102, %cst_39 {dimension_numbers = #tpu.dot_dimension_numbers<[1], [0], [0], [1], [0, 0, 1, 1], [], []>} : vector<8x8xbf16>, vector<8x128xbf16>, vector<8x128xf32> -> vector<8x128xf32>
    %104 = arith.addf %76, %103 : vector<8x128xf32>
    %105 = vector.extract_strided_slice %18 {offsets = [0, 48], sizes = [8, 16], strides = [1, 1]} : vector<8x128xbf16> to vector<8x16xbf16>
    %106 = vector.extract_strided_slice %19 {offsets = [0, 48], sizes = [8, 16], strides = [1, 1]} : vector<8x128xbf16> to vector<8x16xbf16>
    %cst_40 = arith.constant dense<0.000000e+00> : vector<8x8xf32>
    %107 = tpu.matmul %105, %106, %cst_40 {dimension_numbers = #tpu.dot_dimension_numbers<[1], [1], [0], [0], [0, 0, 1, 0], [], []>} : vector<8x16xbf16>, vector<8x16xbf16>, vector<8x8xf32> -> vector<8x8xf32>
    %108 = vector.broadcast %17 : vector<1x8xf32> to vector<8x8xf32>
    %109 = arith.addf %107, %108 : vector<8x8xf32>
    %cst_41 = arith.constant 0.0883883461 : f32
    %110 = vector.broadcast %cst_41 : f32 to vector<8x8xf32>
    %111 = arith.mulf %109, %110 : vector<8x8xf32>
    %cst_42 = arith.constant dense<0xFF800000> : vector<8xf32>
    %112 = vector.multi_reduction <maximumf>, %111, %cst_42 [1] : vector<8x8xf32> to vector<8xf32>
    %113 = vector.shape_cast %112 : vector<8xf32> to vector<8x1xf32>
    %114 = vector.broadcast %113 : vector<8x1xf32> to vector<8x8xf32>
    %115 = arith.subf %111, %114 : vector<8x8xf32>
    %116 = math.exp %115 : vector<8x8xf32>
    %cst_43 = arith.constant dense<0.000000e+00> : vector<8xf32>
    %117 = vector.multi_reduction <add>, %116, %cst_43 [1] : vector<8x8xf32> to vector<8xf32>
    %118 = vector.shape_cast %117 : vector<8xf32> to vector<8x1xf32>
    %119 = tpu.reciprocal %118 {approx = true} : vector<8x1xf32> -> vector<8x1xf32>
    %120 = arith.mulf %118, %119 : vector<8x1xf32>
    %cst_44 = arith.constant 2.000000e+00 : f32
    %121 = vector.broadcast %cst_44 : f32 to vector<8x1xf32>
    %122 = arith.subf %121, %120 : vector<8x1xf32>
    %123 = arith.mulf %119, %122 : vector<8x1xf32>
    %124 = vector.broadcast %123 : vector<8x1xf32> to vector<8x8xf32>
    %125 = arith.mulf %116, %124 : vector<8x8xf32>
    %126 = arith.truncf %125 : vector<8x8xf32> to vector<8x8xbf16>
    %127 = vector.extract_strided_slice %5 {offsets = [0, 48], sizes = [8, 16], strides = [1, 1]} : vector<8x128xbf16> to vector<8x16xbf16>
    %c48 = arith.constant 48 : index
    %c0_45 = arith.constant 0 : index
    %128 = vector.load %arg6[%c48, %c0_45] : memref<128x128xbf16, #tpu.memory_space<vmem>>, vector<16x128xbf16>
    %cst_46 = arith.constant dense<0.000000e+00> : vector<8x128xf32>
    %129 = tpu.matmul %127, %128, %cst_46 {dimension_numbers = #tpu.dot_dimension_numbers<[1], [0], [0], [1], [0, 0, 1, 1], [], []>} : vector<8x16xbf16>, vector<16x128xbf16>, vector<8x128xf32> -> vector<8x128xf32>
    %130 = arith.truncf %129 : vector<8x128xf32> to vector<8x128xbf16>
    %cst_47 = arith.constant dense<0.000000e+00> : vector<8x128xf32>
    %131 = tpu.matmul %126, %130, %cst_47 {dimension_numbers = #tpu.dot_dimension_numbers<[1], [0], [0], [1], [0, 0, 1, 1], [], []>} : vector<8x8xbf16>, vector<8x128xbf16>, vector<8x128xf32> -> vector<8x128xf32>
    %132 = arith.addf %104, %131 : vector<8x128xf32>
    %133 = vector.extract_strided_slice %18 {offsets = [0, 64], sizes = [8, 16], strides = [1, 1]} : vector<8x128xbf16> to vector<8x16xbf16>
    %134 = vector.extract_strided_slice %19 {offsets = [0, 64], sizes = [8, 16], strides = [1, 1]} : vector<8x128xbf16> to vector<8x16xbf16>
    %cst_48 = arith.constant dense<0.000000e+00> : vector<8x8xf32>
    %135 = tpu.matmul %133, %134, %cst_48 {dimension_numbers = #tpu.dot_dimension_numbers<[1], [1], [0], [0], [0, 0, 1, 0], [], []>} : vector<8x16xbf16>, vector<8x16xbf16>, vector<8x8xf32> -> vector<8x8xf32>
    %136 = vector.broadcast %17 : vector<1x8xf32> to vector<8x8xf32>
    %137 = arith.addf %135, %136 : vector<8x8xf32>
    %cst_49 = arith.constant 0.0883883461 : f32
    %138 = vector.broadcast %cst_49 : f32 to vector<8x8xf32>
    %139 = arith.mulf %137, %138 : vector<8x8xf32>
    %cst_50 = arith.constant dense<0xFF800000> : vector<8xf32>
    %140 = vector.multi_reduction <maximumf>, %139, %cst_50 [1] : vector<8x8xf32> to vector<8xf32>
    %141 = vector.shape_cast %140 : vector<8xf32> to vector<8x1xf32>
    %142 = vector.broadcast %141 : vector<8x1xf32> to vector<8x8xf32>
    %143 = arith.subf %139, %142 : vector<8x8xf32>
    %144 = math.exp %143 : vector<8x8xf32>
    %cst_51 = arith.constant dense<0.000000e+00> : vector<8xf32>
    %145 = vector.multi_reduction <add>, %144, %cst_51 [1] : vector<8x8xf32> to vector<8xf32>
    %146 = vector.shape_cast %145 : vector<8xf32> to vector<8x1xf32>
    %147 = tpu.reciprocal %146 {approx = true} : vector<8x1xf32> -> vector<8x1xf32>
    %148 = arith.mulf %146, %147 : vector<8x1xf32>
    %cst_52 = arith.constant 2.000000e+00 : f32
    %149 = vector.broadcast %cst_52 : f32 to vector<8x1xf32>
    %150 = arith.subf %149, %148 : vector<8x1xf32>
    %151 = arith.mulf %147, %150 : vector<8x1xf32>
    %152 = vector.broadcast %151 : vector<8x1xf32> to vector<8x8xf32>
    %153 = arith.mulf %144, %152 : vector<8x8xf32>
    %154 = arith.truncf %153 : vector<8x8xf32> to vector<8x8xbf16>
    %155 = vector.extract_strided_slice %5 {offsets = [0, 64], sizes = [8, 16], strides = [1, 1]} : vector<8x128xbf16> to vector<8x16xbf16>
    %c64 = arith.constant 64 : index
    %c0_53 = arith.constant 0 : index
    %156 = vector.load %arg6[%c64, %c0_53] : memref<128x128xbf16, #tpu.memory_space<vmem>>, vector<16x128xbf16>
    %cst_54 = arith.constant dense<0.000000e+00> : vector<8x128xf32>
    %157 = tpu.matmul %155, %156, %cst_54 {dimension_numbers = #tpu.dot_dimension_numbers<[1], [0], [0], [1], [0, 0, 1, 1], [], []>} : vector<8x16xbf16>, vector<16x128xbf16>, vector<8x128xf32> -> vector<8x128xf32>
    %158 = arith.truncf %157 : vector<8x128xf32> to vector<8x128xbf16>
    %cst_55 = arith.constant dense<0.000000e+00> : vector<8x128xf32>
    %159 = tpu.matmul %154, %158, %cst_55 {dimension_numbers = #tpu.dot_dimension_numbers<[1], [0], [0], [1], [0, 0, 1, 1], [], []>} : vector<8x8xbf16>, vector<8x128xbf16>, vector<8x128xf32> -> vector<8x128xf32>
    %160 = arith.addf %132, %159 : vector<8x128xf32>
    %161 = vector.extract_strided_slice %18 {offsets = [0, 80], sizes = [8, 16], strides = [1, 1]} : vector<8x128xbf16> to vector<8x16xbf16>
    %162 = vector.extract_strided_slice %19 {offsets = [0, 80], sizes = [8, 16], strides = [1, 1]} : vector<8x128xbf16> to vector<8x16xbf16>
    %cst_56 = arith.constant dense<0.000000e+00> : vector<8x8xf32>
    %163 = tpu.matmul %161, %162, %cst_56 {dimension_numbers = #tpu.dot_dimension_numbers<[1], [1], [0], [0], [0, 0, 1, 0], [], []>} : vector<8x16xbf16>, vector<8x16xbf16>, vector<8x8xf32> -> vector<8x8xf32>
    %164 = vector.broadcast %17 : vector<1x8xf32> to vector<8x8xf32>
    %165 = arith.addf %163, %164 : vector<8x8xf32>
    %cst_57 = arith.constant 0.0883883461 : f32
    %166 = vector.broadcast %cst_57 : f32 to vector<8x8xf32>
    %167 = arith.mulf %165, %166 : vector<8x8xf32>
    %cst_58 = arith.constant dense<0xFF800000> : vector<8xf32>
    %168 = vector.multi_reduction <maximumf>, %167, %cst_58 [1] : vector<8x8xf32> to vector<8xf32>
    %169 = vector.shape_cast %168 : vector<8xf32> to vector<8x1xf32>
    %170 = vector.broadcast %169 : vector<8x1xf32> to vector<8x8xf32>
    %171 = arith.subf %167, %170 : vector<8x8xf32>
    %172 = math.exp %171 : vector<8x8xf32>
    %cst_59 = arith.constant dense<0.000000e+00> : vector<8xf32>
    %173 = vector.multi_reduction <add>, %172, %cst_59 [1] : vector<8x8xf32> to vector<8xf32>
    %174 = vector.shape_cast %173 : vector<8xf32> to vector<8x1xf32>
    %175 = tpu.reciprocal %174 {approx = true} : vector<8x1xf32> -> vector<8x1xf32>
    %176 = arith.mulf %174, %175 : vector<8x1xf32>
    %cst_60 = arith.constant 2.000000e+00 : f32
    %177 = vector.broadcast %cst_60 : f32 to vector<8x1xf32>
    %178 = arith.subf %177, %176 : vector<8x1xf32>
    %179 = arith.mulf %175, %178 : vector<8x1xf32>
    %180 = vector.broadcast %179 : vector<8x1xf32> to vector<8x8xf32>
    %181 = arith.mulf %172, %180 : vector<8x8xf32>
    %182 = arith.truncf %181 : vector<8x8xf32> to vector<8x8xbf16>
    %183 = vector.extract_strided_slice %5 {offsets = [0, 80], sizes = [8, 16], strides = [1, 1]} : vector<8x128xbf16> to vector<8x16xbf16>
    %c80 = arith.constant 80 : index
    %c0_61 = arith.constant 0 : index
    %184 = vector.load %arg6[%c80, %c0_61] : memref<128x128xbf16, #tpu.memory_space<vmem>>, vector<16x128xbf16>
    %cst_62 = arith.constant dense<0.000000e+00> : vector<8x128xf32>
    %185 = tpu.matmul %183, %184, %cst_62 {dimension_numbers = #tpu.dot_dimension_numbers<[1], [0], [0], [1], [0, 0, 1, 1], [], []>} : vector<8x16xbf16>, vector<16x128xbf16>, vector<8x128xf32> -> vector<8x128xf32>
    %186 = arith.truncf %185 : vector<8x128xf32> to vector<8x128xbf16>
    %cst_63 = arith.constant dense<0.000000e+00> : vector<8x128xf32>
    %187 = tpu.matmul %182, %186, %cst_63 {dimension_numbers = #tpu.dot_dimension_numbers<[1], [0], [0], [1], [0, 0, 1, 1], [], []>} : vector<8x8xbf16>, vector<8x128xbf16>, vector<8x128xf32> -> vector<8x128xf32>
    %188 = arith.addf %160, %187 : vector<8x128xf32>
    %189 = vector.extract_strided_slice %18 {offsets = [0, 96], sizes = [8, 16], strides = [1, 1]} : vector<8x128xbf16> to vector<8x16xbf16>
    %190 = vector.extract_strided_slice %19 {offsets = [0, 96], sizes = [8, 16], strides = [1, 1]} : vector<8x128xbf16> to vector<8x16xbf16>
    %cst_64 = arith.constant dense<0.000000e+00> : vector<8x8xf32>
    %191 = tpu.matmul %189, %190, %cst_64 {dimension_numbers = #tpu.dot_dimension_numbers<[1], [1], [0], [0], [0, 0, 1, 0], [], []>} : vector<8x16xbf16>, vector<8x16xbf16>, vector<8x8xf32> -> vector<8x8xf32>
    %192 = vector.broadcast %17 : vector<1x8xf32> to vector<8x8xf32>
    %193 = arith.addf %191, %192 : vector<8x8xf32>
    %cst_65 = arith.constant 0.0883883461 : f32
    %194 = vector.broadcast %cst_65 : f32 to vector<8x8xf32>
    %195 = arith.mulf %193, %194 : vector<8x8xf32>
    %cst_66 = arith.constant dense<0xFF800000> : vector<8xf32>
    %196 = vector.multi_reduction <maximumf>, %195, %cst_66 [1] : vector<8x8xf32> to vector<8xf32>
    %197 = vector.shape_cast %196 : vector<8xf32> to vector<8x1xf32>
    %198 = vector.broadcast %197 : vector<8x1xf32> to vector<8x8xf32>
    %199 = arith.subf %195, %198 : vector<8x8xf32>
    %200 = math.exp %199 : vector<8x8xf32>
    %cst_67 = arith.constant dense<0.000000e+00> : vector<8xf32>
    %201 = vector.multi_reduction <add>, %200, %cst_67 [1] : vector<8x8xf32> to vector<8xf32>
    %202 = vector.shape_cast %201 : vector<8xf32> to vector<8x1xf32>
    %203 = tpu.reciprocal %202 {approx = true} : vector<8x1xf32> -> vector<8x1xf32>
    %204 = arith.mulf %202, %203 : vector<8x1xf32>
    %cst_68 = arith.constant 2.000000e+00 : f32
    %205 = vector.broadcast %cst_68 : f32 to vector<8x1xf32>
    %206 = arith.subf %205, %204 : vector<8x1xf32>
    %207 = arith.mulf %203, %206 : vector<8x1xf32>
    %208 = vector.broadcast %207 : vector<8x1xf32> to vector<8x8xf32>
    %209 = arith.mulf %200, %208 : vector<8x8xf32>
    %210 = arith.truncf %209 : vector<8x8xf32> to vector<8x8xbf16>
    %211 = vector.extract_strided_slice %5 {offsets = [0, 96], sizes = [8, 16], strides = [1, 1]} : vector<8x128xbf16> to vector<8x16xbf16>
    %c96 = arith.constant 96 : index
    %c0_69 = arith.constant 0 : index
    %212 = vector.load %arg6[%c96, %c0_69] : memref<128x128xbf16, #tpu.memory_space<vmem>>, vector<16x128xbf16>
    %cst_70 = arith.constant dense<0.000000e+00> : vector<8x128xf32>
    %213 = tpu.matmul %211, %212, %cst_70 {dimension_numbers = #tpu.dot_dimension_numbers<[1], [0], [0], [1], [0, 0, 1, 1], [], []>} : vector<8x16xbf16>, vector<16x128xbf16>, vector<8x128xf32> -> vector<8x128xf32>
    %214 = arith.truncf %213 : vector<8x128xf32> to vector<8x128xbf16>
    %cst_71 = arith.constant dense<0.000000e+00> : vector<8x128xf32>
    %215 = tpu.matmul %210, %214, %cst_71 {dimension_numbers = #tpu.dot_dimension_numbers<[1], [0], [0], [1], [0, 0, 1, 1], [], []>} : vector<8x8xbf16>, vector<8x128xbf16>, vector<8x128xf32> -> vector<8x128xf32>
    %216 = arith.addf %188, %215 : vector<8x128xf32>
    %217 = vector.extract_strided_slice %18 {offsets = [0, 112], sizes = [8, 16], strides = [1, 1]} : vector<8x128xbf16> to vector<8x16xbf16>
    %218 = vector.extract_strided_slice %19 {offsets = [0, 112], sizes = [8, 16], strides = [1, 1]} : vector<8x128xbf16> to vector<8x16xbf16>
    %cst_72 = arith.constant dense<0.000000e+00> : vector<8x8xf32>
    %219 = tpu.matmul %217, %218, %cst_72 {dimension_numbers = #tpu.dot_dimension_numbers<[1], [1], [0], [0], [0, 0, 1, 0], [], []>} : vector<8x16xbf16>, vector<8x16xbf16>, vector<8x8xf32> -> vector<8x8xf32>
    %220 = vector.broadcast %17 : vector<1x8xf32> to vector<8x8xf32>
    %221 = arith.addf %219, %220 : vector<8x8xf32>
    %cst_73 = arith.constant 0.0883883461 : f32
    %222 = vector.broadcast %cst_73 : f32 to vector<8x8xf32>
    %223 = arith.mulf %221, %222 : vector<8x8xf32>
    %cst_74 = arith.constant dense<0xFF800000> : vector<8xf32>
    %224 = vector.multi_reduction <maximumf>, %223, %cst_74 [1] : vector<8x8xf32> to vector<8xf32>
    %225 = vector.shape_cast %224 : vector<8xf32> to vector<8x1xf32>
    %226 = vector.broadcast %225 : vector<8x1xf32> to vector<8x8xf32>
    %227 = arith.subf %223, %226 : vector<8x8xf32>
    %228 = math.exp %227 : vector<8x8xf32>
    %cst_75 = arith.constant dense<0.000000e+00> : vector<8xf32>
    %229 = vector.multi_reduction <add>, %228, %cst_75 [1] : vector<8x8xf32> to vector<8xf32>
    %230 = vector.shape_cast %229 : vector<8xf32> to vector<8x1xf32>
    %231 = tpu.reciprocal %230 {approx = true} : vector<8x1xf32> -> vector<8x1xf32>
    %232 = arith.mulf %230, %231 : vector<8x1xf32>
    %cst_76 = arith.constant 2.000000e+00 : f32
    %233 = vector.broadcast %cst_76 : f32 to vector<8x1xf32>
    %234 = arith.subf %233, %232 : vector<8x1xf32>
    %235 = arith.mulf %231, %234 : vector<8x1xf32>
    %236 = vector.broadcast %235 : vector<8x1xf32> to vector<8x8xf32>
    %237 = arith.mulf %228, %236 : vector<8x8xf32>
    %238 = arith.truncf %237 : vector<8x8xf32> to vector<8x8xbf16>
    %239 = vector.extract_strided_slice %5 {offsets = [0, 112], sizes = [8, 16], strides = [1, 1]} : vector<8x128xbf16> to vector<8x16xbf16>
    %c112 = arith.constant 112 : index
    %c0_77 = arith.constant 0 : index
    %240 = vector.load %arg6[%c112, %c0_77] : memref<128x128xbf16, #tpu.memory_space<vmem>>, vector<16x128xbf16>
    %cst_78 = arith.constant dense<0.000000e+00> : vector<8x128xf32>
    %241 = tpu.matmul %239, %240, %cst_78 {dimension_numbers = #tpu.dot_dimension_numbers<[1], [0], [0], [1], [0, 0, 1, 1], [], []>} : vector<8x16xbf16>, vector<16x128xbf16>, vector<8x128xf32> -> vector<8x128xf32>
    %242 = arith.truncf %241 : vector<8x128xf32> to vector<8x128xbf16>
    %cst_79 = arith.constant dense<0.000000e+00> : vector<8x128xf32>
    %243 = tpu.matmul %238, %242, %cst_79 {dimension_numbers = #tpu.dot_dimension_numbers<[1], [0], [0], [1], [0, 0, 1, 1], [], []>} : vector<8x8xbf16>, vector<8x128xbf16>, vector<8x128xf32> -> vector<8x128xf32>
    %244 = arith.addf %216, %243 : vector<8x128xf32>
    %c0_80 = arith.constant 0 : index
    %c0_81 = arith.constant 0 : index
    %245 = vector.load %arg7[%c0_80, %c0_81] : memref<1x128xf32, #tpu.memory_space<vmem>>, vector<1x128xf32>
    %246 = vector.broadcast %245 : vector<1x128xf32> to vector<8x128xf32>
    %247 = arith.addf %244, %246 : vector<8x128xf32>
    %248 = arith.addf %247, %1 : vector<8x128xf32>
    %c0_82 = arith.constant 0 : index
    %c0_83 = arith.constant 0 : index
    %249 = vector.load %arg8[%c0_82, %c0_83] : memref<1x128xf32, #tpu.memory_space<vmem>>, vector<1x128xf32>
    %c0_84 = arith.constant 0 : index
    %c0_85 = arith.constant 0 : index
    %250 = vector.load %arg9[%c0_84, %c0_85] : memref<1x128xf32, #tpu.memory_space<vmem>>, vector<1x128xf32>
    %cst_86 = arith.constant dense<0.000000e+00> : vector<8xf32>
    %251 = vector.multi_reduction <add>, %248, %cst_86 [1] : vector<8x128xf32> to vector<8xf32>
    %252 = vector.shape_cast %251 : vector<8xf32> to vector<8x1xf32>
    %cst_87 = arith.constant 7.812500e-03 : f32
    %253 = vector.broadcast %cst_87 : f32 to vector<8x1xf32>
    %254 = arith.mulf %252, %253 : vector<8x1xf32>
    %255 = vector.broadcast %254 : vector<8x1xf32> to vector<8x128xf32>
    %256 = arith.subf %248, %255 : vector<8x128xf32>
    %257 = arith.mulf %256, %256 : vector<8x128xf32>
    %cst_88 = arith.constant dense<0.000000e+00> : vector<8xf32>
    %258 = vector.multi_reduction <add>, %257, %cst_88 [1] : vector<8x128xf32> to vector<8xf32>
    %259 = vector.shape_cast %258 : vector<8xf32> to vector<8x1xf32>
    %cst_89 = arith.constant 7.812500e-03 : f32
    %260 = vector.broadcast %cst_89 : f32 to vector<8x1xf32>
    %261 = arith.mulf %259, %260 : vector<8x1xf32>
    %cst_90 = arith.constant 9.99999974E-6 : f32
    %262 = vector.broadcast %cst_90 : f32 to vector<8x1xf32>
    %263 = arith.addf %261, %262 : vector<8x1xf32>
    %264 = math.rsqrt %263 : vector<8x1xf32>
    %265 = vector.broadcast %264 : vector<8x1xf32> to vector<8x128xf32>
    %266 = arith.mulf %256, %265 : vector<8x128xf32>
    %267 = vector.broadcast %249 : vector<1x128xf32> to vector<8x128xf32>
    %268 = arith.mulf %266, %267 : vector<8x128xf32>
    %269 = vector.broadcast %250 : vector<1x128xf32> to vector<8x128xf32>
    %270 = arith.addf %268, %269 : vector<8x128xf32>
    %c0_91 = arith.constant 0 : index
    %c0_92 = arith.constant 0 : index
    %c0_93 = arith.constant 0 : index
    %271 = vector.load %arg10[%c0_91, %c0_92, %c0_93] : memref<1x8x128xf32, #tpu.memory_space<vmem>>, vector<1x8x128xf32>
    %272 = vector.shape_cast %271 : vector<1x8x128xf32> to vector<8x128xf32>
    %273 = vector.shape_cast %270 : vector<8x128xf32> to vector<1x8x128xf32>
    tpu.vector_store %arg10[%c0_91, %c0_92, %c0_93], %273 {strides = array<i32>} : memref<1x8x128xf32, #tpu.memory_space<vmem>>, vector<1x8x128xf32>,
    return
  }
  func.func @transform_0(%arg0: i32) -> (i32, i32, i32) {
    %c0_i32 = arith.constant 0 : i32
    %c0_i32_0 = arith.constant 0 : i32
    %c0_i32_1 = arith.constant 0 : i32
    return %arg0, %c0_i32, %c0_i32_0 : i32, i32, i32
  }
  func.func @transform_1(%arg0: i32) -> (i32, i32, i32) {
    %c0_i32 = arith.constant 0 : i32
    %c0_i32_0 = arith.constant 0 : i32
    %c0_i32_1 = arith.constant 0 : i32
    return %arg0, %c0_i32, %c0_i32_0 : i32, i32, i32
  }
  func.func @transform_2(%arg0: i32) -> (i32, i32, i32) {
    %c0_i32 = arith.constant 0 : i32
    %c0_i32_0 = arith.constant 0 : i32
    %c0_i32_1 = arith.constant 0 : i32
    return %arg0, %c0_i32, %c0_i32_0 : i32, i32, i32
  }
  func.func @transform_3(%arg0: i32) -> (i32, i32) {
    %c0_i32 = arith.constant 0 : i32
    %c0_i32_0 = arith.constant 0 : i32
    %c0_i32_1 = arith.constant 0 : i32
    return %c0_i32, %c0_i32_0 : i32, i32
  }
  func.func @transform_4(%arg0: i32) -> (i32, i32) {
    %c0_i32 = arith.constant 0 : i32
    %c0_i32_0 = arith.constant 0 : i32
    %c0_i32_1 = arith.constant 0 : i32
    return %c0_i32, %c0_i32_0 : i32, i32
  }
  func.func @transform_5(%arg0: i32) -> (i32, i32) {
    %c0_i32 = arith.constant 0 : i32
    %c0_i32_0 = arith.constant 0 : i32
    %c0_i32_1 = arith.constant 0 : i32
    return %c0_i32, %c0_i32_0 : i32, i32
  }
  func.func @transform_6(%arg0: i32) -> (i32, i32) {
    %c0_i32 = arith.constant 0 : i32
    %c0_i32_0 = arith.constant 0 : i32
    %c0_i32_1 = arith.constant 0 : i32
    return %c0_i32, %c0_i32_0 : i32, i32
  }
  func.func @transform_7(%arg0: i32) -> (i32, i32) {
    %c0_i32 = arith.constant 0 : i32
    %c0_i32_0 = arith.constant 0 : i32
    %c0_i32_1 = arith.constant 0 : i32
    return %c0_i32, %c0_i32_0 : i32, i32
  }
  func.func @transform_8(%arg0: i32) -> (i32, i32) {
    %c0_i32 = arith.constant 0 : i32
    %c0_i32_0 = arith.constant 0 : i32
    %c0_i32_1 = arith.constant 0 : i32
    return %c0_i32, %c0_i32_0 : i32, i32
  }
  func.func @transform_9(%arg0: i32) -> (i32, i32, i32) {
    %c0_i32 = arith.constant 0 : i32
    %c0_i32_0 = arith.constant 0 : i32
    %c0_i32_1 = arith.constant 0 : i32
    return %arg0, %c0_i32, %c0_i32_0 : i32, i32, i32
  }
}

module attributes {stable_mosaic.version = 11 : i64} {
  func.func @kernel(%arg0: i32, %arg1: memref<1x8x128xf32, #tpu.memory_space<vmem>>, %arg2: memref<128x256xbf16, #tpu.memory_space<vmem>>, %arg3: memref<128x128xbf16, #tpu.memory_space<vmem>>, %arg4: memref<1x128xf32, #tpu.memory_space<vmem>>, %arg5: memref<1x128xf32, #tpu.memory_space<vmem>>, %arg6: memref<1x128xf32, #tpu.memory_space<vmem>>, %arg7: memref<1x8x128xf32, #tpu.memory_space<vmem>>) attributes {dimension_semantics = [#tpu.dimension_semantics<parallel>], iteration_bounds = array<i64: 2>, scalar_prefetch = 0 : i64, scratch_operands = 0 : i64, tpu.core_type = #tpu.core_type<tc>, window_params = [{transform_indices = @transform_0, window_bounds = array<i64: 1, 8, 128>}, {pipeline_mode = #tpu.pipeline_mode<synchronous>, transform_indices = @transform_1, window_bounds = array<i64: 128, 256>}, {pipeline_mode = #tpu.pipeline_mode<synchronous>, transform_indices = @transform_2, window_bounds = array<i64: 128, 128>}, {pipeline_mode = #tpu.pipeline_mode<synchronous>, transform_indices = @transform_3, window_bounds = array<i64: 1, 128>}, {pipeline_mode = #tpu.pipeline_mode<synchronous>, transform_indices = @transform_4, window_bounds = array<i64: 1, 128>}, {pipeline_mode = #tpu.pipeline_mode<synchronous>, transform_indices = @transform_5, window_bounds = array<i64: 1, 128>}, {transform_indices = @transform_6, window_bounds = array<i64: 1, 8, 128>}]} {
    %c0 = arith.constant 0 : index
    %c0_0 = arith.constant 0 : index
    %c0_1 = arith.constant 0 : index
    %0 = vector.load %arg1[%c0, %c0_0, %c0_1] : memref<1x8x128xf32, #tpu.memory_space<vmem>>, vector<1x8x128xf32>
    %1 = vector.shape_cast %0 : vector<1x8x128xf32> to vector<8x128xf32>
    %2 = arith.truncf %1 : vector<8x128xf32> to vector<8x128xbf16>
    %c0_2 = arith.constant 0 : index
    %c0_3 = arith.constant 0 : index
    %3 = vector.load %arg2[%c0_2, %c0_3] : memref<128x256xbf16, #tpu.memory_space<vmem>>, vector<128x256xbf16>
    %cst = arith.constant dense<0.000000e+00> : vector<8x256xf32>
    %4 = tpu.matmul %2, %3, %cst {dimension_numbers = #tpu.dot_dimension_numbers<[1], [0], [0], [1], [0, 0, 1, 1], [], []>} : vector<8x128xbf16>, vector<128x256xbf16>, vector<8x256xf32> -> vector<8x256xf32>
    %5 = vector.extract_strided_slice %4 {offsets = [0, 0], sizes = [8, 128], strides = [1, 1]} : vector<8x256xf32> to vector<8x128xf32>
    %6 = vector.extract_strided_slice %4 {offsets = [0, 128], sizes = [8, 128], strides = [1, 1]} : vector<8x256xf32> to vector<8x128xf32>
    %7 = tpu.iota {dimensions = array<i32: 0>} : vector<8x8xi32>
    %8 = tpu.iota {dimensions = array<i32: 1>} : vector<8x8xi32>
    %9 = arith.cmpi sgt, %8, %7 : vector<8x8xi32>
    %cst_4 = arith.constant -9.99999944E+27 : f32
    %cst_5 = arith.constant 0.000000e+00 : f32
    %10 = vector.broadcast %cst_4 : f32 to vector<8x8xf32>
    %11 = vector.broadcast %cst_5 : f32 to vector<8x8xf32>
    %12 = arith.select %9, %10, %11 : vector<8x8xi1>, vector<8x8xf32>
    %13 = arith.truncf %5 : vector<8x128xf32> to vector<8x128xbf16>
    %14 = arith.truncf %6 : vector<8x128xf32> to vector<8x128xbf16>
    %cst_6 = arith.constant 0.000000e+00 : f32
    %15 = vector.broadcast %cst_6 : f32 to vector<8x128xf32>
    %16 = vector.extract_strided_slice %13 {offsets = [0, 0], sizes = [8, 16], strides = [1, 1]} : vector<8x128xbf16> to vector<8x16xbf16>
    %17 = vector.extract_strided_slice %14 {offsets = [0, 0], sizes = [8, 16], strides = [1, 1]} : vector<8x128xbf16> to vector<8x16xbf16>
    %cst_7 = arith.constant dense<0.000000e+00> : vector<8x8xf32>
    %18 = tpu.matmul %16, %17, %cst_7 {dimension_numbers = #tpu.dot_dimension_numbers<[1], [1], [0], [0], [0, 0, 1, 0], [], []>} : vector<8x16xbf16>, vector<8x16xbf16>, vector<8x8xf32> -> vector<8x8xf32>
    %19 = arith.addf %18, %12 : vector<8x8xf32>
    %cst_8 = arith.constant 0.0883883461 : f32
    %20 = vector.broadcast %cst_8 : f32 to vector<8x8xf32>
    %21 = arith.mulf %19, %20 : vector<8x8xf32>
    %cst_9 = arith.constant dense<0xFF800000> : vector<8xf32>
    %22 = vector.multi_reduction <maximumf>, %21, %cst_9 [1] : vector<8x8xf32> to vector<8xf32>
    %23 = vector.shape_cast %22 : vector<8xf32> to vector<8x1xf32>
    %24 = vector.broadcast %23 : vector<8x1xf32> to vector<8x8xf32>
    %25 = arith.subf %21, %24 : vector<8x8xf32>
    %26 = math.exp %25 : vector<8x8xf32>
    %cst_10 = arith.constant dense<0.000000e+00> : vector<8xf32>
    %27 = vector.multi_reduction <add>, %26, %cst_10 [1] : vector<8x8xf32> to vector<8xf32>
    %28 = vector.shape_cast %27 : vector<8xf32> to vector<8x1xf32>
    %29 = tpu.reciprocal %28 {approx = true} : vector<8x1xf32> -> vector<8x1xf32>
    %30 = arith.mulf %28, %29 : vector<8x1xf32>
    %cst_11 = arith.constant 2.000000e+00 : f32
    %31 = vector.broadcast %cst_11 : f32 to vector<8x1xf32>
    %32 = arith.subf %31, %30 : vector<8x1xf32>
    %33 = arith.mulf %29, %32 : vector<8x1xf32>
    %34 = vector.broadcast %33 : vector<8x1xf32> to vector<8x8xf32>
    %35 = arith.mulf %26, %34 : vector<8x8xf32>
    %36 = arith.truncf %35 : vector<8x8xf32> to vector<8x8xbf16>
    %37 = vector.extract_strided_slice %2 {offsets = [0, 0], sizes = [8, 16], strides = [1, 1]} : vector<8x128xbf16> to vector<8x16xbf16>
    %c0_12 = arith.constant 0 : index
    %c0_13 = arith.constant 0 : index
    %38 = vector.load %arg3[%c0_12, %c0_13] : memref<128x128xbf16, #tpu.memory_space<vmem>>, vector<16x128xbf16>
    %cst_14 = arith.constant dense<0.000000e+00> : vector<8x128xf32>
    %39 = tpu.matmul %37, %38, %cst_14 {dimension_numbers = #tpu.dot_dimension_numbers<[1], [0], [0], [1], [0, 0, 1, 1], [], []>} : vector<8x16xbf16>, vector<16x128xbf16>, vector<8x128xf32> -> vector<8x128xf32>
    %40 = arith.truncf %39 : vector<8x128xf32> to vector<8x128xbf16>
    %cst_15 = arith.constant dense<0.000000e+00> : vector<8x128xf32>
    %41 = tpu.matmul %36, %40, %cst_15 {dimension_numbers = #tpu.dot_dimension_numbers<[1], [0], [0], [1], [0, 0, 1, 1], [], []>} : vector<8x8xbf16>, vector<8x128xbf16>, vector<8x128xf32> -> vector<8x128xf32>
    %42 = arith.addf %15, %41 : vector<8x128xf32>
    %43 = vector.extract_strided_slice %13 {offsets = [0, 16], sizes = [8, 16], strides = [1, 1]} : vector<8x128xbf16> to vector<8x16xbf16>
    %44 = vector.extract_strided_slice %14 {offsets = [0, 16], sizes = [8, 16], strides = [1, 1]} : vector<8x128xbf16> to vector<8x16xbf16>
    %cst_16 = arith.constant dense<0.000000e+00> : vector<8x8xf32>
    %45 = tpu.matmul %43, %44, %cst_16 {dimension_numbers = #tpu.dot_dimension_numbers<[1], [1], [0], [0], [0, 0, 1, 0], [], []>} : vector<8x16xbf16>, vector<8x16xbf16>, vector<8x8xf32> -> vector<8x8xf32>
    %46 = arith.addf %45, %12 : vector<8x8xf32>
    %cst_17 = arith.constant 0.0883883461 : f32
    %47 = vector.broadcast %cst_17 : f32 to vector<8x8xf32>
    %48 = arith.mulf %46, %47 : vector<8x8xf32>
    %cst_18 = arith.constant dense<0xFF800000> : vector<8xf32>
    %49 = vector.multi_reduction <maximumf>, %48, %cst_18 [1] : vector<8x8xf32> to vector<8xf32>
    %50 = vector.shape_cast %49 : vector<8xf32> to vector<8x1xf32>
    %51 = vector.broadcast %50 : vector<8x1xf32> to vector<8x8xf32>
    %52 = arith.subf %48, %51 : vector<8x8xf32>
    %53 = math.exp %52 : vector<8x8xf32>
    %cst_19 = arith.constant dense<0.000000e+00> : vector<8xf32>
    %54 = vector.multi_reduction <add>, %53, %cst_19 [1] : vector<8x8xf32> to vector<8xf32>
    %55 = vector.shape_cast %54 : vector<8xf32> to vector<8x1xf32>
    %56 = tpu.reciprocal %55 {approx = true} : vector<8x1xf32> -> vector<8x1xf32>
    %57 = arith.mulf %55, %56 : vector<8x1xf32>
    %cst_20 = arith.constant 2.000000e+00 : f32
    %58 = vector.broadcast %cst_20 : f32 to vector<8x1xf32>
    %59 = arith.subf %58, %57 : vector<8x1xf32>
    %60 = arith.mulf %56, %59 : vector<8x1xf32>
    %61 = vector.broadcast %60 : vector<8x1xf32> to vector<8x8xf32>
    %62 = arith.mulf %53, %61 : vector<8x8xf32>
    %63 = arith.truncf %62 : vector<8x8xf32> to vector<8x8xbf16>
    %64 = vector.extract_strided_slice %2 {offsets = [0, 16], sizes = [8, 16], strides = [1, 1]} : vector<8x128xbf16> to vector<8x16xbf16>
    %c16 = arith.constant 16 : index
    %c0_21 = arith.constant 0 : index
    %65 = vector.load %arg3[%c16, %c0_21] : memref<128x128xbf16, #tpu.memory_space<vmem>>, vector<16x128xbf16>
    %cst_22 = arith.constant dense<0.000000e+00> : vector<8x128xf32>
    %66 = tpu.matmul %64, %65, %cst_22 {dimension_numbers = #tpu.dot_dimension_numbers<[1], [0], [0], [1], [0, 0, 1, 1], [], []>} : vector<8x16xbf16>, vector<16x128xbf16>, vector<8x128xf32> -> vector<8x128xf32>
    %67 = arith.truncf %66 : vector<8x128xf32> to vector<8x128xbf16>
    %cst_23 = arith.constant dense<0.000000e+00> : vector<8x128xf32>
    %68 = tpu.matmul %63, %67, %cst_23 {dimension_numbers = #tpu.dot_dimension_numbers<[1], [0], [0], [1], [0, 0, 1, 1], [], []>} : vector<8x8xbf16>, vector<8x128xbf16>, vector<8x128xf32> -> vector<8x128xf32>
    %69 = arith.addf %42, %68 : vector<8x128xf32>
    %70 = vector.extract_strided_slice %13 {offsets = [0, 32], sizes = [8, 16], strides = [1, 1]} : vector<8x128xbf16> to vector<8x16xbf16>
    %71 = vector.extract_strided_slice %14 {offsets = [0, 32], sizes = [8, 16], strides = [1, 1]} : vector<8x128xbf16> to vector<8x16xbf16>
    %cst_24 = arith.constant dense<0.000000e+00> : vector<8x8xf32>
    %72 = tpu.matmul %70, %71, %cst_24 {dimension_numbers = #tpu.dot_dimension_numbers<[1], [1], [0], [0], [0, 0, 1, 0], [], []>} : vector<8x16xbf16>, vector<8x16xbf16>, vector<8x8xf32> -> vector<8x8xf32>
    %73 = arith.addf %72, %12 : vector<8x8xf32>
    %cst_25 = arith.constant 0.0883883461 : f32
    %74 = vector.broadcast %cst_25 : f32 to vector<8x8xf32>
    %75 = arith.mulf %73, %74 : vector<8x8xf32>
    %cst_26 = arith.constant dense<0xFF800000> : vector<8xf32>
    %76 = vector.multi_reduction <maximumf>, %75, %cst_26 [1] : vector<8x8xf32> to vector<8xf32>
    %77 = vector.shape_cast %76 : vector<8xf32> to vector<8x1xf32>
    %78 = vector.broadcast %77 : vector<8x1xf32> to vector<8x8xf32>
    %79 = arith.subf %75, %78 : vector<8x8xf32>
    %80 = math.exp %79 : vector<8x8xf32>
    %cst_27 = arith.constant dense<0.000000e+00> : vector<8xf32>
    %81 = vector.multi_reduction <add>, %80, %cst_27 [1] : vector<8x8xf32> to vector<8xf32>
    %82 = vector.shape_cast %81 : vector<8xf32> to vector<8x1xf32>
    %83 = tpu.reciprocal %82 {approx = true} : vector<8x1xf32> -> vector<8x1xf32>
    %84 = arith.mulf %82, %83 : vector<8x1xf32>
    %cst_28 = arith.constant 2.000000e+00 : f32
    %85 = vector.broadcast %cst_28 : f32 to vector<8x1xf32>
    %86 = arith.subf %85, %84 : vector<8x1xf32>
    %87 = arith.mulf %83, %86 : vector<8x1xf32>
    %88 = vector.broadcast %87 : vector<8x1xf32> to vector<8x8xf32>
    %89 = arith.mulf %80, %88 : vector<8x8xf32>
    %90 = arith.truncf %89 : vector<8x8xf32> to vector<8x8xbf16>
    %91 = vector.extract_strided_slice %2 {offsets = [0, 32], sizes = [8, 16], strides = [1, 1]} : vector<8x128xbf16> to vector<8x16xbf16>
    %c32 = arith.constant 32 : index
    %c0_29 = arith.constant 0 : index
    %92 = vector.load %arg3[%c32, %c0_29] : memref<128x128xbf16, #tpu.memory_space<vmem>>, vector<16x128xbf16>
    %cst_30 = arith.constant dense<0.000000e+00> : vector<8x128xf32>
    %93 = tpu.matmul %91, %92, %cst_30 {dimension_numbers = #tpu.dot_dimension_numbers<[1], [0], [0], [1], [0, 0, 1, 1], [], []>} : vector<8x16xbf16>, vector<16x128xbf16>, vector<8x128xf32> -> vector<8x128xf32>
    %94 = arith.truncf %93 : vector<8x128xf32> to vector<8x128xbf16>
    %cst_31 = arith.constant dense<0.000000e+00> : vector<8x128xf32>
    %95 = tpu.matmul %90, %94, %cst_31 {dimension_numbers = #tpu.dot_dimension_numbers<[1], [0], [0], [1], [0, 0, 1, 1], [], []>} : vector<8x8xbf16>, vector<8x128xbf16>, vector<8x128xf32> -> vector<8x128xf32>
    %96 = arith.addf %69, %95 : vector<8x128xf32>
    %97 = vector.extract_strided_slice %13 {offsets = [0, 48], sizes = [8, 16], strides = [1, 1]} : vector<8x128xbf16> to vector<8x16xbf16>
    %98 = vector.extract_strided_slice %14 {offsets = [0, 48], sizes = [8, 16], strides = [1, 1]} : vector<8x128xbf16> to vector<8x16xbf16>
    %cst_32 = arith.constant dense<0.000000e+00> : vector<8x8xf32>
    %99 = tpu.matmul %97, %98, %cst_32 {dimension_numbers = #tpu.dot_dimension_numbers<[1], [1], [0], [0], [0, 0, 1, 0], [], []>} : vector<8x16xbf16>, vector<8x16xbf16>, vector<8x8xf32> -> vector<8x8xf32>
    %100 = arith.addf %99, %12 : vector<8x8xf32>
    %cst_33 = arith.constant 0.0883883461 : f32
    %101 = vector.broadcast %cst_33 : f32 to vector<8x8xf32>
    %102 = arith.mulf %100, %101 : vector<8x8xf32>
    %cst_34 = arith.constant dense<0xFF800000> : vector<8xf32>
    %103 = vector.multi_reduction <maximumf>, %102, %cst_34 [1] : vector<8x8xf32> to vector<8xf32>
    %104 = vector.shape_cast %103 : vector<8xf32> to vector<8x1xf32>
    %105 = vector.broadcast %104 : vector<8x1xf32> to vector<8x8xf32>
    %106 = arith.subf %102, %105 : vector<8x8xf32>
    %107 = math.exp %106 : vector<8x8xf32>
    %cst_35 = arith.constant dense<0.000000e+00> : vector<8xf32>
    %108 = vector.multi_reduction <add>, %107, %cst_35 [1] : vector<8x8xf32> to vector<8xf32>
    %109 = vector.shape_cast %108 : vector<8xf32> to vector<8x1xf32>
    %110 = tpu.reciprocal %109 {approx = true} : vector<8x1xf32> -> vector<8x1xf32>
    %111 = arith.mulf %109, %110 : vector<8x1xf32>
    %cst_36 = arith.constant 2.000000e+00 : f32
    %112 = vector.broadcast %cst_36 : f32 to vector<8x1xf32>
    %113 = arith.subf %112, %111 : vector<8x1xf32>
    %114 = arith.mulf %110, %113 : vector<8x1xf32>
    %115 = vector.broadcast %114 : vector<8x1xf32> to vector<8x8xf32>
    %116 = arith.mulf %107, %115 : vector<8x8xf32>
    %117 = arith.truncf %116 : vector<8x8xf32> to vector<8x8xbf16>
    %118 = vector.extract_strided_slice %2 {offsets = [0, 48], sizes = [8, 16], strides = [1, 1]} : vector<8x128xbf16> to vector<8x16xbf16>
    %c48 = arith.constant 48 : index
    %c0_37 = arith.constant 0 : index
    %119 = vector.load %arg3[%c48, %c0_37] : memref<128x128xbf16, #tpu.memory_space<vmem>>, vector<16x128xbf16>
    %cst_38 = arith.constant dense<0.000000e+00> : vector<8x128xf32>
    %120 = tpu.matmul %118, %119, %cst_38 {dimension_numbers = #tpu.dot_dimension_numbers<[1], [0], [0], [1], [0, 0, 1, 1], [], []>} : vector<8x16xbf16>, vector<16x128xbf16>, vector<8x128xf32> -> vector<8x128xf32>
    %121 = arith.truncf %120 : vector<8x128xf32> to vector<8x128xbf16>
    %cst_39 = arith.constant dense<0.000000e+00> : vector<8x128xf32>
    %122 = tpu.matmul %117, %121, %cst_39 {dimension_numbers = #tpu.dot_dimension_numbers<[1], [0], [0], [1], [0, 0, 1, 1], [], []>} : vector<8x8xbf16>, vector<8x128xbf16>, vector<8x128xf32> -> vector<8x128xf32>
    %123 = arith.addf %96, %122 : vector<8x128xf32>
    %124 = vector.extract_strided_slice %13 {offsets = [0, 64], sizes = [8, 16], strides = [1, 1]} : vector<8x128xbf16> to vector<8x16xbf16>
    %125 = vector.extract_strided_slice %14 {offsets = [0, 64], sizes = [8, 16], strides = [1, 1]} : vector<8x128xbf16> to vector<8x16xbf16>
    %cst_40 = arith.constant dense<0.000000e+00> : vector<8x8xf32>
    %126 = tpu.matmul %124, %125, %cst_40 {dimension_numbers = #tpu.dot_dimension_numbers<[1], [1], [0], [0], [0, 0, 1, 0], [], []>} : vector<8x16xbf16>, vector<8x16xbf16>, vector<8x8xf32> -> vector<8x8xf32>
    %127 = arith.addf %126, %12 : vector<8x8xf32>
    %cst_41 = arith.constant 0.0883883461 : f32
    %128 = vector.broadcast %cst_41 : f32 to vector<8x8xf32>
    %129 = arith.mulf %127, %128 : vector<8x8xf32>
    %cst_42 = arith.constant dense<0xFF800000> : vector<8xf32>
    %130 = vector.multi_reduction <maximumf>, %129, %cst_42 [1] : vector<8x8xf32> to vector<8xf32>
    %131 = vector.shape_cast %130 : vector<8xf32> to vector<8x1xf32>
    %132 = vector.broadcast %131 : vector<8x1xf32> to vector<8x8xf32>
    %133 = arith.subf %129, %132 : vector<8x8xf32>
    %134 = math.exp %133 : vector<8x8xf32>
    %cst_43 = arith.constant dense<0.000000e+00> : vector<8xf32>
    %135 = vector.multi_reduction <add>, %134, %cst_43 [1] : vector<8x8xf32> to vector<8xf32>
    %136 = vector.shape_cast %135 : vector<8xf32> to vector<8x1xf32>
    %137 = tpu.reciprocal %136 {approx = true} : vector<8x1xf32> -> vector<8x1xf32>
    %138 = arith.mulf %136, %137 : vector<8x1xf32>
    %cst_44 = arith.constant 2.000000e+00 : f32
    %139 = vector.broadcast %cst_44 : f32 to vector<8x1xf32>
    %140 = arith.subf %139, %138 : vector<8x1xf32>
    %141 = arith.mulf %137, %140 : vector<8x1xf32>
    %142 = vector.broadcast %141 : vector<8x1xf32> to vector<8x8xf32>
    %143 = arith.mulf %134, %142 : vector<8x8xf32>
    %144 = arith.truncf %143 : vector<8x8xf32> to vector<8x8xbf16>
    %145 = vector.extract_strided_slice %2 {offsets = [0, 64], sizes = [8, 16], strides = [1, 1]} : vector<8x128xbf16> to vector<8x16xbf16>
    %c64 = arith.constant 64 : index
    %c0_45 = arith.constant 0 : index
    %146 = vector.load %arg3[%c64, %c0_45] : memref<128x128xbf16, #tpu.memory_space<vmem>>, vector<16x128xbf16>
    %cst_46 = arith.constant dense<0.000000e+00> : vector<8x128xf32>
    %147 = tpu.matmul %145, %146, %cst_46 {dimension_numbers = #tpu.dot_dimension_numbers<[1], [0], [0], [1], [0, 0, 1, 1], [], []>} : vector<8x16xbf16>, vector<16x128xbf16>, vector<8x128xf32> -> vector<8x128xf32>
    %148 = arith.truncf %147 : vector<8x128xf32> to vector<8x128xbf16>
    %cst_47 = arith.constant dense<0.000000e+00> : vector<8x128xf32>
    %149 = tpu.matmul %144, %148, %cst_47 {dimension_numbers = #tpu.dot_dimension_numbers<[1], [0], [0], [1], [0, 0, 1, 1], [], []>} : vector<8x8xbf16>, vector<8x128xbf16>, vector<8x128xf32> -> vector<8x128xf32>
    %150 = arith.addf %123, %149 : vector<8x128xf32>
    %151 = vector.extract_strided_slice %13 {offsets = [0, 80], sizes = [8, 16], strides = [1, 1]} : vector<8x128xbf16> to vector<8x16xbf16>
    %152 = vector.extract_strided_slice %14 {offsets = [0, 80], sizes = [8, 16], strides = [1, 1]} : vector<8x128xbf16> to vector<8x16xbf16>
    %cst_48 = arith.constant dense<0.000000e+00> : vector<8x8xf32>
    %153 = tpu.matmul %151, %152, %cst_48 {dimension_numbers = #tpu.dot_dimension_numbers<[1], [1], [0], [0], [0, 0, 1, 0], [], []>} : vector<8x16xbf16>, vector<8x16xbf16>, vector<8x8xf32> -> vector<8x8xf32>
    %154 = arith.addf %153, %12 : vector<8x8xf32>
    %cst_49 = arith.constant 0.0883883461 : f32
    %155 = vector.broadcast %cst_49 : f32 to vector<8x8xf32>
    %156 = arith.mulf %154, %155 : vector<8x8xf32>
    %cst_50 = arith.constant dense<0xFF800000> : vector<8xf32>
    %157 = vector.multi_reduction <maximumf>, %156, %cst_50 [1] : vector<8x8xf32> to vector<8xf32>
    %158 = vector.shape_cast %157 : vector<8xf32> to vector<8x1xf32>
    %159 = vector.broadcast %158 : vector<8x1xf32> to vector<8x8xf32>
    %160 = arith.subf %156, %159 : vector<8x8xf32>
    %161 = math.exp %160 : vector<8x8xf32>
    %cst_51 = arith.constant dense<0.000000e+00> : vector<8xf32>
    %162 = vector.multi_reduction <add>, %161, %cst_51 [1] : vector<8x8xf32> to vector<8xf32>
    %163 = vector.shape_cast %162 : vector<8xf32> to vector<8x1xf32>
    %164 = tpu.reciprocal %163 {approx = true} : vector<8x1xf32> -> vector<8x1xf32>
    %165 = arith.mulf %163, %164 : vector<8x1xf32>
    %cst_52 = arith.constant 2.000000e+00 : f32
    %166 = vector.broadcast %cst_52 : f32 to vector<8x1xf32>
    %167 = arith.subf %166, %165 : vector<8x1xf32>
    %168 = arith.mulf %164, %167 : vector<8x1xf32>
    %169 = vector.broadcast %168 : vector<8x1xf32> to vector<8x8xf32>
    %170 = arith.mulf %161, %169 : vector<8x8xf32>
    %171 = arith.truncf %170 : vector<8x8xf32> to vector<8x8xbf16>
    %172 = vector.extract_strided_slice %2 {offsets = [0, 80], sizes = [8, 16], strides = [1, 1]} : vector<8x128xbf16> to vector<8x16xbf16>
    %c80 = arith.constant 80 : index
    %c0_53 = arith.constant 0 : index
    %173 = vector.load %arg3[%c80, %c0_53] : memref<128x128xbf16, #tpu.memory_space<vmem>>, vector<16x128xbf16>
    %cst_54 = arith.constant dense<0.000000e+00> : vector<8x128xf32>
    %174 = tpu.matmul %172, %173, %cst_54 {dimension_numbers = #tpu.dot_dimension_numbers<[1], [0], [0], [1], [0, 0, 1, 1], [], []>} : vector<8x16xbf16>, vector<16x128xbf16>, vector<8x128xf32> -> vector<8x128xf32>
    %175 = arith.truncf %174 : vector<8x128xf32> to vector<8x128xbf16>
    %cst_55 = arith.constant dense<0.000000e+00> : vector<8x128xf32>
    %176 = tpu.matmul %171, %175, %cst_55 {dimension_numbers = #tpu.dot_dimension_numbers<[1], [0], [0], [1], [0, 0, 1, 1], [], []>} : vector<8x8xbf16>, vector<8x128xbf16>, vector<8x128xf32> -> vector<8x128xf32>
    %177 = arith.addf %150, %176 : vector<8x128xf32>
    %178 = vector.extract_strided_slice %13 {offsets = [0, 96], sizes = [8, 16], strides = [1, 1]} : vector<8x128xbf16> to vector<8x16xbf16>
    %179 = vector.extract_strided_slice %14 {offsets = [0, 96], sizes = [8, 16], strides = [1, 1]} : vector<8x128xbf16> to vector<8x16xbf16>
    %cst_56 = arith.constant dense<0.000000e+00> : vector<8x8xf32>
    %180 = tpu.matmul %178, %179, %cst_56 {dimension_numbers = #tpu.dot_dimension_numbers<[1], [1], [0], [0], [0, 0, 1, 0], [], []>} : vector<8x16xbf16>, vector<8x16xbf16>, vector<8x8xf32> -> vector<8x8xf32>
    %181 = arith.addf %180, %12 : vector<8x8xf32>
    %cst_57 = arith.constant 0.0883883461 : f32
    %182 = vector.broadcast %cst_57 : f32 to vector<8x8xf32>
    %183 = arith.mulf %181, %182 : vector<8x8xf32>
    %cst_58 = arith.constant dense<0xFF800000> : vector<8xf32>
    %184 = vector.multi_reduction <maximumf>, %183, %cst_58 [1] : vector<8x8xf32> to vector<8xf32>
    %185 = vector.shape_cast %184 : vector<8xf32> to vector<8x1xf32>
    %186 = vector.broadcast %185 : vector<8x1xf32> to vector<8x8xf32>
    %187 = arith.subf %183, %186 : vector<8x8xf32>
    %188 = math.exp %187 : vector<8x8xf32>
    %cst_59 = arith.constant dense<0.000000e+00> : vector<8xf32>
    %189 = vector.multi_reduction <add>, %188, %cst_59 [1] : vector<8x8xf32> to vector<8xf32>
    %190 = vector.shape_cast %189 : vector<8xf32> to vector<8x1xf32>
    %191 = tpu.reciprocal %190 {approx = true} : vector<8x1xf32> -> vector<8x1xf32>
    %192 = arith.mulf %190, %191 : vector<8x1xf32>
    %cst_60 = arith.constant 2.000000e+00 : f32
    %193 = vector.broadcast %cst_60 : f32 to vector<8x1xf32>
    %194 = arith.subf %193, %192 : vector<8x1xf32>
    %195 = arith.mulf %191, %194 : vector<8x1xf32>
    %196 = vector.broadcast %195 : vector<8x1xf32> to vector<8x8xf32>
    %197 = arith.mulf %188, %196 : vector<8x8xf32>
    %198 = arith.truncf %197 : vector<8x8xf32> to vector<8x8xbf16>
    %199 = vector.extract_strided_slice %2 {offsets = [0, 96], sizes = [8, 16], strides = [1, 1]} : vector<8x128xbf16> to vector<8x16xbf16>
    %c96 = arith.constant 96 : index
    %c0_61 = arith.constant 0 : index
    %200 = vector.load %arg3[%c96, %c0_61] : memref<128x128xbf16, #tpu.memory_space<vmem>>, vector<16x128xbf16>
    %cst_62 = arith.constant dense<0.000000e+00> : vector<8x128xf32>
    %201 = tpu.matmul %199, %200, %cst_62 {dimension_numbers = #tpu.dot_dimension_numbers<[1], [0], [0], [1], [0, 0, 1, 1], [], []>} : vector<8x16xbf16>, vector<16x128xbf16>, vector<8x128xf32> -> vector<8x128xf32>
    %202 = arith.truncf %201 : vector<8x128xf32> to vector<8x128xbf16>
    %cst_63 = arith.constant dense<0.000000e+00> : vector<8x128xf32>
    %203 = tpu.matmul %198, %202, %cst_63 {dimension_numbers = #tpu.dot_dimension_numbers<[1], [0], [0], [1], [0, 0, 1, 1], [], []>} : vector<8x8xbf16>, vector<8x128xbf16>, vector<8x128xf32> -> vector<8x128xf32>
    %204 = arith.addf %177, %203 : vector<8x128xf32>
    %205 = vector.extract_strided_slice %13 {offsets = [0, 112], sizes = [8, 16], strides = [1, 1]} : vector<8x128xbf16> to vector<8x16xbf16>
    %206 = vector.extract_strided_slice %14 {offsets = [0, 112], sizes = [8, 16], strides = [1, 1]} : vector<8x128xbf16> to vector<8x16xbf16>
    %cst_64 = arith.constant dense<0.000000e+00> : vector<8x8xf32>
    %207 = tpu.matmul %205, %206, %cst_64 {dimension_numbers = #tpu.dot_dimension_numbers<[1], [1], [0], [0], [0, 0, 1, 0], [], []>} : vector<8x16xbf16>, vector<8x16xbf16>, vector<8x8xf32> -> vector<8x8xf32>
    %208 = arith.addf %207, %12 : vector<8x8xf32>
    %cst_65 = arith.constant 0.0883883461 : f32
    %209 = vector.broadcast %cst_65 : f32 to vector<8x8xf32>
    %210 = arith.mulf %208, %209 : vector<8x8xf32>
    %cst_66 = arith.constant dense<0xFF800000> : vector<8xf32>
    %211 = vector.multi_reduction <maximumf>, %210, %cst_66 [1] : vector<8x8xf32> to vector<8xf32>
    %212 = vector.shape_cast %211 : vector<8xf32> to vector<8x1xf32>
    %213 = vector.broadcast %212 : vector<8x1xf32> to vector<8x8xf32>
    %214 = arith.subf %210, %213 : vector<8x8xf32>
    %215 = math.exp %214 : vector<8x8xf32>
    %cst_67 = arith.constant dense<0.000000e+00> : vector<8xf32>
    %216 = vector.multi_reduction <add>, %215, %cst_67 [1] : vector<8x8xf32> to vector<8xf32>
    %217 = vector.shape_cast %216 : vector<8xf32> to vector<8x1xf32>
    %218 = tpu.reciprocal %217 {approx = true} : vector<8x1xf32> -> vector<8x1xf32>
    %219 = arith.mulf %217, %218 : vector<8x1xf32>
    %cst_68 = arith.constant 2.000000e+00 : f32
    %220 = vector.broadcast %cst_68 : f32 to vector<8x1xf32>
    %221 = arith.subf %220, %219 : vector<8x1xf32>
    %222 = arith.mulf %218, %221 : vector<8x1xf32>
    %223 = vector.broadcast %222 : vector<8x1xf32> to vector<8x8xf32>
    %224 = arith.mulf %215, %223 : vector<8x8xf32>
    %225 = arith.truncf %224 : vector<8x8xf32> to vector<8x8xbf16>
    %226 = vector.extract_strided_slice %2 {offsets = [0, 112], sizes = [8, 16], strides = [1, 1]} : vector<8x128xbf16> to vector<8x16xbf16>
    %c112 = arith.constant 112 : index
    %c0_69 = arith.constant 0 : index
    %227 = vector.load %arg3[%c112, %c0_69] : memref<128x128xbf16, #tpu.memory_space<vmem>>, vector<16x128xbf16>
    %cst_70 = arith.constant dense<0.000000e+00> : vector<8x128xf32>
    %228 = tpu.matmul %226, %227, %cst_70 {dimension_numbers = #tpu.dot_dimension_numbers<[1], [0], [0], [1], [0, 0, 1, 1], [], []>} : vector<8x16xbf16>, vector<16x128xbf16>, vector<8x128xf32> -> vector<8x128xf32>
    %229 = arith.truncf %228 : vector<8x128xf32> to vector<8x128xbf16>
    %cst_71 = arith.constant dense<0.000000e+00> : vector<8x128xf32>
    %230 = tpu.matmul %225, %229, %cst_71 {dimension_numbers = #tpu.dot_dimension_numbers<[1], [0], [0], [1], [0, 0, 1, 1], [], []>} : vector<8x8xbf16>, vector<8x128xbf16>, vector<8x128xf32> -> vector<8x128xf32>
    %231 = arith.addf %204, %230 : vector<8x128xf32>
    %c0_72 = arith.constant 0 : index
    %c0_73 = arith.constant 0 : index
    %232 = vector.load %arg4[%c0_72, %c0_73] : memref<1x128xf32, #tpu.memory_space<vmem>>, vector<1x128xf32>
    %233 = vector.broadcast %232 : vector<1x128xf32> to vector<8x128xf32>
    %234 = arith.addf %231, %233 : vector<8x128xf32>
    %235 = arith.addf %234, %1 : vector<8x128xf32>
    %c0_74 = arith.constant 0 : index
    %c0_75 = arith.constant 0 : index
    %236 = vector.load %arg5[%c0_74, %c0_75] : memref<1x128xf32, #tpu.memory_space<vmem>>, vector<1x128xf32>
    %c0_76 = arith.constant 0 : index
    %c0_77 = arith.constant 0 : index
    %237 = vector.load %arg6[%c0_76, %c0_77] : memref<1x128xf32, #tpu.memory_space<vmem>>, vector<1x128xf32>
    %cst_78 = arith.constant dense<0.000000e+00> : vector<8xf32>
    %238 = vector.multi_reduction <add>, %235, %cst_78 [1] : vector<8x128xf32> to vector<8xf32>
    %239 = vector.shape_cast %238 : vector<8xf32> to vector<8x1xf32>
    %cst_79 = arith.constant 7.812500e-03 : f32
    %240 = vector.broadcast %cst_79 : f32 to vector<8x1xf32>
    %241 = arith.mulf %239, %240 : vector<8x1xf32>
    %242 = vector.broadcast %241 : vector<8x1xf32> to vector<8x128xf32>
    %243 = arith.subf %235, %242 : vector<8x128xf32>
    %244 = arith.mulf %243, %243 : vector<8x128xf32>
    %cst_80 = arith.constant dense<0.000000e+00> : vector<8xf32>
    %245 = vector.multi_reduction <add>, %244, %cst_80 [1] : vector<8x128xf32> to vector<8xf32>
    %246 = vector.shape_cast %245 : vector<8xf32> to vector<8x1xf32>
    %cst_81 = arith.constant 7.812500e-03 : f32
    %247 = vector.broadcast %cst_81 : f32 to vector<8x1xf32>
    %248 = arith.mulf %246, %247 : vector<8x1xf32>
    %cst_82 = arith.constant 9.99999974E-6 : f32
    %249 = vector.broadcast %cst_82 : f32 to vector<8x1xf32>
    %250 = arith.addf %248, %249 : vector<8x1xf32>
    %251 = math.rsqrt %250 : vector<8x1xf32>
    %252 = vector.broadcast %251 : vector<8x1xf32> to vector<8x128xf32>
    %253 = arith.mulf %243, %252 : vector<8x128xf32>
    %254 = vector.broadcast %236 : vector<1x128xf32> to vector<8x128xf32>
    %255 = arith.mulf %253, %254 : vector<8x128xf32>
    %256 = vector.broadcast %237 : vector<1x128xf32> to vector<8x128xf32>
    %257 = arith.addf %255, %256 : vector<8x128xf32>
    %c0_83 = arith.constant 0 : index
    %c0_84 = arith.constant 0 : index
    %c0_85 = arith.constant 0 : index
    %258 = vector.load %arg7[%c0_83, %c0_84, %c0_85] : memref<1x8x128xf32, #tpu.memory_space<vmem>>, vector<1x8x128xf32>
    %259 = vector.shape_cast %258 : vector<1x8x128xf32> to vector<8x128xf32>
    %260 = vector.shape_cast %257 : vector<8x128xf32> to vector<1x8x128xf32>
    tpu.vector_store %arg7[%c0_83, %c0_84, %c0_85], %260 {strides = array<i32>} : memref<1x8x128xf32, #tpu.memory_space<vmem>>, vector<1x8x128xf32>,
    return
  }
  func.func @transform_0(%arg0: i32) -> (i32, i32, i32) {
    %c0_i32 = arith.constant 0 : i32
    %c0_i32_0 = arith.constant 0 : i32
    %c0_i32_1 = arith.constant 0 : i32
    return %arg0, %c0_i32, %c0_i32_0 : i32, i32, i32
  }
  func.func @transform_1(%arg0: i32) -> (i32, i32) {
    %c0_i32 = arith.constant 0 : i32
    %c0_i32_0 = arith.constant 0 : i32
    %c0_i32_1 = arith.constant 0 : i32
    return %c0_i32, %c0_i32_0 : i32, i32
  }
  func.func @transform_2(%arg0: i32) -> (i32, i32) {
    %c0_i32 = arith.constant 0 : i32
    %c0_i32_0 = arith.constant 0 : i32
    %c0_i32_1 = arith.constant 0 : i32
    return %c0_i32, %c0_i32_0 : i32, i32
  }
  func.func @transform_3(%arg0: i32) -> (i32, i32) {
    %c0_i32 = arith.constant 0 : i32
    %c0_i32_0 = arith.constant 0 : i32
    %c0_i32_1 = arith.constant 0 : i32
    return %c0_i32, %c0_i32_0 : i32, i32
  }
  func.func @transform_4(%arg0: i32) -> (i32, i32) {
    %c0_i32 = arith.constant 0 : i32
    %c0_i32_0 = arith.constant 0 : i32
    %c0_i32_1 = arith.constant 0 : i32
    return %c0_i32, %c0_i32_0 : i32, i32
  }
  func.func @transform_5(%arg0: i32) -> (i32, i32) {
    %c0_i32 = arith.constant 0 : i32
    %c0_i32_0 = arith.constant 0 : i32
    %c0_i32_1 = arith.constant 0 : i32
    return %c0_i32, %c0_i32_0 : i32, i32
  }
  func.func @transform_6(%arg0: i32) -> (i32, i32, i32) {
    %c0_i32 = arith.constant 0 : i32
    %c0_i32_0 = arith.constant 0 : i32
    %c0_i32_1 = arith.constant 0 : i32
    return %arg0, %c0_i32, %c0_i32_0 : i32, i32, i32
  }
}

</mosaic_0001>

<bundles_post_ra>
// kernel: transformer_fwd.13
= control target key start
LH: loop header
LB: loop body
LE: loop exit
PB: predicated region body
PF: predicated region fallthrough
CT: control target
= control target key end

     0   :  { %12 = vsyncpa [#allocation3], 0  ;;  %s1821_s0 = inlined_call_operand.vmem [shape: f32[2,8,128], index: 0, kind: input, shape index: {}]   ;;  %s1822_s1 = inlined_call_operand.vmem [shape: s32[2,1,8], index: 1, kind: input, shape index: {}]   ;;  %s1823_s2 = inlined_call_operand.hbm [shape: bf16[128,256], index: 2, kind: input, shape index: {}]   ;;  %s1824_s3 = inlined_call_operand.hbm [shape: bf16[128,128], index: 3, kind: input, shape index: {}]   ;;  %s1825_s4 = inlined_call_operand.vmem [shape: f32[1,128], index: 4, kind: input, shape index: {}]   ;;  %s1826_s5 = inlined_call_operand.vmem [shape: f32[1,128], index: 5, kind: input, shape index: {}]   ;;  %s1827_s6 = inlined_call_operand.vmem [shape: f32[1,128], index: 6, kind: input, shape index: {}]   ;;  %s1828_s7 = inlined_call_operand.vmem [shape: f32[2,8,128], index: 7, kind: output, shape index: {}]  }
   0x1   :  { %13 = vsyncpa [#allocation5], 0  ;;  %s1636_s24 = smov 0  }
   0x2 LB: > { %s218_s27 = sshll.u32 %s1823_s2, 4  ;;  %s1645_s28 = sadd.s32 4294967295, %s1580_s24   ;;  %s1580_s24 = sphi %s1636_s24, %s19_s24   ;;  %s219_s27 = int_to_ptr.hbm [resolvable:$true] %s218_s27 }
   0x3   : > { %p1272_p0 = scmp.ge.s32.totalorder %s1580_s24, 1  ;;  %p207_p1 = scmp.lt.s32.totalorder %s1580_s24, 3 }
   0x4   : > { %p1443_p2 = scmp.eq.s32.totalorder %s1645_s28, 0  ;;  %s1582_s30 = smov [#allocation2]  }
   0x5   : > { %p1650_p3 = pnand %p1272_p0, %p207_p1  ;;  %s220_s8 = sshll.u32 %s1582_s30, 4  ;;  %s221_s8 = int_to_ptr.vmem [resolvable:$true] %s220_s8 }
   0x6   : > { %s232_s11 = sshll.u32 %s1824_s3, 4  ;;  %s1583_s12 = smov [#allocation4]   ;;  %s233_s11 = int_to_ptr.hbm [resolvable:$true] %s232_s11 }
   0x7   : > { %p1436_p4 = pneg %p1650_p3  ;;  %s234_s13 = sshll.u32 %s1583_s12, 4  ;;  %s235_s13 = int_to_ptr.vmem [resolvable:$true] %s234_s13 }
   0x8   : > { %s1584_s14 = smov 128   ;;  %s1585_s15 = smov 8  }
   0x9   : > { %p1437_p5 = pnand %p1443_p2, %p1436_p4  ;;  %s1586_s16 = smov 64  }
   0xa   : > { %s1587_s17 = smov 4   ;;  %272 = sbr.rel (%p1650_p3) target bundleno = 2222 (0x8ae), region = 48 }
   0xb   : > { %1439 = dma.hbm_to_vmem [thread:$0]  (!%p1437_p5), %s219_s27, 2048, %s221_s8, [#allocation3], %s1584_s14, %s1584_s14, %s1585_s15  }
   0xc   : > { %1442 = dma.hbm_to_vmem [thread:$0]  (!%p1437_p5), %s233_s11, 1024, %s235_s13, [#allocation5], %s1586_s16, %s1586_s16, %s1587_s17  }
   0xf   : > { %1571 = dma.done.wait (%p1443_p2), [#allocation3], 2048  }
  0x10   : > { %1573 = vsyncadd (%p1443_p2), [#allocation3], 4294965248 }
  0x11   : > { %1575 = dma.done.wait (%p1443_p2), [#allocation5], 1024  }
  0x12   : > { %1577 = vsyncadd (%p1443_p2), [#allocation5], 4294966272  ;;  %v1339_v0 = vld [vmem:[#allocation2 + $0x70] sm:$0xf]  ;;  %v1419_v1 = vld [vmem:[#allocation2 + $0x74] sm:$0xf0] }
  0x13   : > { %v1418_v2 = vld [vmem:[#allocation2 + $0x74] sm:$0xf]  ;;  %v1340_v3 = vor.u32 %v1419_v1, %v1339_v0  ;;  %v1341_v4 = vld [vmem:[#allocation2 + $0x78] sm:$0xf0]  ;;  %v1331_v5 = vld [vmem:[#allocation2 + $0x60] sm:$0xf] }
  0x14   : > { %v1417_v6 = vld [vmem:[#allocation2 + $0x64] sm:$0xf0]  ;;  %v1344_v7 = vor.u32 %v1418_v2, %v1341_v4  ;;  %v1416_v8 = vld [vmem:[#allocation2 + $0x64] sm:$0xf]  ;;  %v1333_v9 = vld [vmem:[#allocation2 + $0x68] sm:$0xf0] }
  0x15   : > { %421 = vmatpush.bf16.msra.mxu0 %v1340_v3  ;;  %v1332_v10 = vor.u32 %v1417_v6, %v1331_v5  ;;  %v1336_v11 = vor.u32 %v1416_v8, %v1333_v9  ;;  %v1323_v12 = vld [vmem:[#allocation2 + $0x50] sm:$0xf]  ;;  %v1415_v13 = vld [vmem:[#allocation2 + $0x54] sm:$0xf0]  ;;  %v1414_v14 = vld [vmem:[#allocation2 + $0x54] sm:$0xf] }
  0x16   : > { %434 = vmatpush.bf16.msra.mxu1 %v1344_v7  ;;  %v1325_v15 = vld [vmem:[#allocation2 + $0x58] sm:$0xf0]  ;;  %v1324_v16 = vor.u32 %v1415_v13, %v1323_v12  ;;  %v1315_v18 = vld [vmem:[#allocation2 + $0x40] sm:$0xf]  ;;  %v1413_v19 = vld [vmem:[#allocation2 + $0x44] sm:$0xf0] }
  0x17   : > { %v1328_v17 = vor.u32 %v1414_v14, %v1325_v15  ;;  %v1412_v20 = vld [vmem:[#allocation2 + $0x44] sm:$0xf]  ;;  %v1317_v21 = vld [vmem:[#allocation2 + $0x48] sm:$0xf0]  ;;  %v1316_v22 = vor.u32 %v1413_v19, %v1315_v18  ;;  %v1307_v24 = vld [vmem:[#allocation2 + $0x30] sm:$0xf] }
  0x18   : > { %v1320_v23 = vor.u32 %v1412_v20, %v1317_v21  ;;  %v1411_v25 = vld [vmem:[#allocation2 + $0x34] sm:$0xf0]  ;;  %v1410_v26 = vld [vmem:[#allocation2 + $0x34] sm:$0xf]  ;;  %v1309_v27 = vld [vmem:[#allocation2 + $0x38] sm:$0xf0] }
  0x19   : > { %422 = vmatpush.bf16.msra.mxu0 %v1332_v10  ;;  %p311_p6 = scmp.lt.s32.totalorder %s1645_s28, 1  ;;  %v1308_v28 = vor.u32 %v1411_v25, %v1307_v24  ;;  %v1312_v29 = vor.u32 %v1410_v26, %v1309_v27  ;;  %v1299_v30 = vld [vmem:[#allocation2 + $0x20] sm:$0xf]  ;;  %v1409_v31 = vld [vmem:[#allocation2 + $0x24] sm:$0xf0]  ;;  %vm457_vm0 = vcmask 130048  }
  0x1a   : > { %435 = vmatpush.bf16.msra.mxu1 %v1336_v11  ;;  %v1408_v32 = vld [vmem:[#allocation2 + $0x24] sm:$0xf]  ;;  %v1301_v33 = vld [vmem:[#allocation2 + $0x28] sm:$0xf0]  ;;  %v1300_v34 = vor.u32 %v1409_v31, %v1299_v30  ;;  %v1291_v36 = vld [vmem:[#allocation2 + $0x10] sm:$0xf] }
  0x1b   : > { %s1831_s28 = smov (!%p311_p6, %s1645_s28), 1  ;;  %v1304_v35 = vor.u32 %v1408_v32, %v1301_v33  ;;  %v1407_v37 = vld [vmem:[#allocation2 + $0x14] sm:$0xf0]  ;;  %v1406_v38 = vld [vmem:[#allocation2 + $0x14] sm:$0xf]  ;;  %s1588_s22 = smov 112  }
  0x1c   : > { %v1293_v39 = vld [vmem:[#allocation2 + $0x18] sm:$0xf0]  ;;  %s1279_s18 = sshll.u32 %s1831_s28, 3  ;;  %v1292_v40 = vor.u32 %v1407_v37, %v1291_v36  ;;  %v1283_v42 = vld [vmem:[#allocation2] sm:$0xf]  ;;  %s1589_s23 = smov 96  }
  0x1d   : > { %423 = vmatpush.bf16.msra.mxu0 %v1324_v16  ;;  %v1296_v41 = vor.u32 %v1406_v38, %v1293_v39  ;;  %v1405_v43 = vld [vmem:[#allocation2 + $0x4] sm:$0xf0]  ;;  %s314_s21 = scalar_lea.vmem %s1821_s0, %s1279_s18  ;;  %v1404_v44 = vld [vmem:[#allocation2 + $0x4] sm:$0xf]  ;;  %v1285_v45 = vld [vmem:[#allocation2 + $0x8] sm:$0xf0]  ;;  %s317_s29 = scalar_lea.vmem %s1822_s1, %s1831_s28 }
  0x1e   : > { %436 = vmatpush.bf16.msra.mxu1 %v1328_v17  ;;  %v1284_v46 = vor.u32 %v1405_v43, %v1283_v42  ;;  %v1681_v47 = vld [vmem:[%s314_s21] sm:$0xff]  ;;  %v1288_v48 = vor.u32 %v1404_v44, %v1285_v45  ;;  %s1590_s25 = smov 80   ;;  %v1591_v7 = vmov 0.0   ;;  %vm478_vm2 = vcmask 64512   ;;  %v1422_v37 = vld [vmem:[#allocation4 + $0x10] sm:$0xff]  ;;  %s1592_s30 = smov 64  }
  0x1f   : > { %v324_v49 = vpack.c.bf16 %v1681_v47, %v1681_v47  ;;  %v1420_v63 = vld [vmem:[#allocation4] sm:$0xff]  ;;  %vm597_vm3 = vcmask 1043456   ;;  %s1593_s8 = smov 48   ;;  %s1594_s9 = smov 16  }
  0x20   : > { %512 = vmatpush.bf16.msra.mxu3 %v1420_v63  ;;  %v447_v5 = vld [vmem:[%s317_s29] sm:$0x1]  ;;  %s1595_s10 = smov 32   ;;  %s321_s20 = scalar_lea.vmem %s1828_s7, %s1279_s18 }
  0x21   : > { %424 = vmatpush.bf16.msra.mxu0 %v1316_v22  ;;  %v567_v59 = vunpack.c.l.b16 %v324_v49  ;;  %vm448_vm1 = vcmp.eq.s32.totalorder %v447_v5, 0 }
  0x22   : > { %437 = vmatpush.bf16.msra.mxu1 %v1320_v23  ;;  %v1345_v8 = vsel %vm448_vm1, 1.0, %v1591_v7 }
  0x23   : > { %v1692_v62 = vpack.c.b16 %v567_v59, %v567_v59  ;;  %1351 = vmatmul.msk.bf16.vlgmr.msra.gmra.mxu3 %vm457_vm0, %v324_v49  ;;  %v451_v9 = vmul.f32 -1e+28, %v1345_v8 }
  0x25   : > { %425 = vmatpush.bf16.msra.mxu0 %v1308_v28  ;;  %v1712_v11 = vperm.slane %v451_v9, 0  ;;  %v1421_v28 = vld [vmem:[#allocation4 + $0x8] sm:$0xff] }
  0x26   : > { %438 = vmatpush.bf16.msra.mxu1 %v1312_v29 }
  0x29   : > { %426 = vmatpush.bf16.msra.mxu0 %v1300_v34 }
  0x2a   : > { %439 = vmatpush.bf16.msra.mxu1 %v1304_v35 }
  0x2d   : > { %427 = vmatpush.bf16.msra.mxu0 %v1292_v40 }
  0x2e   : > { %440 = vmatpush.bf16.msra.mxu1 %v1296_v41 }
  0x31   : > { %428 = vmatpush.bf16.msra.mxu0 %v1284_v46 }
  0x32   : > { %441 = vmatpush.bf16.msra.mxu1 %v1288_v48 }
  0x34   : > { %429 = vmatmul.bf16.vlgmr.msra.gmra.mxu0 %v324_v49 }
  0x35   : > { %442 = vmatmul.bf16.vlgmr.msra.gmra.mxu1 %v324_v49 }
  0x36   : > { %692 = vmatpush.bf16.msrb.mxu1 %v1422_v37 }
  0xa6   : > { %v514_v17 = vpop.f32.mrf.mxu3 }
  0xa7   : > { %v518_v19 = vpack.c.bf16 %v514_v17, %v514_v17 }
  0xa9   : > { %v618_v24 = vsel %vm597_vm3, %v518_v19, 0 }
  0xae   : > { %v516_v18 = vpop.f32.mrf.mxu3 }
  0xb1   : > { %v430_v50 = vpop.f32.mrf.mxu0 }
  0xb2   : > { %v452_v51 = vpack.c.bf16 %v430_v50, %v430_v50  ;;  %v443_v52 = vpop.f32.mrf.mxu1 }
  0xb3   : > { %v453_v53 = vpack.c.bf16 %v443_v52, %v443_v52 }
  0xb4   : > { %v520_v54 = vunpack.c.l.b16 %v452_v51 }
  0xb5   : > { %v525_v55 = vunpack.c.l.b16 %v453_v53  ;;  %v462_v56 = vsel %vm457_vm0, %v453_v53, 0 }
  0xb6   : > { %v1686_v57 = vpack.c.b16 %v520_v54, %v520_v54  ;;  %471 = vmatpush.bf16.xpose.msra.mxu2 %v462_v56 }
  0xb7   : > { %v1688_v58 = vpack.c.b16 %v525_v55, %v525_v55 }
  0xb8   : > { %522 = vrot.lane.b32.xlu2 %v1686_v57, %s1588_s22 }
  0xb9   : > { %527 = vrot.lane.b32.xlu1 %v1688_v58, %s1588_s22  ;;  %v432_v60 = vpop.f32.mrf.mxu0 }
  0xba   : > { %v445_v61 = vpop.f32.mrf.mxu1 }
  0xbd   : > { %1346 = vmatmul.msk.bf16.vlgmr.msra.gmra.mxu2 %vm457_vm0, %v452_v51 }
  0xbe   : > { %587 = vmatpush.bf16.msrb.mxu2 %v1421_v28 }
  0xc0   : > { %635 = vrot.lane.b32.xlu2 %v1688_v58, %s1589_s23 }
  0xc1   : > { %569 = vrot.lane.b32.xlu1 %v1692_v62, %s1588_s22 }
  0xc2   : > { %627 = vmatpush.bf16.msra.mxu2 %v618_v24 }
  0xc8   : > { %719 = vrot.lane.b32.xlu2 %v1686_v57, %s1590_s25 }
  0xc9   : > { %633 = vrot.lane.b32.xlu1 %v1686_v57, %s1589_s23 }
  0xd0   : > { %760 = vrot.lane.b32.xlu2 %v1692_v62, %s1590_s25 }
  0xd1   : > { %674 = vrot.lane.b32.xlu1 %v1692_v62, %s1589_s23 }
 0x112   : > { %v523_v0 = vpop.permute.xlu2 %522 }
 0x11a   : > { %v636_v1 = vpop.permute.xlu2 %635 }
 0x11b   : > { %v641_v2 = vsel %vm457_vm0, %v636_v1, 0 }
 0x11c   : > { %650 = vmatpush.bf16.xpose.msrb.mxu0 %v641_v2 }
 0x122   : > { %v720_v39 = vpop.permute.xlu2 %719 }
 0x12a   : > { %v1726_v40 = vpop.permute.xlu2 %760 }
 0x12b   : > { %v528_v3 = vpop.permute.xlu1 %527 }
 0x12c   : > { %v533_v4 = vsel %vm457_vm0, %v528_v3, 0 }
 0x12d   : > { %542 = vmatpush.bf16.xpose.msrb.mxu3 %v533_v4 }
 0x133   : > { %v570_v6 = vpop.permute.xlu1 %569 }
 0x134   : > { %1352 = vmatmul.msk.bf16.vlgmr.msrb.gmra.mxu3 %vm457_vm0, %v523_v0  ;;  %1357 = vmatmul.msk.bf16.vlgmr.msrb.gmra.mxu2 %vm457_vm0, %v570_v6 }
 0x13b   : > { %v634_v10 = vpop.permute.xlu1 %633 }
 0x13c   : > { %1360 = vmatmul.msk.bf16.vlgmr.msrb.gmra.mxu0 %vm457_vm0, %v634_v10 }
 0x140   : > { %v473_v12 = vpop.f32.mrf.mxu2 }
 0x141   : > { %v474_v13 = vadd.f32 %v473_v12, %v1712_v11 }
 0x143   : > { %v477_v14 = vmul.f32 0.088388346, %v474_v13  ;;  %v675_v38 = vpop.permute.xlu1 %674 }
 0x144   : > { %1365 = vmatmul.msk.bf16.vlgmr.msrb.gmra.mxu1 %vm457_vm0, %v675_v38 }
 0x145   : > { %v479_v15 = vsel %vm478_vm2, %v477_v14, -inf }
 0x146   : > { %480 = vmax.xlane.f32.xlu0 %v479_v15 }
 0x148   : > { %v475_v16 = vpop.f32.mrf.mxu2 }
 0x1b7   : > { %v544_v20 = vpop.f32.mrf.mxu3  ;;  %v589_v0 = vpop.f32.mrf.mxu2 }
 0x1b8   : > { %v545_v21 = vadd.f32 %v544_v20, %v1712_v11  ;;  %v593_v1 = vpack.c.bf16 %v589_v0, %v589_v0 }
 0x1b9   : > { %v481_v22 = vpop.xlane.xlu0 %480  ;;  %v652_v23 = vpop.f32.mrf.mxu0 }
 0x1ba   : > { %v548_v25 = vmul.f32 0.088388346, %v545_v21  ;;  %v482_v26 = vsub.f32 %v477_v14, %v481_v22  ;;  %v653_v27 = vadd.f32 %v652_v23, %v1712_v11  ;;  %v599_v2 = vsel %vm597_vm3, %v593_v1, 0  ;;  %v1423_v22 = vld [vmem:[#allocation4 + $0x18] sm:$0xff] }
 0x1bb   : > { %608 = vmatpush.bf16.msra.mxu3 %v599_v2  ;;  %778 = vmatpush.bf16.msra.mxu0 %v1423_v22 }
 0x1bc   : > { %v483_v29 = vmul.f32 1.442695, %v482_v26  ;;  %v656_v30 = vmul.f32 0.088388346, %v653_v27  ;;  %v549_v31 = vsel %vm478_vm2, %v548_v25, -inf }
 0x1bd   : > { %550 = vmax.xlane.f32.xlu1 %v549_v31 }
 0x1be   : > { %1472 = vpow2.f32 %v483_v29  ;;  %v657_v32 = vsel %vm478_vm2, %v656_v30, -inf  ;;  %1372 = vmatmul.msk.bf16.vlgmr.msra.gmra.mxu0 %vm457_vm0, %v1726_v40 }
 0x1bf   : > { %v546_v33 = vpop.f32.mrf.mxu3  ;;  %658 = vmax.xlane.f32.xlu2 %v657_v32  ;;  %v591_v5 = vpop.f32.mrf.mxu2 }
 0x1c1   : > { %v654_v34 = vpop.f32.mrf.mxu0  ;;  %v694_v3 = vpop.f32.mrf.mxu1 }
 0x1c2   : > { %v698_v4 = vpack.c.bf16 %v694_v3, %v694_v3 }
 0x1c4   : > { %v1473_v35 = vpop.eup %1472  ;;  %v703_v6 = vsel %vm597_vm3, %v698_v4, 0 }
 0x1c5   : > { %v485_v36 = vsel %vm478_vm2, %v1473_v35, 0.0  ;;  %712 = vmatpush.bf16.msrb.mxu3 %v703_v6 }
 0x1c6   : > { %486 = vadd.xlane.f32.xlu0 %v485_v36 }
 0x1c9   : > { %v696_v7 = vpop.f32.mrf.mxu1 }
 0x1da   : > { %721 = vrot.lane.b32.xlu0 %v1688_v58, %s1590_s25 }
 0x230   : > { %v551_v41 = vpop.xlane.xlu1 %550 }
 0x231   : > { %v552_v42 = vsub.f32 %v548_v25, %v551_v41 }
 0x232   : > { %v659_v43 = vpop.xlane.xlu2 %658 }
 0x233   : > { %v553_v44 = vmul.f32 1.442695, %v552_v42  ;;  %v660_v45 = vsub.f32 %v656_v30, %v659_v43 }
 0x235   : > { %1474 = vpow2.f32 %v553_v44  ;;  %v661_v46 = vmul.f32 1.442695, %v660_v45 }
 0x237   : > { %1476 = vpow2.f32 %v661_v46 }
 0x239   : > { %v487_v48 = vpop.xlane.xlu0 %486 }
 0x23a   : > { %1478 = vrcp.f32 %v487_v48 }
 0x23b   : > { %v1475_v49 = vpop.eup %1474  ;;  %v780_v43 = vpop.f32.mrf.mxu0 }
 0x23c   : > { %v555_v50 = vsel %vm478_vm2, %v1475_v49, 0.0  ;;  %v784_v44 = vpack.c.bf16 %v780_v43, %v780_v43 }
 0x23d   : > { %v1477_v51 = vpop.eup %1476  ;;  %556 = vadd.xlane.f32.xlu2 %v555_v50 }
 0x23e   : > { %v663_v52 = vsel %vm478_vm2, %v1477_v51, 0.0 }
 0x23f   : > { %664 = vadd.xlane.f32.xlu1 %v663_v52 }
 0x240   : > { %v1479_v53 = vpop.eup %1478 }
 0x241   : > { %v489_v54 = vmul.f32 %v1479_v53, %v487_v48  ;;  %v789_v48 = vsel %vm597_vm3, %v784_v44, 0 }
 0x242   : > { %798 = vmatpush.bf16.msra.mxu1 %v789_v48 }
 0x243   : > { %v490_v55 = vsub.f32 2.0, %v489_v54  ;;  %v782_v52 = vpop.f32.mrf.mxu0 }
 0x245   : > { %v491_v56 = vmul.f32 %v1479_v53, %v490_v55  ;;  %v1425_v55 = vld [vmem:[#allocation4 + $0x28] sm:$0xff] }
 0x247   : > { %v492_v59 = vmul.f32 %v1473_v35, %v491_v56  ;;  %v1424_v56 = vld [vmem:[#allocation4 + $0x20] sm:$0xff] }
 0x249   : > { %v493_v60 = vpack.c.bf16 %v492_v59, %v492_v59 }
 0x24b   : > { %1359 = vmatmul.msk.bf16.vlgmr.msra.gmra.mxu2 %vm478_vm2, %v493_v60 }
 0x24c   : > { %v722_v61 = vpop.permute.xlu0 %721 }
 0x24d   : > { %v727_v63 = vsel %vm457_vm0, %v722_v61, 0 }
 0x24e   : > { %736 = vmatpush.bf16.xpose.msrb.mxu2 %v727_v63 }
 0x255   : > { %807 = vrot.lane.b32.xlu2 %v1688_v58, %s1592_s30 }
 0x256   : > { %864 = vmatpush.bf16.msra.mxu2 %v1424_v56 }
 0x258   : > { %805 = vrot.lane.b32.xlu1 %v1686_v57, %s1592_s30 }
 0x25b   : > { %1367 = vmatmul.msk.bf16.vlgmr.msrb.gmra.mxu2 %vm457_vm0, %v720_v39 }
 0x25d   : > { %891 = vrot.lane.b32.xlu2 %v1686_v57, %s1593_s8 }
 0x260   : > { %932 = vrot.lane.b32.xlu1 %v1692_v62, %s1593_s8 }
 0x2b0   : > { %v557_v8 = vpop.xlane.xlu2 %556 }
 0x2b1   : > { %1480 = vrcp.f32 %v557_v8 }
 0x2b2   : > { %v665_v9 = vpop.xlane.xlu1 %664 }
 0x2b3   : > { %1482 = vrcp.f32 %v665_v9 }
 0x2b7   : > { %v1481_v10 = vpop.eup %1480 }
 0x2b8   : > { %v559_v12 = vmul.f32 %v1481_v10, %v557_v8  ;;  %v808_v17 = vpop.permute.xlu2 %807 }
 0x2b9   : > { %v1483_v15 = vpop.eup %1482  ;;  %v813_v20 = vsel %vm457_vm0, %v808_v17, 0 }
 0x2ba   : > { %v560_v13 = vsub.f32 2.0, %v559_v12  ;;  %v667_v19 = vmul.f32 %v1483_v15, %v665_v9 }
 0x2bc   : > { %v561_v14 = vmul.f32 %v1481_v10, %v560_v13  ;;  %v668_v21 = vsub.f32 2.0, %v667_v19 }
 0x2be   : > { %v562_v16 = vmul.f32 %v1475_v49, %v561_v14  ;;  %v669_v23 = vmul.f32 %v1483_v15, %v668_v21 }
 0x2c0   : > { %v563_v18 = vpack.c.bf16 %v562_v16, %v562_v16  ;;  %v670_v24 = vmul.f32 %v1477_v51, %v669_v23  ;;  %v892_v60 = vpop.permute.xlu2 %891 }
 0x2c2   : > { %1358 = vmatmul.msk.bf16.vlgmr.msra.gmra.mxu3 %vm478_vm2, %v563_v18  ;;  %v671_v26 = vpack.c.bf16 %v670_v24, %v670_v24 }
 0x2c3   : > { %822 = vmatpush.bf16.xpose.msra.mxu3 %v813_v20 }
 0x2ca   : > { %v806_v30 = vpop.permute.xlu1 %805 }
 0x2ce   : > { %v629_v25 = vpop.f32.mrf.mxu2 }
 0x2d2   : > { %1366 = vmatmul.msk.bf16.vlgmr.msrb.gmra.mxu3 %vm478_vm2, %v671_v26  ;;  %v933_v59 = vpop.permute.xlu1 %932 }
 0x2d3   : > { %950 = vmatpush.bf16.msrb.mxu3 %v1425_v55 }
 0x2d6   : > { %v631_v27 = vpop.f32.mrf.mxu2 }
 0x2de   : > { %v738_v28 = vpop.f32.mrf.mxu2 }
 0x2df   : > { %v739_v29 = vadd.f32 %v738_v28, %v1712_v11 }
 0x2e1   : > { %v742_v31 = vmul.f32 0.088388346, %v739_v29 }
 0x2e2   : > { %1374 = vmatmul.msk.bf16.vlgmr.msra.gmra.mxu3 %vm457_vm0, %v806_v30 }
 0x2e3   : > { %v743_v32 = vsel %vm478_vm2, %v742_v31, -inf }
 0x2e4   : > { %744 = vmax.xlane.f32.xlu0 %v743_v32 }
 0x2e6   : > { %v740_v33 = vpop.f32.mrf.mxu2 }
 0x2f2   : > { %1386 = vmatmul.msk.bf16.vlgmr.msrb.gmra.mxu3 %vm457_vm0, %v933_v59 }
 0x345   : > { %v610_v34 = vpop.f32.mrf.mxu3 }
 0x346   : > { %v630_v36 = vadd.f32 %v629_v25, %v610_v34 }
 0x34d   : > { %v612_v35 = vpop.f32.mrf.mxu3 }
 0x355   : > { %v714_v37 = vpop.f32.mrf.mxu3 }
 0x356   : > { %v1751_v38 = vadd.f32 %v714_v37, %v630_v36 }
 0x357   : > { %v745_v39 = vpop.xlane.xlu0 %744 }
 0x358   : > { %v746_v40 = vsub.f32 %v742_v31, %v745_v39 }
 0x35a   : > { %v747_v41 = vmul.f32 1.442695, %v746_v40 }
 0x35c   : > { %1484 = vpow2.f32 %v747_v41 }
 0x35d   : > { %v716_v42 = vpop.f32.mrf.mxu3 }
 0x362   : > { %v1485_v45 = vpop.eup %1484 }
 0x363   : > { %v749_v46 = vsel %vm478_vm2, %v1485_v45, 0.0 }
 0x364   : > { %750 = vadd.xlane.f32.xlu0 %v749_v46 }
 0x365   : > { %v824_v49 = vpop.f32.mrf.mxu3 }
 0x366   : > { %v825_v50 = vadd.f32 %v824_v49, %v1712_v11 }
 0x368   : > { %v828_v51 = vmul.f32 0.088388346, %v825_v50 }
 0x36a   : > { %v829_v53 = vsel %vm478_vm2, %v828_v51, -inf }
 0x36b   : > { %830 = vmax.xlane.f32.xlu2 %v829_v53 }
 0x36d   : > { %v826_v54 = vpop.f32.mrf.mxu3 }
 0x375   : > { %v952_v14 = vpop.f32.mrf.mxu3 }
 0x376   : > { %v956_v15 = vpack.c.bf16 %v952_v14, %v952_v14 }
 0x378   : > { %893 = vrot.lane.b32.xlu0 %v1688_v58, %s1593_s8  ;;  %v961_v16 = vsel %vm597_vm3, %v956_v15, 0 }
 0x379   : > { %970 = vmatpush.bf16.msrb.mxu2 %v961_v16 }
 0x37d   : > { %v954_v17 = vpop.f32.mrf.mxu3 }
 0x380   : > { %846 = vrot.lane.b32.xlu0 %v1692_v62, %s1592_s30 }
 0x3d7   : > { %v751_v61 = vpop.xlane.xlu0 %750 }
 0x3d8   : > { %1486 = vrcp.f32 %v751_v61 }
 0x3de   : > { %v1487_v63 = vpop.eup %1486  ;;  %v831_v0 = vpop.xlane.xlu2 %830 }
 0x3df   : > { %v753_v1 = vmul.f32 %v1487_v63, %v751_v61  ;;  %v832_v2 = vsub.f32 %v828_v51, %v831_v0 }
 0x3e1   : > { %v754_v3 = vsub.f32 2.0, %v753_v1  ;;  %v833_v4 = vmul.f32 1.442695, %v832_v2 }
 0x3e3   : > { %v755_v5 = vmul.f32 %v1487_v63, %v754_v3  ;;  %1488 = vpow2.f32 %v833_v4  ;;  %v1426_v63 = vld [vmem:[#allocation4 + $0x30] sm:$0xff] }
 0x3e5   : > { %v756_v6 = vmul.f32 %v1485_v45, %v755_v5 }
 0x3e7   : > { %v757_v7 = vpack.c.bf16 %v756_v6, %v756_v6 }
 0x3e9   : > { %v1489_v8 = vpop.eup %1488  ;;  %1373 = vmatmul.msk.bf16.vlgmr.msra.gmra.mxu1 %vm478_vm2, %v757_v7 }
 0x3ea   : > { %v894_v9 = vpop.permute.xlu0 %893  ;;  %v835_v10 = vsel %vm478_vm2, %v1489_v8, 0.0 }
 0x3eb   : > { %v899_v12 = vsel %vm457_vm0, %v894_v9, 0  ;;  %836 = vadd.xlane.f32.xlu1 %v835_v10  ;;  %v1427_v10 = vld [vmem:[#allocation4 + $0x38] sm:$0xff] }
 0x3ec   : > { %908 = vmatpush.bf16.xpose.msrb.mxu1 %v899_v12 }
 0x3f2   : > { %v847_v13 = vpop.permute.xlu0 %846 }
 0x3f3   : > { %1379 = vmatmul.msk.bf16.vlgmr.msra.gmra.mxu2 %vm457_vm0, %v847_v13 }
 0x3f4   : > { %1036 = vmatpush.bf16.msra.mxu1 %v1426_v63 }
 0x3f9   : > { %1381 = vmatmul.msk.bf16.vlgmr.msrb.gmra.mxu1 %vm457_vm0, %v892_v60 }
 0x404   : > { %1065 = vrot.lane.b32.xlu1 %v1688_v58, %s1594_s9 }
 0x40c   : > { %1018 = vrot.lane.b32.xlu1 %v1692_v62, %s1595_s10 }
 0x45e   : > { %v837_v18 = vpop.xlane.xlu1 %836 }
 0x45f   : > { %1490 = vrcp.f32 %v837_v18 }
 0x465   : > { %v1491_v21 = vpop.eup %1490 }
 0x466   : > { %v800_v19 = vpop.f32.mrf.mxu1  ;;  %v839_v22 = vmul.f32 %v1491_v21, %v837_v18 }
 0x467   : > { %v804_v20 = vadd.f32 %v800_v19, %v1751_v38 }
 0x468   : > { %v840_v24 = vsub.f32 2.0, %v839_v22 }
 0x46a   : > { %v841_v25 = vmul.f32 %v1491_v21, %v840_v24 }
 0x46c   : > { %v842_v28 = vmul.f32 %v1489_v8, %v841_v25 }
 0x46e   : > { %v802_v23 = vpop.f32.mrf.mxu1  ;;  %v843_v35 = vpack.c.bf16 %v842_v28, %v842_v28 }
 0x476   : > { %v866_v26 = vpop.f32.mrf.mxu2  ;;  %v910_v27 = vpop.f32.mrf.mxu1 }
 0x477   : > { %v870_v29 = vpack.c.bf16 %v866_v26, %v866_v26  ;;  %v911_v30 = vadd.f32 %v910_v27, %v1712_v11  ;;  %v1066_v31 = vpop.permute.xlu1 %1065 }
 0x478   : > { %v1071_v32 = vsel %vm457_vm0, %v1066_v31, 0 }
 0x479   : > { %v875_v33 = vsel %vm597_vm3, %v870_v29, 0  ;;  %v914_v34 = vmul.f32 0.088388346, %v911_v30  ;;  %1080 = vmatpush.bf16.xpose.msra.mxu2 %v1071_v32 }
 0x47a   : > { %884 = vmatpush.bf16.msrb.mxu0 %v875_v33 }
 0x47b   : > { %v915_v36 = vsel %vm478_vm2, %v914_v34, -inf }
 0x47c   : > { %916 = vmax.xlane.f32.xlu0 %v915_v36 }
 0x47d   : > { %1380 = vmatmul.msk.bf16.vlgmr.msrb.gmra.mxu0 %vm478_vm2, %v843_v35 }
 0x47e   : > { %v912_v37 = vpop.f32.mrf.mxu1  ;;  %v868_v38 = vpop.f32.mrf.mxu2 }
 0x47f   : > { %v1019_v1 = vpop.permute.xlu1 %1018 }
 0x480   : > { %1393 = vmatmul.msk.bf16.vlgmr.msra.gmra.mxu1 %vm457_vm0, %v1019_v1 }
 0x490   : > { %979 = vrot.lane.b32.xlu0 %v1688_v58, %s1595_s10 }
 0x498   : > { %1063 = vrot.lane.b32.xlu0 %v1686_v57, %s1594_s9 }
 0x4a0   : > { %1104 = vrot.lane.b32.xlu0 %v1692_v62, %s1594_s9 }
 0x4ef   : > { %v917_v39 = vpop.xlane.xlu0 %916 }
 0x4f0   : > { %v918_v40 = vsub.f32 %v914_v34, %v917_v39 }
 0x4f2   : > { %v919_v41 = vmul.f32 1.442695, %v918_v40 }
 0x4f4   : > { %1492 = vpow2.f32 %v919_v41 }
 0x4fa   : > { %v1493_v42 = vpop.eup %1492  ;;  %v886_v43 = vpop.f32.mrf.mxu0 }
 0x4fb   : > { %v890_v44 = vadd.f32 %v886_v43, %v804_v20  ;;  %v921_v45 = vsel %vm478_vm2, %v1493_v42, 0.0 }
 0x4fc   : > { %922 = vadd.xlane.f32.xlu2 %v921_v45 }
 0x4fd   : > { %v1038_v18 = vpop.f32.mrf.mxu1 }
 0x502   : > { %v980_v46 = vpop.permute.xlu0 %979  ;;  %v888_v48 = vpop.f32.mrf.mxu0 }
 0x503   : > { %v985_v58 = vsel %vm457_vm0, %v980_v46, 0  ;;  %v1469_v48 = vld [vmem:[%s1825_s4] ss:$0 sm:$0xff] }
 0x504   : > { %994 = vmatpush.bf16.xpose.msra.mxu0 %v985_v58 }
 0x505   : > { %v1040_v20 = vpop.f32.mrf.mxu1 }
 0x50a   : > { %v1064_v56 = vpop.permute.xlu0 %1063 }
 0x50c   : > { %1122 = vmatpush.bf16.msrb.mxu0 %v1427_v10 }
 0x512   : > { %v1105_v12 = vpop.permute.xlu0 %1104 }
 0x514   : > { %977 = vrot.lane.b32.xlu2 %v1686_v57, %s1595_s10 }
 0x56f   : > { %v923_v49 = vpop.xlane.xlu2 %922 }
 0x570   : > { %1494 = vrcp.f32 %v923_v49 }
 0x576   : > { %v1495_v62 = vpop.eup %1494 }
 0x577   : > { %v925_v50 = vmul.f32 %v1495_v62, %v923_v49  ;;  %v978_v51 = vpop.permute.xlu2 %977 }
 0x578   : > { %1388 = vmatmul.msk.bf16.vlgmr.msra.gmra.mxu0 %vm457_vm0, %v978_v51 }
 0x579   : > { %v926_v52 = vsub.f32 2.0, %v925_v50 }
 0x57b   : > { %v927_v53 = vmul.f32 %v1495_v62, %v926_v52 }
 0x57d   : > { %v928_v54 = vmul.f32 %v1493_v42, %v927_v53 }
 0x57f   : > { %v929_v55 = vpack.c.bf16 %v928_v54, %v928_v54 }
 0x581   : > { %1387 = vmatmul.msk.bf16.vlgmr.msrb.gmra.mxu2 %vm478_vm2, %v929_v55 }
 0x588   : > { %1400 = vmatmul.msk.bf16.vlgmr.msrb.gmra.mxu0 %vm457_vm0, %v1105_v12 }
 0x591   : > { %1395 = vmatmul.msk.bf16.vlgmr.msra.gmra.mxu2 %vm457_vm0, %v1064_v56 }
 0x5f5   : > { %v996_v59 = vpop.f32.mrf.mxu0 }
 0x5f6   : > { %v997_v60 = vadd.f32 %v996_v59, %v1712_v11 }
 0x5f8   : > { %v1000_v57 = vmul.f32 0.088388346, %v997_v60 }
 0x5fa   : > { %v1001_v61 = vsel %vm478_vm2, %v1000_v57, -inf }
 0x5fb   : > { %1002 = vmax.xlane.f32.xlu2 %v1001_v61 }
 0x5fd   : > { %v998_v0 = vpop.f32.mrf.mxu0 }
 0x604   : > { %v972_v2 = vpop.f32.mrf.mxu2 }
 0x605   : > { %v976_v3 = vadd.f32 %v972_v2, %v890_v44  ;;  %v1124_v26 = vpop.f32.mrf.mxu0 }
 0x606   : > { %v1128_v27 = vpack.c.bf16 %v1124_v26, %v1124_v26 }
 0x608   : > { %v1133_v28 = vsel %vm597_vm3, %v1128_v27, 0 }
 0x609   : > { %1142 = vmatpush.bf16.msrb.mxu1 %v1133_v28 }
 0x60c   : > { %v974_v4 = vpop.f32.mrf.mxu2 }
 0x60d   : > { %v1126_v29 = vpop.f32.mrf.mxu0  ;;  %v1471_v4 = vld [vmem:[%s1827_s6] ss:$0 sm:$0xff] }
 0x614   : > { %v1082_v5 = vpop.f32.mrf.mxu2 }
 0x615   : > { %v1083_v6 = vadd.f32 %v1082_v5, %v1712_v11  ;;  %v1042_v11 = vpack.c.bf16 %v1038_v18, %v1038_v18 }
 0x617   : > { %v1086_v7 = vmul.f32 0.088388346, %v1083_v6  ;;  %v1047_v19 = vsel %vm597_vm3, %v1042_v11, 0 }
 0x618   : > { %1056 = vmatpush.bf16.msra.mxu3 %v1047_v19 }
 0x619   : > { %v1087_v8 = vsel %vm478_vm2, %v1086_v7, -inf }
 0x61a   : > { %1088 = vmax.xlane.f32.xlu1 %v1087_v8 }
 0x61c   : > { %v1084_v9 = vpop.f32.mrf.mxu2 }
 0x66e   : > { %v1003_v13 = vpop.xlane.xlu2 %1002 }
 0x66f   : > { %v1004_v14 = vsub.f32 %v1000_v57, %v1003_v13 }
 0x671   : > { %v1005_v15 = vmul.f32 1.442695, %v1004_v14 }
 0x673   : > { %1496 = vpow2.f32 %v1005_v15 }
 0x679   : > { %v1497_v16 = vpop.eup %1496 }
 0x67a   : > { %v1007_v17 = vsel %vm478_vm2, %v1497_v16, 0.0 }
 0x67b   : > { %1008 = vadd.xlane.f32.xlu0 %v1007_v17 }
 0x68d   : > { %v1089_v21 = vpop.xlane.xlu1 %1088 }
 0x68e   : > { %v1090_v22 = vsub.f32 %v1086_v7, %v1089_v21 }
 0x690   : > { %v1091_v23 = vmul.f32 1.442695, %v1090_v22 }
 0x692   : > { %1498 = vpow2.f32 %v1091_v23 }
 0x698   : > { %v1499_v24 = vpop.eup %1498 }
 0x699   : > { %v1093_v25 = vsel %vm478_vm2, %v1499_v24, 0.0 }
 0x69a   : > { %1094 = vadd.xlane.f32.xlu2 %v1093_v25 }
 0x6ee   : > { %v1009_v30 = vpop.xlane.xlu0 %1008 }
 0x6ef   : > { %1500 = vrcp.f32 %v1009_v30 }
 0x6f5   : > { %v1501_v31 = vpop.eup %1500 }
 0x6f6   : > { %v1011_v32 = vmul.f32 %v1501_v31, %v1009_v30 }
 0x6f8   : > { %v1012_v33 = vsub.f32 2.0, %v1011_v32 }
 0x6fa   : > { %v1013_v34 = vmul.f32 %v1501_v31, %v1012_v33 }
 0x6fc   : > { %v1014_v35 = vmul.f32 %v1497_v16, %v1013_v34 }
 0x6fe   : > { %v1015_v36 = vpack.c.bf16 %v1014_v35, %v1014_v35 }
 0x700   : > { %1394 = vmatmul.msk.bf16.vlgmr.msra.gmra.mxu3 %vm478_vm2, %v1015_v36 }
 0x70d   : > { %v1095_v37 = vpop.xlane.xlu2 %1094 }
 0x70e   : > { %1502 = vrcp.f32 %v1095_v37 }
 0x714   : > { %v1503_v38 = vpop.eup %1502 }
 0x715   : > { %v1097_v39 = vmul.f32 %v1503_v38, %v1095_v37 }
 0x717   : > { %v1098_v40 = vsub.f32 2.0, %v1097_v39 }
 0x719   : > { %v1099_v41 = vmul.f32 %v1503_v38, %v1098_v40 }
 0x71b   : > { %v1100_v42 = vmul.f32 %v1499_v24, %v1099_v41 }
 0x71d   : > { %v1101_v43 = vpack.c.bf16 %v1100_v42, %v1100_v42 }
 0x71f   : > { %1401 = vmatmul.msk.bf16.vlgmr.msrb.gmra.mxu1 %vm478_vm2, %v1101_v43 }
 0x783   : > { %v1058_v44 = vpop.f32.mrf.mxu3 }
 0x784   : > { %v1062_v46 = vadd.f32 %v1058_v44, %v976_v3 }
 0x78b   : > { %v1060_v45 = vpop.f32.mrf.mxu3 }
 0x79c   : > { %v1144_v58 = vpop.f32.mrf.mxu1 }
 0x79d   : > { %v1148_v49 = vadd.f32 %v1144_v58, %v1062_v46 }
 0x79f   : > { %v1153_v62 = vadd.f32 %v1469_v48, %v1148_v49 }
 0x7a1   : > { %v1154_v50 = vadd.f32 %v1153_v62, %v1681_v47  ;;  %v1470_v47 = vld [vmem:[%s1826_s5] ss:$0 sm:$0xff] }
 0x7a3   : > { %1157 = vadd.xlane.f32.xlu1 %v1154_v50 }
 0x7a4   : > { %v1146_v51 = vpop.f32.mrf.mxu1 }
 0x816   : > { %v1158_v52 = vpop.xlane.xlu1 %1157 }
 0x817   : > { %v1159_v53 = vmul.f32 0.0078125, %v1158_v52 }
 0x819   : > { %v1160_v54 = vsub.f32 %v1154_v50, %v1159_v53 }
 0x81b   : > { %v1161_v55 = vmul.f32 %v1160_v54, %v1160_v54 }
 0x81d   : > { %1162 = vadd.xlane.f32.xlu0 %v1161_v55 }
 0x890   : > { %v1163_v56 = vpop.xlane.xlu0 %1162 }
 0x891   : > { %v1164_v59 = vmul.f32 0.0078125, %v1163_v56 }
 0x893   : > { %v1165_v60 = vadd.f32 1e-05, %v1164_v59 }
 0x895   : > { %1504 = vrsqrt.f32 %v1165_v60  ;;  %vm1172_vm5 = vweird.f32 %v1165_v60 }
 0x89b   : > { %v1505_v57 = vpop.eup %1504 }
 0x89c   : > { %v1167_v61 = vmul.f32 %v1505_v57, %v1165_v60  ;;  %vm1173_vm4 = vweird.f32 %v1505_v57 }
 0x89d   : > { %vm1174_vm6 = vmor %vm1172_vm5, %vm1173_vm4 }
 0x89e   : > { %v1168_v63 = vmul.f32 %v1505_v57, %v1167_v61 }
 0x8a0   : > { %v1169_v0 = vmul.f32 0.5, %v1168_v63 }
 0x8a2   : > { %v1170_v1 = vsub.f32 1.5, %v1169_v0 }
 0x8a4   : > { %v1171_v2 = vmul.f32 %v1505_v57, %v1170_v1 }
 0x8a6   : > { %v1175_v3 = vsel %vm1174_vm6, %v1505_v57, %v1171_v2 }
 0x8a7   : > { %v1176_v5 = vmul.f32 %v1175_v3, %v1160_v54 }
 0x8a9   : > { %v1180_v6 = vmul.f32 %v1470_v47, %v1176_v5 }
 0x8ab   : > { %v1184_v7 = vadd.f32 %v1471_v4, %v1180_v6 }
 0x8ad   : > { %1185 = vst [vmem:[%s321_s20] sm:$0xff] %v1184_v7 }
 0x8ae PF: > { %s19_s24 = sadd.s32 1, %s1580_s24  }
 0x8af   : > { %p16_p7 = scmp.ge.s32.totalorder %s19_s24, 4  }
 0x8b1   :  { %18 = sbr.rel (!%p16_p7) target bundleno = 2 (0x2), region = 90 }
 0x8b6   :  { %1205 = vsyncpa [#allocation3], 1 }
 0x8b7   :  { %1207 = vsyncpa [#allocation3 + $0x1], 1 }
 0x8b8   :  { %1208 = vsyncpa [#allocation5], 1 }

// kernel: transformer_fwd.14
= control target key start
LH: loop header
LB: loop body
LE: loop exit
PB: predicated region body
PF: predicated region fallthrough
CT: control target
= control target key end

     0   :  { %12 = vsyncpa [#allocation3], 0  ;;  %s1556_s0 = inlined_call_operand.vmem [shape: f32[16,128], index: 0, kind: input, shape index: {}]   ;;  %s1557_s1 = inlined_call_operand.hbm [shape: bf16[128,512], index: 1, kind: input, shape index: {}]   ;;  %s1558_s2 = inlined_call_operand.vmem [shape: f32[1,512], index: 2, kind: input, shape index: {}]   ;;  %s1559_s3 = inlined_call_operand.hbm [shape: bf16[512,128], index: 3, kind: input, shape index: {}]   ;;  %s1560_s4 = inlined_call_operand.vmem [shape: f32[1,128], index: 4, kind: input, shape index: {}]   ;;  %s1561_s5 = inlined_call_operand.vmem [shape: f32[1,128], index: 5, kind: input, shape index: {}]   ;;  %s1562_s6 = inlined_call_operand.vmem [shape: f32[1,128], index: 6, kind: input, shape index: {}]   ;;  %s1563_s7 = inlined_call_operand.vmem [shape: f32[16,128], index: 7, kind: output, shape index: {}]  }
   0x1   :  { %13 = vsyncpa [#allocation5], 0  ;;  %s1484_s24 = smov 0  }
   0x2 LB: > { %s213_s27 = sshll.u32 %s1557_s1, 4  ;;  %s1493_s28 = sadd.s32 4294967295, %s1436_s24   ;;  %s1436_s24 = sphi %s1484_s24, %s19_s24   ;;  %s214_s27 = int_to_ptr.hbm [resolvable:$true] %s213_s27 }
   0x3   : > { %p993_p0 = scmp.ge.s32.totalorder %s1436_s24, 1  ;;  %p202_p1 = scmp.lt.s32.totalorder %s1436_s24, 3 }
   0x4   : > { %p1339_p2 = scmp.eq.s32.totalorder %s1493_s28, 0  ;;  %s1438_s30 = smov [#allocation2]  }
   0x5   : > { %p1498_p3 = pnand %p993_p0, %p202_p1  ;;  %s215_s8 = sshll.u32 %s1438_s30, 4  ;;  %s216_s8 = int_to_ptr.vmem [resolvable:$true] %s215_s8 }
   0x6   : > { %s230_s11 = sshll.u32 %s1559_s3, 4  ;;  %s1439_s12 = smov [#allocation4]   ;;  %s231_s11 = int_to_ptr.hbm [resolvable:$true] %s230_s11 }
   0x7   : > { %p1332_p4 = pneg %p1498_p3  ;;  %s232_s13 = sshll.u32 %s1439_s12, 4  ;;  %s233_s13 = int_to_ptr.vmem [resolvable:$true] %s232_s13 }
   0x8   : > { %s1440_s14 = smov 256   ;;  %s1441_s15 = smov 16  }
   0x9   : > { %p1333_p5 = pnand %p1339_p2, %p1332_p4  ;;  %s1442_s16 = smov 64  }
   0xa   : > { %s1443_s17 = smov 4   ;;  %264 = sbr.rel (%p1498_p3) target bundleno = 596 (0x254), region = 48 }
   0xb   : > { %1335 = dma.hbm_to_vmem [thread:$0]  (!%p1333_p5), %s214_s27, 4096, %s216_s8, [#allocation3], %s1440_s14, %s1440_s14, %s1441_s15  }
   0xc   : > { %1338 = dma.hbm_to_vmem [thread:$0]  (!%p1333_p5), %s231_s11, 4096, %s233_s13, [#allocation5], %s1442_s16, %s1442_s16, %s1443_s17  }
   0xf   : > { %1427 = dma.done.wait (%p1339_p2), [#allocation3], 4096  }
  0x10   : > { %1429 = vsyncadd (%p1339_p2), [#allocation3], 4294963200 }
  0x11   : > { %1431 = dma.done.wait (%p1339_p2), [#allocation5], 4096  }
  0x12   : > { %1433 = vsyncadd (%p1339_p2), [#allocation5], 4294963200  ;;  %v1116_v0 = vld [vmem:[#allocation2 + $0xe0] sm:$0xf]  ;;  %v1290_v1 = vld [vmem:[#allocation2 + $0xec] sm:$0xf0] }
  0x13   : > { %v1124_v2 = vld [vmem:[#allocation2 + $0xe8] sm:$0xf]  ;;  %v1117_v3 = vor.u32 %v1290_v1, %v1116_v0  ;;  %v1291_v4 = vld [vmem:[#allocation2 + $0xf4] sm:$0xf0]  ;;  %v1289_v5 = vld [vmem:[#allocation2 + $0xec] sm:$0xf] }
  0x14   : > { %v1126_v6 = vld [vmem:[#allocation2 + $0xf8] sm:$0xf0]  ;;  %v1125_v7 = vor.u32 %v1291_v4, %v1124_v2  ;;  %v1288_v9 = vld [vmem:[#allocation2 + $0xe4] sm:$0xf]  ;;  %v1118_v10 = vld [vmem:[#allocation2 + $0xf0] sm:$0xf0] }
  0x15   : > { %v1129_v8 = vor.u32 %v1289_v5, %v1126_v6  ;;  %v1100_v11 = vld [vmem:[#allocation2 + $0xc0] sm:$0xf]  ;;  %512 = vmatpush.bf16.msra.mxu0 %v1117_v3  ;;  %v1121_v12 = vor.u32 %v1288_v9, %v1118_v10  ;;  %v1286_v13 = vld [vmem:[#allocation2 + $0xcc] sm:$0xf0]  ;;  %v1108_v14 = vld [vmem:[#allocation2 + $0xc8] sm:$0xf] }
  0x16   : > { %v1287_v15 = vld [vmem:[#allocation2 + $0xd4] sm:$0xf0]  ;;  %538 = vmatpush.bf16.msra.mxu2 %v1125_v7  ;;  %v1101_v16 = vor.u32 %v1286_v13, %v1100_v11  ;;  %v1285_v18 = vld [vmem:[#allocation2 + $0xcc] sm:$0xf]  ;;  %v1110_v19 = vld [vmem:[#allocation2 + $0xd8] sm:$0xf0] }
  0x17   : > { %551 = vmatpush.bf16.msra.mxu3 %v1129_v8  ;;  %v1109_v17 = vor.u32 %v1287_v15, %v1108_v14  ;;  %v1284_v20 = vld [vmem:[#allocation2 + $0xc4] sm:$0xf]  ;;  %525 = vmatpush.bf16.msra.mxu1 %v1121_v12  ;;  %v1113_v21 = vor.u32 %v1285_v18, %v1110_v19  ;;  %v1102_v22 = vld [vmem:[#allocation2 + $0xd0] sm:$0xf0]  ;;  %v1084_v23 = vld [vmem:[#allocation2 + $0xa0] sm:$0xf] }
  0x18   : > { %v1282_v24 = vld [vmem:[#allocation2 + $0xac] sm:$0xf0]  ;;  %v1105_v25 = vor.u32 %v1284_v20, %v1102_v22  ;;  %v1092_v26 = vld [vmem:[#allocation2 + $0xa8] sm:$0xf]  ;;  %v1283_v27 = vld [vmem:[#allocation2 + $0xb4] sm:$0xf0] }
  0x19   : > { %v1281_v28 = vld [vmem:[#allocation2 + $0xac] sm:$0xf]  ;;  %513 = vmatpush.bf16.msra.mxu0 %v1101_v16  ;;  %v1085_v29 = vor.u32 %v1282_v24, %v1084_v23  ;;  %v1094_v30 = vld [vmem:[#allocation2 + $0xb8] sm:$0xf0]  ;;  %v1280_v31 = vld [vmem:[#allocation2 + $0xa4] sm:$0xf]  ;;  %v1093_v33 = vor.u32 %v1283_v27, %v1092_v26 }
  0x1a   : > { %v1086_v32 = vld [vmem:[#allocation2 + $0xb0] sm:$0xf0]  ;;  %539 = vmatpush.bf16.msra.mxu2 %v1109_v17  ;;  %v1097_v34 = vor.u32 %v1281_v28, %v1094_v30  ;;  %v1068_v35 = vld [vmem:[#allocation2 + $0x80] sm:$0xf]  ;;  %v1278_v36 = vld [vmem:[#allocation2 + $0x8c] sm:$0xf0] }
  0x1b   : > { %552 = vmatpush.bf16.msra.mxu3 %v1113_v21  ;;  %v1076_v37 = vld [vmem:[#allocation2 + $0x88] sm:$0xf]  ;;  %526 = vmatpush.bf16.msra.mxu1 %v1105_v25  ;;  %v1089_v38 = vor.u32 %v1280_v31, %v1086_v32  ;;  %v1279_v39 = vld [vmem:[#allocation2 + $0x94] sm:$0xf0]  ;;  %v1277_v40 = vld [vmem:[#allocation2 + $0x8c] sm:$0xf]  ;;  %v1069_v44 = vor.u32 %v1278_v36, %v1068_v35 }
  0x1c   : > { %v1078_v41 = vld [vmem:[#allocation2 + $0x98] sm:$0xf0]  ;;  %v1276_v42 = vld [vmem:[#allocation2 + $0x84] sm:$0xf]  ;;  %v1070_v43 = vld [vmem:[#allocation2 + $0x90] sm:$0xf0]  ;;  %v1077_v45 = vor.u32 %v1279_v39, %v1076_v37 }
  0x1d   : > { %514 = vmatpush.bf16.msra.mxu0 %v1085_v29  ;;  %p300_p6 = scmp.lt.s32.totalorder %s1493_s28, 1  ;;  %v1081_v46 = vor.u32 %v1277_v40, %v1078_v41  ;;  %v1052_v47 = vld [vmem:[#allocation2 + $0x60] sm:$0xf]  ;;  %v1274_v48 = vld [vmem:[#allocation2 + $0x6c] sm:$0xf0]  ;;  %v1073_v50 = vor.u32 %v1276_v42, %v1070_v43  ;;  %v1307_v35 = vld [vmem:[#allocation4 + $0x78] sm:$0xff] }
  0x1e   : > { %540 = vmatpush.bf16.msra.mxu2 %v1093_v33  ;;  %v1060_v49 = vld [vmem:[#allocation2 + $0x68] sm:$0xf]  ;;  %v1275_v51 = vld [vmem:[#allocation2 + $0x74] sm:$0xf0]  ;;  %v1273_v52 = vld [vmem:[#allocation2 + $0x6c] sm:$0xf]  ;;  %v1053_v56 = vor.u32 %v1274_v48, %v1052_v47 }
  0x1f   : > { %553 = vmatpush.bf16.msra.mxu3 %v1097_v34  ;;  %527 = vmatpush.bf16.msra.mxu1 %v1089_v38  ;;  %v1062_v53 = vld [vmem:[#allocation2 + $0x78] sm:$0xf0]  ;;  %v1272_v54 = vld [vmem:[#allocation2 + $0x64] sm:$0xf]  ;;  %v1054_v55 = vld [vmem:[#allocation2 + $0x70] sm:$0xf0]  ;;  %v1061_v57 = vor.u32 %v1275_v51, %v1060_v49 }
  0x20   : > { %s1566_s28 = smov (!%p300_p6, %s1493_s28), 1  ;;  %v1065_v58 = vor.u32 %v1273_v52, %v1062_v53  ;;  %v1036_v59 = vld [vmem:[#allocation2 + $0x40] sm:$0xf]  ;;  %v1270_v60 = vld [vmem:[#allocation2 + $0x4c] sm:$0xf0]  ;;  %v1057_v62 = vor.u32 %v1272_v54, %v1054_v55  ;;  %v1299_v33 = vld [vmem:[#allocation4 + $0x38] sm:$0xff] }
  0x21   : > { %515 = vmatpush.bf16.msra.mxu0 %v1069_v44  ;;  %v1044_v61 = vld [vmem:[#allocation2 + $0x48] sm:$0xf]  ;;  %v1271_v63 = vld [vmem:[#allocation2 + $0x54] sm:$0xf0]  ;;  %v1269_v0 = vld [vmem:[#allocation2 + $0x4c] sm:$0xf]  ;;  %v1037_v4 = vor.u32 %v1270_v60, %v1036_v59 }
  0x22   : > { %541 = vmatpush.bf16.msra.mxu2 %v1077_v45  ;;  %v1046_v1 = vld [vmem:[#allocation2 + $0x58] sm:$0xf0]  ;;  %v1268_v2 = vld [vmem:[#allocation2 + $0x44] sm:$0xf]  ;;  %v1038_v3 = vld [vmem:[#allocation2 + $0x50] sm:$0xf0]  ;;  %v1045_v5 = vor.u32 %v1271_v63, %v1044_v61 }
  0x23   : > { %554 = vmatpush.bf16.msra.mxu3 %v1081_v46  ;;  %528 = vmatpush.bf16.msra.mxu1 %v1073_v50  ;;  %s1000_s18 = sshll.u32 %s1566_s28, 3  ;;  %v1049_v6 = vor.u32 %v1269_v0, %v1046_v1  ;;  %v1020_v7 = vld [vmem:[#allocation2 + $0x20] sm:$0xf]  ;;  %v1266_v8 = vld [vmem:[#allocation2 + $0x2c] sm:$0xf0]  ;;  %v1041_v10 = vor.u32 %v1268_v2, %v1038_v3  ;;  %v1315_v36 = vld [vmem:[#allocation4 + $0xb8] sm:$0xff] }
  0x24   : > { %v1028_v9 = vld [vmem:[#allocation2 + $0x28] sm:$0xf]  ;;  %v1267_v11 = vld [vmem:[#allocation2 + $0x34] sm:$0xf0]  ;;  %v1265_v12 = vld [vmem:[#allocation2 + $0x2c] sm:$0xf]  ;;  %v1021_v16 = vor.u32 %v1266_v8, %v1020_v7  ;;  %s303_s21 = scalar_lea.vmem %s1556_s0, %s1000_s18  ;;  %s307_s11 = scalar_lea.vmem %s1563_s7, %s1000_s18 }
  0x25   : > { %516 = vmatpush.bf16.msra.mxu0 %v1053_v56  ;;  %v1030_v13 = vld [vmem:[#allocation2 + $0x38] sm:$0xf0]  ;;  %v1264_v14 = vld [vmem:[#allocation2 + $0x24] sm:$0xf]  ;;  %v1022_v15 = vld [vmem:[#allocation2 + $0x30] sm:$0xf0]  ;;  %v1029_v17 = vor.u32 %v1267_v11, %v1028_v9 }
  0x26   : > { %542 = vmatpush.bf16.msra.mxu2 %v1061_v57  ;;  %v1033_v18 = vor.u32 %v1265_v12, %v1030_v13  ;;  %v1004_v19 = vld [vmem:[#allocation2] sm:$0xf]  ;;  %v1262_v20 = vld [vmem:[#allocation2 + $0xc] sm:$0xf0]  ;;  %v1012_v21 = vld [vmem:[#allocation2 + $0x8] sm:$0xf]  ;;  %v1025_v22 = vor.u32 %v1264_v14, %v1022_v15 }
  0x27   : > { %555 = vmatpush.bf16.msra.mxu3 %v1065_v58  ;;  %529 = vmatpush.bf16.msra.mxu1 %v1057_v62  ;;  %v1263_v23 = vld [vmem:[#allocation2 + $0x14] sm:$0xf0]  ;;  %v1261_v24 = vld [vmem:[#allocation2 + $0xc] sm:$0xf]  ;;  %v1014_v25 = vld [vmem:[#allocation2 + $0x18] sm:$0xf0]  ;;  %v1005_v28 = vor.u32 %v1262_v20, %v1004_v19 }
  0x28   : > { %v1260_v26 = vld [vmem:[#allocation2 + $0x4] sm:$0xf]  ;;  %v1006_v27 = vld [vmem:[#allocation2 + $0x10] sm:$0xf0]  ;;  %v1013_v30 = vor.u32 %v1263_v23, %v1012_v21  ;;  %v1017_v31 = vor.u32 %v1261_v24, %v1014_v25  ;;  %v1323_v38 = vld [vmem:[#allocation4 + $0xf8] sm:$0xff] }
  0x29   : > { %517 = vmatpush.bf16.msra.mxu0 %v1037_v4  ;;  %v1531_v29 = vld [vmem:[%s303_s21] sm:$0xff]  ;;  %v1009_v32 = vor.u32 %v1260_v26, %v1006_v27  ;;  %v1298_v37 = vld [vmem:[#allocation4 + $0x30] sm:$0xff]  ;;  %v1297_v41 = vld [vmem:[#allocation4 + $0x28] sm:$0xff] }
  0x2a   : > { %543 = vmatpush.bf16.msra.mxu2 %v1045_v5  ;;  %v309_v34 = vpack.c.bf16 %v1531_v29, %v1531_v29  ;;  %v1306_v39 = vld [vmem:[#allocation4 + $0x70] sm:$0xff]  ;;  %v1305_v43 = vld [vmem:[#allocation4 + $0x68] sm:$0xff]  ;;  %v1296_v45 = vld [vmem:[#allocation4 + $0x20] sm:$0xff] }
  0x2b   : > { %556 = vmatpush.bf16.msra.mxu3 %v1049_v6  ;;  %530 = vmatpush.bf16.msra.mxu1 %v1041_v10  ;;  %v1314_v40 = vld [vmem:[#allocation4 + $0xb0] sm:$0xff]  ;;  %v1313_v44 = vld [vmem:[#allocation4 + $0xa8] sm:$0xff]  ;;  %v1304_v47 = vld [vmem:[#allocation4 + $0x60] sm:$0xff] }
  0x2c   : > { %v1322_v42 = vld [vmem:[#allocation4 + $0xf0] sm:$0xff]  ;;  %v1321_v46 = vld [vmem:[#allocation4 + $0xe8] sm:$0xff]  ;;  %v1312_v48 = vld [vmem:[#allocation4 + $0xa0] sm:$0xff] }
  0x2d   : > { %518 = vmatpush.bf16.msra.mxu0 %v1021_v16  ;;  %v1295_v49 = vld [vmem:[#allocation4 + $0x18] sm:$0xff]  ;;  %v1320_v50 = vld [vmem:[#allocation4 + $0xe0] sm:$0xff]  ;;  %v1294_v53 = vld [vmem:[#allocation4 + $0x10] sm:$0xff] }
  0x2e   : > { %544 = vmatpush.bf16.msra.mxu2 %v1029_v17  ;;  %v1303_v51 = vld [vmem:[#allocation4 + $0x58] sm:$0xff]  ;;  %v1302_v55 = vld [vmem:[#allocation4 + $0x50] sm:$0xff]  ;;  %v1293_v56 = vld [vmem:[#allocation4 + $0x8] sm:$0xff] }
  0x2f   : > { %557 = vmatpush.bf16.msra.mxu3 %v1033_v18  ;;  %531 = vmatpush.bf16.msra.mxu1 %v1025_v22  ;;  %v1311_v52 = vld [vmem:[#allocation4 + $0x98] sm:$0xff]  ;;  %v1301_v57 = vld [vmem:[#allocation4 + $0x48] sm:$0xff]  ;;  %v1310_v58 = vld [vmem:[#allocation4 + $0x90] sm:$0xff] }
  0x30   : > { %v1319_v54 = vld [vmem:[#allocation4 + $0xd8] sm:$0xff]  ;;  %v1318_v59 = vld [vmem:[#allocation4 + $0xd0] sm:$0xff]  ;;  %v1292_v60 = vld [vmem:[#allocation4] sm:$0xff] }
  0x31   : > { %519 = vmatpush.bf16.msra.mxu0 %v1005_v28  ;;  %v1300_v61 = vld [vmem:[#allocation4 + $0x40] sm:$0xff]  ;;  %v1309_v62 = vld [vmem:[#allocation4 + $0x88] sm:$0xff] }
  0x32   : > { %545 = vmatpush.bf16.msra.mxu2 %v1013_v30  ;;  %v1317_v63 = vld [vmem:[#allocation4 + $0xc8] sm:$0xff]  ;;  %v1308_v0 = vld [vmem:[#allocation4 + $0x80] sm:$0xff] }
  0x33   : > { %558 = vmatpush.bf16.msra.mxu3 %v1017_v31  ;;  %532 = vmatpush.bf16.msra.mxu1 %v1009_v32  ;;  %v1316_v1 = vld [vmem:[#allocation4 + $0xc0] sm:$0xff] }
  0x34   : > { %520 = vmatmul.bf16.vlgmr.msra.gmra.mxu0 %v309_v34  ;;  %v342_v2 = vld [vmem:[%s1558_s2] sm:$0xf] }
  0x35   : > { %832 = vmatpush.bf16.msrb.mxu0 %v1299_v33  ;;  %546 = vmatmul.bf16.vlgmr.msra.gmra.mxu2 %v309_v34  ;;  %v344_v3 = vperm.slane %v342_v2, 0  ;;  %v345_v4 = vperm.slane %v342_v2, 1  ;;  %v346_v10 = vperm.slane %v342_v2, 2  ;;  %v347_v11 = vperm.slane %v342_v2, 3  ;;  %v1357_v28 = vld [vmem:[%s1560_s4] ss:$0 sm:$0xff] }
  0x36   : > { %559 = vmatmul.bf16.vlgmr.msra.gmra.mxu3 %v309_v34  ;;  %533 = vmatmul.bf16.vlgmr.msra.gmra.mxu1 %v309_v34 }
  0x37   : > { %845 = vmatpush.bf16.msrb.mxu1 %v1307_v35  ;;  %858 = vmatpush.bf16.msrb.mxu2 %v1315_v36 }
  0x38   : > { %871 = vmatpush.bf16.msrb.mxu3 %v1323_v38 }
  0x39   : > { %833 = vmatpush.bf16.msrb.mxu0 %v1298_v37 }
  0x3b   : > { %846 = vmatpush.bf16.msrb.mxu1 %v1306_v39  ;;  %859 = vmatpush.bf16.msrb.mxu2 %v1314_v40 }
  0x3c   : > { %872 = vmatpush.bf16.msrb.mxu3 %v1322_v42 }
  0x3d   : > { %834 = vmatpush.bf16.msrb.mxu0 %v1297_v41 }
  0x3f   : > { %847 = vmatpush.bf16.msrb.mxu1 %v1305_v43  ;;  %860 = vmatpush.bf16.msrb.mxu2 %v1313_v44 }
  0x40   : > { %873 = vmatpush.bf16.msrb.mxu3 %v1321_v46 }
  0x41   : > { %835 = vmatpush.bf16.msrb.mxu0 %v1296_v45 }
  0x43   : > { %848 = vmatpush.bf16.msrb.mxu1 %v1304_v47  ;;  %861 = vmatpush.bf16.msrb.mxu2 %v1312_v48 }
  0x44   : > { %874 = vmatpush.bf16.msrb.mxu3 %v1320_v50 }
  0x45   : > { %836 = vmatpush.bf16.msrb.mxu0 %v1295_v49 }
  0x47   : > { %849 = vmatpush.bf16.msrb.mxu1 %v1303_v51  ;;  %862 = vmatpush.bf16.msrb.mxu2 %v1311_v52 }
  0x48   : > { %875 = vmatpush.bf16.msrb.mxu3 %v1319_v54  ;;  %v1358_v54 = vld [vmem:[%s1561_s5] ss:$0 sm:$0xff] }
  0x49   : > { %837 = vmatpush.bf16.msrb.mxu0 %v1294_v53 }
  0x4b   : > { %850 = vmatpush.bf16.msrb.mxu1 %v1302_v55  ;;  %863 = vmatpush.bf16.msrb.mxu2 %v1310_v58 }
  0x4c   : > { %876 = vmatpush.bf16.msrb.mxu3 %v1318_v59 }
  0x4d   : > { %838 = vmatpush.bf16.msrb.mxu0 %v1293_v56  ;;  %v1359_v56 = vld [vmem:[%s1562_s6] ss:$0 sm:$0xff] }
  0x4f   : > { %851 = vmatpush.bf16.msrb.mxu1 %v1301_v57  ;;  %864 = vmatpush.bf16.msrb.mxu2 %v1309_v62 }
  0x50   : > { %877 = vmatpush.bf16.msrb.mxu3 %v1317_v63 }
  0x51   : > { %839 = vmatpush.bf16.msrb.mxu0 %v1292_v60 }
  0x53   : > { %852 = vmatpush.bf16.msrb.mxu1 %v1300_v61  ;;  %865 = vmatpush.bf16.msrb.mxu2 %v1308_v0 }
  0x54   : > { %878 = vmatpush.bf16.msrb.mxu3 %v1316_v1 }
  0xb1   : > { %v521_v5 = vpop.f32.mrf.mxu0 }
  0xb2   : > { %v522_v6 = vadd.f32 %v521_v5, %v344_v3 }
  0xb3   : > { %v534_v7 = vpop.f32.mrf.mxu1 }
  0xb4   : > { %v564_v8 = vmax.f32 %v522_v6, 0.0  ;;  %v535_v9 = vadd.f32 %v534_v7, %v345_v4 }
  0xb6   : > { %v568_v12 = vpack.c.bf16 %v564_v8, %v564_v8  ;;  %v565_v13 = vmax.f32 %v535_v9, 0.0 }
  0xb8   : > { %v569_v14 = vpack.c.bf16 %v565_v13, %v565_v13  ;;  %v547_v15 = vpop.f32.mrf.mxu2  ;;  %840 = vmatmul.bf16.vlgmr.msrb.gmra.mxu0 %v568_v12 }
  0xb9   : > { %v560_v16 = vpop.f32.mrf.mxu3  ;;  %v548_v17 = vadd.f32 %v547_v15, %v346_v10  ;;  %v523_v19 = vpop.f32.mrf.mxu0 }
  0xba   : > { %v561_v18 = vadd.f32 %v560_v16, %v347_v11  ;;  %853 = vmatmul.bf16.vlgmr.msrb.gmra.mxu1 %v569_v14 }
  0xbb   : > { %v566_v20 = vmax.f32 %v548_v17, 0.0  ;;  %v536_v22 = vpop.f32.mrf.mxu1 }
  0xbc   : > { %v567_v21 = vmax.f32 %v561_v18, 0.0 }
  0xbd   : > { %v570_v23 = vpack.c.bf16 %v566_v20, %v566_v20 }
  0xbe   : > { %v571_v24 = vpack.c.bf16 %v567_v21, %v567_v21 }
  0xbf   : > { %866 = vmatmul.bf16.vlgmr.msrb.gmra.mxu2 %v570_v23 }
  0xc0   : > { %879 = vmatmul.bf16.vlgmr.msrb.gmra.mxu3 %v571_v24  ;;  %v549_v25 = vpop.f32.mrf.mxu2 }
  0xc1   : > { %v562_v26 = vpop.f32.mrf.mxu3 }
 0x135   : > { %v841_v27 = vpop.f32.mrf.mxu0 }
 0x136   : > { %v842_v31 = vadd.f32 %v1357_v28, %v841_v27 }
 0x137   : > { %v854_v30 = vpop.f32.mrf.mxu1 }
 0x138   : > { %v855_v33 = vadd.f32 %v854_v30, %v842_v31 }
 0x13d   : > { %v843_v32 = vpop.f32.mrf.mxu0 }
 0x13f   : > { %v856_v34 = vpop.f32.mrf.mxu1 }
 0x142   : > { %v867_v35 = vpop.f32.mrf.mxu2 }
 0x143   : > { %v880_v36 = vpop.f32.mrf.mxu3  ;;  %v868_v37 = vadd.f32 %v867_v35, %v855_v33 }
 0x145   : > { %v881_v38 = vadd.f32 %v880_v36, %v868_v37 }
 0x147   : > { %v884_v39 = vadd.f32 %v881_v38, %v1531_v29 }
 0x149   : > { %887 = vadd.xlane.f32.xlu0 %v884_v39 }
 0x14a   : > { %v869_v40 = vpop.f32.mrf.mxu2 }
 0x14b   : > { %v882_v41 = vpop.f32.mrf.mxu3 }
 0x1bc   : > { %v888_v42 = vpop.xlane.xlu0 %887 }
 0x1bd   : > { %v889_v43 = vmul.f32 0.0078125, %v888_v42 }
 0x1bf   : > { %v890_v44 = vsub.f32 %v884_v39, %v889_v43 }
 0x1c1   : > { %v891_v45 = vmul.f32 %v890_v44, %v890_v44 }
 0x1c3   : > { %892 = vadd.xlane.f32.xlu0 %v891_v45 }
 0x236   : > { %v893_v46 = vpop.xlane.xlu0 %892 }
 0x237   : > { %v894_v47 = vmul.f32 0.0078125, %v893_v46 }
 0x239   : > { %v895_v48 = vadd.f32 1e-05, %v894_v47 }
 0x23b   : > { %1360 = vrsqrt.f32 %v895_v48  ;;  %vm902_vm1 = vweird.f32 %v895_v48 }
 0x241   : > { %v1361_v49 = vpop.eup %1360 }
 0x242   : > { %v897_v50 = vmul.f32 %v1361_v49, %v895_v48  ;;  %vm903_vm0 = vweird.f32 %v1361_v49 }
 0x243   : > { %vm904_vm2 = vmor %vm902_vm1, %vm903_vm0 }
 0x244   : > { %v898_v51 = vmul.f32 %v1361_v49, %v897_v50 }
 0x246   : > { %v899_v52 = vmul.f32 0.5, %v898_v51 }
 0x248   : > { %v900_v53 = vsub.f32 1.5, %v899_v52 }
 0x24a   : > { %v901_v29 = vmul.f32 %v1361_v49, %v900_v53 }
 0x24c   : > { %v905_v55 = vsel %vm904_vm2, %v1361_v49, %v901_v29 }
 0x24d   : > { %v906_v57 = vmul.f32 %v905_v55, %v890_v44 }
 0x24f   : > { %v910_v58 = vmul.f32 %v1358_v54, %v906_v57 }
 0x251   : > { %v914_v59 = vadd.f32 %v1359_v56, %v910_v58 }
 0x253   : > { %915 = vst [vmem:[%s307_s11] sm:$0xff] %v914_v59 }
 0x254 PF: > { %s19_s24 = sadd.s32 1, %s1436_s24  }
 0x255   : > { %p16_p7 = scmp.ge.s32.totalorder %s19_s24, 4  }
 0x257   :  { %18 = sbr.rel (!%p16_p7) target bundleno = 2 (0x2), region = 87 }
 0x25c   :  { %935 = vsyncpa [#allocation3], 1 }
 0x25d   :  { %937 = vsyncpa [#allocation3 + $0x1], 1 }
 0x25e   :  { %938 = vsyncpa [#allocation5], 1 }

// kernel: transformer_fwd.11
= control target key start
LH: loop header
LB: loop body
LE: loop exit
PB: predicated region body
PF: predicated region fallthrough
CT: control target
= control target key end

     0   :  { %12 = vsyncpa [#allocation3], 0  ;;  %s1558_s24 = smov 0   ;;  %s1818_s0 = inlined_call_operand.vmem [shape: f32[2,8,128], index: 0, kind: input, shape index: {}]   ;;  %s1819_s1 = inlined_call_operand.vmem [shape: s32[2,1,8], index: 1, kind: input, shape index: {}]   ;;  %s1820_s2 = inlined_call_operand.vmem [shape: bf16[128,256], index: 2, kind: input, shape index: {}]   ;;  %s1821_s3 = inlined_call_operand.hbm [shape: bf16[128,128], index: 3, kind: input, shape index: {}]   ;;  %s1822_s4 = inlined_call_operand.vmem [shape: f32[1,128], index: 4, kind: input, shape index: {}]   ;;  %s1823_s5 = inlined_call_operand.vmem [shape: f32[1,128], index: 5, kind: input, shape index: {}]   ;;  %s1824_s6 = inlined_call_operand.vmem [shape: f32[1,128], index: 6, kind: input, shape index: {}]   ;;  %s1825_s7 = inlined_call_operand.vmem [shape: f32[2,8,128], index: 7, kind: output, shape index: {}]  }
   0x1 LB: > { %s220_s27 = sshll.u32 %s1821_s3, 4  ;;  %s1567_s28 = sadd.s32 4294967295, %s1505_s24   ;;  %s1505_s24 = sphi %s1558_s24, %s18_s24   ;;  %s221_s27 = int_to_ptr.hbm [resolvable:$true] %s220_s27 }
   0x2   : > { %p1245_p0 = scmp.ge.s32.totalorder %s1505_s24, 1  ;;  %p206_p1 = scmp.lt.s32.totalorder %s1505_s24, 3 }
   0x3   : > { %p1407_p2 = scmp.eq.s32.totalorder %s1567_s28, 0  ;;  %s1507_s29 = smov [#allocation2]  }
   0x4   : > { %p207_p3 = pnand %p1245_p0, %p206_p1  ;;  %s222_s30 = sshll.u32 %s1507_s29, 4  ;;  %s223_s30 = int_to_ptr.vmem [resolvable:$true] %s222_s30 }
   0x5   : > { %s1508_s8 = smov 64   ;;  %s1509_s9 = smov 4  }
   0x6   : > { %p1403_p4 = pneg %p207_p3  ;;  %260 = sbr.rel (%p207_p3) target bundleno = 2216 (0x8a8), region = 48 }
   0x8   : > { %p1404_p5 = pnand %p1407_p2, %p1403_p4 }
   0xa   : > { %1406 = dma.hbm_to_vmem [thread:$0]  (!%p1404_p5), %s221_s27, 1024, %s223_s30, [#allocation3], %s1508_s8, %s1508_s8, %s1509_s9  }
   0xb   : > { %1500 = dma.done.wait (%p1407_p2), [#allocation3], 1024  }
   0xc   : > { %1502 = vsyncadd (%p1407_p2), [#allocation3], 4294966272  ;;  %v1310_v0 = vld [vmem:[%s1820_s2 + $0x70] sm:$0xf]  ;;  %v1390_v1 = vld [vmem:[%s1820_s2 + $0x74] sm:$0xf0] }
   0xd   : > { %v1389_v2 = vld [vmem:[%s1820_s2 + $0x74] sm:$0xf]  ;;  %v1311_v3 = vor.u32 %v1390_v1, %v1310_v0  ;;  %v1312_v4 = vld [vmem:[%s1820_s2 + $0x78] sm:$0xf0]  ;;  %v1302_v5 = vld [vmem:[%s1820_s2 + $0x60] sm:$0xf] }
   0xe   : > { %v1388_v6 = vld [vmem:[%s1820_s2 + $0x64] sm:$0xf0]  ;;  %v1315_v7 = vor.u32 %v1389_v2, %v1312_v4  ;;  %v1387_v8 = vld [vmem:[%s1820_s2 + $0x64] sm:$0xf]  ;;  %v1304_v9 = vld [vmem:[%s1820_s2 + $0x68] sm:$0xf0] }
   0xf   : > { %404 = vmatpush.bf16.msra.mxu0 %v1311_v3  ;;  %v1303_v10 = vor.u32 %v1388_v6, %v1302_v5  ;;  %v1307_v11 = vor.u32 %v1387_v8, %v1304_v9  ;;  %v1294_v12 = vld [vmem:[%s1820_s2 + $0x50] sm:$0xf]  ;;  %v1386_v13 = vld [vmem:[%s1820_s2 + $0x54] sm:$0xf0]  ;;  %v1385_v14 = vld [vmem:[%s1820_s2 + $0x54] sm:$0xf] }
  0x10   : > { %417 = vmatpush.bf16.msra.mxu1 %v1315_v7  ;;  %v1296_v15 = vld [vmem:[%s1820_s2 + $0x58] sm:$0xf0]  ;;  %v1295_v16 = vor.u32 %v1386_v13, %v1294_v12  ;;  %v1286_v18 = vld [vmem:[%s1820_s2 + $0x40] sm:$0xf]  ;;  %v1384_v19 = vld [vmem:[%s1820_s2 + $0x44] sm:$0xf0] }
  0x11   : > { %v1299_v17 = vor.u32 %v1385_v14, %v1296_v15  ;;  %v1383_v20 = vld [vmem:[%s1820_s2 + $0x44] sm:$0xf]  ;;  %v1288_v21 = vld [vmem:[%s1820_s2 + $0x48] sm:$0xf0]  ;;  %v1287_v22 = vor.u32 %v1384_v19, %v1286_v18  ;;  %v1278_v24 = vld [vmem:[%s1820_s2 + $0x30] sm:$0xf] }
  0x12   : > { %v1291_v23 = vor.u32 %v1383_v20, %v1288_v21  ;;  %v1382_v25 = vld [vmem:[%s1820_s2 + $0x34] sm:$0xf0]  ;;  %v1381_v26 = vld [vmem:[%s1820_s2 + $0x34] sm:$0xf]  ;;  %v1280_v27 = vld [vmem:[%s1820_s2 + $0x38] sm:$0xf0] }
  0x13   : > { %405 = vmatpush.bf16.msra.mxu0 %v1303_v10  ;;  %p294_p6 = scmp.lt.s32.totalorder %s1567_s28, 1  ;;  %v1279_v28 = vor.u32 %v1382_v25, %v1278_v24  ;;  %v1283_v29 = vor.u32 %v1381_v26, %v1280_v27  ;;  %v1270_v30 = vld [vmem:[%s1820_s2 + $0x20] sm:$0xf]  ;;  %v1380_v31 = vld [vmem:[%s1820_s2 + $0x24] sm:$0xf0]  ;;  %vm440_vm0 = vcmask 130048  }
  0x14   : > { %418 = vmatpush.bf16.msra.mxu1 %v1307_v11  ;;  %v1379_v32 = vld [vmem:[%s1820_s2 + $0x24] sm:$0xf]  ;;  %v1272_v33 = vld [vmem:[%s1820_s2 + $0x28] sm:$0xf0]  ;;  %v1271_v34 = vor.u32 %v1380_v31, %v1270_v30  ;;  %v1262_v36 = vld [vmem:[%s1820_s2 + $0x10] sm:$0xf] }
  0x15   : > { %s1827_s28 = smov (!%p294_p6, %s1567_s28), 1  ;;  %v1275_v35 = vor.u32 %v1379_v32, %v1272_v33  ;;  %v1378_v37 = vld [vmem:[%s1820_s2 + $0x14] sm:$0xf0]  ;;  %v1377_v38 = vld [vmem:[%s1820_s2 + $0x14] sm:$0xf]  ;;  %s1510_s15 = smov 112  }
  0x16   : > { %v1264_v39 = vld [vmem:[%s1820_s2 + $0x18] sm:$0xf0]  ;;  %s1250_s25 = sshll.u32 %s1827_s28, 3  ;;  %v1263_v40 = vor.u32 %v1378_v37, %v1262_v36  ;;  %v1254_v42 = vld [vmem:[%s1820_s2] sm:$0xf]  ;;  %s1511_s16 = smov 96  }
  0x17   : > { %406 = vmatpush.bf16.msra.mxu0 %v1295_v16  ;;  %v1267_v41 = vor.u32 %v1377_v38, %v1264_v39  ;;  %v1376_v43 = vld [vmem:[%s1820_s2 + $0x4] sm:$0xf0]  ;;  %s297_s10 = scalar_lea.vmem %s1818_s0, %s1250_s25  ;;  %v1375_v44 = vld [vmem:[%s1820_s2 + $0x4] sm:$0xf]  ;;  %v1256_v45 = vld [vmem:[%s1820_s2 + $0x8] sm:$0xf0]  ;;  %s300_s20 = scalar_lea.vmem %s1819_s1, %s1827_s28 }
  0x18   : > { %419 = vmatpush.bf16.msra.mxu1 %v1299_v17  ;;  %v1255_v46 = vor.u32 %v1376_v43, %v1254_v42  ;;  %v1678_v47 = vld [vmem:[%s297_s10] sm:$0xff]  ;;  %v1259_v48 = vor.u32 %v1375_v44, %v1256_v45  ;;  %s1512_s17 = smov 80   ;;  %v1513_v7 = vmov 0.0   ;;  %vm461_vm2 = vcmask 64512   ;;  %v1393_v37 = vld [vmem:[#allocation2 + $0x10] sm:$0xff]  ;;  %s1514_s21 = smov 64  }
  0x19   : > { %v307_v49 = vpack.c.bf16 %v1678_v47, %v1678_v47  ;;  %v1391_v63 = vld [vmem:[#allocation2] sm:$0xff]  ;;  %vm580_vm3 = vcmask 1043456   ;;  %s1515_s22 = smov 48   ;;  %s1516_s23 = smov 16  }
  0x1a   : > { %495 = vmatpush.bf16.msra.mxu3 %v1391_v63  ;;  %v430_v5 = vld [vmem:[%s300_s20] sm:$0x1]  ;;  %s1517_s26 = smov 32   ;;  %s304_s13 = scalar_lea.vmem %s1825_s7, %s1250_s25 }
  0x1b   : > { %407 = vmatpush.bf16.msra.mxu0 %v1287_v22  ;;  %v550_v59 = vunpack.c.l.b16 %v307_v49  ;;  %vm431_vm1 = vcmp.eq.s32.totalorder %v430_v5, 0 }
  0x1c   : > { %420 = vmatpush.bf16.msra.mxu1 %v1291_v23  ;;  %v1316_v8 = vsel %vm431_vm1, 1.0, %v1513_v7 }
  0x1d   : > { %v1689_v62 = vpack.c.b16 %v550_v59, %v550_v59  ;;  %1322 = vmatmul.msk.bf16.vlgmr.msra.gmra.mxu3 %vm440_vm0, %v307_v49  ;;  %v434_v9 = vmul.f32 -1e+28, %v1316_v8 }
  0x1f   : > { %408 = vmatpush.bf16.msra.mxu0 %v1279_v28  ;;  %v1709_v11 = vperm.slane %v434_v9, 0  ;;  %v1392_v28 = vld [vmem:[#allocation2 + $0x8] sm:$0xff] }
  0x20   : > { %421 = vmatpush.bf16.msra.mxu1 %v1283_v29 }
  0x23   : > { %409 = vmatpush.bf16.msra.mxu0 %v1271_v34 }
  0x24   : > { %422 = vmatpush.bf16.msra.mxu1 %v1275_v35 }
  0x27   : > { %410 = vmatpush.bf16.msra.mxu0 %v1263_v40 }
  0x28   : > { %423 = vmatpush.bf16.msra.mxu1 %v1267_v41 }
  0x2b   : > { %411 = vmatpush.bf16.msra.mxu0 %v1255_v46 }
  0x2c   : > { %424 = vmatpush.bf16.msra.mxu1 %v1259_v48 }
  0x2e   : > { %412 = vmatmul.bf16.vlgmr.msra.gmra.mxu0 %v307_v49 }
  0x2f   : > { %425 = vmatmul.bf16.vlgmr.msra.gmra.mxu1 %v307_v49 }
  0x30   : > { %675 = vmatpush.bf16.msrb.mxu1 %v1393_v37 }
  0xa0   : > { %v497_v17 = vpop.f32.mrf.mxu3 }
  0xa1   : > { %v501_v19 = vpack.c.bf16 %v497_v17, %v497_v17 }
  0xa3   : > { %v601_v24 = vsel %vm580_vm3, %v501_v19, 0 }
  0xa8   : > { %v499_v18 = vpop.f32.mrf.mxu3 }
  0xab   : > { %v413_v50 = vpop.f32.mrf.mxu0 }
  0xac   : > { %v435_v51 = vpack.c.bf16 %v413_v50, %v413_v50  ;;  %v426_v52 = vpop.f32.mrf.mxu1 }
  0xad   : > { %v436_v53 = vpack.c.bf16 %v426_v52, %v426_v52 }
  0xae   : > { %v503_v54 = vunpack.c.l.b16 %v435_v51 }
  0xaf   : > { %v508_v55 = vunpack.c.l.b16 %v436_v53  ;;  %v445_v56 = vsel %vm440_vm0, %v436_v53, 0 }
  0xb0   : > { %v1683_v57 = vpack.c.b16 %v503_v54, %v503_v54  ;;  %454 = vmatpush.bf16.xpose.msra.mxu2 %v445_v56 }
  0xb1   : > { %v1685_v58 = vpack.c.b16 %v508_v55, %v508_v55 }
  0xb2   : > { %505 = vrot.lane.b32.xlu2 %v1683_v57, %s1510_s15 }
  0xb3   : > { %510 = vrot.lane.b32.xlu1 %v1685_v58, %s1510_s15  ;;  %v415_v60 = vpop.f32.mrf.mxu0 }
  0xb4   : > { %v428_v61 = vpop.f32.mrf.mxu1 }
  0xb7   : > { %1317 = vmatmul.msk.bf16.vlgmr.msra.gmra.mxu2 %vm440_vm0, %v435_v51 }
  0xb8   : > { %570 = vmatpush.bf16.msrb.mxu2 %v1392_v28 }
  0xba   : > { %618 = vrot.lane.b32.xlu2 %v1685_v58, %s1511_s16 }
  0xbb   : > { %552 = vrot.lane.b32.xlu1 %v1689_v62, %s1510_s15 }
  0xbc   : > { %610 = vmatpush.bf16.msra.mxu2 %v601_v24 }
  0xc2   : > { %702 = vrot.lane.b32.xlu2 %v1683_v57, %s1512_s17 }
  0xc3   : > { %616 = vrot.lane.b32.xlu1 %v1683_v57, %s1511_s16 }
  0xca   : > { %743 = vrot.lane.b32.xlu2 %v1689_v62, %s1512_s17 }
  0xcb   : > { %657 = vrot.lane.b32.xlu1 %v1689_v62, %s1511_s16 }
 0x10c   : > { %v506_v0 = vpop.permute.xlu2 %505 }
 0x114   : > { %v619_v1 = vpop.permute.xlu2 %618 }
 0x115   : > { %v624_v2 = vsel %vm440_vm0, %v619_v1, 0 }
 0x116   : > { %633 = vmatpush.bf16.xpose.msrb.mxu0 %v624_v2 }
 0x11c   : > { %v703_v39 = vpop.permute.xlu2 %702 }
 0x124   : > { %v1723_v40 = vpop.permute.xlu2 %743 }
 0x125   : > { %v511_v3 = vpop.permute.xlu1 %510 }
 0x126   : > { %v516_v4 = vsel %vm440_vm0, %v511_v3, 0 }
 0x127   : > { %525 = vmatpush.bf16.xpose.msrb.mxu3 %v516_v4 }
 0x12d   : > { %v553_v6 = vpop.permute.xlu1 %552 }
 0x12e   : > { %1323 = vmatmul.msk.bf16.vlgmr.msrb.gmra.mxu3 %vm440_vm0, %v506_v0  ;;  %1328 = vmatmul.msk.bf16.vlgmr.msrb.gmra.mxu2 %vm440_vm0, %v553_v6 }
 0x135   : > { %v617_v10 = vpop.permute.xlu1 %616 }
 0x136   : > { %1331 = vmatmul.msk.bf16.vlgmr.msrb.gmra.mxu0 %vm440_vm0, %v617_v10 }
 0x13a   : > { %v456_v12 = vpop.f32.mrf.mxu2 }
 0x13b   : > { %v457_v13 = vadd.f32 %v456_v12, %v1709_v11 }
 0x13d   : > { %v460_v14 = vmul.f32 0.088388346, %v457_v13  ;;  %v658_v38 = vpop.permute.xlu1 %657 }
 0x13e   : > { %1336 = vmatmul.msk.bf16.vlgmr.msrb.gmra.mxu1 %vm440_vm0, %v658_v38 }
 0x13f   : > { %v462_v15 = vsel %vm461_vm2, %v460_v14, -inf }
 0x140   : > { %463 = vmax.xlane.f32.xlu0 %v462_v15 }
 0x142   : > { %v458_v16 = vpop.f32.mrf.mxu2 }
 0x1b1   : > { %v527_v20 = vpop.f32.mrf.mxu3  ;;  %v572_v0 = vpop.f32.mrf.mxu2 }
 0x1b2   : > { %v528_v21 = vadd.f32 %v527_v20, %v1709_v11  ;;  %v576_v1 = vpack.c.bf16 %v572_v0, %v572_v0 }
 0x1b3   : > { %v464_v22 = vpop.xlane.xlu0 %463  ;;  %v635_v23 = vpop.f32.mrf.mxu0 }
 0x1b4   : > { %v531_v25 = vmul.f32 0.088388346, %v528_v21  ;;  %v465_v26 = vsub.f32 %v460_v14, %v464_v22  ;;  %v636_v27 = vadd.f32 %v635_v23, %v1709_v11  ;;  %v582_v2 = vsel %vm580_vm3, %v576_v1, 0  ;;  %v1394_v22 = vld [vmem:[#allocation2 + $0x18] sm:$0xff] }
 0x1b5   : > { %591 = vmatpush.bf16.msra.mxu3 %v582_v2  ;;  %761 = vmatpush.bf16.msra.mxu0 %v1394_v22 }
 0x1b6   : > { %v466_v29 = vmul.f32 1.442695, %v465_v26  ;;  %v639_v30 = vmul.f32 0.088388346, %v636_v27  ;;  %v532_v31 = vsel %vm461_vm2, %v531_v25, -inf }
 0x1b7   : > { %533 = vmax.xlane.f32.xlu1 %v532_v31 }
 0x1b8   : > { %1431 = vpow2.f32 %v466_v29  ;;  %v640_v32 = vsel %vm461_vm2, %v639_v30, -inf  ;;  %1343 = vmatmul.msk.bf16.vlgmr.msra.gmra.mxu0 %vm440_vm0, %v1723_v40 }
 0x1b9   : > { %v529_v33 = vpop.f32.mrf.mxu3  ;;  %641 = vmax.xlane.f32.xlu2 %v640_v32  ;;  %v574_v5 = vpop.f32.mrf.mxu2 }
 0x1bb   : > { %v637_v34 = vpop.f32.mrf.mxu0  ;;  %v677_v3 = vpop.f32.mrf.mxu1 }
 0x1bc   : > { %v681_v4 = vpack.c.bf16 %v677_v3, %v677_v3 }
 0x1be   : > { %v1432_v35 = vpop.eup %1431  ;;  %v686_v6 = vsel %vm580_vm3, %v681_v4, 0 }
 0x1bf   : > { %v468_v36 = vsel %vm461_vm2, %v1432_v35, 0.0  ;;  %695 = vmatpush.bf16.msrb.mxu3 %v686_v6 }
 0x1c0   : > { %469 = vadd.xlane.f32.xlu0 %v468_v36 }
 0x1c3   : > { %v679_v7 = vpop.f32.mrf.mxu1 }
 0x1d4   : > { %704 = vrot.lane.b32.xlu0 %v1685_v58, %s1512_s17 }
 0x22a   : > { %v534_v41 = vpop.xlane.xlu1 %533 }
 0x22b   : > { %v535_v42 = vsub.f32 %v531_v25, %v534_v41 }
 0x22c   : > { %v642_v43 = vpop.xlane.xlu2 %641 }
 0x22d   : > { %v536_v44 = vmul.f32 1.442695, %v535_v42  ;;  %v643_v45 = vsub.f32 %v639_v30, %v642_v43 }
 0x22f   : > { %1433 = vpow2.f32 %v536_v44  ;;  %v644_v46 = vmul.f32 1.442695, %v643_v45 }
 0x231   : > { %1435 = vpow2.f32 %v644_v46 }
 0x233   : > { %v470_v48 = vpop.xlane.xlu0 %469 }
 0x234   : > { %1437 = vrcp.f32 %v470_v48 }
 0x235   : > { %v1434_v49 = vpop.eup %1433  ;;  %v763_v43 = vpop.f32.mrf.mxu0 }
 0x236   : > { %v538_v50 = vsel %vm461_vm2, %v1434_v49, 0.0  ;;  %v767_v44 = vpack.c.bf16 %v763_v43, %v763_v43 }
 0x237   : > { %v1436_v51 = vpop.eup %1435  ;;  %539 = vadd.xlane.f32.xlu2 %v538_v50 }
 0x238   : > { %v646_v52 = vsel %vm461_vm2, %v1436_v51, 0.0 }
 0x239   : > { %647 = vadd.xlane.f32.xlu1 %v646_v52 }
 0x23a   : > { %v1438_v53 = vpop.eup %1437 }
 0x23b   : > { %v472_v54 = vmul.f32 %v1438_v53, %v470_v48  ;;  %v772_v48 = vsel %vm580_vm3, %v767_v44, 0 }
 0x23c   : > { %781 = vmatpush.bf16.msra.mxu1 %v772_v48 }
 0x23d   : > { %v473_v55 = vsub.f32 2.0, %v472_v54  ;;  %v765_v52 = vpop.f32.mrf.mxu0 }
 0x23f   : > { %v474_v56 = vmul.f32 %v1438_v53, %v473_v55  ;;  %v1396_v55 = vld [vmem:[#allocation2 + $0x28] sm:$0xff] }
 0x241   : > { %v475_v59 = vmul.f32 %v1432_v35, %v474_v56  ;;  %v1395_v56 = vld [vmem:[#allocation2 + $0x20] sm:$0xff] }
 0x243   : > { %v476_v60 = vpack.c.bf16 %v475_v59, %v475_v59 }
 0x245   : > { %1330 = vmatmul.msk.bf16.vlgmr.msra.gmra.mxu2 %vm461_vm2, %v476_v60 }
 0x246   : > { %v705_v61 = vpop.permute.xlu0 %704 }
 0x247   : > { %v710_v63 = vsel %vm440_vm0, %v705_v61, 0 }
 0x248   : > { %719 = vmatpush.bf16.xpose.msrb.mxu2 %v710_v63 }
 0x24f   : > { %790 = vrot.lane.b32.xlu2 %v1685_v58, %s1514_s21 }
 0x250   : > { %847 = vmatpush.bf16.msra.mxu2 %v1395_v56 }
 0x252   : > { %788 = vrot.lane.b32.xlu1 %v1683_v57, %s1514_s21 }
 0x255   : > { %1338 = vmatmul.msk.bf16.vlgmr.msrb.gmra.mxu2 %vm440_vm0, %v703_v39 }
 0x257   : > { %874 = vrot.lane.b32.xlu2 %v1683_v57, %s1515_s22 }
 0x25a   : > { %915 = vrot.lane.b32.xlu1 %v1689_v62, %s1515_s22 }
 0x2aa   : > { %v540_v8 = vpop.xlane.xlu2 %539 }
 0x2ab   : > { %1439 = vrcp.f32 %v540_v8 }
 0x2ac   : > { %v648_v9 = vpop.xlane.xlu1 %647 }
 0x2ad   : > { %1441 = vrcp.f32 %v648_v9 }
 0x2b1   : > { %v1440_v10 = vpop.eup %1439 }
 0x2b2   : > { %v542_v12 = vmul.f32 %v1440_v10, %v540_v8  ;;  %v791_v17 = vpop.permute.xlu2 %790 }
 0x2b3   : > { %v1442_v15 = vpop.eup %1441  ;;  %v796_v20 = vsel %vm440_vm0, %v791_v17, 0 }
 0x2b4   : > { %v543_v13 = vsub.f32 2.0, %v542_v12  ;;  %v650_v19 = vmul.f32 %v1442_v15, %v648_v9 }
 0x2b6   : > { %v544_v14 = vmul.f32 %v1440_v10, %v543_v13  ;;  %v651_v21 = vsub.f32 2.0, %v650_v19 }
 0x2b8   : > { %v545_v16 = vmul.f32 %v1434_v49, %v544_v14  ;;  %v652_v23 = vmul.f32 %v1442_v15, %v651_v21 }
 0x2ba   : > { %v546_v18 = vpack.c.bf16 %v545_v16, %v545_v16  ;;  %v653_v24 = vmul.f32 %v1436_v51, %v652_v23  ;;  %v875_v60 = vpop.permute.xlu2 %874 }
 0x2bc   : > { %1329 = vmatmul.msk.bf16.vlgmr.msra.gmra.mxu3 %vm461_vm2, %v546_v18  ;;  %v654_v26 = vpack.c.bf16 %v653_v24, %v653_v24 }
 0x2bd   : > { %805 = vmatpush.bf16.xpose.msra.mxu3 %v796_v20 }
 0x2c4   : > { %v789_v30 = vpop.permute.xlu1 %788 }
 0x2c8   : > { %v612_v25 = vpop.f32.mrf.mxu2 }
 0x2cc   : > { %1337 = vmatmul.msk.bf16.vlgmr.msrb.gmra.mxu3 %vm461_vm2, %v654_v26  ;;  %v916_v59 = vpop.permute.xlu1 %915 }
 0x2cd   : > { %933 = vmatpush.bf16.msrb.mxu3 %v1396_v55 }
 0x2d0   : > { %v614_v27 = vpop.f32.mrf.mxu2 }
 0x2d8   : > { %v721_v28 = vpop.f32.mrf.mxu2 }
 0x2d9   : > { %v722_v29 = vadd.f32 %v721_v28, %v1709_v11 }
 0x2db   : > { %v725_v31 = vmul.f32 0.088388346, %v722_v29 }
 0x2dc   : > { %1345 = vmatmul.msk.bf16.vlgmr.msra.gmra.mxu3 %vm440_vm0, %v789_v30 }
 0x2dd   : > { %v726_v32 = vsel %vm461_vm2, %v725_v31, -inf }
 0x2de   : > { %727 = vmax.xlane.f32.xlu0 %v726_v32 }
 0x2e0   : > { %v723_v33 = vpop.f32.mrf.mxu2 }
 0x2ec   : > { %1357 = vmatmul.msk.bf16.vlgmr.msrb.gmra.mxu3 %vm440_vm0, %v916_v59 }
 0x33f   : > { %v593_v34 = vpop.f32.mrf.mxu3 }
 0x340   : > { %v613_v36 = vadd.f32 %v612_v25, %v593_v34 }
 0x347   : > { %v595_v35 = vpop.f32.mrf.mxu3 }
 0x34f   : > { %v697_v37 = vpop.f32.mrf.mxu3 }
 0x350   : > { %v1748_v38 = vadd.f32 %v697_v37, %v613_v36 }
 0x351   : > { %v728_v39 = vpop.xlane.xlu0 %727 }
 0x352   : > { %v729_v40 = vsub.f32 %v725_v31, %v728_v39 }
 0x354   : > { %v730_v41 = vmul.f32 1.442695, %v729_v40 }
 0x356   : > { %1443 = vpow2.f32 %v730_v41 }
 0x357   : > { %v699_v42 = vpop.f32.mrf.mxu3 }
 0x35c   : > { %v1444_v45 = vpop.eup %1443 }
 0x35d   : > { %v732_v46 = vsel %vm461_vm2, %v1444_v45, 0.0 }
 0x35e   : > { %733 = vadd.xlane.f32.xlu0 %v732_v46 }
 0x35f   : > { %v807_v49 = vpop.f32.mrf.mxu3 }
 0x360   : > { %v808_v50 = vadd.f32 %v807_v49, %v1709_v11 }
 0x362   : > { %v811_v51 = vmul.f32 0.088388346, %v808_v50 }
 0x364   : > { %v812_v53 = vsel %vm461_vm2, %v811_v51, -inf }
 0x365   : > { %813 = vmax.xlane.f32.xlu2 %v812_v53 }
 0x367   : > { %v809_v54 = vpop.f32.mrf.mxu3 }
 0x36f   : > { %v935_v14 = vpop.f32.mrf.mxu3 }
 0x370   : > { %v939_v15 = vpack.c.bf16 %v935_v14, %v935_v14 }
 0x372   : > { %876 = vrot.lane.b32.xlu0 %v1685_v58, %s1515_s22  ;;  %v944_v16 = vsel %vm580_vm3, %v939_v15, 0 }
 0x373   : > { %953 = vmatpush.bf16.msrb.mxu2 %v944_v16 }
 0x377   : > { %v937_v17 = vpop.f32.mrf.mxu3 }
 0x37a   : > { %829 = vrot.lane.b32.xlu0 %v1689_v62, %s1514_s21 }
 0x3d1   : > { %v734_v61 = vpop.xlane.xlu0 %733 }
 0x3d2   : > { %1445 = vrcp.f32 %v734_v61 }
 0x3d8   : > { %v1446_v63 = vpop.eup %1445  ;;  %v814_v0 = vpop.xlane.xlu2 %813 }
 0x3d9   : > { %v736_v1 = vmul.f32 %v1446_v63, %v734_v61  ;;  %v815_v2 = vsub.f32 %v811_v51, %v814_v0 }
 0x3db   : > { %v737_v3 = vsub.f32 2.0, %v736_v1  ;;  %v816_v4 = vmul.f32 1.442695, %v815_v2 }
 0x3dd   : > { %v738_v5 = vmul.f32 %v1446_v63, %v737_v3  ;;  %1447 = vpow2.f32 %v816_v4  ;;  %v1397_v63 = vld [vmem:[#allocation2 + $0x30] sm:$0xff] }
 0x3df   : > { %v739_v6 = vmul.f32 %v1444_v45, %v738_v5 }
 0x3e1   : > { %v740_v7 = vpack.c.bf16 %v739_v6, %v739_v6 }
 0x3e3   : > { %v1448_v8 = vpop.eup %1447  ;;  %1344 = vmatmul.msk.bf16.vlgmr.msra.gmra.mxu1 %vm461_vm2, %v740_v7 }
 0x3e4   : > { %v877_v9 = vpop.permute.xlu0 %876  ;;  %v818_v10 = vsel %vm461_vm2, %v1448_v8, 0.0 }
 0x3e5   : > { %v882_v12 = vsel %vm440_vm0, %v877_v9, 0  ;;  %819 = vadd.xlane.f32.xlu1 %v818_v10  ;;  %v1398_v10 = vld [vmem:[#allocation2 + $0x38] sm:$0xff] }
 0x3e6   : > { %891 = vmatpush.bf16.xpose.msrb.mxu1 %v882_v12 }
 0x3ec   : > { %v830_v13 = vpop.permute.xlu0 %829 }
 0x3ed   : > { %1350 = vmatmul.msk.bf16.vlgmr.msra.gmra.mxu2 %vm440_vm0, %v830_v13 }
 0x3ee   : > { %1019 = vmatpush.bf16.msra.mxu1 %v1397_v63 }
 0x3f3   : > { %1352 = vmatmul.msk.bf16.vlgmr.msrb.gmra.mxu1 %vm440_vm0, %v875_v60 }
 0x3fe   : > { %1048 = vrot.lane.b32.xlu1 %v1685_v58, %s1516_s23 }
 0x406   : > { %1001 = vrot.lane.b32.xlu1 %v1689_v62, %s1517_s26 }
 0x458   : > { %v820_v18 = vpop.xlane.xlu1 %819 }
 0x459   : > { %1449 = vrcp.f32 %v820_v18 }
 0x45f   : > { %v1450_v21 = vpop.eup %1449 }
 0x460   : > { %v783_v19 = vpop.f32.mrf.mxu1  ;;  %v822_v22 = vmul.f32 %v1450_v21, %v820_v18 }
 0x461   : > { %v787_v20 = vadd.f32 %v783_v19, %v1748_v38 }
 0x462   : > { %v823_v24 = vsub.f32 2.0, %v822_v22 }
 0x464   : > { %v824_v25 = vmul.f32 %v1450_v21, %v823_v24 }
 0x466   : > { %v825_v28 = vmul.f32 %v1448_v8, %v824_v25 }
 0x468   : > { %v785_v23 = vpop.f32.mrf.mxu1  ;;  %v826_v35 = vpack.c.bf16 %v825_v28, %v825_v28 }
 0x470   : > { %v849_v26 = vpop.f32.mrf.mxu2  ;;  %v893_v27 = vpop.f32.mrf.mxu1 }
 0x471   : > { %v853_v29 = vpack.c.bf16 %v849_v26, %v849_v26  ;;  %v894_v30 = vadd.f32 %v893_v27, %v1709_v11  ;;  %v1049_v31 = vpop.permute.xlu1 %1048 }
 0x472   : > { %v1054_v32 = vsel %vm440_vm0, %v1049_v31, 0 }
 0x473   : > { %v858_v33 = vsel %vm580_vm3, %v853_v29, 0  ;;  %v897_v34 = vmul.f32 0.088388346, %v894_v30  ;;  %1063 = vmatpush.bf16.xpose.msra.mxu2 %v1054_v32 }
 0x474   : > { %867 = vmatpush.bf16.msrb.mxu0 %v858_v33 }
 0x475   : > { %v898_v36 = vsel %vm461_vm2, %v897_v34, -inf }
 0x476   : > { %899 = vmax.xlane.f32.xlu0 %v898_v36 }
 0x477   : > { %1351 = vmatmul.msk.bf16.vlgmr.msrb.gmra.mxu0 %vm461_vm2, %v826_v35 }
 0x478   : > { %v895_v37 = vpop.f32.mrf.mxu1  ;;  %v851_v38 = vpop.f32.mrf.mxu2 }
 0x479   : > { %v1002_v1 = vpop.permute.xlu1 %1001 }
 0x47a   : > { %1364 = vmatmul.msk.bf16.vlgmr.msra.gmra.mxu1 %vm440_vm0, %v1002_v1 }
 0x48a   : > { %962 = vrot.lane.b32.xlu0 %v1685_v58, %s1517_s26 }
 0x492   : > { %1046 = vrot.lane.b32.xlu0 %v1683_v57, %s1516_s23 }
 0x49a   : > { %1087 = vrot.lane.b32.xlu0 %v1689_v62, %s1516_s23 }
 0x4e9   : > { %v900_v39 = vpop.xlane.xlu0 %899 }
 0x4ea   : > { %v901_v40 = vsub.f32 %v897_v34, %v900_v39 }
 0x4ec   : > { %v902_v41 = vmul.f32 1.442695, %v901_v40 }
 0x4ee   : > { %1451 = vpow2.f32 %v902_v41 }
 0x4f4   : > { %v1452_v42 = vpop.eup %1451  ;;  %v869_v43 = vpop.f32.mrf.mxu0 }
 0x4f5   : > { %v873_v44 = vadd.f32 %v869_v43, %v787_v20  ;;  %v904_v45 = vsel %vm461_vm2, %v1452_v42, 0.0 }
 0x4f6   : > { %905 = vadd.xlane.f32.xlu2 %v904_v45 }
 0x4f7   : > { %v1021_v18 = vpop.f32.mrf.mxu1 }
 0x4fc   : > { %v963_v46 = vpop.permute.xlu0 %962  ;;  %v871_v48 = vpop.f32.mrf.mxu0 }
 0x4fd   : > { %v968_v58 = vsel %vm440_vm0, %v963_v46, 0  ;;  %v1428_v48 = vld [vmem:[%s1822_s4] ss:$0 sm:$0xff] }
 0x4fe   : > { %977 = vmatpush.bf16.xpose.msra.mxu0 %v968_v58 }
 0x4ff   : > { %v1023_v20 = vpop.f32.mrf.mxu1 }
 0x504   : > { %v1047_v56 = vpop.permute.xlu0 %1046 }
 0x506   : > { %1105 = vmatpush.bf16.msrb.mxu0 %v1398_v10 }
 0x50c   : > { %v1088_v12 = vpop.permute.xlu0 %1087 }
 0x50e   : > { %960 = vrot.lane.b32.xlu2 %v1683_v57, %s1517_s26 }
 0x569   : > { %v906_v49 = vpop.xlane.xlu2 %905 }
 0x56a   : > { %1453 = vrcp.f32 %v906_v49 }
 0x570   : > { %v1454_v62 = vpop.eup %1453 }
 0x571   : > { %v908_v50 = vmul.f32 %v1454_v62, %v906_v49  ;;  %v961_v51 = vpop.permute.xlu2 %960 }
 0x572   : > { %1359 = vmatmul.msk.bf16.vlgmr.msra.gmra.mxu0 %vm440_vm0, %v961_v51 }
 0x573   : > { %v909_v52 = vsub.f32 2.0, %v908_v50 }
 0x575   : > { %v910_v53 = vmul.f32 %v1454_v62, %v909_v52 }
 0x577   : > { %v911_v54 = vmul.f32 %v1452_v42, %v910_v53 }
 0x579   : > { %v912_v55 = vpack.c.bf16 %v911_v54, %v911_v54 }
 0x57b   : > { %1358 = vmatmul.msk.bf16.vlgmr.msrb.gmra.mxu2 %vm461_vm2, %v912_v55 }
 0x582   : > { %1371 = vmatmul.msk.bf16.vlgmr.msrb.gmra.mxu0 %vm440_vm0, %v1088_v12 }
 0x58b   : > { %1366 = vmatmul.msk.bf16.vlgmr.msra.gmra.mxu2 %vm440_vm0, %v1047_v56 }
 0x5ef   : > { %v979_v59 = vpop.f32.mrf.mxu0 }
 0x5f0   : > { %v980_v60 = vadd.f32 %v979_v59, %v1709_v11 }
 0x5f2   : > { %v983_v57 = vmul.f32 0.088388346, %v980_v60 }
 0x5f4   : > { %v984_v61 = vsel %vm461_vm2, %v983_v57, -inf }
 0x5f5   : > { %985 = vmax.xlane.f32.xlu2 %v984_v61 }
 0x5f7   : > { %v981_v0 = vpop.f32.mrf.mxu0 }
 0x5fe   : > { %v955_v2 = vpop.f32.mrf.mxu2 }
 0x5ff   : > { %v959_v3 = vadd.f32 %v955_v2, %v873_v44  ;;  %v1107_v26 = vpop.f32.mrf.mxu0 }
 0x600   : > { %v1111_v27 = vpack.c.bf16 %v1107_v26, %v1107_v26 }
 0x602   : > { %v1116_v28 = vsel %vm580_vm3, %v1111_v27, 0 }
 0x603   : > { %1125 = vmatpush.bf16.msrb.mxu1 %v1116_v28 }
 0x606   : > { %v957_v4 = vpop.f32.mrf.mxu2 }
 0x607   : > { %v1109_v29 = vpop.f32.mrf.mxu0  ;;  %v1430_v4 = vld [vmem:[%s1824_s6] ss:$0 sm:$0xff] }
 0x60e   : > { %v1065_v5 = vpop.f32.mrf.mxu2 }
 0x60f   : > { %v1066_v6 = vadd.f32 %v1065_v5, %v1709_v11  ;;  %v1025_v11 = vpack.c.bf16 %v1021_v18, %v1021_v18 }
 0x611   : > { %v1069_v7 = vmul.f32 0.088388346, %v1066_v6  ;;  %v1030_v19 = vsel %vm580_vm3, %v1025_v11, 0 }
 0x612   : > { %1039 = vmatpush.bf16.msra.mxu3 %v1030_v19 }
 0x613   : > { %v1070_v8 = vsel %vm461_vm2, %v1069_v7, -inf }
 0x614   : > { %1071 = vmax.xlane.f32.xlu1 %v1070_v8 }
 0x616   : > { %v1067_v9 = vpop.f32.mrf.mxu2 }
 0x668   : > { %v986_v13 = vpop.xlane.xlu2 %985 }
 0x669   : > { %v987_v14 = vsub.f32 %v983_v57, %v986_v13 }
 0x66b   : > { %v988_v15 = vmul.f32 1.442695, %v987_v14 }
 0x66d   : > { %1455 = vpow2.f32 %v988_v15 }
 0x673   : > { %v1456_v16 = vpop.eup %1455 }
 0x674   : > { %v990_v17 = vsel %vm461_vm2, %v1456_v16, 0.0 }
 0x675   : > { %991 = vadd.xlane.f32.xlu0 %v990_v17 }
 0x687   : > { %v1072_v21 = vpop.xlane.xlu1 %1071 }
 0x688   : > { %v1073_v22 = vsub.f32 %v1069_v7, %v1072_v21 }
 0x68a   : > { %v1074_v23 = vmul.f32 1.442695, %v1073_v22 }
 0x68c   : > { %1457 = vpow2.f32 %v1074_v23 }
 0x692   : > { %v1458_v24 = vpop.eup %1457 }
 0x693   : > { %v1076_v25 = vsel %vm461_vm2, %v1458_v24, 0.0 }
 0x694   : > { %1077 = vadd.xlane.f32.xlu2 %v1076_v25 }
 0x6e8   : > { %v992_v30 = vpop.xlane.xlu0 %991 }
 0x6e9   : > { %1459 = vrcp.f32 %v992_v30 }
 0x6ef   : > { %v1460_v31 = vpop.eup %1459 }
 0x6f0   : > { %v994_v32 = vmul.f32 %v1460_v31, %v992_v30 }
 0x6f2   : > { %v995_v33 = vsub.f32 2.0, %v994_v32 }
 0x6f4   : > { %v996_v34 = vmul.f32 %v1460_v31, %v995_v33 }
 0x6f6   : > { %v997_v35 = vmul.f32 %v1456_v16, %v996_v34 }
 0x6f8   : > { %v998_v36 = vpack.c.bf16 %v997_v35, %v997_v35 }
 0x6fa   : > { %1365 = vmatmul.msk.bf16.vlgmr.msra.gmra.mxu3 %vm461_vm2, %v998_v36 }
 0x707   : > { %v1078_v37 = vpop.xlane.xlu2 %1077 }
 0x708   : > { %1461 = vrcp.f32 %v1078_v37 }
 0x70e   : > { %v1462_v38 = vpop.eup %1461 }
 0x70f   : > { %v1080_v39 = vmul.f32 %v1462_v38, %v1078_v37 }
 0x711   : > { %v1081_v40 = vsub.f32 2.0, %v1080_v39 }
 0x713   : > { %v1082_v41 = vmul.f32 %v1462_v38, %v1081_v40 }
 0x715   : > { %v1083_v42 = vmul.f32 %v1458_v24, %v1082_v41 }
 0x717   : > { %v1084_v43 = vpack.c.bf16 %v1083_v42, %v1083_v42 }
 0x719   : > { %1372 = vmatmul.msk.bf16.vlgmr.msrb.gmra.mxu1 %vm461_vm2, %v1084_v43 }
 0x77d   : > { %v1041_v44 = vpop.f32.mrf.mxu3 }
 0x77e   : > { %v1045_v46 = vadd.f32 %v1041_v44, %v959_v3 }
 0x785   : > { %v1043_v45 = vpop.f32.mrf.mxu3 }
 0x796   : > { %v1127_v58 = vpop.f32.mrf.mxu1 }
 0x797   : > { %v1131_v49 = vadd.f32 %v1127_v58, %v1045_v46 }
 0x799   : > { %v1136_v62 = vadd.f32 %v1428_v48, %v1131_v49 }
 0x79b   : > { %v1137_v50 = vadd.f32 %v1136_v62, %v1678_v47  ;;  %v1429_v47 = vld [vmem:[%s1823_s5] ss:$0 sm:$0xff] }
 0x79d   : > { %1140 = vadd.xlane.f32.xlu1 %v1137_v50 }
 0x79e   : > { %v1129_v51 = vpop.f32.mrf.mxu1 }
 0x810   : > { %v1141_v52 = vpop.xlane.xlu1 %1140 }
 0x811   : > { %v1142_v53 = vmul.f32 0.0078125, %v1141_v52 }
 0x813   : > { %v1143_v54 = vsub.f32 %v1137_v50, %v1142_v53 }
 0x815   : > { %v1144_v55 = vmul.f32 %v1143_v54, %v1143_v54 }
 0x817   : > { %1145 = vadd.xlane.f32.xlu0 %v1144_v55 }
 0x88a   : > { %v1146_v56 = vpop.xlane.xlu0 %1145 }
 0x88b   : > { %v1147_v59 = vmul.f32 0.0078125, %v1146_v56 }
 0x88d   : > { %v1148_v60 = vadd.f32 1e-05, %v1147_v59 }
 0x88f   : > { %1463 = vrsqrt.f32 %v1148_v60  ;;  %vm1155_vm5 = vweird.f32 %v1148_v60 }
 0x895   : > { %v1464_v57 = vpop.eup %1463 }
 0x896   : > { %v1150_v61 = vmul.f32 %v1464_v57, %v1148_v60  ;;  %vm1156_vm4 = vweird.f32 %v1464_v57 }
 0x897   : > { %vm1157_vm6 = vmor %vm1155_vm5, %vm1156_vm4 }
 0x898   : > { %v1151_v63 = vmul.f32 %v1464_v57, %v1150_v61 }
 0x89a   : > { %v1152_v0 = vmul.f32 0.5, %v1151_v63 }
 0x89c   : > { %v1153_v1 = vsub.f32 1.5, %v1152_v0 }
 0x89e   : > { %v1154_v2 = vmul.f32 %v1464_v57, %v1153_v1 }
 0x8a0   : > { %v1158_v3 = vsel %vm1157_vm6, %v1464_v57, %v1154_v2 }
 0x8a1   : > { %v1159_v5 = vmul.f32 %v1158_v3, %v1143_v54 }
 0x8a3   : > { %v1163_v6 = vmul.f32 %v1429_v47, %v1159_v5 }
 0x8a5   : > { %v1167_v7 = vadd.f32 %v1430_v4, %v1163_v6 }
 0x8a7   : > { %1168 = vst [vmem:[%s304_s13] sm:$0xff] %v1167_v7 }
 0x8a8 PF: > { %s18_s24 = sadd.s32 1, %s1505_s24  }
 0x8a9   : > { %p15_p7 = scmp.ge.s32.totalorder %s18_s24, 4  }
 0x8ab   :  { %17 = sbr.rel (!%p15_p7) target bundleno = 1 (0x1), region = 86 }
 0x8b0   :  { %1188 = vsyncpa [#allocation3], 1 }
 0x8b1   :  { %1190 = vsyncpa [#allocation3 + $0x1], 1 }

// kernel: transformer_fwd.12
= control target key start
LH: loop header
LB: loop body
LE: loop exit
PB: predicated region body
PF: predicated region fallthrough
CT: control target
= control target key end

     0   :  { %12 = vsyncpa [#allocation3], 0  ;;  %s1406_s24 = smov 0   ;;  %s1649_s0 = inlined_call_operand.vmem [shape: f32[16,128], index: 0, kind: input, shape index: {}]   ;;  %s1650_s1 = inlined_call_operand.vmem [shape: bf16[128,512], index: 1, kind: input, shape index: {}]   ;;  %s1651_s2 = inlined_call_operand.vmem [shape: f32[1,512], index: 2, kind: input, shape index: {}]   ;;  %s1652_s3 = inlined_call_operand.hbm [shape: bf16[512,128], index: 3, kind: input, shape index: {}]   ;;  %s1653_s4 = inlined_call_operand.vmem [shape: f32[1,128], index: 4, kind: input, shape index: {}]   ;;  %s1654_s5 = inlined_call_operand.vmem [shape: f32[1,128], index: 5, kind: input, shape index: {}]   ;;  %s1655_s6 = inlined_call_operand.vmem [shape: f32[1,128], index: 6, kind: input, shape index: {}]   ;;  %s1656_s7 = inlined_call_operand.vmem [shape: f32[16,128], index: 7, kind: output, shape index: {}]  }
   0x1 LB: > { %s218_s27 = sshll.u32 %s1652_s3, 4  ;;  %s1415_s28 = sadd.s32 4294967295, %s1361_s24   ;;  %s1361_s24 = sphi %s1406_s24, %s18_s24   ;;  %s219_s27 = int_to_ptr.hbm [resolvable:$true] %s218_s27 }
   0x2   : > { %p966_p0 = scmp.ge.s32.totalorder %s1361_s24, 1  ;;  %p201_p1 = scmp.lt.s32.totalorder %s1361_s24, 3 }
   0x3   : > { %p1303_p2 = scmp.eq.s32.totalorder %s1415_s28, 0  ;;  %s1363_s29 = smov [#allocation2]  }
   0x4   : > { %p202_p3 = pnand %p966_p0, %p201_p1  ;;  %s220_s30 = sshll.u32 %s1363_s29, 4  ;;  %s221_s30 = int_to_ptr.vmem [resolvable:$true] %s220_s30 }
   0x5   : > { %s1364_s8 = smov 64   ;;  %s1365_s9 = smov 4  }
   0x6   : > { %p1299_p4 = pneg %p202_p3  ;;  %252 = sbr.rel (%p202_p3) target bundleno = 590 (0x24e), region = 48 }
   0x8   : > { %p1300_p5 = pnand %p1303_p2, %p1299_p4 }
   0xa   : > { %1302 = dma.hbm_to_vmem [thread:$0]  (!%p1300_p5), %s219_s27, 4096, %s221_s30, [#allocation3], %s1364_s8, %s1364_s8, %s1365_s9  }
   0xb   : > { %1356 = dma.done.wait (%p1303_p2), [#allocation3], 4096  }
   0xc   : > { %1358 = vsyncadd (%p1303_p2), [#allocation3], 4294963200  ;;  %v1087_v0 = vld [vmem:[%s1650_s1 + $0xe0] sm:$0xf]  ;;  %v1261_v1 = vld [vmem:[%s1650_s1 + $0xec] sm:$0xf0] }
   0xd   : > { %v1095_v2 = vld [vmem:[%s1650_s1 + $0xe8] sm:$0xf]  ;;  %v1088_v3 = vor.u32 %v1261_v1, %v1087_v0  ;;  %v1262_v4 = vld [vmem:[%s1650_s1 + $0xf4] sm:$0xf0]  ;;  %v1260_v5 = vld [vmem:[%s1650_s1 + $0xec] sm:$0xf] }
   0xe   : > { %v1097_v6 = vld [vmem:[%s1650_s1 + $0xf8] sm:$0xf0]  ;;  %v1096_v7 = vor.u32 %v1262_v4, %v1095_v2  ;;  %v1259_v9 = vld [vmem:[%s1650_s1 + $0xe4] sm:$0xf]  ;;  %v1089_v10 = vld [vmem:[%s1650_s1 + $0xf0] sm:$0xf0] }
   0xf   : > { %v1100_v8 = vor.u32 %v1260_v5, %v1097_v6  ;;  %v1071_v11 = vld [vmem:[%s1650_s1 + $0xc0] sm:$0xf]  ;;  %495 = vmatpush.bf16.msra.mxu0 %v1088_v3  ;;  %v1092_v12 = vor.u32 %v1259_v9, %v1089_v10  ;;  %v1257_v13 = vld [vmem:[%s1650_s1 + $0xcc] sm:$0xf0]  ;;  %v1079_v14 = vld [vmem:[%s1650_s1 + $0xc8] sm:$0xf] }
  0x10   : > { %v1258_v15 = vld [vmem:[%s1650_s1 + $0xd4] sm:$0xf0]  ;;  %521 = vmatpush.bf16.msra.mxu2 %v1096_v7  ;;  %v1072_v16 = vor.u32 %v1257_v13, %v1071_v11  ;;  %v1256_v18 = vld [vmem:[%s1650_s1 + $0xcc] sm:$0xf]  ;;  %v1081_v19 = vld [vmem:[%s1650_s1 + $0xd8] sm:$0xf0] }
  0x11   : > { %534 = vmatpush.bf16.msra.mxu3 %v1100_v8  ;;  %v1080_v17 = vor.u32 %v1258_v15, %v1079_v14  ;;  %v1255_v20 = vld [vmem:[%s1650_s1 + $0xc4] sm:$0xf]  ;;  %508 = vmatpush.bf16.msra.mxu1 %v1092_v12  ;;  %v1084_v21 = vor.u32 %v1256_v18, %v1081_v19  ;;  %v1073_v22 = vld [vmem:[%s1650_s1 + $0xd0] sm:$0xf0]  ;;  %v1055_v23 = vld [vmem:[%s1650_s1 + $0xa0] sm:$0xf] }
  0x12   : > { %v1253_v24 = vld [vmem:[%s1650_s1 + $0xac] sm:$0xf0]  ;;  %v1076_v25 = vor.u32 %v1255_v20, %v1073_v22  ;;  %v1063_v26 = vld [vmem:[%s1650_s1 + $0xa8] sm:$0xf]  ;;  %v1254_v27 = vld [vmem:[%s1650_s1 + $0xb4] sm:$0xf0] }
  0x13   : > { %v1252_v28 = vld [vmem:[%s1650_s1 + $0xac] sm:$0xf]  ;;  %496 = vmatpush.bf16.msra.mxu0 %v1072_v16  ;;  %v1056_v29 = vor.u32 %v1253_v24, %v1055_v23  ;;  %v1065_v30 = vld [vmem:[%s1650_s1 + $0xb8] sm:$0xf0]  ;;  %v1251_v31 = vld [vmem:[%s1650_s1 + $0xa4] sm:$0xf]  ;;  %v1064_v33 = vor.u32 %v1254_v27, %v1063_v26 }
  0x14   : > { %v1057_v32 = vld [vmem:[%s1650_s1 + $0xb0] sm:$0xf0]  ;;  %522 = vmatpush.bf16.msra.mxu2 %v1080_v17  ;;  %v1068_v34 = vor.u32 %v1252_v28, %v1065_v30  ;;  %v1039_v35 = vld [vmem:[%s1650_s1 + $0x80] sm:$0xf]  ;;  %v1249_v36 = vld [vmem:[%s1650_s1 + $0x8c] sm:$0xf0] }
  0x15   : > { %535 = vmatpush.bf16.msra.mxu3 %v1084_v21  ;;  %v1047_v37 = vld [vmem:[%s1650_s1 + $0x88] sm:$0xf]  ;;  %509 = vmatpush.bf16.msra.mxu1 %v1076_v25  ;;  %v1060_v38 = vor.u32 %v1251_v31, %v1057_v32  ;;  %v1250_v39 = vld [vmem:[%s1650_s1 + $0x94] sm:$0xf0]  ;;  %v1248_v40 = vld [vmem:[%s1650_s1 + $0x8c] sm:$0xf]  ;;  %v1040_v44 = vor.u32 %v1249_v36, %v1039_v35 }
  0x16   : > { %v1049_v41 = vld [vmem:[%s1650_s1 + $0x98] sm:$0xf0]  ;;  %v1247_v42 = vld [vmem:[%s1650_s1 + $0x84] sm:$0xf]  ;;  %v1041_v43 = vld [vmem:[%s1650_s1 + $0x90] sm:$0xf0]  ;;  %v1048_v45 = vor.u32 %v1250_v39, %v1047_v37 }
  0x17   : > { %497 = vmatpush.bf16.msra.mxu0 %v1056_v29  ;;  %p283_p6 = scmp.lt.s32.totalorder %s1415_s28, 1  ;;  %v1052_v46 = vor.u32 %v1248_v40, %v1049_v41  ;;  %v1023_v47 = vld [vmem:[%s1650_s1 + $0x60] sm:$0xf]  ;;  %v1245_v48 = vld [vmem:[%s1650_s1 + $0x6c] sm:$0xf0]  ;;  %v1044_v50 = vor.u32 %v1247_v42, %v1041_v43  ;;  %v1278_v35 = vld [vmem:[#allocation2 + $0x78] sm:$0xff] }
  0x18   : > { %523 = vmatpush.bf16.msra.mxu2 %v1064_v33  ;;  %v1031_v49 = vld [vmem:[%s1650_s1 + $0x68] sm:$0xf]  ;;  %v1246_v51 = vld [vmem:[%s1650_s1 + $0x74] sm:$0xf0]  ;;  %v1244_v52 = vld [vmem:[%s1650_s1 + $0x6c] sm:$0xf]  ;;  %v1024_v56 = vor.u32 %v1245_v48, %v1023_v47 }
  0x19   : > { %536 = vmatpush.bf16.msra.mxu3 %v1068_v34  ;;  %510 = vmatpush.bf16.msra.mxu1 %v1060_v38  ;;  %v1033_v53 = vld [vmem:[%s1650_s1 + $0x78] sm:$0xf0]  ;;  %v1243_v54 = vld [vmem:[%s1650_s1 + $0x64] sm:$0xf]  ;;  %v1025_v55 = vld [vmem:[%s1650_s1 + $0x70] sm:$0xf0]  ;;  %v1032_v57 = vor.u32 %v1246_v51, %v1031_v49 }
  0x1a   : > { %s1658_s28 = smov (!%p283_p6, %s1415_s28), 1  ;;  %v1036_v58 = vor.u32 %v1244_v52, %v1033_v53  ;;  %v1007_v59 = vld [vmem:[%s1650_s1 + $0x40] sm:$0xf]  ;;  %v1241_v60 = vld [vmem:[%s1650_s1 + $0x4c] sm:$0xf0]  ;;  %v1028_v62 = vor.u32 %v1243_v54, %v1025_v55  ;;  %v1270_v33 = vld [vmem:[#allocation2 + $0x38] sm:$0xff] }
  0x1b   : > { %498 = vmatpush.bf16.msra.mxu0 %v1040_v44  ;;  %v1015_v61 = vld [vmem:[%s1650_s1 + $0x48] sm:$0xf]  ;;  %v1242_v63 = vld [vmem:[%s1650_s1 + $0x54] sm:$0xf0]  ;;  %v1240_v0 = vld [vmem:[%s1650_s1 + $0x4c] sm:$0xf]  ;;  %v1008_v4 = vor.u32 %v1241_v60, %v1007_v59 }
  0x1c   : > { %524 = vmatpush.bf16.msra.mxu2 %v1048_v45  ;;  %v1017_v1 = vld [vmem:[%s1650_s1 + $0x58] sm:$0xf0]  ;;  %v1239_v2 = vld [vmem:[%s1650_s1 + $0x44] sm:$0xf]  ;;  %v1009_v3 = vld [vmem:[%s1650_s1 + $0x50] sm:$0xf0]  ;;  %v1016_v5 = vor.u32 %v1242_v63, %v1015_v61 }
  0x1d   : > { %537 = vmatpush.bf16.msra.mxu3 %v1052_v46  ;;  %511 = vmatpush.bf16.msra.mxu1 %v1044_v50  ;;  %s971_s22 = sshll.u32 %s1658_s28, 3  ;;  %v1020_v6 = vor.u32 %v1240_v0, %v1017_v1  ;;  %v991_v7 = vld [vmem:[%s1650_s1 + $0x20] sm:$0xf]  ;;  %v1237_v8 = vld [vmem:[%s1650_s1 + $0x2c] sm:$0xf0]  ;;  %v1012_v10 = vor.u32 %v1239_v2, %v1009_v3  ;;  %v1286_v36 = vld [vmem:[#allocation2 + $0xb8] sm:$0xff] }
  0x1e   : > { %v999_v9 = vld [vmem:[%s1650_s1 + $0x28] sm:$0xf]  ;;  %v1238_v11 = vld [vmem:[%s1650_s1 + $0x34] sm:$0xf0]  ;;  %v1236_v12 = vld [vmem:[%s1650_s1 + $0x2c] sm:$0xf]  ;;  %v992_v16 = vor.u32 %v1237_v8, %v991_v7  ;;  %s286_s29 = scalar_lea.vmem %s1649_s0, %s971_s22  ;;  %s290_s30 = scalar_lea.vmem %s1656_s7, %s971_s22 }
  0x1f   : > { %499 = vmatpush.bf16.msra.mxu0 %v1024_v56  ;;  %v1001_v13 = vld [vmem:[%s1650_s1 + $0x38] sm:$0xf0]  ;;  %v1235_v14 = vld [vmem:[%s1650_s1 + $0x24] sm:$0xf]  ;;  %v993_v15 = vld [vmem:[%s1650_s1 + $0x30] sm:$0xf0]  ;;  %v1000_v17 = vor.u32 %v1238_v11, %v999_v9 }
  0x20   : > { %525 = vmatpush.bf16.msra.mxu2 %v1032_v57  ;;  %v1004_v18 = vor.u32 %v1236_v12, %v1001_v13  ;;  %v975_v19 = vld [vmem:[%s1650_s1] sm:$0xf]  ;;  %v1233_v20 = vld [vmem:[%s1650_s1 + $0xc] sm:$0xf0]  ;;  %v983_v21 = vld [vmem:[%s1650_s1 + $0x8] sm:$0xf]  ;;  %v996_v22 = vor.u32 %v1235_v14, %v993_v15 }
  0x21   : > { %538 = vmatpush.bf16.msra.mxu3 %v1036_v58  ;;  %512 = vmatpush.bf16.msra.mxu1 %v1028_v62  ;;  %v1234_v23 = vld [vmem:[%s1650_s1 + $0x14] sm:$0xf0]  ;;  %v1232_v24 = vld [vmem:[%s1650_s1 + $0xc] sm:$0xf]  ;;  %v985_v25 = vld [vmem:[%s1650_s1 + $0x18] sm:$0xf0]  ;;  %v976_v28 = vor.u32 %v1233_v20, %v975_v19 }
  0x22   : > { %v1231_v26 = vld [vmem:[%s1650_s1 + $0x4] sm:$0xf]  ;;  %v977_v27 = vld [vmem:[%s1650_s1 + $0x10] sm:$0xf0]  ;;  %v984_v30 = vor.u32 %v1234_v23, %v983_v21  ;;  %v988_v31 = vor.u32 %v1232_v24, %v985_v25  ;;  %v1294_v38 = vld [vmem:[#allocation2 + $0xf8] sm:$0xff] }
  0x23   : > { %500 = vmatpush.bf16.msra.mxu0 %v1008_v4  ;;  %v1624_v29 = vld [vmem:[%s286_s29] sm:$0xff]  ;;  %v980_v32 = vor.u32 %v1231_v26, %v977_v27  ;;  %v1269_v37 = vld [vmem:[#allocation2 + $0x30] sm:$0xff]  ;;  %v1268_v41 = vld [vmem:[#allocation2 + $0x28] sm:$0xff] }
  0x24   : > { %526 = vmatpush.bf16.msra.mxu2 %v1016_v5  ;;  %v292_v34 = vpack.c.bf16 %v1624_v29, %v1624_v29  ;;  %v1277_v39 = vld [vmem:[#allocation2 + $0x70] sm:$0xff]  ;;  %v1276_v43 = vld [vmem:[#allocation2 + $0x68] sm:$0xff]  ;;  %v1267_v45 = vld [vmem:[#allocation2 + $0x20] sm:$0xff] }
  0x25   : > { %539 = vmatpush.bf16.msra.mxu3 %v1020_v6  ;;  %513 = vmatpush.bf16.msra.mxu1 %v1012_v10  ;;  %v1285_v40 = vld [vmem:[#allocation2 + $0xb0] sm:$0xff]  ;;  %v1284_v44 = vld [vmem:[#allocation2 + $0xa8] sm:$0xff]  ;;  %v1275_v47 = vld [vmem:[#allocation2 + $0x60] sm:$0xff] }
  0x26   : > { %v1293_v42 = vld [vmem:[#allocation2 + $0xf0] sm:$0xff]  ;;  %v1292_v46 = vld [vmem:[#allocation2 + $0xe8] sm:$0xff]  ;;  %v1283_v48 = vld [vmem:[#allocation2 + $0xa0] sm:$0xff] }
  0x27   : > { %501 = vmatpush.bf16.msra.mxu0 %v992_v16  ;;  %v1266_v49 = vld [vmem:[#allocation2 + $0x18] sm:$0xff]  ;;  %v1291_v50 = vld [vmem:[#allocation2 + $0xe0] sm:$0xff]  ;;  %v1265_v53 = vld [vmem:[#allocation2 + $0x10] sm:$0xff] }
  0x28   : > { %527 = vmatpush.bf16.msra.mxu2 %v1000_v17  ;;  %v1274_v51 = vld [vmem:[#allocation2 + $0x58] sm:$0xff]  ;;  %v1273_v55 = vld [vmem:[#allocation2 + $0x50] sm:$0xff]  ;;  %v1264_v56 = vld [vmem:[#allocation2 + $0x8] sm:$0xff] }
  0x29   : > { %540 = vmatpush.bf16.msra.mxu3 %v1004_v18  ;;  %514 = vmatpush.bf16.msra.mxu1 %v996_v22  ;;  %v1282_v52 = vld [vmem:[#allocation2 + $0x98] sm:$0xff]  ;;  %v1272_v57 = vld [vmem:[#allocation2 + $0x48] sm:$0xff]  ;;  %v1281_v58 = vld [vmem:[#allocation2 + $0x90] sm:$0xff] }
  0x2a   : > { %v1290_v54 = vld [vmem:[#allocation2 + $0xd8] sm:$0xff]  ;;  %v1289_v59 = vld [vmem:[#allocation2 + $0xd0] sm:$0xff]  ;;  %v1263_v60 = vld [vmem:[#allocation2] sm:$0xff] }
  0x2b   : > { %502 = vmatpush.bf16.msra.mxu0 %v976_v28  ;;  %v1271_v61 = vld [vmem:[#allocation2 + $0x40] sm:$0xff]  ;;  %v1280_v62 = vld [vmem:[#allocation2 + $0x88] sm:$0xff] }
  0x2c   : > { %528 = vmatpush.bf16.msra.mxu2 %v984_v30  ;;  %v1288_v63 = vld [vmem:[#allocation2 + $0xc8] sm:$0xff]  ;;  %v1279_v0 = vld [vmem:[#allocation2 + $0x80] sm:$0xff] }
  0x2d   : > { %541 = vmatpush.bf16.msra.mxu3 %v988_v31  ;;  %515 = vmatpush.bf16.msra.mxu1 %v980_v32  ;;  %v1287_v1 = vld [vmem:[#allocation2 + $0xc0] sm:$0xff] }
  0x2e   : > { %503 = vmatmul.bf16.vlgmr.msra.gmra.mxu0 %v292_v34  ;;  %v325_v2 = vld [vmem:[%s1651_s2] sm:$0xf] }
  0x2f   : > { %815 = vmatpush.bf16.msrb.mxu0 %v1270_v33  ;;  %529 = vmatmul.bf16.vlgmr.msra.gmra.mxu2 %v292_v34  ;;  %v327_v3 = vperm.slane %v325_v2, 0  ;;  %v328_v4 = vperm.slane %v325_v2, 1  ;;  %v329_v10 = vperm.slane %v325_v2, 2  ;;  %v330_v11 = vperm.slane %v325_v2, 3  ;;  %v1316_v28 = vld [vmem:[%s1653_s4] ss:$0 sm:$0xff] }
  0x30   : > { %542 = vmatmul.bf16.vlgmr.msra.gmra.mxu3 %v292_v34  ;;  %516 = vmatmul.bf16.vlgmr.msra.gmra.mxu1 %v292_v34 }
  0x31   : > { %828 = vmatpush.bf16.msrb.mxu1 %v1278_v35  ;;  %841 = vmatpush.bf16.msrb.mxu2 %v1286_v36 }
  0x32   : > { %854 = vmatpush.bf16.msrb.mxu3 %v1294_v38 }
  0x33   : > { %816 = vmatpush.bf16.msrb.mxu0 %v1269_v37 }
  0x35   : > { %829 = vmatpush.bf16.msrb.mxu1 %v1277_v39  ;;  %842 = vmatpush.bf16.msrb.mxu2 %v1285_v40 }
  0x36   : > { %855 = vmatpush.bf16.msrb.mxu3 %v1293_v42 }
  0x37   : > { %817 = vmatpush.bf16.msrb.mxu0 %v1268_v41 }
  0x39   : > { %830 = vmatpush.bf16.msrb.mxu1 %v1276_v43  ;;  %843 = vmatpush.bf16.msrb.mxu2 %v1284_v44 }
  0x3a   : > { %856 = vmatpush.bf16.msrb.mxu3 %v1292_v46 }
  0x3b   : > { %818 = vmatpush.bf16.msrb.mxu0 %v1267_v45 }
  0x3d   : > { %831 = vmatpush.bf16.msrb.mxu1 %v1275_v47  ;;  %844 = vmatpush.bf16.msrb.mxu2 %v1283_v48 }
  0x3e   : > { %857 = vmatpush.bf16.msrb.mxu3 %v1291_v50 }
  0x3f   : > { %819 = vmatpush.bf16.msrb.mxu0 %v1266_v49 }
  0x41   : > { %832 = vmatpush.bf16.msrb.mxu1 %v1274_v51  ;;  %845 = vmatpush.bf16.msrb.mxu2 %v1282_v52 }
  0x42   : > { %858 = vmatpush.bf16.msrb.mxu3 %v1290_v54  ;;  %v1317_v54 = vld [vmem:[%s1654_s5] ss:$0 sm:$0xff] }
  0x43   : > { %820 = vmatpush.bf16.msrb.mxu0 %v1265_v53 }
  0x45   : > { %833 = vmatpush.bf16.msrb.mxu1 %v1273_v55  ;;  %846 = vmatpush.bf16.msrb.mxu2 %v1281_v58 }
  0x46   : > { %859 = vmatpush.bf16.msrb.mxu3 %v1289_v59 }
  0x47   : > { %821 = vmatpush.bf16.msrb.mxu0 %v1264_v56  ;;  %v1318_v56 = vld [vmem:[%s1655_s6] ss:$0 sm:$0xff] }
  0x49   : > { %834 = vmatpush.bf16.msrb.mxu1 %v1272_v57  ;;  %847 = vmatpush.bf16.msrb.mxu2 %v1280_v62 }
  0x4a   : > { %860 = vmatpush.bf16.msrb.mxu3 %v1288_v63 }
  0x4b   : > { %822 = vmatpush.bf16.msrb.mxu0 %v1263_v60 }
  0x4d   : > { %835 = vmatpush.bf16.msrb.mxu1 %v1271_v61  ;;  %848 = vmatpush.bf16.msrb.mxu2 %v1279_v0 }
  0x4e   : > { %861 = vmatpush.bf16.msrb.mxu3 %v1287_v1 }
  0xab   : > { %v504_v5 = vpop.f32.mrf.mxu0 }
  0xac   : > { %v505_v6 = vadd.f32 %v504_v5, %v327_v3 }
  0xad   : > { %v517_v7 = vpop.f32.mrf.mxu1 }
  0xae   : > { %v547_v8 = vmax.f32 %v505_v6, 0.0  ;;  %v518_v9 = vadd.f32 %v517_v7, %v328_v4 }
  0xb0   : > { %v551_v12 = vpack.c.bf16 %v547_v8, %v547_v8  ;;  %v548_v13 = vmax.f32 %v518_v9, 0.0 }
  0xb2   : > { %v552_v14 = vpack.c.bf16 %v548_v13, %v548_v13  ;;  %v530_v15 = vpop.f32.mrf.mxu2  ;;  %823 = vmatmul.bf16.vlgmr.msrb.gmra.mxu0 %v551_v12 }
  0xb3   : > { %v543_v16 = vpop.f32.mrf.mxu3  ;;  %v531_v17 = vadd.f32 %v530_v15, %v329_v10  ;;  %v506_v19 = vpop.f32.mrf.mxu0 }
  0xb4   : > { %v544_v18 = vadd.f32 %v543_v16, %v330_v11  ;;  %836 = vmatmul.bf16.vlgmr.msrb.gmra.mxu1 %v552_v14 }
  0xb5   : > { %v549_v20 = vmax.f32 %v531_v17, 0.0  ;;  %v519_v22 = vpop.f32.mrf.mxu1 }
  0xb6   : > { %v550_v21 = vmax.f32 %v544_v18, 0.0 }
  0xb7   : > { %v553_v23 = vpack.c.bf16 %v549_v20, %v549_v20 }
  0xb8   : > { %v554_v24 = vpack.c.bf16 %v550_v21, %v550_v21 }
  0xb9   : > { %849 = vmatmul.bf16.vlgmr.msrb.gmra.mxu2 %v553_v23 }
  0xba   : > { %862 = vmatmul.bf16.vlgmr.msrb.gmra.mxu3 %v554_v24  ;;  %v532_v25 = vpop.f32.mrf.mxu2 }
  0xbb   : > { %v545_v26 = vpop.f32.mrf.mxu3 }
 0x12f   : > { %v824_v27 = vpop.f32.mrf.mxu0 }
 0x130   : > { %v825_v31 = vadd.f32 %v1316_v28, %v824_v27 }
 0x131   : > { %v837_v30 = vpop.f32.mrf.mxu1 }
 0x132   : > { %v838_v33 = vadd.f32 %v837_v30, %v825_v31 }
 0x137   : > { %v826_v32 = vpop.f32.mrf.mxu0 }
 0x139   : > { %v839_v34 = vpop.f32.mrf.mxu1 }
 0x13c   : > { %v850_v35 = vpop.f32.mrf.mxu2 }
 0x13d   : > { %v863_v36 = vpop.f32.mrf.mxu3  ;;  %v851_v37 = vadd.f32 %v850_v35, %v838_v33 }
 0x13f   : > { %v864_v38 = vadd.f32 %v863_v36, %v851_v37 }
 0x141   : > { %v867_v39 = vadd.f32 %v864_v38, %v1624_v29 }
 0x143   : > { %870 = vadd.xlane.f32.xlu0 %v867_v39 }
 0x144   : > { %v852_v40 = vpop.f32.mrf.mxu2 }
 0x145   : > { %v865_v41 = vpop.f32.mrf.mxu3 }
 0x1b6   : > { %v871_v42 = vpop.xlane.xlu0 %870 }
 0x1b7   : > { %v872_v43 = vmul.f32 0.0078125, %v871_v42 }
 0x1b9   : > { %v873_v44 = vsub.f32 %v867_v39, %v872_v43 }
 0x1bb   : > { %v874_v45 = vmul.f32 %v873_v44, %v873_v44 }
 0x1bd   : > { %875 = vadd.xlane.f32.xlu0 %v874_v45 }
 0x230   : > { %v876_v46 = vpop.xlane.xlu0 %875 }
 0x231   : > { %v877_v47 = vmul.f32 0.0078125, %v876_v46 }
 0x233   : > { %v878_v48 = vadd.f32 1e-05, %v877_v47 }
 0x235   : > { %1319 = vrsqrt.f32 %v878_v48  ;;  %vm885_vm1 = vweird.f32 %v878_v48 }
 0x23b   : > { %v1320_v49 = vpop.eup %1319 }
 0x23c   : > { %v880_v50 = vmul.f32 %v1320_v49, %v878_v48  ;;  %vm886_vm0 = vweird.f32 %v1320_v49 }
 0x23d   : > { %vm887_vm2 = vmor %vm885_vm1, %vm886_vm0 }
 0x23e   : > { %v881_v51 = vmul.f32 %v1320_v49, %v880_v50 }
 0x240   : > { %v882_v52 = vmul.f32 0.5, %v881_v51 }
 0x242   : > { %v883_v53 = vsub.f32 1.5, %v882_v52 }
 0x244   : > { %v884_v29 = vmul.f32 %v1320_v49, %v883_v53 }
 0x246   : > { %v888_v55 = vsel %vm887_vm2, %v1320_v49, %v884_v29 }
 0x247   : > { %v889_v57 = vmul.f32 %v888_v55, %v873_v44 }
 0x249   : > { %v893_v58 = vmul.f32 %v1317_v54, %v889_v57 }
 0x24b   : > { %v897_v59 = vadd.f32 %v1318_v56, %v893_v58 }
 0x24d   : > { %898 = vst [vmem:[%s290_s30] sm:$0xff] %v897_v59 }
 0x24e PF: > { %s18_s24 = sadd.s32 1, %s1361_s24  }
 0x24f   : > { %p15_p7 = scmp.ge.s32.totalorder %s18_s24, 4  }
 0x251   :  { %17 = sbr.rel (!%p15_p7) target bundleno = 1 (0x1), region = 83 }
 0x256   :  { %918 = vsyncpa [#allocation3], 1 }
 0x257   :  { %920 = vsyncpa [#allocation3 + $0x1], 1 }

// kernel: transformer_fwd.21
= control target key start
LH: loop header
LB: loop body
LE: loop exit
PB: predicated region body
PF: predicated region fallthrough
CT: control target
= control target key end

     0   :  { %8 = vsyncpa [#allocation3], 0  ;;  %s1088_s0 = inlined_call_operand.vmem [shape: f32[16,128], index: 0, kind: input, shape index: {}]   ;;  %s1089_s1 = inlined_call_operand.hbm [shape: bf16[128,512], index: 1, kind: input, shape index: {}]   ;;  %s1090_s2 = inlined_call_operand.vmem [shape: f32[1,512], index: 2, kind: input, shape index: {}]   ;;  %s1091_s3 = inlined_call_operand.hbm [shape: f32[16,512], index: 3, kind: output, shape index: {}]  }
   0x1   :  { %10 = vsyncpa [#allocation3 + $0x1], 0 }
   0x2   :  { %11 = vsyncpa [#allocation4], 0 }
   0x3   :  { %13 = vsyncpa [#allocation4 + $0x1], 0  ;;  %s880_s12 = smov 0   ;;  %s882_s13 = smov 0  }
   0x4   :  { %s884_s14 = smov 0   ;;  %s886_s15 = smov 0  }
   0x5   :  { %s888_s16 = smov 0   ;;  %s890_s17 = smov 0  }
   0x6   :  { %s892_s18 = smov 0   ;;  %s894_s19 = smov 0  }
   0x7   :  { %s896_s20 = smov 0   ;;  %s898_s21 = smov 0  }
   0x8   :  { %s900_s22 = smov 0  }
   0x9 LB: > { %1095 = sst [smem:[#allocation8_spill]] %s851_s21  ;;  %s499_s23 = sadd.s32 4294967295, %s855_s22   ;;  %s855_s22 = sphi %s900_s22, %s19_s22   ;;  %s851_s21 = sphi %s898_s21, %s1106_s21   ;;  %s847_s20 = sphi %s896_s20, %s1114_s20   ;;  %s843_s19 = sphi %s894_s19, %s1104_s19   ;;  %s839_s18 = sphi %s892_s18, %s1113_s18   ;;  %s835_s17 = sphi %s890_s17, %s1112_s17   ;;  %s831_s16 = sphi %s888_s16, %s1111_s16   ;;  %s827_s15 = sphi %s886_s15, %s1110_s15   ;;  %s823_s14 = sphi %s884_s14, %s1109_s14   ;;  %s819_s13 = sphi %s882_s13, %s1108_s13   ;;  %s815_s12 = sphi %s880_s12, %s1107_s12  }
   0xa   : > { %s500_s24 = sadd.s32 4294967294, %s855_s22   ;;  %s28_s25 = sadd.s32 1, %s847_s20 }
   0xb   : > { %s31_s26 = sadd.s32 1, %s851_s21  ;;  %p29_p0 = scmp.ge.s32.totalorder %s28_s25, 2 }
   0xc   : > { %s64_s27 = sadd.s32 1, %s835_s17  ;;  %p71_p1 = scmp.ne.s32.totalorder %s835_s17, %s831_s16 }
   0xd   : > { %p72_p2 = scmp.eq.s32.totalorder %s855_s22, 0  ;;  %s1116_s25 = smov (%p29_p0, %s28_s25), 0 }
   0xe   : > { %1096 = sst [smem:[#allocation9_spill]] %s1116_s25  ;;  %s1118_s26 = smov (!%p29_p0, %s31_s26), %s851_s21 }
   0xf   : > { %s61_s28 = ssub.s32 %s847_s20, %s1116_s25  ;;  %p946_p3 = por %p72_p2, %p71_p1 }
  0x10   : > { %p33_p4 = scmp.ge.s32.totalorder %s1118_s26, 2  ;;  %p62_p5 = scmp.eq.s32.totalorder %s61_s28, 0 }
  0x11   : > { %p77_p6 = scmp.ne.s32.totalorder %s831_s16, %s827_s15  ;;  %p78_p7 = scmp.eq.s32.totalorder %s499_s23, 0 }
  0x12   : > { %s1120_s26 = smov (%p33_p4, %s1118_s26), 0  ;;  %s118_s7 = sadd.s32 1, %s823_s14 }
  0x13   : > { %1098 = sst [smem:[#allocation10_spill]] %s1120_s26  ;;  %p956_p8 = por %p78_p7, %p77_p6 }
  0x14   : > { %s954_s30 = scalar_select %p62_p5, %s835_s17, %s64_s27  }
  0x15   : > { %s113_s5 = ssub.s32 %s851_s21, %s1120_s26  ;;  %p128_p10 = scmp.ne.s32.totalorder %s823_s14, %s819_s13 }
  0x16   : > { %1099 = sst [smem:[#allocation11_spill]] %s954_s30  ;;  %s115_s6 = sor.u32 %s113_s5, %s61_s28 }
  0x17   : > { %p116_p9 = scmp.eq.s32.totalorder %s115_s6, 0  ;;  %p129_p11 = scmp.eq.s32.totalorder %s499_s23, 3 }
  0x18   : > { %p134_p12 = scmp.ne.s32.totalorder %s819_s13, %s815_s12  ;;  %p135_p0 = scmp.eq.s32.totalorder %s500_s24, 3 }
  0x19   : > { %s968_s8 = scalar_select %p116_p9, %s823_s14, %s118_s7  }
  0x1a   : > { %p970_p13 = por %p129_p11, %p128_p10  ;;  %p610_p1 = scmp.lt.s32.totalorder %s855_s22, 4 }
  0x1b   : > { %p975_p2 = por %p135_p0, %p134_p12  ;;  %s162_s11 = sand.u32 1, %s835_s17  }
  0x1c   : > { %s503_s15 = sshll.u32 %s162_s11, 7  ;;  %s581_s27 = sshll.u32 %s847_s20, 3 }
  0x1d   : > { %s171_s5 = scalar_lea.hbm %s1089_s1, %s581_s27  ;;  %s166_s6 = scalar_lea.vmem [#allocation2], %s503_s15 }
  0x1e   : > { %s174_s7 = sshll.u32 %s166_s6, 4  ;;  %s172_s26 = sshll.u32 %s171_s5, 4  ;;  %s175_s7 = int_to_ptr.vmem [resolvable:$true] %s174_s7  ;;  %s173_s26 = int_to_ptr.hbm [resolvable:$true] %s172_s26 }
  0x1f   : > { %p603_p4 = pnand %p610_p1, %p946_p3  ;;  %s163_s24 = scalar_lea.sflag [#allocation3], %s162_s11 }
  0x20   : > { %s857_s25 = smov 256   ;;  %s858_s21 = smov 128  }
  0x21   : > { %s859_s30 = smov 8   ;;  %p506_p5 = scmp.ge.s32.totalorder %s855_s22, 1 }
  0x22   : > { %605 = dma.hbm_to_vmem [thread:$0]  (!%p603_p4), %s173_s26, 2048, %s175_s7, %s163_s24, %s857_s25, %s858_s21, %s859_s30  }
  0x23   : > { %p190_p6 = scmp.lt.s32.totalorder %s855_s22, 5 }
  0x25   : > { %p191_p7 = pnand %p506_p5, %p190_p6 }
  0x26   : > { %s196_s23 = sand.u32 (!%p191_p7), 1, %s831_s16  }
  0x27   : > { %194 = sbr.rel (%p191_p7) target bundleno = 214 (0xd6), region = 32  ;;  %s507_s27 = sshll.u32 (!%p191_p7), %s196_s23, 7 }
  0x28   : > { %s197_s15 = scalar_lea.sflag (!%p191_p7), [#allocation3], %s196_s23  ;;  %s989_s28 = scalar_lea.vmem (!%p191_p7), [#allocation2], %s507_s27 }
  0x2c   : > { %806 = dma.done.wait (%p956_p8), %s197_s15, 2048  }
  0x2d   : > { %808 = vsyncadd (%p956_p8), %s197_s15, 4294965248  ;;  %v569_v0 = vld [vmem:[%s989_s28 + $0x70] sm:$0xf]  ;;  %v597_v1 = vld [vmem:[%s989_s28 + $0x74] sm:$0xf0]  ;;  %p232_p3 = scmp.lt.s32.totalorder %s843_s19, 1 }
  0x2e   : > { %v596_v2 = vld [vmem:[%s989_s28 + $0x74] sm:$0xf]  ;;  %v570_v3 = vor.u32 %v597_v1, %v569_v0  ;;  %v571_v4 = vld [vmem:[%s989_s28 + $0x78] sm:$0xf0]  ;;  %v561_v5 = vld [vmem:[%s989_s28 + $0x60] sm:$0xf] }
  0x2f   : > { %v595_v6 = vld [vmem:[%s989_s28 + $0x64] sm:$0xf0]  ;;  %v574_v7 = vor.u32 %v596_v2, %v571_v4  ;;  %v594_v8 = vld [vmem:[%s989_s28 + $0x64] sm:$0xf]  ;;  %v563_v9 = vld [vmem:[%s989_s28 + $0x68] sm:$0xf0] }
  0x30   : > { %347 = vmatpush.bf16.msra.mxu0 %v570_v3  ;;  %v562_v10 = vor.u32 %v595_v6, %v561_v5  ;;  %v566_v11 = vor.u32 %v594_v8, %v563_v9  ;;  %v553_v12 = vld [vmem:[%s989_s28 + $0x50] sm:$0xf]  ;;  %v593_v13 = vld [vmem:[%s989_s28 + $0x54] sm:$0xf0]  ;;  %v592_v14 = vld [vmem:[%s989_s28 + $0x54] sm:$0xf] }
  0x31   : > { %360 = vmatpush.bf16.msra.mxu1 %v574_v7  ;;  %v555_v15 = vld [vmem:[%s989_s28 + $0x58] sm:$0xf0]  ;;  %v554_v16 = vor.u32 %v593_v13, %v553_v12  ;;  %v545_v18 = vld [vmem:[%s989_s28 + $0x40] sm:$0xf]  ;;  %v591_v19 = vld [vmem:[%s989_s28 + $0x44] sm:$0xf0] }
  0x32   : > { %v558_v17 = vor.u32 %v592_v14, %v555_v15  ;;  %v590_v20 = vld [vmem:[%s989_s28 + $0x44] sm:$0xf]  ;;  %v547_v21 = vld [vmem:[%s989_s28 + $0x48] sm:$0xf0]  ;;  %v546_v22 = vor.u32 %v591_v19, %v545_v18  ;;  %v537_v24 = vld [vmem:[%s989_s28 + $0x30] sm:$0xf] }
  0x33   : > { %v550_v23 = vor.u32 %v590_v20, %v547_v21  ;;  %v589_v25 = vld [vmem:[%s989_s28 + $0x34] sm:$0xf0]  ;;  %v588_v26 = vld [vmem:[%s989_s28 + $0x34] sm:$0xf]  ;;  %v539_v27 = vld [vmem:[%s989_s28 + $0x38] sm:$0xf0] }
  0x34   : > { %348 = vmatpush.bf16.msra.mxu0 %v562_v10  ;;  %v538_v28 = vor.u32 %v589_v25, %v537_v24  ;;  %v542_v29 = vor.u32 %v588_v26, %v539_v27  ;;  %v529_v30 = vld [vmem:[%s989_s28 + $0x20] sm:$0xf]  ;;  %v587_v31 = vld [vmem:[%s989_s28 + $0x24] sm:$0xf0]  ;;  %v586_v32 = vld [vmem:[%s989_s28 + $0x24] sm:$0xf] }
  0x35   : > { %361 = vmatpush.bf16.msra.mxu1 %v566_v11  ;;  %v531_v33 = vld [vmem:[%s989_s28 + $0x28] sm:$0xf0]  ;;  %s233_s21 = scalar_select %p232_p3, %s843_s19, 1  ;;  %v530_v34 = vor.u32 %v587_v31, %v529_v30  ;;  %v521_v36 = vld [vmem:[%s989_s28 + $0x10] sm:$0xf] }
  0x36   : > { %v534_v35 = vor.u32 %v586_v32, %v531_v33  ;;  %v585_v37 = vld [vmem:[%s989_s28 + $0x14] sm:$0xf0]  ;;  %v584_v38 = vld [vmem:[%s989_s28 + $0x14] sm:$0xf]  ;;  %v523_v39 = vld [vmem:[%s989_s28 + $0x18] sm:$0xf0] }
  0x37   : > { %s509_s25 = sshll.u32 %s233_s21, 3  ;;  %v522_v40 = vor.u32 %v585_v37, %v521_v36  ;;  %v526_v41 = vor.u32 %v584_v38, %v523_v39  ;;  %v513_v42 = vld [vmem:[%s989_s28] sm:$0xf]  ;;  %v583_v43 = vld [vmem:[%s989_s28 + $0x4] sm:$0xf0]  ;;  %s510_s4 = sshll.u32 %s839_s18, 1 }
  0x38   : > { %349 = vmatpush.bf16.msra.mxu0 %v554_v16  ;;  %s235_s30 = scalar_lea.vmem %s1088_s0, %s509_s25  ;;  %v582_v44 = vld [vmem:[%s989_s28 + $0x4] sm:$0xf]  ;;  %v515_v45 = vld [vmem:[%s989_s28 + $0x8] sm:$0xf0]  ;;  %v514_v46 = vor.u32 %v583_v43, %v513_v42  ;;  %p238_p8 = scmp.lt.s32.totalorder %s510_s4, 3 }
  0x39   : > { %362 = vmatpush.bf16.msra.mxu1 %v558_v17  ;;  %v243_v47 = vld [vmem:[%s235_s30] sm:$0xff]  ;;  %v518_v48 = vor.u32 %v582_v44, %v515_v45  ;;  %s577_s5 = sshll.u32 %s843_s19, 2  ;;  %s229_s27 = sand.u32 1, %s819_s13  }
  0x3a   : > { %v244_v49 = vpack.c.bf16 %v243_v47, %v243_v47  ;;  %s239_s11 = scalar_select %p238_p8, %s510_s4, 3 }
  0x3b   : > { %s387_s6 = sadd.s32 %s577_s5, %s510_s4  ;;  %s508_s28 = sshll.u32 %s229_s27, 4 }
  0x3c   : > { %350 = vmatpush.bf16.msra.mxu0 %v546_v22  ;;  %s240_s23 = scalar_lea.vmem %s1090_s2, %s239_s11  ;;  %s578_s15 = sshll.u32 %s387_s6, 3 }
  0x3d   : > { %363 = vmatpush.bf16.msra.mxu1 %v550_v23  ;;  %v261_v50 = vld [vmem:[%s240_s23] sm:$0x3]  ;;  %s389_s26 = scalar_lea.hbm %s1091_s3, %s578_s15  ;;  %s231_s29 = scalar_lea.vmem [#allocation5], %s508_s28 }
  0x3e   : > { %v263_v51 = vperm.slane %v261_v50, 0  ;;  %v264_v52 = vperm.slane %v261_v50, 1  ;;  %s391_s18 = sshll.u32 %s231_s29, 4  ;;  %s393_s30 = sshll.u32 %s389_s26, 4  ;;  %s392_s18 = int_to_ptr.vmem [resolvable:$true] %s391_s18  ;;  %s394_s30 = int_to_ptr.hbm [resolvable:$true] %s393_s30 }
  0x3f   : > { %s376_s19 = scalar_lea.sflag [#allocation4], %s229_s27  ;;  %s747_s4 = sshra.s32 %s394_s30, 4  ;;  %s748_s4 = int_to_ptr.hbm [resolvable:$true] %s747_s4 }
  0x40   : > { %351 = vmatpush.bf16.msra.mxu0 %v538_v28  ;;  %s749_s11 = scalar_lea.hbm %s748_s4, 16  ;;  %s753_s7 = scalar_lea.hbm %s1091_s3, 64 }
  0x41   : > { %364 = vmatpush.bf16.msra.mxu1 %v542_v29  ;;  %p750_p9 = scmp.ne.s32.totalorder %s748_s4, %s749_s11  ;;  %p754_p12 = scmp.lt.s32.totalorder %s748_s4, %s1091_s3 }
  0x42   : > { %p755_p0 = scmp.lt.s32.totalorder %s753_s7, %s749_s11 }
  0x43   : > { %p751_p10 = pnand %p750_p9, %p970_p13 }
  0x44   : > { %352 = vmatpush.bf16.msra.mxu0 %v530_v34  ;;  %p756_p1 = por %p755_p0, %p754_p12 }
  0x45   : > { %365 = vmatpush.bf16.msra.mxu1 %v534_v35  ;;  %p752_p11 = pneg %p751_p10 }
  0x47   : > { %p757_p4 = pnand %p756_p1, %p752_p11 }
  0x48   : > { %353 = vmatpush.bf16.msra.mxu0 %v522_v40 }
  0x49   : > { %366 = vmatpush.bf16.msra.mxu1 %v526_v41 }
  0x4c   : > { %354 = vmatpush.bf16.msra.mxu0 %v514_v46 }
  0x4d   : > { %367 = vmatpush.bf16.msra.mxu1 %v518_v48 }
  0x4f   : > { %355 = vmatmul.bf16.vlgmr.msra.gmra.mxu0 %v244_v49 }
  0x50   : > { %368 = vmatmul.bf16.vlgmr.msra.gmra.mxu1 %v244_v49 }
  0xcc   : > { %v356_v53 = vpop.f32.mrf.mxu0 }
  0xcd   : > { %v357_v54 = vadd.f32 %v356_v53, %v263_v51  ;;  %v369_v55 = vpop.f32.mrf.mxu1 }
  0xce   : > { %v370_v56 = vadd.f32 %v369_v55, %v264_v52 }
  0xcf   : > { %373 = vst [vmem:[%s231_s29] sm:$0xff] %v357_v54 }
  0xd0   : > { %374 = vst [vmem:[%s231_s29 + $0x8] sm:$0xff] %v370_v56 }
  0xd1   : > { %760 = shalt.err (!%p757_p4)
}
  0xd2   : > { %600 = dma.vmem_to_hbm [thread:$0]  (%p970_p13), %s392_s18, 256, %s394_s30, %s376_s19  }
  0xd4   : > { %v358_v57 = vpop.f32.mrf.mxu0 }
  0xd5   : > { %v371_v58 = vpop.f32.mrf.mxu1 }
  0xd6 PF: > { %p611_p5 = scmp.ge.s32.totalorder %s855_s22, 2  ;;  %s405_s27 = sand.u32 1, %s815_s12  }
  0xd7   : > { %s406_s15 = scalar_lea.sflag [#allocation4], %s405_s27 }
  0xd8   : > { %p607_p6 = pnand %p611_p5, %p975_p2 }
  0xda   : > { %p608_p7 = pneg %p607_p6 }
  0xdc   : > { %810 = dma.done.wait (%p608_p7), %s406_s15, 256  }
  0xdd   : > { %812 = vsyncadd (%p608_p7), %s406_s15, 4294967040  ;;  %s19_s22 = sadd.s32 1, %s855_s22   ;;  %s1103_s9 = sld [smem:[#allocation11_spill]] }
  0xde   : > { %p16_p3 = scmp.ge.s32.totalorder %s19_s22, 6   ;;  %s1104_s19 = sld [smem:[#allocation8_spill]] }
  0xdf   : > { %s1105_s28 = sld [smem:[#allocation9_spill]]  ;;  %s1107_s12 = smov %s819_s13 }
  0xe0   : > { %s1106_s21 = sld [smem:[#allocation10_spill]]  ;;  %s1108_s13 = smov %s823_s14 }
  0xe1   : > { %s1109_s14 = smov %s968_s8  ;;  %s1110_s15 = smov %s831_s16 }
  0xe2   : > { %s1111_s16 = smov %s835_s17  ;;  %s1113_s18 = smov %s847_s20 }
  0xe3   : > { %s1112_s17 = smov %s1103_s9  ;;  %18 = sbr.rel (!%p16_p3) target bundleno = 9 (0x9), region = 83 }
  0xe5   : > { %s1114_s20 = smov %s1105_s28 }
  0xe8   :  { %412 = vsyncpa [#allocation3], 1 }
  0xe9   :  { %414 = vsyncpa [#allocation3 + $0x1], 1 }
  0xea   :  { %415 = vsyncpa [#allocation4], 1 }
  0xeb   :  { %417 = vsyncpa [#allocation4 + $0x1], 1 }

// kernel: transformer_fwd.18
= control target key start
LH: loop header
LB: loop body
LE: loop exit
PB: predicated region body
PF: predicated region fallthrough
CT: control target
= control target key end

     0   :  { %11 = vsyncpa [#allocation3], 0  ;;  %s1759_s0 = inlined_call_operand.vmem [shape: f32[2,8,128], index: 0, kind: input, shape index: {}]   ;;  %s1760_s1 = inlined_call_operand.hbm [shape: bf16[128,256], index: 1, kind: input, shape index: {}]   ;;  %s1761_s2 = inlined_call_operand.hbm [shape: bf16[128,128], index: 2, kind: input, shape index: {}]   ;;  %s1762_s3 = inlined_call_operand.vmem [shape: f32[1,128], index: 3, kind: input, shape index: {}]   ;;  %s1763_s4 = inlined_call_operand.vmem [shape: f32[1,128], index: 4, kind: input, shape index: {}]   ;;  %s1764_s5 = inlined_call_operand.vmem [shape: f32[1,128], index: 5, kind: input, shape index: {}]   ;;  %s1765_s6 = inlined_call_operand.vmem [shape: f32[2,8,128], index: 6, kind: output, shape index: {}]  }
   0x1   :  { %12 = vsyncpa [#allocation5], 0  ;;  %s1578_s21 = smov 0  }
   0x2 LB: > { %s191_s24 = sshll.u32 %s1760_s1, 4  ;;  %s1587_s25 = sadd.s32 4294967295, %s1527_s21   ;;  %s1527_s21 = sphi %s1578_s21, %s18_s21   ;;  %s192_s24 = int_to_ptr.hbm [resolvable:$true] %s191_s24 }
   0x3   : > { %p1220_p0 = scmp.ge.s32.totalorder %s1527_s21, 1  ;;  %p180_p1 = scmp.lt.s32.totalorder %s1527_s21, 3 }
   0x4   : > { %p1390_p2 = scmp.eq.s32.totalorder %s1587_s25, 0  ;;  %s1529_s27 = smov [#allocation2]  }
   0x5   : > { %p1592_p3 = pnand %p1220_p0, %p180_p1  ;;  %s193_s28 = sshll.u32 %s1529_s27, 4  ;;  %s194_s28 = int_to_ptr.vmem [resolvable:$true] %s193_s28 }
   0x6   : > { %s205_s7 = sshll.u32 %s1761_s2, 4  ;;  %s1530_s8 = smov [#allocation4]   ;;  %s206_s7 = int_to_ptr.hbm [resolvable:$true] %s205_s7 }
   0x7   : > { %p1383_p4 = pneg %p1592_p3  ;;  %s207_s9 = sshll.u32 %s1530_s8, 4  ;;  %s208_s9 = int_to_ptr.vmem [resolvable:$true] %s207_s9 }
   0x8   : > { %s1531_s10 = smov 128   ;;  %s1532_s11 = smov 8  }
   0x9   : > { %p1384_p5 = pnand %p1390_p2, %p1383_p4  ;;  %s1533_s12 = smov 64  }
   0xa   : > { %s1534_s13 = smov 4   ;;  %239 = sbr.rel (%p1592_p3) target bundleno = 2222 (0x8ae), region = 44 }
   0xb   : > { %1386 = dma.hbm_to_vmem [thread:$0]  (!%p1384_p5), %s192_s24, 2048, %s194_s28, [#allocation3], %s1531_s10, %s1531_s10, %s1532_s11  }
   0xc   : > { %1389 = dma.hbm_to_vmem [thread:$0]  (!%p1384_p5), %s206_s7, 1024, %s208_s9, [#allocation5], %s1533_s12, %s1533_s12, %s1534_s13  }
   0xf   : > { %1518 = dma.done.wait (%p1390_p2), [#allocation3], 2048  }
  0x10   : > { %1520 = vsyncadd (%p1390_p2), [#allocation3], 4294965248 }
  0x11   : > { %1522 = dma.done.wait (%p1390_p2), [#allocation5], 1024  }
  0x12   : > { %1524 = vsyncadd (%p1390_p2), [#allocation5], 4294966272  ;;  %v1287_v0 = vld [vmem:[#allocation2 + $0x70] sm:$0xf]  ;;  %v1366_v1 = vld [vmem:[#allocation2 + $0x74] sm:$0xf0] }
  0x13   : > { %v1365_v2 = vld [vmem:[#allocation2 + $0x74] sm:$0xf]  ;;  %v1288_v3 = vor.u32 %v1366_v1, %v1287_v0  ;;  %v1289_v4 = vld [vmem:[#allocation2 + $0x78] sm:$0xf0]  ;;  %v1279_v5 = vld [vmem:[#allocation2 + $0x60] sm:$0xf] }
  0x14   : > { %v1364_v6 = vld [vmem:[#allocation2 + $0x64] sm:$0xf0]  ;;  %v1292_v7 = vor.u32 %v1365_v2, %v1289_v4  ;;  %v1363_v8 = vld [vmem:[#allocation2 + $0x64] sm:$0xf]  ;;  %v1281_v9 = vld [vmem:[#allocation2 + $0x68] sm:$0xf0] }
  0x15   : > { %380 = vmatpush.bf16.msra.mxu0 %v1288_v3  ;;  %v1280_v10 = vor.u32 %v1364_v6, %v1279_v5  ;;  %v1284_v11 = vor.u32 %v1363_v8, %v1281_v9  ;;  %v1271_v12 = vld [vmem:[#allocation2 + $0x50] sm:$0xf]  ;;  %v1362_v13 = vld [vmem:[#allocation2 + $0x54] sm:$0xf0]  ;;  %v1361_v14 = vld [vmem:[#allocation2 + $0x54] sm:$0xf]  ;;  %v406_v6 = vlaneseq }
  0x16   : > { %393 = vmatpush.bf16.msra.mxu1 %v1292_v7  ;;  %v1273_v15 = vld [vmem:[#allocation2 + $0x58] sm:$0xf0]  ;;  %v1272_v16 = vor.u32 %v1362_v13, %v1271_v12  ;;  %v1263_v18 = vld [vmem:[#allocation2 + $0x40] sm:$0xf]  ;;  %v1360_v19 = vld [vmem:[#allocation2 + $0x44] sm:$0xf0] }
  0x17   : > { %v1276_v17 = vor.u32 %v1361_v14, %v1273_v15  ;;  %v1359_v20 = vld [vmem:[#allocation2 + $0x44] sm:$0xf]  ;;  %v1265_v21 = vld [vmem:[#allocation2 + $0x48] sm:$0xf0]  ;;  %v1264_v22 = vor.u32 %v1360_v19, %v1263_v18  ;;  %v1255_v24 = vld [vmem:[#allocation2 + $0x30] sm:$0xf] }
  0x18   : > { %v1268_v23 = vor.u32 %v1359_v20, %v1265_v21  ;;  %v1358_v25 = vld [vmem:[#allocation2 + $0x34] sm:$0xf0]  ;;  %v1357_v26 = vld [vmem:[#allocation2 + $0x34] sm:$0xf]  ;;  %v1257_v27 = vld [vmem:[#allocation2 + $0x38] sm:$0xf0] }
  0x19   : > { %381 = vmatpush.bf16.msra.mxu0 %v1280_v10  ;;  %p273_p6 = scmp.lt.s32.totalorder %s1587_s25, 1  ;;  %v1256_v28 = vor.u32 %v1358_v25, %v1255_v24  ;;  %v1260_v29 = vor.u32 %v1357_v26, %v1257_v27  ;;  %v1247_v30 = vld [vmem:[#allocation2 + $0x20] sm:$0xf]  ;;  %v1356_v31 = vld [vmem:[#allocation2 + $0x24] sm:$0xf0]  ;;  %vm414_vm0 = vcmask 130048  }
  0x1a   : > { %394 = vmatpush.bf16.msra.mxu1 %v1284_v11  ;;  %v1355_v32 = vld [vmem:[#allocation2 + $0x24] sm:$0xf]  ;;  %v1249_v33 = vld [vmem:[#allocation2 + $0x28] sm:$0xf0]  ;;  %v1248_v34 = vor.u32 %v1356_v31, %v1247_v30  ;;  %v1239_v36 = vld [vmem:[#allocation2 + $0x10] sm:$0xf] }
  0x1b   : > { %s1768_s25 = smov (!%p273_p6, %s1587_s25), 1  ;;  %v1252_v35 = vor.u32 %v1355_v32, %v1249_v33  ;;  %v1354_v37 = vld [vmem:[#allocation2 + $0x14] sm:$0xf0]  ;;  %v1353_v38 = vld [vmem:[#allocation2 + $0x14] sm:$0xf]  ;;  %s1535_s18 = smov 112  }
  0x1c   : > { %v1241_v39 = vld [vmem:[#allocation2 + $0x18] sm:$0xf0]  ;;  %s1227_s14 = sshll.u32 %s1768_s25, 3  ;;  %v1240_v40 = vor.u32 %v1354_v37, %v1239_v36  ;;  %v1231_v42 = vld [vmem:[#allocation2] sm:$0xf]  ;;  %s1536_s19 = smov 96  }
  0x1d   : > { %382 = vmatpush.bf16.msra.mxu0 %v1272_v16  ;;  %v1244_v41 = vor.u32 %v1353_v38, %v1241_v39  ;;  %v1352_v43 = vld [vmem:[#allocation2 + $0x4] sm:$0xf0]  ;;  %s276_s17 = scalar_lea.vmem %s1759_s0, %s1227_s14  ;;  %v1351_v44 = vld [vmem:[#allocation2 + $0x4] sm:$0xf]  ;;  %v1233_v45 = vld [vmem:[#allocation2 + $0x8] sm:$0xf0]  ;;  %s280_s11 = scalar_lea.vmem %s1765_s6, %s1227_s14 }
  0x1e   : > { %395 = vmatpush.bf16.msra.mxu1 %v1276_v17  ;;  %v1232_v46 = vor.u32 %v1352_v43, %v1231_v42  ;;  %v1623_v47 = vld [vmem:[%s276_s17] sm:$0xff]  ;;  %v1236_v48 = vor.u32 %v1351_v44, %v1233_v45  ;;  %s1537_s20 = smov 80   ;;  %v407_v7 = vshrl.u32 %v406_v6, 7  ;;  %v409_v8 = vand.u32 127, %v406_v6  ;;  %v1369_v37 = vld [vmem:[#allocation4 + $0x10] sm:$0xff]  ;;  %s1539_s22 = smov 64  }
  0x1f   : > { %v283_v49 = vpack.c.bf16 %v1623_v47, %v1623_v47  ;;  %v1367_v63 = vld [vmem:[#allocation4] sm:$0xff]  ;;  %v1538_v10 = vmov 0.0   ;;  %vm435_vm2 = vcmask 64512   ;;  %vm554_vm3 = vcmask 1043456   ;;  %s1540_s23 = smov 48   ;;  %s1541_s24 = smov 16  }
  0x20   : > { %469 = vmatpush.bf16.msra.mxu3 %v1367_v63  ;;  %vm410_vm1 = vcmp.gt.s32.totalorder %v409_v8, %v407_v7  ;;  %s1542_s26 = smov 32  }
  0x21   : > { %383 = vmatpush.bf16.msra.mxu0 %v1264_v22  ;;  %v524_v59 = vunpack.c.l.b16 %v283_v49  ;;  %v1650_v11 = vsel %vm410_vm1, -1e+28, %v1538_v10 }
  0x22   : > { %396 = vmatpush.bf16.msra.mxu1 %v1268_v23 }
  0x23   : > { %v1634_v62 = vpack.c.b16 %v524_v59, %v524_v59  ;;  %1298 = vmatmul.msk.bf16.vlgmr.msra.gmra.mxu3 %vm414_vm0, %v283_v49 }
  0x25   : > { %384 = vmatpush.bf16.msra.mxu0 %v1256_v28  ;;  %v1368_v28 = vld [vmem:[#allocation4 + $0x8] sm:$0xff] }
  0x26   : > { %397 = vmatpush.bf16.msra.mxu1 %v1260_v29 }
  0x29   : > { %385 = vmatpush.bf16.msra.mxu0 %v1248_v34 }
  0x2a   : > { %398 = vmatpush.bf16.msra.mxu1 %v1252_v35 }
  0x2d   : > { %386 = vmatpush.bf16.msra.mxu0 %v1240_v40 }
  0x2e   : > { %399 = vmatpush.bf16.msra.mxu1 %v1244_v41 }
  0x31   : > { %387 = vmatpush.bf16.msra.mxu0 %v1232_v46 }
  0x32   : > { %400 = vmatpush.bf16.msra.mxu1 %v1236_v48 }
  0x34   : > { %388 = vmatmul.bf16.vlgmr.msra.gmra.mxu0 %v283_v49 }
  0x35   : > { %401 = vmatmul.bf16.vlgmr.msra.gmra.mxu1 %v283_v49 }
  0x36   : > { %649 = vmatpush.bf16.msrb.mxu1 %v1369_v37 }
  0xa6   : > { %v471_v17 = vpop.f32.mrf.mxu3 }
  0xa7   : > { %v475_v19 = vpack.c.bf16 %v471_v17, %v471_v17 }
  0xa9   : > { %v575_v24 = vsel %vm554_vm3, %v475_v19, 0 }
  0xae   : > { %v473_v18 = vpop.f32.mrf.mxu3 }
  0xb1   : > { %v389_v50 = vpop.f32.mrf.mxu0 }
  0xb2   : > { %v412_v51 = vpack.c.bf16 %v389_v50, %v389_v50  ;;  %v402_v52 = vpop.f32.mrf.mxu1 }
  0xb3   : > { %v413_v53 = vpack.c.bf16 %v402_v52, %v402_v52 }
  0xb4   : > { %v477_v54 = vunpack.c.l.b16 %v412_v51 }
  0xb5   : > { %v482_v55 = vunpack.c.l.b16 %v413_v53  ;;  %v419_v56 = vsel %vm414_vm0, %v413_v53, 0 }
  0xb6   : > { %v1628_v57 = vpack.c.b16 %v477_v54, %v477_v54  ;;  %428 = vmatpush.bf16.xpose.msra.mxu2 %v419_v56 }
  0xb7   : > { %v1630_v58 = vpack.c.b16 %v482_v55, %v482_v55 }
  0xb8   : > { %479 = vrot.lane.b32.xlu2 %v1628_v57, %s1535_s18 }
  0xb9   : > { %484 = vrot.lane.b32.xlu1 %v1630_v58, %s1535_s18  ;;  %v391_v60 = vpop.f32.mrf.mxu0 }
  0xba   : > { %v404_v61 = vpop.f32.mrf.mxu1 }
  0xbd   : > { %1293 = vmatmul.msk.bf16.vlgmr.msra.gmra.mxu2 %vm414_vm0, %v412_v51 }
  0xbe   : > { %544 = vmatpush.bf16.msrb.mxu2 %v1368_v28 }
  0xc0   : > { %592 = vrot.lane.b32.xlu2 %v1630_v58, %s1536_s19 }
  0xc1   : > { %526 = vrot.lane.b32.xlu1 %v1634_v62, %s1535_s18 }
  0xc2   : > { %584 = vmatpush.bf16.msra.mxu2 %v575_v24 }
  0xc8   : > { %676 = vrot.lane.b32.xlu2 %v1628_v57, %s1537_s20 }
  0xc9   : > { %590 = vrot.lane.b32.xlu1 %v1628_v57, %s1536_s19 }
  0xd0   : > { %717 = vrot.lane.b32.xlu2 %v1634_v62, %s1537_s20 }
  0xd1   : > { %631 = vrot.lane.b32.xlu1 %v1634_v62, %s1536_s19 }
 0x112   : > { %v480_v0 = vpop.permute.xlu2 %479 }
 0x11a   : > { %v593_v1 = vpop.permute.xlu2 %592 }
 0x11b   : > { %v598_v2 = vsel %vm414_vm0, %v593_v1, 0 }
 0x11c   : > { %607 = vmatpush.bf16.xpose.msrb.mxu0 %v598_v2 }
 0x122   : > { %v677_v39 = vpop.permute.xlu2 %676 }
 0x12a   : > { %v1664_v40 = vpop.permute.xlu2 %717 }
 0x12b   : > { %v485_v3 = vpop.permute.xlu1 %484 }
 0x12c   : > { %v490_v4 = vsel %vm414_vm0, %v485_v3, 0 }
 0x12d   : > { %499 = vmatpush.bf16.xpose.msrb.mxu3 %v490_v4 }
 0x133   : > { %v527_v5 = vpop.permute.xlu1 %526 }
 0x134   : > { %1299 = vmatmul.msk.bf16.vlgmr.msrb.gmra.mxu3 %vm414_vm0, %v480_v0  ;;  %1304 = vmatmul.msk.bf16.vlgmr.msrb.gmra.mxu2 %vm414_vm0, %v527_v5 }
 0x13b   : > { %v591_v9 = vpop.permute.xlu1 %590 }
 0x13c   : > { %1307 = vmatmul.msk.bf16.vlgmr.msrb.gmra.mxu0 %vm414_vm0, %v591_v9 }
 0x140   : > { %v430_v12 = vpop.f32.mrf.mxu2 }
 0x141   : > { %v431_v13 = vadd.f32 %v430_v12, %v1650_v11 }
 0x143   : > { %v434_v14 = vmul.f32 0.088388346, %v431_v13  ;;  %v632_v38 = vpop.permute.xlu1 %631 }
 0x144   : > { %1312 = vmatmul.msk.bf16.vlgmr.msrb.gmra.mxu1 %vm414_vm0, %v632_v38 }
 0x145   : > { %v436_v15 = vsel %vm435_vm2, %v434_v14, -inf }
 0x146   : > { %437 = vmax.xlane.f32.xlu0 %v436_v15 }
 0x148   : > { %v432_v16 = vpop.f32.mrf.mxu2 }
 0x1b7   : > { %v501_v20 = vpop.f32.mrf.mxu3  ;;  %v546_v0 = vpop.f32.mrf.mxu2 }
 0x1b8   : > { %v502_v21 = vadd.f32 %v501_v20, %v1650_v11  ;;  %v550_v1 = vpack.c.bf16 %v546_v0, %v546_v0 }
 0x1b9   : > { %v438_v22 = vpop.xlane.xlu0 %437  ;;  %v609_v23 = vpop.f32.mrf.mxu0 }
 0x1ba   : > { %v505_v25 = vmul.f32 0.088388346, %v502_v21  ;;  %v439_v26 = vsub.f32 %v434_v14, %v438_v22  ;;  %v610_v27 = vadd.f32 %v609_v23, %v1650_v11  ;;  %v556_v2 = vsel %vm554_vm3, %v550_v1, 0  ;;  %v1370_v22 = vld [vmem:[#allocation4 + $0x18] sm:$0xff] }
 0x1bb   : > { %565 = vmatpush.bf16.msra.mxu3 %v556_v2  ;;  %735 = vmatpush.bf16.msra.mxu0 %v1370_v22 }
 0x1bc   : > { %v440_v29 = vmul.f32 1.442695, %v439_v26  ;;  %v613_v30 = vmul.f32 0.088388346, %v610_v27  ;;  %v506_v31 = vsel %vm435_vm2, %v505_v25, -inf }
 0x1bd   : > { %507 = vmax.xlane.f32.xlu1 %v506_v31 }
 0x1be   : > { %1419 = vpow2.f32 %v440_v29  ;;  %v614_v32 = vsel %vm435_vm2, %v613_v30, -inf  ;;  %1319 = vmatmul.msk.bf16.vlgmr.msra.gmra.mxu0 %vm414_vm0, %v1664_v40 }
 0x1bf   : > { %v503_v33 = vpop.f32.mrf.mxu3  ;;  %615 = vmax.xlane.f32.xlu2 %v614_v32  ;;  %v548_v5 = vpop.f32.mrf.mxu2 }
 0x1c1   : > { %v611_v34 = vpop.f32.mrf.mxu0  ;;  %v651_v3 = vpop.f32.mrf.mxu1 }
 0x1c2   : > { %v655_v4 = vpack.c.bf16 %v651_v3, %v651_v3 }
 0x1c4   : > { %v1420_v35 = vpop.eup %1419  ;;  %v660_v6 = vsel %vm554_vm3, %v655_v4, 0 }
 0x1c5   : > { %v442_v36 = vsel %vm435_vm2, %v1420_v35, 0.0  ;;  %669 = vmatpush.bf16.msrb.mxu3 %v660_v6 }
 0x1c6   : > { %443 = vadd.xlane.f32.xlu0 %v442_v36 }
 0x1c9   : > { %v653_v7 = vpop.f32.mrf.mxu1 }
 0x1da   : > { %678 = vrot.lane.b32.xlu0 %v1630_v58, %s1537_s20 }
 0x230   : > { %v508_v41 = vpop.xlane.xlu1 %507 }
 0x231   : > { %v509_v42 = vsub.f32 %v505_v25, %v508_v41 }
 0x232   : > { %v616_v43 = vpop.xlane.xlu2 %615 }
 0x233   : > { %v510_v44 = vmul.f32 1.442695, %v509_v42  ;;  %v617_v45 = vsub.f32 %v613_v30, %v616_v43 }
 0x235   : > { %1421 = vpow2.f32 %v510_v44  ;;  %v618_v46 = vmul.f32 1.442695, %v617_v45 }
 0x237   : > { %1423 = vpow2.f32 %v618_v46 }
 0x239   : > { %v444_v48 = vpop.xlane.xlu0 %443 }
 0x23a   : > { %1425 = vrcp.f32 %v444_v48 }
 0x23b   : > { %v1422_v49 = vpop.eup %1421  ;;  %v737_v43 = vpop.f32.mrf.mxu0 }
 0x23c   : > { %v512_v50 = vsel %vm435_vm2, %v1422_v49, 0.0  ;;  %v741_v44 = vpack.c.bf16 %v737_v43, %v737_v43 }
 0x23d   : > { %v1424_v51 = vpop.eup %1423  ;;  %513 = vadd.xlane.f32.xlu2 %v512_v50 }
 0x23e   : > { %v620_v52 = vsel %vm435_vm2, %v1424_v51, 0.0 }
 0x23f   : > { %621 = vadd.xlane.f32.xlu1 %v620_v52 }
 0x240   : > { %v1426_v53 = vpop.eup %1425 }
 0x241   : > { %v446_v54 = vmul.f32 %v1426_v53, %v444_v48  ;;  %v746_v48 = vsel %vm554_vm3, %v741_v44, 0 }
 0x242   : > { %755 = vmatpush.bf16.msra.mxu1 %v746_v48 }
 0x243   : > { %v447_v55 = vsub.f32 2.0, %v446_v54  ;;  %v739_v52 = vpop.f32.mrf.mxu0 }
 0x245   : > { %v448_v56 = vmul.f32 %v1426_v53, %v447_v55  ;;  %v1372_v55 = vld [vmem:[#allocation4 + $0x28] sm:$0xff] }
 0x247   : > { %v449_v59 = vmul.f32 %v1420_v35, %v448_v56  ;;  %v1371_v56 = vld [vmem:[#allocation4 + $0x20] sm:$0xff] }
 0x249   : > { %v450_v60 = vpack.c.bf16 %v449_v59, %v449_v59 }
 0x24b   : > { %1306 = vmatmul.msk.bf16.vlgmr.msra.gmra.mxu2 %vm435_vm2, %v450_v60 }
 0x24c   : > { %v679_v61 = vpop.permute.xlu0 %678 }
 0x24d   : > { %v684_v63 = vsel %vm414_vm0, %v679_v61, 0 }
 0x24e   : > { %693 = vmatpush.bf16.xpose.msrb.mxu2 %v684_v63 }
 0x255   : > { %764 = vrot.lane.b32.xlu2 %v1630_v58, %s1539_s22 }
 0x256   : > { %821 = vmatpush.bf16.msra.mxu2 %v1371_v56 }
 0x258   : > { %762 = vrot.lane.b32.xlu1 %v1628_v57, %s1539_s22 }
 0x25b   : > { %1314 = vmatmul.msk.bf16.vlgmr.msrb.gmra.mxu2 %vm414_vm0, %v677_v39 }
 0x25d   : > { %848 = vrot.lane.b32.xlu2 %v1628_v57, %s1540_s23 }
 0x260   : > { %889 = vrot.lane.b32.xlu1 %v1634_v62, %s1540_s23 }
 0x2b0   : > { %v514_v8 = vpop.xlane.xlu2 %513 }
 0x2b1   : > { %1427 = vrcp.f32 %v514_v8 }
 0x2b2   : > { %v622_v9 = vpop.xlane.xlu1 %621 }
 0x2b3   : > { %1429 = vrcp.f32 %v622_v9 }
 0x2b7   : > { %v1428_v10 = vpop.eup %1427 }
 0x2b8   : > { %v516_v12 = vmul.f32 %v1428_v10, %v514_v8  ;;  %v765_v17 = vpop.permute.xlu2 %764 }
 0x2b9   : > { %v1430_v15 = vpop.eup %1429  ;;  %v770_v20 = vsel %vm414_vm0, %v765_v17, 0 }
 0x2ba   : > { %v517_v13 = vsub.f32 2.0, %v516_v12  ;;  %v624_v19 = vmul.f32 %v1430_v15, %v622_v9 }
 0x2bc   : > { %v518_v14 = vmul.f32 %v1428_v10, %v517_v13  ;;  %v625_v21 = vsub.f32 2.0, %v624_v19 }
 0x2be   : > { %v519_v16 = vmul.f32 %v1422_v49, %v518_v14  ;;  %v626_v23 = vmul.f32 %v1430_v15, %v625_v21 }
 0x2c0   : > { %v520_v18 = vpack.c.bf16 %v519_v16, %v519_v16  ;;  %v627_v24 = vmul.f32 %v1424_v51, %v626_v23  ;;  %v849_v60 = vpop.permute.xlu2 %848 }
 0x2c2   : > { %1305 = vmatmul.msk.bf16.vlgmr.msra.gmra.mxu3 %vm435_vm2, %v520_v18  ;;  %v628_v26 = vpack.c.bf16 %v627_v24, %v627_v24 }
 0x2c3   : > { %779 = vmatpush.bf16.xpose.msra.mxu3 %v770_v20 }
 0x2ca   : > { %v763_v30 = vpop.permute.xlu1 %762 }
 0x2ce   : > { %v586_v25 = vpop.f32.mrf.mxu2 }
 0x2d2   : > { %1313 = vmatmul.msk.bf16.vlgmr.msrb.gmra.mxu3 %vm435_vm2, %v628_v26  ;;  %v890_v59 = vpop.permute.xlu1 %889 }
 0x2d3   : > { %907 = vmatpush.bf16.msrb.mxu3 %v1372_v55 }
 0x2d6   : > { %v588_v27 = vpop.f32.mrf.mxu2 }
 0x2de   : > { %v695_v28 = vpop.f32.mrf.mxu2 }
 0x2df   : > { %v696_v29 = vadd.f32 %v695_v28, %v1650_v11 }
 0x2e1   : > { %v699_v31 = vmul.f32 0.088388346, %v696_v29 }
 0x2e2   : > { %1321 = vmatmul.msk.bf16.vlgmr.msra.gmra.mxu3 %vm414_vm0, %v763_v30 }
 0x2e3   : > { %v700_v32 = vsel %vm435_vm2, %v699_v31, -inf }
 0x2e4   : > { %701 = vmax.xlane.f32.xlu0 %v700_v32 }
 0x2e6   : > { %v697_v33 = vpop.f32.mrf.mxu2 }
 0x2f2   : > { %1333 = vmatmul.msk.bf16.vlgmr.msrb.gmra.mxu3 %vm414_vm0, %v890_v59 }
 0x345   : > { %v567_v34 = vpop.f32.mrf.mxu3 }
 0x346   : > { %v587_v36 = vadd.f32 %v586_v25, %v567_v34 }
 0x34d   : > { %v569_v35 = vpop.f32.mrf.mxu3 }
 0x355   : > { %v671_v37 = vpop.f32.mrf.mxu3 }
 0x356   : > { %v1689_v38 = vadd.f32 %v671_v37, %v587_v36 }
 0x357   : > { %v702_v39 = vpop.xlane.xlu0 %701 }
 0x358   : > { %v703_v40 = vsub.f32 %v699_v31, %v702_v39 }
 0x35a   : > { %v704_v41 = vmul.f32 1.442695, %v703_v40 }
 0x35c   : > { %1431 = vpow2.f32 %v704_v41 }
 0x35d   : > { %v673_v42 = vpop.f32.mrf.mxu3 }
 0x362   : > { %v1432_v45 = vpop.eup %1431 }
 0x363   : > { %v706_v46 = vsel %vm435_vm2, %v1432_v45, 0.0 }
 0x364   : > { %707 = vadd.xlane.f32.xlu0 %v706_v46 }
 0x365   : > { %v781_v49 = vpop.f32.mrf.mxu3 }
 0x366   : > { %v782_v50 = vadd.f32 %v781_v49, %v1650_v11 }
 0x368   : > { %v785_v51 = vmul.f32 0.088388346, %v782_v50 }
 0x36a   : > { %v786_v53 = vsel %vm435_vm2, %v785_v51, -inf }
 0x36b   : > { %787 = vmax.xlane.f32.xlu2 %v786_v53 }
 0x36d   : > { %v783_v54 = vpop.f32.mrf.mxu3 }
 0x375   : > { %v909_v14 = vpop.f32.mrf.mxu3 }
 0x376   : > { %v913_v15 = vpack.c.bf16 %v909_v14, %v909_v14 }
 0x378   : > { %850 = vrot.lane.b32.xlu0 %v1630_v58, %s1540_s23  ;;  %v918_v16 = vsel %vm554_vm3, %v913_v15, 0 }
 0x379   : > { %927 = vmatpush.bf16.msrb.mxu2 %v918_v16 }
 0x37d   : > { %v911_v17 = vpop.f32.mrf.mxu3 }
 0x380   : > { %803 = vrot.lane.b32.xlu0 %v1634_v62, %s1539_s22 }
 0x3d7   : > { %v708_v61 = vpop.xlane.xlu0 %707 }
 0x3d8   : > { %1433 = vrcp.f32 %v708_v61 }
 0x3de   : > { %v1434_v63 = vpop.eup %1433  ;;  %v788_v0 = vpop.xlane.xlu2 %787 }
 0x3df   : > { %v710_v1 = vmul.f32 %v1434_v63, %v708_v61  ;;  %v789_v2 = vsub.f32 %v785_v51, %v788_v0 }
 0x3e1   : > { %v711_v3 = vsub.f32 2.0, %v710_v1  ;;  %v790_v4 = vmul.f32 1.442695, %v789_v2 }
 0x3e3   : > { %v712_v5 = vmul.f32 %v1434_v63, %v711_v3  ;;  %1435 = vpow2.f32 %v790_v4  ;;  %v1373_v63 = vld [vmem:[#allocation4 + $0x30] sm:$0xff] }
 0x3e5   : > { %v713_v6 = vmul.f32 %v1432_v45, %v712_v5 }
 0x3e7   : > { %v714_v7 = vpack.c.bf16 %v713_v6, %v713_v6 }
 0x3e9   : > { %v1436_v8 = vpop.eup %1435  ;;  %1320 = vmatmul.msk.bf16.vlgmr.msra.gmra.mxu1 %vm435_vm2, %v714_v7 }
 0x3ea   : > { %v851_v9 = vpop.permute.xlu0 %850  ;;  %v792_v10 = vsel %vm435_vm2, %v1436_v8, 0.0 }
 0x3eb   : > { %v856_v12 = vsel %vm414_vm0, %v851_v9, 0  ;;  %793 = vadd.xlane.f32.xlu1 %v792_v10  ;;  %v1374_v10 = vld [vmem:[#allocation4 + $0x38] sm:$0xff] }
 0x3ec   : > { %865 = vmatpush.bf16.xpose.msrb.mxu1 %v856_v12 }
 0x3f2   : > { %v804_v13 = vpop.permute.xlu0 %803 }
 0x3f3   : > { %1326 = vmatmul.msk.bf16.vlgmr.msra.gmra.mxu2 %vm414_vm0, %v804_v13 }
 0x3f4   : > { %993 = vmatpush.bf16.msra.mxu1 %v1373_v63 }
 0x3f9   : > { %1328 = vmatmul.msk.bf16.vlgmr.msrb.gmra.mxu1 %vm414_vm0, %v849_v60 }
 0x404   : > { %1022 = vrot.lane.b32.xlu1 %v1630_v58, %s1541_s24 }
 0x40c   : > { %975 = vrot.lane.b32.xlu1 %v1634_v62, %s1542_s26 }
 0x45e   : > { %v794_v18 = vpop.xlane.xlu1 %793 }
 0x45f   : > { %1437 = vrcp.f32 %v794_v18 }
 0x465   : > { %v1438_v21 = vpop.eup %1437 }
 0x466   : > { %v757_v19 = vpop.f32.mrf.mxu1  ;;  %v796_v22 = vmul.f32 %v1438_v21, %v794_v18 }
 0x467   : > { %v761_v20 = vadd.f32 %v757_v19, %v1689_v38 }
 0x468   : > { %v797_v24 = vsub.f32 2.0, %v796_v22 }
 0x46a   : > { %v798_v25 = vmul.f32 %v1438_v21, %v797_v24 }
 0x46c   : > { %v799_v28 = vmul.f32 %v1436_v8, %v798_v25 }
 0x46e   : > { %v759_v23 = vpop.f32.mrf.mxu1  ;;  %v800_v35 = vpack.c.bf16 %v799_v28, %v799_v28 }
 0x476   : > { %v823_v26 = vpop.f32.mrf.mxu2  ;;  %v867_v27 = vpop.f32.mrf.mxu1 }
 0x477   : > { %v827_v29 = vpack.c.bf16 %v823_v26, %v823_v26  ;;  %v868_v30 = vadd.f32 %v867_v27, %v1650_v11  ;;  %v1023_v31 = vpop.permute.xlu1 %1022 }
 0x478   : > { %v1028_v32 = vsel %vm414_vm0, %v1023_v31, 0 }
 0x479   : > { %v832_v33 = vsel %vm554_vm3, %v827_v29, 0  ;;  %v871_v34 = vmul.f32 0.088388346, %v868_v30  ;;  %1037 = vmatpush.bf16.xpose.msra.mxu2 %v1028_v32 }
 0x47a   : > { %841 = vmatpush.bf16.msrb.mxu0 %v832_v33 }
 0x47b   : > { %v872_v36 = vsel %vm435_vm2, %v871_v34, -inf }
 0x47c   : > { %873 = vmax.xlane.f32.xlu0 %v872_v36 }
 0x47d   : > { %1327 = vmatmul.msk.bf16.vlgmr.msrb.gmra.mxu0 %vm435_vm2, %v800_v35 }
 0x47e   : > { %v869_v37 = vpop.f32.mrf.mxu1  ;;  %v825_v38 = vpop.f32.mrf.mxu2 }
 0x47f   : > { %v976_v1 = vpop.permute.xlu1 %975 }
 0x480   : > { %1340 = vmatmul.msk.bf16.vlgmr.msra.gmra.mxu1 %vm414_vm0, %v976_v1 }
 0x490   : > { %936 = vrot.lane.b32.xlu0 %v1630_v58, %s1542_s26 }
 0x498   : > { %1020 = vrot.lane.b32.xlu0 %v1628_v57, %s1541_s24 }
 0x4a0   : > { %1061 = vrot.lane.b32.xlu0 %v1634_v62, %s1541_s24 }
 0x4ef   : > { %v874_v39 = vpop.xlane.xlu0 %873 }
 0x4f0   : > { %v875_v40 = vsub.f32 %v871_v34, %v874_v39 }
 0x4f2   : > { %v876_v41 = vmul.f32 1.442695, %v875_v40 }
 0x4f4   : > { %1439 = vpow2.f32 %v876_v41 }
 0x4fa   : > { %v1440_v42 = vpop.eup %1439  ;;  %v843_v43 = vpop.f32.mrf.mxu0 }
 0x4fb   : > { %v847_v44 = vadd.f32 %v843_v43, %v761_v20  ;;  %v878_v45 = vsel %vm435_vm2, %v1440_v42, 0.0 }
 0x4fc   : > { %879 = vadd.xlane.f32.xlu2 %v878_v45 }
 0x4fd   : > { %v995_v18 = vpop.f32.mrf.mxu1 }
 0x502   : > { %v937_v46 = vpop.permute.xlu0 %936  ;;  %v845_v48 = vpop.f32.mrf.mxu0 }
 0x503   : > { %v942_v58 = vsel %vm414_vm0, %v937_v46, 0  ;;  %v1416_v48 = vld [vmem:[%s1762_s3] ss:$0 sm:$0xff] }
 0x504   : > { %951 = vmatpush.bf16.xpose.msra.mxu0 %v942_v58 }
 0x505   : > { %v997_v20 = vpop.f32.mrf.mxu1 }
 0x50a   : > { %v1021_v56 = vpop.permute.xlu0 %1020 }
 0x50c   : > { %1079 = vmatpush.bf16.msrb.mxu0 %v1374_v10 }
 0x512   : > { %v1062_v12 = vpop.permute.xlu0 %1061 }
 0x514   : > { %934 = vrot.lane.b32.xlu2 %v1628_v57, %s1542_s26 }
 0x56f   : > { %v880_v49 = vpop.xlane.xlu2 %879 }
 0x570   : > { %1441 = vrcp.f32 %v880_v49 }
 0x576   : > { %v1442_v62 = vpop.eup %1441 }
 0x577   : > { %v882_v50 = vmul.f32 %v1442_v62, %v880_v49  ;;  %v935_v51 = vpop.permute.xlu2 %934 }
 0x578   : > { %1335 = vmatmul.msk.bf16.vlgmr.msra.gmra.mxu0 %vm414_vm0, %v935_v51 }
 0x579   : > { %v883_v52 = vsub.f32 2.0, %v882_v50 }
 0x57b   : > { %v884_v53 = vmul.f32 %v1442_v62, %v883_v52 }
 0x57d   : > { %v885_v54 = vmul.f32 %v1440_v42, %v884_v53 }
 0x57f   : > { %v886_v55 = vpack.c.bf16 %v885_v54, %v885_v54 }
 0x581   : > { %1334 = vmatmul.msk.bf16.vlgmr.msrb.gmra.mxu2 %vm435_vm2, %v886_v55 }
 0x588   : > { %1347 = vmatmul.msk.bf16.vlgmr.msrb.gmra.mxu0 %vm414_vm0, %v1062_v12 }
 0x591   : > { %1342 = vmatmul.msk.bf16.vlgmr.msra.gmra.mxu2 %vm414_vm0, %v1021_v56 }
 0x5f5   : > { %v953_v59 = vpop.f32.mrf.mxu0 }
 0x5f6   : > { %v954_v60 = vadd.f32 %v953_v59, %v1650_v11 }
 0x5f8   : > { %v957_v57 = vmul.f32 0.088388346, %v954_v60 }
 0x5fa   : > { %v958_v61 = vsel %vm435_vm2, %v957_v57, -inf }
 0x5fb   : > { %959 = vmax.xlane.f32.xlu2 %v958_v61 }
 0x5fd   : > { %v955_v0 = vpop.f32.mrf.mxu0 }
 0x604   : > { %v929_v2 = vpop.f32.mrf.mxu2 }
 0x605   : > { %v933_v3 = vadd.f32 %v929_v2, %v847_v44  ;;  %v1081_v26 = vpop.f32.mrf.mxu0 }
 0x606   : > { %v1085_v27 = vpack.c.bf16 %v1081_v26, %v1081_v26 }
 0x608   : > { %v1090_v28 = vsel %vm554_vm3, %v1085_v27, 0 }
 0x609   : > { %1099 = vmatpush.bf16.msrb.mxu1 %v1090_v28 }
 0x60c   : > { %v931_v4 = vpop.f32.mrf.mxu2 }
 0x60d   : > { %v1083_v29 = vpop.f32.mrf.mxu0  ;;  %v1418_v4 = vld [vmem:[%s1764_s5] ss:$0 sm:$0xff] }
 0x614   : > { %v1039_v5 = vpop.f32.mrf.mxu2 }
 0x615   : > { %v1040_v6 = vadd.f32 %v1039_v5, %v1650_v11  ;;  %v999_v11 = vpack.c.bf16 %v995_v18, %v995_v18 }
 0x617   : > { %v1043_v7 = vmul.f32 0.088388346, %v1040_v6  ;;  %v1004_v19 = vsel %vm554_vm3, %v999_v11, 0 }
 0x618   : > { %1013 = vmatpush.bf16.msra.mxu3 %v1004_v19 }
 0x619   : > { %v1044_v8 = vsel %vm435_vm2, %v1043_v7, -inf }
 0x61a   : > { %1045 = vmax.xlane.f32.xlu1 %v1044_v8 }
 0x61c   : > { %v1041_v9 = vpop.f32.mrf.mxu2 }
 0x66e   : > { %v960_v13 = vpop.xlane.xlu2 %959 }
 0x66f   : > { %v961_v14 = vsub.f32 %v957_v57, %v960_v13 }
 0x671   : > { %v962_v15 = vmul.f32 1.442695, %v961_v14 }
 0x673   : > { %1443 = vpow2.f32 %v962_v15 }
 0x679   : > { %v1444_v16 = vpop.eup %1443 }
 0x67a   : > { %v964_v17 = vsel %vm435_vm2, %v1444_v16, 0.0 }
 0x67b   : > { %965 = vadd.xlane.f32.xlu0 %v964_v17 }
 0x68d   : > { %v1046_v21 = vpop.xlane.xlu1 %1045 }
 0x68e   : > { %v1047_v22 = vsub.f32 %v1043_v7, %v1046_v21 }
 0x690   : > { %v1048_v23 = vmul.f32 1.442695, %v1047_v22 }
 0x692   : > { %1445 = vpow2.f32 %v1048_v23 }
 0x698   : > { %v1446_v24 = vpop.eup %1445 }
 0x699   : > { %v1050_v25 = vsel %vm435_vm2, %v1446_v24, 0.0 }
 0x69a   : > { %1051 = vadd.xlane.f32.xlu2 %v1050_v25 }
 0x6ee   : > { %v966_v30 = vpop.xlane.xlu0 %965 }
 0x6ef   : > { %1447 = vrcp.f32 %v966_v30 }
 0x6f5   : > { %v1448_v31 = vpop.eup %1447 }
 0x6f6   : > { %v968_v32 = vmul.f32 %v1448_v31, %v966_v30 }
 0x6f8   : > { %v969_v33 = vsub.f32 2.0, %v968_v32 }
 0x6fa   : > { %v970_v34 = vmul.f32 %v1448_v31, %v969_v33 }
 0x6fc   : > { %v971_v35 = vmul.f32 %v1444_v16, %v970_v34 }
 0x6fe   : > { %v972_v36 = vpack.c.bf16 %v971_v35, %v971_v35 }
 0x700   : > { %1341 = vmatmul.msk.bf16.vlgmr.msra.gmra.mxu3 %vm435_vm2, %v972_v36 }
 0x70d   : > { %v1052_v37 = vpop.xlane.xlu2 %1051 }
 0x70e   : > { %1449 = vrcp.f32 %v1052_v37 }
 0x714   : > { %v1450_v38 = vpop.eup %1449 }
 0x715   : > { %v1054_v39 = vmul.f32 %v1450_v38, %v1052_v37 }
 0x717   : > { %v1055_v40 = vsub.f32 2.0, %v1054_v39 }
 0x719   : > { %v1056_v41 = vmul.f32 %v1450_v38, %v1055_v40 }
 0x71b   : > { %v1057_v42 = vmul.f32 %v1446_v24, %v1056_v41 }
 0x71d   : > { %v1058_v43 = vpack.c.bf16 %v1057_v42, %v1057_v42 }
 0x71f   : > { %1348 = vmatmul.msk.bf16.vlgmr.msrb.gmra.mxu1 %vm435_vm2, %v1058_v43 }
 0x783   : > { %v1015_v44 = vpop.f32.mrf.mxu3 }
 0x784   : > { %v1019_v46 = vadd.f32 %v1015_v44, %v933_v3 }
 0x78b   : > { %v1017_v45 = vpop.f32.mrf.mxu3 }
 0x79c   : > { %v1101_v58 = vpop.f32.mrf.mxu1 }
 0x79d   : > { %v1105_v49 = vadd.f32 %v1101_v58, %v1019_v46 }
 0x79f   : > { %v1110_v62 = vadd.f32 %v1416_v48, %v1105_v49 }
 0x7a1   : > { %v1111_v50 = vadd.f32 %v1110_v62, %v1623_v47  ;;  %v1417_v47 = vld [vmem:[%s1763_s4] ss:$0 sm:$0xff] }
 0x7a3   : > { %1114 = vadd.xlane.f32.xlu1 %v1111_v50 }
 0x7a4   : > { %v1103_v51 = vpop.f32.mrf.mxu1 }
 0x816   : > { %v1115_v52 = vpop.xlane.xlu1 %1114 }
 0x817   : > { %v1116_v53 = vmul.f32 0.0078125, %v1115_v52 }
 0x819   : > { %v1117_v54 = vsub.f32 %v1111_v50, %v1116_v53 }
 0x81b   : > { %v1118_v55 = vmul.f32 %v1117_v54, %v1117_v54 }
 0x81d   : > { %1119 = vadd.xlane.f32.xlu0 %v1118_v55 }
 0x890   : > { %v1120_v56 = vpop.xlane.xlu0 %1119 }
 0x891   : > { %v1121_v59 = vmul.f32 0.0078125, %v1120_v56 }
 0x893   : > { %v1122_v60 = vadd.f32 1e-05, %v1121_v59 }
 0x895   : > { %1451 = vrsqrt.f32 %v1122_v60  ;;  %vm1129_vm5 = vweird.f32 %v1122_v60 }
 0x89b   : > { %v1452_v57 = vpop.eup %1451 }
 0x89c   : > { %v1124_v61 = vmul.f32 %v1452_v57, %v1122_v60  ;;  %vm1130_vm4 = vweird.f32 %v1452_v57 }
 0x89d   : > { %vm1131_vm6 = vmor %vm1129_vm5, %vm1130_vm4 }
 0x89e   : > { %v1125_v63 = vmul.f32 %v1452_v57, %v1124_v61 }
 0x8a0   : > { %v1126_v0 = vmul.f32 0.5, %v1125_v63 }
 0x8a2   : > { %v1127_v1 = vsub.f32 1.5, %v1126_v0 }
 0x8a4   : > { %v1128_v2 = vmul.f32 %v1452_v57, %v1127_v1 }
 0x8a6   : > { %v1132_v3 = vsel %vm1131_vm6, %v1452_v57, %v1128_v2 }
 0x8a7   : > { %v1133_v5 = vmul.f32 %v1132_v3, %v1117_v54 }
 0x8a9   : > { %v1137_v6 = vmul.f32 %v1417_v47, %v1133_v5 }
 0x8ab   : > { %v1141_v7 = vadd.f32 %v1418_v4, %v1137_v6 }
 0x8ad   : > { %1142 = vst [vmem:[%s280_s11] sm:$0xff] %v1141_v7 }
 0x8ae PF: > { %s18_s21 = sadd.s32 1, %s1527_s21  }
 0x8af   : > { %p15_p7 = scmp.ge.s32.totalorder %s18_s21, 4  }
 0x8b1   :  { %17 = sbr.rel (!%p15_p7) target bundleno = 2 (0x2), region = 83 }
 0x8b6   :  { %1162 = vsyncpa [#allocation3], 1 }
 0x8b7   :  { %1164 = vsyncpa [#allocation3 + $0x1], 1 }
 0x8b8   :  { %1165 = vsyncpa [#allocation5], 1 }

// kernel: transformer_fwd.15
= control target key start
LH: loop header
LB: loop body
LE: loop exit
PB: predicated region body
PF: predicated region fallthrough
CT: control target
= control target key end

     0   :  { %11 = vsyncpa [#allocation3], 0  ;;  %s1500_s21 = smov 0   ;;  %s1684_s0 = inlined_call_operand.vmem [shape: f32[2,8,128], index: 0, kind: input, shape index: {}]   ;;  %s1685_s1 = inlined_call_operand.hbm [shape: bf16[128,256], index: 1, kind: input, shape index: {}]   ;;  %s1686_s2 = inlined_call_operand.vmem [shape: bf16[128,128], index: 2, kind: input, shape index: {}]   ;;  %s1687_s3 = inlined_call_operand.vmem [shape: f32[1,128], index: 3, kind: input, shape index: {}]   ;;  %s1688_s4 = inlined_call_operand.vmem [shape: f32[1,128], index: 4, kind: input, shape index: {}]   ;;  %s1689_s5 = inlined_call_operand.vmem [shape: f32[1,128], index: 5, kind: input, shape index: {}]   ;;  %s1690_s6 = inlined_call_operand.vmem [shape: f32[2,8,128], index: 6, kind: output, shape index: {}]  }
   0x1 LB: > { %s190_s24 = sshll.u32 %s1685_s1, 4  ;;  %s1509_s25 = sadd.s32 4294967295, %s1452_s21   ;;  %s1452_s21 = sphi %s1500_s21, %s17_s21   ;;  %s191_s24 = int_to_ptr.hbm [resolvable:$true] %s190_s24 }
   0x2   : > { %p1193_p0 = scmp.ge.s32.totalorder %s1452_s21, 1  ;;  %p179_p1 = scmp.lt.s32.totalorder %s1452_s21, 3 }
   0x3   : > { %p1354_p2 = scmp.eq.s32.totalorder %s1509_s25, 0  ;;  %s1454_s26 = smov [#allocation2]  }
   0x4   : > { %p180_p3 = pnand %p1193_p0, %p179_p1  ;;  %s192_s27 = sshll.u32 %s1454_s26, 4  ;;  %s193_s27 = int_to_ptr.vmem [resolvable:$true] %s192_s27 }
   0x5   : > { %s1455_s28 = smov 128   ;;  %s1456_s29 = smov 8  }
   0x6   : > { %p1350_p4 = pneg %p180_p3  ;;  %227 = sbr.rel (%p180_p3) target bundleno = 2216 (0x8a8), region = 44 }
   0x8   : > { %p1351_p5 = pnand %p1354_p2, %p1350_p4 }
   0xa   : > { %1353 = dma.hbm_to_vmem [thread:$0]  (!%p1351_p5), %s191_s24, 2048, %s193_s27, [#allocation3], %s1455_s28, %s1455_s28, %s1456_s29  }
   0xb   : > { %1447 = dma.done.wait (%p1354_p2), [#allocation3], 2048  }
   0xc   : > { %1449 = vsyncadd (%p1354_p2), [#allocation3], 4294965248  ;;  %v1258_v0 = vld [vmem:[#allocation2 + $0x70] sm:$0xf]  ;;  %v1337_v1 = vld [vmem:[#allocation2 + $0x74] sm:$0xf0] }
   0xd   : > { %v1336_v2 = vld [vmem:[#allocation2 + $0x74] sm:$0xf]  ;;  %v1259_v3 = vor.u32 %v1337_v1, %v1258_v0  ;;  %v1260_v4 = vld [vmem:[#allocation2 + $0x78] sm:$0xf0]  ;;  %v1250_v5 = vld [vmem:[#allocation2 + $0x60] sm:$0xf] }
   0xe   : > { %v1335_v6 = vld [vmem:[#allocation2 + $0x64] sm:$0xf0]  ;;  %v1263_v7 = vor.u32 %v1336_v2, %v1260_v4  ;;  %v1334_v8 = vld [vmem:[#allocation2 + $0x64] sm:$0xf]  ;;  %v1252_v9 = vld [vmem:[#allocation2 + $0x68] sm:$0xf0] }
   0xf   : > { %363 = vmatpush.bf16.msra.mxu0 %v1259_v3  ;;  %v1251_v10 = vor.u32 %v1335_v6, %v1250_v5  ;;  %v1255_v11 = vor.u32 %v1334_v8, %v1252_v9  ;;  %v1242_v12 = vld [vmem:[#allocation2 + $0x50] sm:$0xf]  ;;  %v1333_v13 = vld [vmem:[#allocation2 + $0x54] sm:$0xf0]  ;;  %v1332_v14 = vld [vmem:[#allocation2 + $0x54] sm:$0xf]  ;;  %v389_v6 = vlaneseq }
  0x10   : > { %376 = vmatpush.bf16.msra.mxu1 %v1263_v7  ;;  %v1244_v15 = vld [vmem:[#allocation2 + $0x58] sm:$0xf0]  ;;  %v1243_v16 = vor.u32 %v1333_v13, %v1242_v12  ;;  %v1234_v18 = vld [vmem:[#allocation2 + $0x40] sm:$0xf]  ;;  %v1331_v19 = vld [vmem:[#allocation2 + $0x44] sm:$0xf0] }
  0x11   : > { %v1247_v17 = vor.u32 %v1332_v14, %v1244_v15  ;;  %v1330_v20 = vld [vmem:[#allocation2 + $0x44] sm:$0xf]  ;;  %v1236_v21 = vld [vmem:[#allocation2 + $0x48] sm:$0xf0]  ;;  %v1235_v22 = vor.u32 %v1331_v19, %v1234_v18  ;;  %v1226_v24 = vld [vmem:[#allocation2 + $0x30] sm:$0xf] }
  0x12   : > { %v1239_v23 = vor.u32 %v1330_v20, %v1236_v21  ;;  %v1329_v25 = vld [vmem:[#allocation2 + $0x34] sm:$0xf0]  ;;  %v1328_v26 = vld [vmem:[#allocation2 + $0x34] sm:$0xf]  ;;  %v1228_v27 = vld [vmem:[#allocation2 + $0x38] sm:$0xf0] }
  0x13   : > { %364 = vmatpush.bf16.msra.mxu0 %v1251_v10  ;;  %p256_p6 = scmp.lt.s32.totalorder %s1509_s25, 1  ;;  %v1227_v28 = vor.u32 %v1329_v25, %v1226_v24  ;;  %v1231_v29 = vor.u32 %v1328_v26, %v1228_v27  ;;  %v1218_v30 = vld [vmem:[#allocation2 + $0x20] sm:$0xf]  ;;  %v1327_v31 = vld [vmem:[#allocation2 + $0x24] sm:$0xf0]  ;;  %vm397_vm0 = vcmask 130048  }
  0x14   : > { %377 = vmatpush.bf16.msra.mxu1 %v1255_v11  ;;  %v1326_v32 = vld [vmem:[#allocation2 + $0x24] sm:$0xf]  ;;  %v1220_v33 = vld [vmem:[#allocation2 + $0x28] sm:$0xf0]  ;;  %v1219_v34 = vor.u32 %v1327_v31, %v1218_v30  ;;  %v1210_v36 = vld [vmem:[#allocation2 + $0x10] sm:$0xf] }
  0x15   : > { %s1692_s25 = smov (!%p256_p6, %s1509_s25), 1  ;;  %v1223_v35 = vor.u32 %v1326_v32, %v1220_v33  ;;  %v1325_v37 = vld [vmem:[#allocation2 + $0x14] sm:$0xf0]  ;;  %v1324_v38 = vld [vmem:[#allocation2 + $0x14] sm:$0xf]  ;;  %s1457_s10 = smov 112  }
  0x16   : > { %v1212_v39 = vld [vmem:[#allocation2 + $0x18] sm:$0xf0]  ;;  %s1198_s30 = sshll.u32 %s1692_s25, 3  ;;  %v1211_v40 = vor.u32 %v1325_v37, %v1210_v36  ;;  %v1202_v42 = vld [vmem:[#allocation2] sm:$0xf]  ;;  %s1458_s11 = smov 96  }
  0x17   : > { %365 = vmatpush.bf16.msra.mxu0 %v1243_v16  ;;  %v1215_v41 = vor.u32 %v1324_v38, %v1212_v39  ;;  %v1323_v43 = vld [vmem:[#allocation2 + $0x4] sm:$0xf0]  ;;  %s259_s9 = scalar_lea.vmem %s1684_s0, %s1198_s30  ;;  %v1322_v44 = vld [vmem:[#allocation2 + $0x4] sm:$0xf]  ;;  %v1204_v45 = vld [vmem:[#allocation2 + $0x8] sm:$0xf0] }
  0x18   : > { %378 = vmatpush.bf16.msra.mxu1 %v1247_v17  ;;  %v1203_v46 = vor.u32 %v1323_v43, %v1202_v42  ;;  %v1524_v47 = vld [vmem:[%s259_s9] sm:$0xff]  ;;  %v1207_v48 = vor.u32 %v1322_v44, %v1204_v45  ;;  %s1459_s12 = smov 80   ;;  %v390_v7 = vshrl.u32 %v389_v6, 7  ;;  %v392_v8 = vand.u32 127, %v389_v6  ;;  %v1340_v37 = vld [vmem:[%s1686_s2 + $0x10] sm:$0xff]  ;;  %s1461_s19 = smov 64  }
  0x19   : > { %v266_v49 = vpack.c.bf16 %v1524_v47, %v1524_v47  ;;  %v1338_v63 = vld [vmem:[%s1686_s2] sm:$0xff]  ;;  %v1460_v10 = vmov 0.0   ;;  %vm418_vm2 = vcmask 64512   ;;  %vm537_vm3 = vcmask 1043456   ;;  %s1462_s20 = smov 48   ;;  %s1463_s29 = smov 16  }
  0x1a   : > { %452 = vmatpush.bf16.msra.mxu3 %v1338_v63  ;;  %vm393_vm1 = vcmp.gt.s32.totalorder %v392_v8, %v390_v7  ;;  %s1464_s7 = smov 32  }
  0x1b   : > { %366 = vmatpush.bf16.msra.mxu0 %v1235_v22  ;;  %v507_v59 = vunpack.c.l.b16 %v266_v49  ;;  %v1554_v11 = vsel %vm393_vm1, -1e+28, %v1460_v10 }
  0x1c   : > { %379 = vmatpush.bf16.msra.mxu1 %v1239_v23 }
  0x1d   : > { %v1535_v62 = vpack.c.b16 %v507_v59, %v507_v59  ;;  %1269 = vmatmul.msk.bf16.vlgmr.msra.gmra.mxu3 %vm397_vm0, %v266_v49 }
  0x1f   : > { %367 = vmatpush.bf16.msra.mxu0 %v1227_v28  ;;  %v1339_v28 = vld [vmem:[%s1686_s2 + $0x8] sm:$0xff] }
  0x20   : > { %380 = vmatpush.bf16.msra.mxu1 %v1231_v29 }
  0x23   : > { %368 = vmatpush.bf16.msra.mxu0 %v1219_v34 }
  0x24   : > { %381 = vmatpush.bf16.msra.mxu1 %v1223_v35 }
  0x27   : > { %369 = vmatpush.bf16.msra.mxu0 %v1211_v40 }
  0x28   : > { %382 = vmatpush.bf16.msra.mxu1 %v1215_v41 }
  0x2b   : > { %370 = vmatpush.bf16.msra.mxu0 %v1203_v46 }
  0x2c   : > { %383 = vmatpush.bf16.msra.mxu1 %v1207_v48 }
  0x2e   : > { %371 = vmatmul.bf16.vlgmr.msra.gmra.mxu0 %v266_v49 }
  0x2f   : > { %384 = vmatmul.bf16.vlgmr.msra.gmra.mxu1 %v266_v49 }
  0x30   : > { %632 = vmatpush.bf16.msrb.mxu1 %v1340_v37 }
  0xa0   : > { %v454_v17 = vpop.f32.mrf.mxu3 }
  0xa1   : > { %v458_v19 = vpack.c.bf16 %v454_v17, %v454_v17 }
  0xa3   : > { %v558_v24 = vsel %vm537_vm3, %v458_v19, 0 }
  0xa8   : > { %v456_v18 = vpop.f32.mrf.mxu3 }
  0xab   : > { %v372_v50 = vpop.f32.mrf.mxu0 }
  0xac   : > { %v395_v51 = vpack.c.bf16 %v372_v50, %v372_v50  ;;  %v385_v52 = vpop.f32.mrf.mxu1 }
  0xad   : > { %v396_v53 = vpack.c.bf16 %v385_v52, %v385_v52 }
  0xae   : > { %v460_v54 = vunpack.c.l.b16 %v395_v51 }
  0xaf   : > { %v465_v55 = vunpack.c.l.b16 %v396_v53  ;;  %v402_v56 = vsel %vm397_vm0, %v396_v53, 0 }
  0xb0   : > { %v1529_v57 = vpack.c.b16 %v460_v54, %v460_v54  ;;  %411 = vmatpush.bf16.xpose.msra.mxu2 %v402_v56 }
  0xb1   : > { %v1531_v58 = vpack.c.b16 %v465_v55, %v465_v55 }
  0xb2   : > { %462 = vrot.lane.b32.xlu2 %v1529_v57, %s1457_s10 }
  0xb3   : > { %467 = vrot.lane.b32.xlu1 %v1531_v58, %s1457_s10  ;;  %v374_v60 = vpop.f32.mrf.mxu0 }
  0xb4   : > { %v387_v61 = vpop.f32.mrf.mxu1 }
  0xb7   : > { %1264 = vmatmul.msk.bf16.vlgmr.msra.gmra.mxu2 %vm397_vm0, %v395_v51 }
  0xb8   : > { %527 = vmatpush.bf16.msrb.mxu2 %v1339_v28 }
  0xba   : > { %575 = vrot.lane.b32.xlu2 %v1531_v58, %s1458_s11 }
  0xbb   : > { %509 = vrot.lane.b32.xlu1 %v1535_v62, %s1457_s10 }
  0xbc   : > { %567 = vmatpush.bf16.msra.mxu2 %v558_v24 }
  0xc2   : > { %659 = vrot.lane.b32.xlu2 %v1529_v57, %s1459_s12 }
  0xc3   : > { %573 = vrot.lane.b32.xlu1 %v1529_v57, %s1458_s11 }
  0xca   : > { %700 = vrot.lane.b32.xlu2 %v1535_v62, %s1459_s12 }
  0xcb   : > { %614 = vrot.lane.b32.xlu1 %v1535_v62, %s1458_s11 }
 0x10c   : > { %v463_v0 = vpop.permute.xlu2 %462 }
 0x114   : > { %v576_v1 = vpop.permute.xlu2 %575 }
 0x115   : > { %v581_v2 = vsel %vm397_vm0, %v576_v1, 0 }
 0x116   : > { %590 = vmatpush.bf16.xpose.msrb.mxu0 %v581_v2 }
 0x11c   : > { %v660_v39 = vpop.permute.xlu2 %659 }
 0x124   : > { %v1574_v40 = vpop.permute.xlu2 %700 }
 0x125   : > { %v468_v3 = vpop.permute.xlu1 %467 }
 0x126   : > { %v473_v4 = vsel %vm397_vm0, %v468_v3, 0 }
 0x127   : > { %482 = vmatpush.bf16.xpose.msrb.mxu3 %v473_v4 }
 0x12d   : > { %v510_v5 = vpop.permute.xlu1 %509 }
 0x12e   : > { %1270 = vmatmul.msk.bf16.vlgmr.msrb.gmra.mxu3 %vm397_vm0, %v463_v0  ;;  %1275 = vmatmul.msk.bf16.vlgmr.msrb.gmra.mxu2 %vm397_vm0, %v510_v5 }
 0x135   : > { %v574_v9 = vpop.permute.xlu1 %573 }
 0x136   : > { %1278 = vmatmul.msk.bf16.vlgmr.msrb.gmra.mxu0 %vm397_vm0, %v574_v9 }
 0x13a   : > { %v413_v12 = vpop.f32.mrf.mxu2 }
 0x13b   : > { %v414_v13 = vadd.f32 %v413_v12, %v1554_v11 }
 0x13d   : > { %v417_v14 = vmul.f32 0.088388346, %v414_v13  ;;  %v615_v38 = vpop.permute.xlu1 %614 }
 0x13e   : > { %1283 = vmatmul.msk.bf16.vlgmr.msrb.gmra.mxu1 %vm397_vm0, %v615_v38 }
 0x13f   : > { %v419_v15 = vsel %vm418_vm2, %v417_v14, -inf }
 0x140   : > { %420 = vmax.xlane.f32.xlu0 %v419_v15 }
 0x142   : > { %v415_v16 = vpop.f32.mrf.mxu2 }
 0x1b1   : > { %v484_v20 = vpop.f32.mrf.mxu3  ;;  %v529_v0 = vpop.f32.mrf.mxu2 }
 0x1b2   : > { %v485_v21 = vadd.f32 %v484_v20, %v1554_v11  ;;  %v533_v1 = vpack.c.bf16 %v529_v0, %v529_v0 }
 0x1b3   : > { %v421_v22 = vpop.xlane.xlu0 %420  ;;  %v592_v23 = vpop.f32.mrf.mxu0 }
 0x1b4   : > { %v488_v25 = vmul.f32 0.088388346, %v485_v21  ;;  %v422_v26 = vsub.f32 %v417_v14, %v421_v22  ;;  %v593_v27 = vadd.f32 %v592_v23, %v1554_v11  ;;  %v539_v2 = vsel %vm537_vm3, %v533_v1, 0  ;;  %v1341_v22 = vld [vmem:[%s1686_s2 + $0x18] sm:$0xff] }
 0x1b5   : > { %548 = vmatpush.bf16.msra.mxu3 %v539_v2  ;;  %718 = vmatpush.bf16.msra.mxu0 %v1341_v22 }
 0x1b6   : > { %v423_v29 = vmul.f32 1.442695, %v422_v26  ;;  %v596_v30 = vmul.f32 0.088388346, %v593_v27  ;;  %v489_v31 = vsel %vm418_vm2, %v488_v25, -inf }
 0x1b7   : > { %490 = vmax.xlane.f32.xlu1 %v489_v31 }
 0x1b8   : > { %1378 = vpow2.f32 %v423_v29  ;;  %v597_v32 = vsel %vm418_vm2, %v596_v30, -inf  ;;  %1290 = vmatmul.msk.bf16.vlgmr.msra.gmra.mxu0 %vm397_vm0, %v1574_v40 }
 0x1b9   : > { %v486_v33 = vpop.f32.mrf.mxu3  ;;  %598 = vmax.xlane.f32.xlu2 %v597_v32  ;;  %v531_v5 = vpop.f32.mrf.mxu2 }
 0x1bb   : > { %v594_v34 = vpop.f32.mrf.mxu0  ;;  %v634_v3 = vpop.f32.mrf.mxu1 }
 0x1bc   : > { %v638_v4 = vpack.c.bf16 %v634_v3, %v634_v3 }
 0x1be   : > { %v1379_v35 = vpop.eup %1378  ;;  %v643_v6 = vsel %vm537_vm3, %v638_v4, 0 }
 0x1bf   : > { %v425_v36 = vsel %vm418_vm2, %v1379_v35, 0.0  ;;  %652 = vmatpush.bf16.msrb.mxu3 %v643_v6 }
 0x1c0   : > { %426 = vadd.xlane.f32.xlu0 %v425_v36 }
 0x1c3   : > { %v636_v7 = vpop.f32.mrf.mxu1 }
 0x1d4   : > { %661 = vrot.lane.b32.xlu0 %v1531_v58, %s1459_s12 }
 0x22a   : > { %v491_v41 = vpop.xlane.xlu1 %490 }
 0x22b   : > { %v492_v42 = vsub.f32 %v488_v25, %v491_v41 }
 0x22c   : > { %v599_v43 = vpop.xlane.xlu2 %598 }
 0x22d   : > { %v493_v44 = vmul.f32 1.442695, %v492_v42  ;;  %v600_v45 = vsub.f32 %v596_v30, %v599_v43 }
 0x22f   : > { %1380 = vpow2.f32 %v493_v44  ;;  %v601_v46 = vmul.f32 1.442695, %v600_v45 }
 0x231   : > { %1382 = vpow2.f32 %v601_v46 }
 0x233   : > { %v427_v48 = vpop.xlane.xlu0 %426 }
 0x234   : > { %1384 = vrcp.f32 %v427_v48 }
 0x235   : > { %v1381_v49 = vpop.eup %1380  ;;  %v720_v43 = vpop.f32.mrf.mxu0 }
 0x236   : > { %v495_v50 = vsel %vm418_vm2, %v1381_v49, 0.0  ;;  %v724_v44 = vpack.c.bf16 %v720_v43, %v720_v43 }
 0x237   : > { %v1383_v51 = vpop.eup %1382  ;;  %496 = vadd.xlane.f32.xlu2 %v495_v50 }
 0x238   : > { %v603_v52 = vsel %vm418_vm2, %v1383_v51, 0.0 }
 0x239   : > { %604 = vadd.xlane.f32.xlu1 %v603_v52 }
 0x23a   : > { %v1385_v53 = vpop.eup %1384 }
 0x23b   : > { %v429_v54 = vmul.f32 %v1385_v53, %v427_v48  ;;  %v729_v48 = vsel %vm537_vm3, %v724_v44, 0 }
 0x23c   : > { %738 = vmatpush.bf16.msra.mxu1 %v729_v48 }
 0x23d   : > { %v430_v55 = vsub.f32 2.0, %v429_v54  ;;  %v722_v52 = vpop.f32.mrf.mxu0 }
 0x23f   : > { %v431_v56 = vmul.f32 %v1385_v53, %v430_v55  ;;  %v1343_v55 = vld [vmem:[%s1686_s2 + $0x28] sm:$0xff] }
 0x241   : > { %v432_v59 = vmul.f32 %v1379_v35, %v431_v56  ;;  %v1342_v56 = vld [vmem:[%s1686_s2 + $0x20] sm:$0xff] }
 0x243   : > { %v433_v60 = vpack.c.bf16 %v432_v59, %v432_v59 }
 0x245   : > { %1277 = vmatmul.msk.bf16.vlgmr.msra.gmra.mxu2 %vm418_vm2, %v433_v60 }
 0x246   : > { %v662_v61 = vpop.permute.xlu0 %661 }
 0x247   : > { %v667_v63 = vsel %vm397_vm0, %v662_v61, 0 }
 0x248   : > { %676 = vmatpush.bf16.xpose.msrb.mxu2 %v667_v63 }
 0x24f   : > { %747 = vrot.lane.b32.xlu2 %v1531_v58, %s1461_s19 }
 0x250   : > { %804 = vmatpush.bf16.msra.mxu2 %v1342_v56 }
 0x252   : > { %745 = vrot.lane.b32.xlu1 %v1529_v57, %s1461_s19 }
 0x255   : > { %1285 = vmatmul.msk.bf16.vlgmr.msrb.gmra.mxu2 %vm397_vm0, %v660_v39 }
 0x257   : > { %831 = vrot.lane.b32.xlu2 %v1529_v57, %s1462_s20 }
 0x25a   : > { %872 = vrot.lane.b32.xlu1 %v1535_v62, %s1462_s20 }
 0x2aa   : > { %v497_v8 = vpop.xlane.xlu2 %496 }
 0x2ab   : > { %1386 = vrcp.f32 %v497_v8 }
 0x2ac   : > { %v605_v9 = vpop.xlane.xlu1 %604 }
 0x2ad   : > { %1388 = vrcp.f32 %v605_v9 }
 0x2b1   : > { %v1387_v10 = vpop.eup %1386 }
 0x2b2   : > { %v499_v12 = vmul.f32 %v1387_v10, %v497_v8  ;;  %v748_v17 = vpop.permute.xlu2 %747 }
 0x2b3   : > { %v1389_v15 = vpop.eup %1388  ;;  %v753_v20 = vsel %vm397_vm0, %v748_v17, 0 }
 0x2b4   : > { %v500_v13 = vsub.f32 2.0, %v499_v12  ;;  %v607_v19 = vmul.f32 %v1389_v15, %v605_v9 }
 0x2b6   : > { %v501_v14 = vmul.f32 %v1387_v10, %v500_v13  ;;  %v608_v21 = vsub.f32 2.0, %v607_v19 }
 0x2b8   : > { %v502_v16 = vmul.f32 %v1381_v49, %v501_v14  ;;  %v609_v23 = vmul.f32 %v1389_v15, %v608_v21 }
 0x2ba   : > { %v503_v18 = vpack.c.bf16 %v502_v16, %v502_v16  ;;  %v610_v24 = vmul.f32 %v1383_v51, %v609_v23  ;;  %v832_v60 = vpop.permute.xlu2 %831 }
 0x2bc   : > { %1276 = vmatmul.msk.bf16.vlgmr.msra.gmra.mxu3 %vm418_vm2, %v503_v18  ;;  %v611_v26 = vpack.c.bf16 %v610_v24, %v610_v24 }
 0x2bd   : > { %762 = vmatpush.bf16.xpose.msra.mxu3 %v753_v20 }
 0x2c4   : > { %v746_v30 = vpop.permute.xlu1 %745 }
 0x2c8   : > { %v569_v25 = vpop.f32.mrf.mxu2 }
 0x2cc   : > { %1284 = vmatmul.msk.bf16.vlgmr.msrb.gmra.mxu3 %vm418_vm2, %v611_v26  ;;  %v873_v59 = vpop.permute.xlu1 %872 }
 0x2cd   : > { %890 = vmatpush.bf16.msrb.mxu3 %v1343_v55 }
 0x2d0   : > { %v571_v27 = vpop.f32.mrf.mxu2 }
 0x2d8   : > { %v678_v28 = vpop.f32.mrf.mxu2 }
 0x2d9   : > { %v679_v29 = vadd.f32 %v678_v28, %v1554_v11 }
 0x2db   : > { %v682_v31 = vmul.f32 0.088388346, %v679_v29 }
 0x2dc   : > { %1292 = vmatmul.msk.bf16.vlgmr.msra.gmra.mxu3 %vm397_vm0, %v746_v30 }
 0x2dd   : > { %v683_v32 = vsel %vm418_vm2, %v682_v31, -inf }
 0x2de   : > { %684 = vmax.xlane.f32.xlu0 %v683_v32 }
 0x2e0   : > { %v680_v33 = vpop.f32.mrf.mxu2 }
 0x2ec   : > { %1304 = vmatmul.msk.bf16.vlgmr.msrb.gmra.mxu3 %vm397_vm0, %v873_v59 }
 0x33f   : > { %v550_v34 = vpop.f32.mrf.mxu3 }
 0x340   : > { %v570_v36 = vadd.f32 %v569_v25, %v550_v34 }
 0x347   : > { %v552_v35 = vpop.f32.mrf.mxu3 }
 0x34f   : > { %v654_v37 = vpop.f32.mrf.mxu3 }
 0x350   : > { %v1602_v38 = vadd.f32 %v654_v37, %v570_v36 }
 0x351   : > { %v685_v39 = vpop.xlane.xlu0 %684 }
 0x352   : > { %v686_v40 = vsub.f32 %v682_v31, %v685_v39 }
 0x354   : > { %v687_v41 = vmul.f32 1.442695, %v686_v40 }
 0x356   : > { %1390 = vpow2.f32 %v687_v41 }
 0x357   : > { %v656_v42 = vpop.f32.mrf.mxu3 }
 0x35c   : > { %v1391_v45 = vpop.eup %1390 }
 0x35d   : > { %v689_v46 = vsel %vm418_vm2, %v1391_v45, 0.0 }
 0x35e   : > { %690 = vadd.xlane.f32.xlu0 %v689_v46 }
 0x35f   : > { %v764_v49 = vpop.f32.mrf.mxu3 }
 0x360   : > { %v765_v50 = vadd.f32 %v764_v49, %v1554_v11 }
 0x362   : > { %v768_v51 = vmul.f32 0.088388346, %v765_v50 }
 0x364   : > { %v769_v53 = vsel %vm418_vm2, %v768_v51, -inf }
 0x365   : > { %770 = vmax.xlane.f32.xlu2 %v769_v53 }
 0x367   : > { %v766_v54 = vpop.f32.mrf.mxu3 }
 0x36f   : > { %v892_v14 = vpop.f32.mrf.mxu3 }
 0x370   : > { %v896_v15 = vpack.c.bf16 %v892_v14, %v892_v14 }
 0x372   : > { %833 = vrot.lane.b32.xlu0 %v1531_v58, %s1462_s20  ;;  %v901_v16 = vsel %vm537_vm3, %v896_v15, 0  ;;  %s263_s20 = scalar_lea.vmem %s1690_s6, %s1198_s30 }
 0x373   : > { %910 = vmatpush.bf16.msrb.mxu2 %v901_v16 }
 0x377   : > { %v894_v17 = vpop.f32.mrf.mxu3 }
 0x37a   : > { %786 = vrot.lane.b32.xlu0 %v1535_v62, %s1461_s19 }
 0x3d1   : > { %v691_v61 = vpop.xlane.xlu0 %690 }
 0x3d2   : > { %1392 = vrcp.f32 %v691_v61 }
 0x3d8   : > { %v1393_v63 = vpop.eup %1392  ;;  %v771_v0 = vpop.xlane.xlu2 %770 }
 0x3d9   : > { %v693_v1 = vmul.f32 %v1393_v63, %v691_v61  ;;  %v772_v2 = vsub.f32 %v768_v51, %v771_v0 }
 0x3db   : > { %v694_v3 = vsub.f32 2.0, %v693_v1  ;;  %v773_v4 = vmul.f32 1.442695, %v772_v2 }
 0x3dd   : > { %v695_v5 = vmul.f32 %v1393_v63, %v694_v3  ;;  %1394 = vpow2.f32 %v773_v4  ;;  %v1344_v63 = vld [vmem:[%s1686_s2 + $0x30] sm:$0xff] }
 0x3df   : > { %v696_v6 = vmul.f32 %v1391_v45, %v695_v5 }
 0x3e1   : > { %v697_v7 = vpack.c.bf16 %v696_v6, %v696_v6 }
 0x3e3   : > { %v1395_v8 = vpop.eup %1394  ;;  %1291 = vmatmul.msk.bf16.vlgmr.msra.gmra.mxu1 %vm418_vm2, %v697_v7 }
 0x3e4   : > { %v834_v9 = vpop.permute.xlu0 %833  ;;  %v775_v10 = vsel %vm418_vm2, %v1395_v8, 0.0 }
 0x3e5   : > { %v839_v12 = vsel %vm397_vm0, %v834_v9, 0  ;;  %776 = vadd.xlane.f32.xlu1 %v775_v10  ;;  %v1345_v10 = vld [vmem:[%s1686_s2 + $0x38] sm:$0xff] }
 0x3e6   : > { %848 = vmatpush.bf16.xpose.msrb.mxu1 %v839_v12 }
 0x3ec   : > { %v787_v13 = vpop.permute.xlu0 %786 }
 0x3ed   : > { %1297 = vmatmul.msk.bf16.vlgmr.msra.gmra.mxu2 %vm397_vm0, %v787_v13 }
 0x3ee   : > { %976 = vmatpush.bf16.msra.mxu1 %v1344_v63 }
 0x3f3   : > { %1299 = vmatmul.msk.bf16.vlgmr.msrb.gmra.mxu1 %vm397_vm0, %v832_v60 }
 0x3fe   : > { %1005 = vrot.lane.b32.xlu1 %v1531_v58, %s1463_s29 }
 0x406   : > { %958 = vrot.lane.b32.xlu1 %v1535_v62, %s1464_s7 }
 0x458   : > { %v777_v18 = vpop.xlane.xlu1 %776 }
 0x459   : > { %1396 = vrcp.f32 %v777_v18 }
 0x45f   : > { %v1397_v21 = vpop.eup %1396 }
 0x460   : > { %v740_v19 = vpop.f32.mrf.mxu1  ;;  %v779_v22 = vmul.f32 %v1397_v21, %v777_v18 }
 0x461   : > { %v744_v20 = vadd.f32 %v740_v19, %v1602_v38 }
 0x462   : > { %v780_v24 = vsub.f32 2.0, %v779_v22 }
 0x464   : > { %v781_v25 = vmul.f32 %v1397_v21, %v780_v24 }
 0x466   : > { %v782_v28 = vmul.f32 %v1395_v8, %v781_v25 }
 0x468   : > { %v742_v23 = vpop.f32.mrf.mxu1  ;;  %v783_v35 = vpack.c.bf16 %v782_v28, %v782_v28 }
 0x470   : > { %v806_v26 = vpop.f32.mrf.mxu2  ;;  %v850_v27 = vpop.f32.mrf.mxu1 }
 0x471   : > { %v810_v29 = vpack.c.bf16 %v806_v26, %v806_v26  ;;  %v851_v30 = vadd.f32 %v850_v27, %v1554_v11  ;;  %v1006_v31 = vpop.permute.xlu1 %1005 }
 0x472   : > { %v1011_v32 = vsel %vm397_vm0, %v1006_v31, 0 }
 0x473   : > { %v815_v33 = vsel %vm537_vm3, %v810_v29, 0  ;;  %v854_v34 = vmul.f32 0.088388346, %v851_v30  ;;  %1020 = vmatpush.bf16.xpose.msra.mxu2 %v1011_v32 }
 0x474   : > { %824 = vmatpush.bf16.msrb.mxu0 %v815_v33 }
 0x475   : > { %v855_v36 = vsel %vm418_vm2, %v854_v34, -inf }
 0x476   : > { %856 = vmax.xlane.f32.xlu0 %v855_v36 }
 0x477   : > { %1298 = vmatmul.msk.bf16.vlgmr.msrb.gmra.mxu0 %vm418_vm2, %v783_v35 }
 0x478   : > { %v852_v37 = vpop.f32.mrf.mxu1  ;;  %v808_v38 = vpop.f32.mrf.mxu2 }
 0x479   : > { %v959_v1 = vpop.permute.xlu1 %958 }
 0x47a   : > { %1311 = vmatmul.msk.bf16.vlgmr.msra.gmra.mxu1 %vm397_vm0, %v959_v1 }
 0x48a   : > { %919 = vrot.lane.b32.xlu0 %v1531_v58, %s1464_s7 }
 0x492   : > { %1003 = vrot.lane.b32.xlu0 %v1529_v57, %s1463_s29 }
 0x49a   : > { %1044 = vrot.lane.b32.xlu0 %v1535_v62, %s1463_s29 }
 0x4e9   : > { %v857_v39 = vpop.xlane.xlu0 %856 }
 0x4ea   : > { %v858_v40 = vsub.f32 %v854_v34, %v857_v39 }
 0x4ec   : > { %v859_v41 = vmul.f32 1.442695, %v858_v40 }
 0x4ee   : > { %1398 = vpow2.f32 %v859_v41 }
 0x4f4   : > { %v1399_v42 = vpop.eup %1398  ;;  %v826_v43 = vpop.f32.mrf.mxu0 }
 0x4f5   : > { %v830_v44 = vadd.f32 %v826_v43, %v744_v20  ;;  %v861_v45 = vsel %vm418_vm2, %v1399_v42, 0.0 }
 0x4f6   : > { %862 = vadd.xlane.f32.xlu2 %v861_v45 }
 0x4f7   : > { %v978_v17 = vpop.f32.mrf.mxu1 }
 0x4f8   : > { %v982_v18 = vpack.c.bf16 %v978_v17, %v978_v17 }
 0x4fa   : > { %v987_v19 = vsel %vm537_vm3, %v982_v18, 0 }
 0x4fb   : > { %996 = vmatpush.bf16.msra.mxu3 %v987_v19 }
 0x4fc   : > { %v920_v46 = vpop.permute.xlu0 %919  ;;  %v828_v48 = vpop.f32.mrf.mxu0 }
 0x4fd   : > { %v925_v58 = vsel %vm397_vm0, %v920_v46, 0  ;;  %v1375_v48 = vld [vmem:[%s1687_s3] ss:$0 sm:$0xff] }
 0x4fe   : > { %934 = vmatpush.bf16.xpose.msra.mxu0 %v925_v58 }
 0x4ff   : > { %v980_v20 = vpop.f32.mrf.mxu1 }
 0x504   : > { %v1004_v56 = vpop.permute.xlu0 %1003 }
 0x506   : > { %1062 = vmatpush.bf16.msrb.mxu0 %v1345_v10 }
 0x50c   : > { %v1045_v12 = vpop.permute.xlu0 %1044 }
 0x50e   : > { %917 = vrot.lane.b32.xlu2 %v1529_v57, %s1464_s7 }
 0x569   : > { %v863_v49 = vpop.xlane.xlu2 %862 }
 0x56a   : > { %1400 = vrcp.f32 %v863_v49 }
 0x570   : > { %v1401_v62 = vpop.eup %1400 }
 0x571   : > { %v865_v50 = vmul.f32 %v1401_v62, %v863_v49  ;;  %v918_v51 = vpop.permute.xlu2 %917 }
 0x572   : > { %1306 = vmatmul.msk.bf16.vlgmr.msra.gmra.mxu0 %vm397_vm0, %v918_v51 }
 0x573   : > { %v866_v52 = vsub.f32 2.0, %v865_v50 }
 0x575   : > { %v867_v53 = vmul.f32 %v1401_v62, %v866_v52 }
 0x577   : > { %v868_v54 = vmul.f32 %v1399_v42, %v867_v53 }
 0x579   : > { %v869_v55 = vpack.c.bf16 %v868_v54, %v868_v54 }
 0x57b   : > { %1305 = vmatmul.msk.bf16.vlgmr.msrb.gmra.mxu2 %vm418_vm2, %v869_v55 }
 0x582   : > { %1318 = vmatmul.msk.bf16.vlgmr.msrb.gmra.mxu0 %vm397_vm0, %v1045_v12 }
 0x58b   : > { %1313 = vmatmul.msk.bf16.vlgmr.msra.gmra.mxu2 %vm397_vm0, %v1004_v56 }
 0x5ef   : > { %v936_v59 = vpop.f32.mrf.mxu0 }
 0x5f0   : > { %v937_v60 = vadd.f32 %v936_v59, %v1554_v11 }
 0x5f2   : > { %v940_v57 = vmul.f32 0.088388346, %v937_v60 }
 0x5f4   : > { %v941_v61 = vsel %vm418_vm2, %v940_v57, -inf }
 0x5f5   : > { %942 = vmax.xlane.f32.xlu2 %v941_v61 }
 0x5f7   : > { %v938_v0 = vpop.f32.mrf.mxu0 }
 0x5fe   : > { %v912_v2 = vpop.f32.mrf.mxu2 }
 0x5ff   : > { %v916_v3 = vadd.f32 %v912_v2, %v830_v44  ;;  %v1064_v26 = vpop.f32.mrf.mxu0 }
 0x600   : > { %v1068_v27 = vpack.c.bf16 %v1064_v26, %v1064_v26 }
 0x602   : > { %v1073_v28 = vsel %vm537_vm3, %v1068_v27, 0 }
 0x603   : > { %1082 = vmatpush.bf16.msrb.mxu1 %v1073_v28 }
 0x606   : > { %v914_v4 = vpop.f32.mrf.mxu2 }
 0x607   : > { %v1066_v29 = vpop.f32.mrf.mxu0  ;;  %v1377_v4 = vld [vmem:[%s1689_s5] ss:$0 sm:$0xff] }
 0x60e   : > { %v1022_v5 = vpop.f32.mrf.mxu2 }
 0x60f   : > { %v1023_v6 = vadd.f32 %v1022_v5, %v1554_v11 }
 0x611   : > { %v1026_v7 = vmul.f32 0.088388346, %v1023_v6 }
 0x613   : > { %v1027_v8 = vsel %vm418_vm2, %v1026_v7, -inf }
 0x614   : > { %1028 = vmax.xlane.f32.xlu1 %v1027_v8 }
 0x616   : > { %v1024_v9 = vpop.f32.mrf.mxu2 }
 0x668   : > { %v943_v13 = vpop.xlane.xlu2 %942 }
 0x669   : > { %v944_v14 = vsub.f32 %v940_v57, %v943_v13 }
 0x66b   : > { %v945_v15 = vmul.f32 1.442695, %v944_v14 }
 0x66d   : > { %1402 = vpow2.f32 %v945_v15 }
 0x673   : > { %v1403_v16 = vpop.eup %1402 }
 0x674   : > { %v947_v11 = vsel %vm418_vm2, %v1403_v16, 0.0 }
 0x675   : > { %948 = vadd.xlane.f32.xlu0 %v947_v11 }
 0x687   : > { %v1029_v21 = vpop.xlane.xlu1 %1028 }
 0x688   : > { %v1030_v22 = vsub.f32 %v1026_v7, %v1029_v21 }
 0x68a   : > { %v1031_v23 = vmul.f32 1.442695, %v1030_v22 }
 0x68c   : > { %1404 = vpow2.f32 %v1031_v23 }
 0x692   : > { %v1405_v24 = vpop.eup %1404 }
 0x693   : > { %v1033_v25 = vsel %vm418_vm2, %v1405_v24, 0.0 }
 0x694   : > { %1034 = vadd.xlane.f32.xlu2 %v1033_v25 }
 0x6e8   : > { %v949_v30 = vpop.xlane.xlu0 %948 }
 0x6e9   : > { %1406 = vrcp.f32 %v949_v30 }
 0x6ef   : > { %v1407_v31 = vpop.eup %1406 }
 0x6f0   : > { %v951_v32 = vmul.f32 %v1407_v31, %v949_v30 }
 0x6f2   : > { %v952_v33 = vsub.f32 2.0, %v951_v32 }
 0x6f4   : > { %v953_v34 = vmul.f32 %v1407_v31, %v952_v33 }
 0x6f6   : > { %v954_v35 = vmul.f32 %v1403_v16, %v953_v34 }
 0x6f8   : > { %v955_v36 = vpack.c.bf16 %v954_v35, %v954_v35 }
 0x6fa   : > { %1312 = vmatmul.msk.bf16.vlgmr.msra.gmra.mxu3 %vm418_vm2, %v955_v36 }
 0x707   : > { %v1035_v37 = vpop.xlane.xlu2 %1034 }
 0x708   : > { %1408 = vrcp.f32 %v1035_v37 }
 0x70e   : > { %v1409_v38 = vpop.eup %1408 }
 0x70f   : > { %v1037_v39 = vmul.f32 %v1409_v38, %v1035_v37 }
 0x711   : > { %v1038_v40 = vsub.f32 2.0, %v1037_v39 }
 0x713   : > { %v1039_v41 = vmul.f32 %v1409_v38, %v1038_v40 }
 0x715   : > { %v1040_v42 = vmul.f32 %v1405_v24, %v1039_v41 }
 0x717   : > { %v1041_v43 = vpack.c.bf16 %v1040_v42, %v1040_v42 }
 0x719   : > { %1319 = vmatmul.msk.bf16.vlgmr.msrb.gmra.mxu1 %vm418_vm2, %v1041_v43 }
 0x77d   : > { %v998_v44 = vpop.f32.mrf.mxu3 }
 0x77e   : > { %v1002_v46 = vadd.f32 %v998_v44, %v916_v3 }
 0x785   : > { %v1000_v45 = vpop.f32.mrf.mxu3 }
 0x796   : > { %v1084_v58 = vpop.f32.mrf.mxu1 }
 0x797   : > { %v1088_v49 = vadd.f32 %v1084_v58, %v1002_v46 }
 0x799   : > { %v1093_v62 = vadd.f32 %v1375_v48, %v1088_v49 }
 0x79b   : > { %v1094_v50 = vadd.f32 %v1093_v62, %v1524_v47  ;;  %v1376_v47 = vld [vmem:[%s1688_s4] ss:$0 sm:$0xff] }
 0x79d   : > { %1097 = vadd.xlane.f32.xlu1 %v1094_v50 }
 0x79e   : > { %v1086_v51 = vpop.f32.mrf.mxu1 }
 0x810   : > { %v1098_v52 = vpop.xlane.xlu1 %1097 }
 0x811   : > { %v1099_v53 = vmul.f32 0.0078125, %v1098_v52 }
 0x813   : > { %v1100_v54 = vsub.f32 %v1094_v50, %v1099_v53 }
 0x815   : > { %v1101_v55 = vmul.f32 %v1100_v54, %v1100_v54 }
 0x817   : > { %1102 = vadd.xlane.f32.xlu0 %v1101_v55 }
 0x88a   : > { %v1103_v56 = vpop.xlane.xlu0 %1102 }
 0x88b   : > { %v1104_v59 = vmul.f32 0.0078125, %v1103_v56 }
 0x88d   : > { %v1105_v60 = vadd.f32 1e-05, %v1104_v59 }
 0x88f   : > { %1410 = vrsqrt.f32 %v1105_v60  ;;  %vm1112_vm5 = vweird.f32 %v1105_v60 }
 0x895   : > { %v1411_v57 = vpop.eup %1410 }
 0x896   : > { %v1107_v61 = vmul.f32 %v1411_v57, %v1105_v60  ;;  %vm1113_vm4 = vweird.f32 %v1411_v57 }
 0x897   : > { %vm1114_vm6 = vmor %vm1112_vm5, %vm1113_vm4 }
 0x898   : > { %v1108_v63 = vmul.f32 %v1411_v57, %v1107_v61 }
 0x89a   : > { %v1109_v0 = vmul.f32 0.5, %v1108_v63 }
 0x89c   : > { %v1110_v1 = vsub.f32 1.5, %v1109_v0 }
 0x89e   : > { %v1111_v2 = vmul.f32 %v1411_v57, %v1110_v1 }
 0x8a0   : > { %v1115_v3 = vsel %vm1114_vm6, %v1411_v57, %v1111_v2 }
 0x8a1   : > { %v1116_v5 = vmul.f32 %v1115_v3, %v1100_v54 }
 0x8a3   : > { %v1120_v6 = vmul.f32 %v1376_v47, %v1116_v5 }
 0x8a5   : > { %v1124_v7 = vadd.f32 %v1377_v4, %v1120_v6 }
 0x8a7   : > { %1125 = vst [vmem:[%s263_s20] sm:$0xff] %v1124_v7 }
 0x8a8 PF: > { %s17_s21 = sadd.s32 1, %s1452_s21  }
 0x8a9   : > { %p14_p7 = scmp.ge.s32.totalorder %s17_s21, 4  }
 0x8ab   :  { %16 = sbr.rel (!%p14_p7) target bundleno = 1 (0x1), region = 79 }
 0x8b0   :  { %1145 = vsyncpa [#allocation3], 1 }
 0x8b1   :  { %1147 = vsyncpa [#allocation3 + $0x1], 1 }

// kernel: transformer_fwd.16
= control target key start
LH: loop header
LB: loop body
LE: loop exit
PB: predicated region body
PF: predicated region fallthrough
CT: control target
= control target key end

     0   :  { %14 = vsyncpa [#allocation3], 0  ;;  %s2020_s0 = inlined_call_operand.vmem [shape: f32[2,8,128], index: 0, kind: input, shape index: {}]   ;;  %s2021_s1 = inlined_call_operand.vmem [shape: f32[2,8,128], index: 1, kind: input, shape index: {}]   ;;  %s2022_s2 = inlined_call_operand.vmem [shape: s32[2,1,8], index: 2, kind: input, shape index: {}]   ;;  %s2023_s3 = inlined_call_operand.hbm [shape: bf16[128,128], index: 3, kind: input, shape index: {}]   ;;  %s2024_s4 = inlined_call_operand.hbm [shape: bf16[128,128], index: 4, kind: input, shape index: {}]   ;;  %s2025_s5 = inlined_call_operand.hbm [shape: bf16[128,128], index: 5, kind: input, shape index: {}]   ;;  %s2026_s6 = inlined_call_operand.vmem [shape: f32[1,128], index: 6, kind: input, shape index: {}]   ;;  %s2027_s7 = inlined_call_operand.vmem [shape: f32[1,128], index: 7, kind: input, shape index: {}]   ;;  %s2028_s8 = inlined_call_operand.vmem [shape: f32[1,128], index: 8, kind: input, shape index: {}]   ;;  %s2029_s9 = inlined_call_operand.vmem [shape: f32[2,8,128], index: 9, kind: output, shape index: {}]  }
   0x1   :  { %15 = vsyncpa [#allocation5], 0  ;;  %s1828_s30 = smov 0  }
   0x2 LB: > { %s1834_s10 = sadd.s32 4294967295, %s1763_s30   ;;  %p1414_p0 = scmp.ge.s32.totalorder %s1763_s30, 1  ;;  %s1763_s30 = sphi %s1828_s30, %s21_s30  }
   0x3   : > { %p256_p1 = scmp.lt.s32.totalorder %s1763_s30, 3  ;;  %p1595_p2 = scmp.eq.s32.totalorder %s1834_s10, 0 }
   0x4   : > { %s281_s13 = sshll.u32 %s2024_s4, 4  ;;  %s267_s17 = sshll.u32 %s2023_s3, 4  ;;  %s282_s13 = int_to_ptr.hbm [resolvable:$true] %s281_s13  ;;  %s268_s17 = int_to_ptr.hbm [resolvable:$true] %s267_s17 }
   0x5   : > { %p1842_p3 = pnand %p1414_p0, %p256_p1  ;;  %s1765_s18 = smov [#allocation4]  }
   0x6   : > { %s283_s19 = sshll.u32 %s1765_s18, 4  ;;  %s1766_s20 = smov [#allocation2]   ;;  %s284_s19 = int_to_ptr.vmem [resolvable:$true] %s283_s19 }
   0x7   : > { %p1585_p4 = pneg %p1842_p3  ;;  %s269_s21 = sshll.u32 %s1766_s20, 4  ;;  %s270_s21 = int_to_ptr.vmem [resolvable:$true] %s269_s21 }
   0x8   : > { %s295_s24 = sshll.u32 %s2025_s5, 4  ;;  %s1767_s25 = smov 64   ;;  %s296_s24 = int_to_ptr.hbm [resolvable:$true] %s295_s24 }
   0x9   : > { %p1586_p5 = pnand %p1595_p2, %p1585_p4  ;;  %s1768_s26 = smov 4  }
   0xa   : > { %s1769_s27 = smov [#allocation6]   ;;  %342 = sbr.rel (%p1842_p3) target bundleno = 2220 (0x8ac), region = 56 }
   0xb   : > { %1591 = dma.hbm_to_vmem [thread:$0]  (!%p1586_p5), %s282_s13, 1024, %s284_s19, [#allocation5], %s1767_s25, %s1767_s25, %s1768_s26  }
   0xc   : > { %1588 = dma.hbm_to_vmem [thread:$0]  (!%p1586_p5), %s268_s17, 1024, %s270_s21, [#allocation3], %s1767_s25, %s1767_s25, %s1768_s26  }
   0xd   : > { %s297_s28 = sshll.u32 %s1769_s27, 4  ;;  %s298_s28 = int_to_ptr.vmem [resolvable:$true] %s297_s28 }
   0xe   : > { %1594 = dma.hbm_to_vmem [thread:$0]  (!%p1586_p5), %s296_s24, 1024, %s298_s28, [#allocation5], %s1767_s25, %s1767_s25, %s1768_s26  }
   0xf   : > { %1754 = dma.done.wait (%p1595_p2), [#allocation3], 1024  }
  0x10   : > { %1756 = vsyncadd (%p1595_p2), [#allocation3], 4294966272 }
  0x11   : > { %1758 = dma.done.wait (%p1595_p2), [#allocation5], 2048  }
  0x12   : > { %1760 = vsyncadd (%p1595_p2), [#allocation5], 4294965248  ;;  %v1556_v0 = vld [vmem:[#allocation2 + $0x38] sm:$0xff]  ;;  %v1555_v2 = vld [vmem:[#allocation2 + $0x30] sm:$0xff]  ;;  %p394_p6 = scmp.lt.s32.totalorder %s1834_s10, 1  ;;  %vm578_vm0 = vcmask 130048  }
  0x13   : > { %v1564_v1 = vld [vmem:[#allocation4 + $0x38] sm:$0xff]  ;;  %478 = vmatpush.bf16.msra.mxu0 %v1556_v0  ;;  %v1563_v3 = vld [vmem:[#allocation4 + $0x30] sm:$0xff]  ;;  %v1554_v4 = vld [vmem:[#allocation2 + $0x28] sm:$0xff]  ;;  %s1770_s17 = smov 112   ;;  %s1771_s18 = smov 96   ;;  %v1773_v41 = vmov 0.0  }
  0x14   : > { %555 = vmatpush.bf16.msra.mxu1 %v1564_v1  ;;  %v1562_v5 = vld [vmem:[#allocation4 + $0x28] sm:$0xff]  ;;  %v1553_v6 = vld [vmem:[#allocation2 + $0x20] sm:$0xff]  ;;  %v1552_v8 = vld [vmem:[#allocation2 + $0x18] sm:$0xff]  ;;  %s2032_s10 = smov (!%p394_p6, %s1834_s10), 1  ;;  %s1772_s19 = smov 80   ;;  %vm599_vm2 = vcmask 64512  }
  0x15   : > { %v1561_v7 = vld [vmem:[#allocation4 + $0x20] sm:$0xff]  ;;  %v1560_v9 = vld [vmem:[#allocation4 + $0x18] sm:$0xff]  ;;  %v1551_v10 = vld [vmem:[#allocation2 + $0x10] sm:$0xff]  ;;  %s1871_s29 = sshll.u32 %s2032_s10, 3  ;;  %s404_s22 = scalar_lea.vmem %s2022_s2, %s2032_s10  ;;  %vm718_vm3 = vcmask 1043456  }
  0x16   : > { %v1559_v11 = vld [vmem:[#allocation4 + $0x10] sm:$0xff]  ;;  %v1550_v12 = vld [vmem:[#allocation2 + $0x8] sm:$0xff]  ;;  %s397_s13 = scalar_lea.vmem %s2020_s0, %s1871_s29  ;;  %s401_s16 = scalar_lea.vmem %s2021_s1, %s1871_s29  ;;  %v1549_v14 = vld [vmem:[#allocation2] sm:$0xff] }
  0x17   : > { %479 = vmatpush.bf16.msra.mxu0 %v1555_v2  ;;  %v1558_v13 = vld [vmem:[#allocation4 + $0x8] sm:$0xff]  ;;  %v1557_v15 = vld [vmem:[#allocation4] sm:$0xff]  ;;  %s1774_s10 = smov 64   ;;  %s1775_s23 = smov 48  }
  0x18   : > { %556 = vmatpush.bf16.msra.mxu1 %v1563_v3  ;;  %v1881_v16 = vld [vmem:[%s397_s13] sm:$0xff]  ;;  %v1566_v62 = vld [vmem:[#allocation6 + $0x8] sm:$0xff]  ;;  %s1776_s24 = smov 16   ;;  %s1777_s25 = smov 32  }
  0x19   : > { %v412_v17 = vld [vmem:[%s401_s16] sm:$0xff]  ;;  %v411_v18 = vpack.c.bf16 %v1881_v16, %v1881_v16  ;;  %s408_s16 = scalar_lea.vmem %s2029_s9, %s1871_s29 }
  0x1a   : > { %v413_v19 = vpack.c.bf16 %v412_v17, %v412_v17  ;;  %v1565_v33 = vld [vmem:[#allocation6] sm:$0xff] }
  0x1b   : > { %480 = vmatpush.bf16.msra.mxu0 %v1554_v4  ;;  %633 = vmatpush.bf16.msra.mxu3 %v1565_v33  ;;  %v568_v39 = vld [vmem:[%s404_s22] sm:$0x1] }
  0x1c   : > { %557 = vmatpush.bf16.msra.mxu1 %v1562_v5  ;;  %v688_v29 = vunpack.c.l.b16 %v413_v19  ;;  %vm569_vm1 = vcmp.eq.s32.totalorder %v568_v39, 0 }
  0x1d   : > { %v1490_v42 = vsel %vm569_vm1, 1.0, %v1773_v41 }
  0x1e   : > { %v1892_v32 = vpack.c.b16 %v688_v29, %v688_v29  ;;  %1496 = vmatmul.msk.bf16.vlgmr.msra.gmra.mxu3 %vm578_vm0, %v413_v19  ;;  %v572_v43 = vmul.f32 -1e+28, %v1490_v42 }
  0x1f   : > { %481 = vmatpush.bf16.msra.mxu0 %v1553_v6 }
  0x20   : > { %558 = vmatpush.bf16.msra.mxu1 %v1561_v7  ;;  %v1912_v45 = vperm.slane %v572_v43, 0  ;;  %v1567_v7 = vld [vmem:[#allocation6 + $0x10] sm:$0xff] }
  0x23   : > { %482 = vmatpush.bf16.msra.mxu0 %v1552_v8 }
  0x24   : > { %559 = vmatpush.bf16.msra.mxu1 %v1560_v9 }
  0x27   : > { %483 = vmatpush.bf16.msra.mxu0 %v1551_v10 }
  0x28   : > { %560 = vmatpush.bf16.msra.mxu1 %v1559_v11 }
  0x2b   : > { %484 = vmatpush.bf16.msra.mxu0 %v1550_v12 }
  0x2c   : > { %561 = vmatpush.bf16.msra.mxu1 %v1558_v13 }
  0x2f   : > { %485 = vmatpush.bf16.msra.mxu0 %v1549_v14 }
  0x30   : > { %562 = vmatpush.bf16.msra.mxu1 %v1557_v15 }
  0x32   : > { %486 = vmatmul.bf16.vlgmr.msra.gmra.mxu0 %v411_v18 }
  0x33   : > { %563 = vmatmul.bf16.vlgmr.msra.gmra.mxu1 %v413_v19 }
  0x34   : > { %813 = vmatpush.bf16.msrb.mxu1 %v1567_v7 }
  0xa1   : > { %v635_v51 = vpop.f32.mrf.mxu3 }
  0xa2   : > { %v639_v53 = vpack.c.bf16 %v635_v51, %v635_v51 }
  0xa4   : > { %v739_v58 = vsel %vm718_vm3, %v639_v53, 0 }
  0xa9   : > { %v637_v52 = vpop.f32.mrf.mxu3 }
  0xaf   : > { %v487_v20 = vpop.f32.mrf.mxu0 }
  0xb0   : > { %v564_v21 = vpop.f32.mrf.mxu1  ;;  %v573_v22 = vpack.c.bf16 %v487_v20, %v487_v20 }
  0xb1   : > { %v574_v23 = vpack.c.bf16 %v564_v21, %v564_v21 }
  0xb2   : > { %v641_v24 = vunpack.c.l.b16 %v573_v22 }
  0xb3   : > { %v646_v25 = vunpack.c.l.b16 %v574_v23  ;;  %v583_v26 = vsel %vm578_vm0, %v574_v23, 0 }
  0xb4   : > { %592 = vmatpush.bf16.xpose.msra.mxu2 %v583_v26  ;;  %v1886_v27 = vpack.c.b16 %v641_v24, %v641_v24 }
  0xb5   : > { %v1888_v28 = vpack.c.b16 %v646_v25, %v646_v25 }
  0xb6   : > { %643 = vrot.lane.b32.xlu2 %v1886_v27, %s1770_s17 }
  0xb7   : > { %648 = vrot.lane.b32.xlu1 %v1888_v28, %s1770_s17  ;;  %v489_v30 = vpop.f32.mrf.mxu0 }
  0xb8   : > { %v566_v31 = vpop.f32.mrf.mxu1 }
  0xbb   : > { %1491 = vmatmul.msk.bf16.vlgmr.msra.gmra.mxu2 %vm578_vm0, %v573_v22 }
  0xbc   : > { %708 = vmatpush.bf16.msrb.mxu2 %v1566_v62 }
  0xbe   : > { %756 = vrot.lane.b32.xlu2 %v1888_v28, %s1771_s18 }
  0xbf   : > { %690 = vrot.lane.b32.xlu1 %v1892_v32, %s1770_s17 }
  0xc0   : > { %748 = vmatpush.bf16.msra.mxu2 %v739_v58 }
  0xc6   : > { %840 = vrot.lane.b32.xlu2 %v1886_v27, %s1772_s19 }
  0xc7   : > { %754 = vrot.lane.b32.xlu1 %v1886_v27, %s1771_s18 }
  0xce   : > { %881 = vrot.lane.b32.xlu2 %v1892_v32, %s1772_s19 }
  0xcf   : > { %795 = vrot.lane.b32.xlu1 %v1892_v32, %s1771_s18 }
 0x110   : > { %v644_v34 = vpop.permute.xlu2 %643 }
 0x118   : > { %v757_v35 = vpop.permute.xlu2 %756 }
 0x119   : > { %v762_v36 = vsel %vm578_vm0, %v757_v35, 0 }
 0x11a   : > { %771 = vmatpush.bf16.xpose.msrb.mxu0 %v762_v36 }
 0x120   : > { %v841_v9 = vpop.permute.xlu2 %840 }
 0x128   : > { %v1926_v10 = vpop.permute.xlu2 %881 }
 0x129   : > { %v649_v37 = vpop.permute.xlu1 %648 }
 0x12a   : > { %v654_v38 = vsel %vm578_vm0, %v649_v37, 0 }
 0x12b   : > { %663 = vmatpush.bf16.xpose.msrb.mxu3 %v654_v38 }
 0x131   : > { %v691_v40 = vpop.permute.xlu1 %690 }
 0x132   : > { %1497 = vmatmul.msk.bf16.vlgmr.msrb.gmra.mxu3 %vm578_vm0, %v644_v34  ;;  %1502 = vmatmul.msk.bf16.vlgmr.msrb.gmra.mxu2 %vm578_vm0, %v691_v40 }
 0x139   : > { %v755_v44 = vpop.permute.xlu1 %754 }
 0x13a   : > { %1505 = vmatmul.msk.bf16.vlgmr.msrb.gmra.mxu0 %vm578_vm0, %v755_v44 }
 0x13e   : > { %v594_v46 = vpop.f32.mrf.mxu2 }
 0x13f   : > { %v595_v47 = vadd.f32 %v594_v46, %v1912_v45 }
 0x141   : > { %v598_v48 = vmul.f32 0.088388346, %v595_v47  ;;  %v796_v8 = vpop.permute.xlu1 %795 }
 0x142   : > { %1510 = vmatmul.msk.bf16.vlgmr.msrb.gmra.mxu1 %vm578_vm0, %v796_v8 }
 0x143   : > { %v600_v49 = vsel %vm599_vm2, %v598_v48, -inf }
 0x144   : > { %601 = vmax.xlane.f32.xlu0 %v600_v49 }
 0x146   : > { %v596_v50 = vpop.f32.mrf.mxu2 }
 0x1b5   : > { %v665_v54 = vpop.f32.mrf.mxu3  ;;  %v710_v34 = vpop.f32.mrf.mxu2 }
 0x1b6   : > { %v666_v55 = vadd.f32 %v665_v54, %v1912_v45  ;;  %v714_v35 = vpack.c.bf16 %v710_v34, %v710_v34 }
 0x1b7   : > { %v602_v56 = vpop.xlane.xlu0 %601  ;;  %v773_v57 = vpop.f32.mrf.mxu0 }
 0x1b8   : > { %v669_v59 = vmul.f32 0.088388346, %v666_v55  ;;  %v603_v60 = vsub.f32 %v598_v48, %v602_v56  ;;  %v774_v61 = vadd.f32 %v773_v57, %v1912_v45  ;;  %v720_v36 = vsel %vm718_vm3, %v714_v35, 0  ;;  %v1568_v56 = vld [vmem:[#allocation6 + $0x18] sm:$0xff] }
 0x1b9   : > { %729 = vmatpush.bf16.msra.mxu3 %v720_v36  ;;  %899 = vmatpush.bf16.msra.mxu0 %v1568_v56 }
 0x1ba   : > { %v604_v63 = vmul.f32 1.442695, %v603_v60  ;;  %v777_v0 = vmul.f32 0.088388346, %v774_v61  ;;  %v670_v1 = vsel %vm599_vm2, %v669_v59, -inf }
 0x1bb   : > { %671 = vmax.xlane.f32.xlu1 %v670_v1 }
 0x1bc   : > { %1625 = vpow2.f32 %v604_v63  ;;  %v778_v2 = vsel %vm599_vm2, %v777_v0, -inf  ;;  %1517 = vmatmul.msk.bf16.vlgmr.msra.gmra.mxu0 %vm578_vm0, %v1926_v10 }
 0x1bd   : > { %v667_v3 = vpop.f32.mrf.mxu3  ;;  %779 = vmax.xlane.f32.xlu2 %v778_v2  ;;  %v712_v39 = vpop.f32.mrf.mxu2 }
 0x1bf   : > { %v775_v4 = vpop.f32.mrf.mxu0  ;;  %v815_v37 = vpop.f32.mrf.mxu1 }
 0x1c0   : > { %v819_v38 = vpack.c.bf16 %v815_v37, %v815_v37 }
 0x1c2   : > { %v1626_v5 = vpop.eup %1625  ;;  %v824_v40 = vsel %vm718_vm3, %v819_v38, 0 }
 0x1c3   : > { %v606_v6 = vsel %vm599_vm2, %v1626_v5, 0.0  ;;  %833 = vmatpush.bf16.msrb.mxu3 %v824_v40 }
 0x1c4   : > { %607 = vadd.xlane.f32.xlu0 %v606_v6 }
 0x1c7   : > { %v817_v41 = vpop.f32.mrf.mxu1 }
 0x1d8   : > { %842 = vrot.lane.b32.xlu0 %v1888_v28, %s1772_s19 }
 0x22e   : > { %v672_v11 = vpop.xlane.xlu1 %671 }
 0x22f   : > { %v673_v12 = vsub.f32 %v669_v59, %v672_v11 }
 0x230   : > { %v780_v13 = vpop.xlane.xlu2 %779 }
 0x231   : > { %v674_v14 = vmul.f32 1.442695, %v673_v12  ;;  %v781_v15 = vsub.f32 %v777_v0, %v780_v13 }
 0x233   : > { %1627 = vpow2.f32 %v674_v14  ;;  %v782_v17 = vmul.f32 1.442695, %v781_v15 }
 0x235   : > { %1629 = vpow2.f32 %v782_v17 }
 0x237   : > { %v608_v18 = vpop.xlane.xlu0 %607 }
 0x238   : > { %1631 = vrcp.f32 %v608_v18 }
 0x239   : > { %v1628_v19 = vpop.eup %1627  ;;  %v901_v13 = vpop.f32.mrf.mxu0 }
 0x23a   : > { %v676_v20 = vsel %vm599_vm2, %v1628_v19, 0.0  ;;  %v905_v14 = vpack.c.bf16 %v901_v13, %v901_v13 }
 0x23b   : > { %v1630_v21 = vpop.eup %1629  ;;  %677 = vadd.xlane.f32.xlu2 %v676_v20 }
 0x23c   : > { %v784_v22 = vsel %vm599_vm2, %v1630_v21, 0.0 }
 0x23d   : > { %785 = vadd.xlane.f32.xlu1 %v784_v22 }
 0x23e   : > { %v1632_v23 = vpop.eup %1631 }
 0x23f   : > { %v610_v24 = vmul.f32 %v1632_v23, %v608_v18  ;;  %v910_v18 = vsel %vm718_vm3, %v905_v14, 0 }
 0x240   : > { %919 = vmatpush.bf16.msra.mxu1 %v910_v18 }
 0x241   : > { %v611_v25 = vsub.f32 2.0, %v610_v24  ;;  %v903_v22 = vpop.f32.mrf.mxu0 }
 0x243   : > { %v612_v26 = vmul.f32 %v1632_v23, %v611_v25  ;;  %v1570_v25 = vld [vmem:[#allocation6 + $0x28] sm:$0xff] }
 0x245   : > { %v613_v29 = vmul.f32 %v1626_v5, %v612_v26  ;;  %v1569_v26 = vld [vmem:[#allocation6 + $0x20] sm:$0xff] }
 0x247   : > { %v614_v30 = vpack.c.bf16 %v613_v29, %v613_v29 }
 0x249   : > { %1504 = vmatmul.msk.bf16.vlgmr.msra.gmra.mxu2 %vm599_vm2, %v614_v30 }
 0x24a   : > { %v843_v31 = vpop.permute.xlu0 %842 }
 0x24b   : > { %v848_v33 = vsel %vm578_vm0, %v843_v31, 0 }
 0x24c   : > { %857 = vmatpush.bf16.xpose.msrb.mxu2 %v848_v33 }
 0x253   : > { %928 = vrot.lane.b32.xlu2 %v1888_v28, %s1774_s10 }
 0x254   : > { %985 = vmatpush.bf16.msra.mxu2 %v1569_v26 }
 0x256   : > { %926 = vrot.lane.b32.xlu1 %v1886_v27, %s1774_s10 }
 0x259   : > { %1512 = vmatmul.msk.bf16.vlgmr.msrb.gmra.mxu2 %vm578_vm0, %v841_v9 }
 0x25b   : > { %1012 = vrot.lane.b32.xlu2 %v1886_v27, %s1775_s23 }
 0x25e   : > { %1053 = vrot.lane.b32.xlu1 %v1892_v32, %s1775_s23 }
 0x2ae   : > { %v678_v42 = vpop.xlane.xlu2 %677 }
 0x2af   : > { %1633 = vrcp.f32 %v678_v42 }
 0x2b0   : > { %v786_v43 = vpop.xlane.xlu1 %785 }
 0x2b1   : > { %1635 = vrcp.f32 %v786_v43 }
 0x2b5   : > { %v1634_v44 = vpop.eup %1633 }
 0x2b6   : > { %v680_v46 = vmul.f32 %v1634_v44, %v678_v42  ;;  %v929_v51 = vpop.permute.xlu2 %928 }
 0x2b7   : > { %v1636_v49 = vpop.eup %1635  ;;  %v934_v54 = vsel %vm578_vm0, %v929_v51, 0 }
 0x2b8   : > { %v681_v47 = vsub.f32 2.0, %v680_v46  ;;  %v788_v53 = vmul.f32 %v1636_v49, %v786_v43 }
 0x2ba   : > { %v682_v48 = vmul.f32 %v1634_v44, %v681_v47  ;;  %v789_v55 = vsub.f32 2.0, %v788_v53 }
 0x2bc   : > { %v683_v50 = vmul.f32 %v1628_v19, %v682_v48  ;;  %v790_v57 = vmul.f32 %v1636_v49, %v789_v55 }
 0x2be   : > { %v684_v52 = vpack.c.bf16 %v683_v50, %v683_v50  ;;  %v791_v58 = vmul.f32 %v1630_v21, %v790_v57  ;;  %v1013_v30 = vpop.permute.xlu2 %1012 }
 0x2c0   : > { %1503 = vmatmul.msk.bf16.vlgmr.msra.gmra.mxu3 %vm599_vm2, %v684_v52  ;;  %v792_v60 = vpack.c.bf16 %v791_v58, %v791_v58 }
 0x2c1   : > { %943 = vmatpush.bf16.xpose.msra.mxu3 %v934_v54 }
 0x2c8   : > { %v927_v0 = vpop.permute.xlu1 %926 }
 0x2cc   : > { %v750_v59 = vpop.f32.mrf.mxu2 }
 0x2d0   : > { %1511 = vmatmul.msk.bf16.vlgmr.msrb.gmra.mxu3 %vm599_vm2, %v792_v60  ;;  %v1054_v29 = vpop.permute.xlu1 %1053 }
 0x2d1   : > { %1071 = vmatpush.bf16.msrb.mxu3 %v1570_v25 }
 0x2d4   : > { %v752_v61 = vpop.f32.mrf.mxu2 }
 0x2dc   : > { %v859_v62 = vpop.f32.mrf.mxu2 }
 0x2dd   : > { %v860_v63 = vadd.f32 %v859_v62, %v1912_v45 }
 0x2df   : > { %v863_v1 = vmul.f32 0.088388346, %v860_v63 }
 0x2e0   : > { %1519 = vmatmul.msk.bf16.vlgmr.msra.gmra.mxu3 %vm578_vm0, %v927_v0 }
 0x2e1   : > { %v864_v2 = vsel %vm599_vm2, %v863_v1, -inf }
 0x2e2   : > { %865 = vmax.xlane.f32.xlu0 %v864_v2 }
 0x2e4   : > { %v861_v3 = vpop.f32.mrf.mxu2 }
 0x2f0   : > { %1531 = vmatmul.msk.bf16.vlgmr.msrb.gmra.mxu3 %vm578_vm0, %v1054_v29 }
 0x343   : > { %v731_v4 = vpop.f32.mrf.mxu3 }
 0x344   : > { %v751_v6 = vadd.f32 %v750_v59, %v731_v4 }
 0x34b   : > { %v733_v5 = vpop.f32.mrf.mxu3 }
 0x353   : > { %v835_v7 = vpop.f32.mrf.mxu3 }
 0x354   : > { %v1951_v8 = vadd.f32 %v835_v7, %v751_v6 }
 0x355   : > { %v866_v9 = vpop.xlane.xlu0 %865 }
 0x356   : > { %v867_v10 = vsub.f32 %v863_v1, %v866_v9 }
 0x358   : > { %v868_v11 = vmul.f32 1.442695, %v867_v10 }
 0x35a   : > { %1637 = vpow2.f32 %v868_v11 }
 0x35b   : > { %v837_v12 = vpop.f32.mrf.mxu3 }
 0x360   : > { %v1638_v15 = vpop.eup %1637 }
 0x361   : > { %v870_v17 = vsel %vm599_vm2, %v1638_v15, 0.0 }
 0x362   : > { %871 = vadd.xlane.f32.xlu0 %v870_v17 }
 0x363   : > { %v945_v19 = vpop.f32.mrf.mxu3 }
 0x364   : > { %v946_v20 = vadd.f32 %v945_v19, %v1912_v45 }
 0x366   : > { %v949_v21 = vmul.f32 0.088388346, %v946_v20 }
 0x368   : > { %v950_v23 = vsel %vm599_vm2, %v949_v21, -inf }
 0x369   : > { %951 = vmax.xlane.f32.xlu2 %v950_v23 }
 0x36b   : > { %v947_v24 = vpop.f32.mrf.mxu3 }
 0x373   : > { %v1073_v48 = vpop.f32.mrf.mxu3 }
 0x374   : > { %v1077_v49 = vpack.c.bf16 %v1073_v48, %v1073_v48 }
 0x376   : > { %1014 = vrot.lane.b32.xlu0 %v1888_v28, %s1775_s23  ;;  %v1082_v50 = vsel %vm718_vm3, %v1077_v49, 0 }
 0x377   : > { %1091 = vmatpush.bf16.msrb.mxu2 %v1082_v50 }
 0x37b   : > { %v1075_v51 = vpop.f32.mrf.mxu3 }
 0x37e   : > { %967 = vrot.lane.b32.xlu0 %v1892_v32, %s1774_s10 }
 0x3d5   : > { %v872_v31 = vpop.xlane.xlu0 %871 }
 0x3d6   : > { %1639 = vrcp.f32 %v872_v31 }
 0x3dc   : > { %v1640_v33 = vpop.eup %1639  ;;  %v952_v34 = vpop.xlane.xlu2 %951 }
 0x3dd   : > { %v874_v35 = vmul.f32 %v1640_v33, %v872_v31  ;;  %v953_v36 = vsub.f32 %v949_v21, %v952_v34 }
 0x3df   : > { %v875_v37 = vsub.f32 2.0, %v874_v35  ;;  %v954_v38 = vmul.f32 1.442695, %v953_v36 }
 0x3e1   : > { %v876_v39 = vmul.f32 %v1640_v33, %v875_v37  ;;  %1641 = vpow2.f32 %v954_v38  ;;  %v1571_v33 = vld [vmem:[#allocation6 + $0x30] sm:$0xff] }
 0x3e3   : > { %v877_v40 = vmul.f32 %v1638_v15, %v876_v39 }
 0x3e5   : > { %v878_v41 = vpack.c.bf16 %v877_v40, %v877_v40 }
 0x3e7   : > { %v1642_v42 = vpop.eup %1641  ;;  %1518 = vmatmul.msk.bf16.vlgmr.msra.gmra.mxu1 %vm599_vm2, %v878_v41 }
 0x3e8   : > { %v1015_v43 = vpop.permute.xlu0 %1014  ;;  %v956_v44 = vsel %vm599_vm2, %v1642_v42, 0.0 }
 0x3e9   : > { %v1020_v46 = vsel %vm578_vm0, %v1015_v43, 0  ;;  %957 = vadd.xlane.f32.xlu1 %v956_v44  ;;  %v1572_v44 = vld [vmem:[#allocation6 + $0x38] sm:$0xff] }
 0x3ea   : > { %1029 = vmatpush.bf16.xpose.msrb.mxu1 %v1020_v46 }
 0x3f0   : > { %v968_v47 = vpop.permute.xlu0 %967 }
 0x3f1   : > { %1524 = vmatmul.msk.bf16.vlgmr.msra.gmra.mxu2 %vm578_vm0, %v968_v47 }
 0x3f2   : > { %1157 = vmatpush.bf16.msra.mxu1 %v1571_v33 }
 0x3f7   : > { %1526 = vmatmul.msk.bf16.vlgmr.msrb.gmra.mxu1 %vm578_vm0, %v1013_v30 }
 0x402   : > { %1186 = vrot.lane.b32.xlu1 %v1888_v28, %s1776_s24 }
 0x40a   : > { %1139 = vrot.lane.b32.xlu1 %v1892_v32, %s1777_s25 }
 0x45c   : > { %v958_v52 = vpop.xlane.xlu1 %957 }
 0x45d   : > { %1643 = vrcp.f32 %v958_v52 }
 0x463   : > { %v1644_v55 = vpop.eup %1643 }
 0x464   : > { %v921_v53 = vpop.f32.mrf.mxu1  ;;  %v960_v56 = vmul.f32 %v1644_v55, %v958_v52 }
 0x465   : > { %v925_v54 = vadd.f32 %v921_v53, %v1951_v8 }
 0x466   : > { %v961_v58 = vsub.f32 2.0, %v960_v56 }
 0x468   : > { %v962_v59 = vmul.f32 %v1644_v55, %v961_v58 }
 0x46a   : > { %v963_v62 = vmul.f32 %v1642_v42, %v962_v59 }
 0x46c   : > { %v923_v57 = vpop.f32.mrf.mxu1  ;;  %v964_v5 = vpack.c.bf16 %v963_v62, %v963_v62 }
 0x474   : > { %v987_v60 = vpop.f32.mrf.mxu2  ;;  %v1031_v61 = vpop.f32.mrf.mxu1 }
 0x475   : > { %v991_v63 = vpack.c.bf16 %v987_v60, %v987_v60  ;;  %v1032_v0 = vadd.f32 %v1031_v61, %v1912_v45  ;;  %v1187_v1 = vpop.permute.xlu1 %1186 }
 0x476   : > { %v1192_v2 = vsel %vm578_vm0, %v1187_v1, 0 }
 0x477   : > { %v996_v3 = vsel %vm718_vm3, %v991_v63, 0  ;;  %v1035_v4 = vmul.f32 0.088388346, %v1032_v0  ;;  %1201 = vmatpush.bf16.xpose.msra.mxu2 %v1192_v2 }
 0x478   : > { %1005 = vmatpush.bf16.msrb.mxu0 %v996_v3 }
 0x479   : > { %v1036_v6 = vsel %vm599_vm2, %v1035_v4, -inf }
 0x47a   : > { %1037 = vmax.xlane.f32.xlu0 %v1036_v6 }
 0x47b   : > { %1525 = vmatmul.msk.bf16.vlgmr.msrb.gmra.mxu0 %vm599_vm2, %v964_v5 }
 0x47c   : > { %v1033_v7 = vpop.f32.mrf.mxu1  ;;  %v989_v8 = vpop.f32.mrf.mxu2 }
 0x47d   : > { %v1140_v35 = vpop.permute.xlu1 %1139 }
 0x47e   : > { %1538 = vmatmul.msk.bf16.vlgmr.msra.gmra.mxu1 %vm578_vm0, %v1140_v35 }
 0x48e   : > { %1100 = vrot.lane.b32.xlu0 %v1888_v28, %s1777_s25 }
 0x496   : > { %1184 = vrot.lane.b32.xlu0 %v1886_v27, %s1776_s24 }
 0x49e   : > { %1225 = vrot.lane.b32.xlu0 %v1892_v32, %s1776_s24 }
 0x4ed   : > { %v1038_v9 = vpop.xlane.xlu0 %1037 }
 0x4ee   : > { %v1039_v10 = vsub.f32 %v1035_v4, %v1038_v9 }
 0x4f0   : > { %v1040_v11 = vmul.f32 1.442695, %v1039_v10 }
 0x4f2   : > { %1645 = vpow2.f32 %v1040_v11 }
 0x4f8   : > { %v1646_v12 = vpop.eup %1645  ;;  %v1007_v13 = vpop.f32.mrf.mxu0 }
 0x4f9   : > { %v1011_v14 = vadd.f32 %v1007_v13, %v925_v54  ;;  %v1042_v15 = vsel %vm599_vm2, %v1646_v12, 0.0 }
 0x4fa   : > { %1043 = vadd.xlane.f32.xlu2 %v1042_v15 }
 0x4fb   : > { %v1159_v52 = vpop.f32.mrf.mxu1 }
 0x500   : > { %v1101_v17 = vpop.permute.xlu0 %1100  ;;  %v1009_v18 = vpop.f32.mrf.mxu0 }
 0x501   : > { %v1106_v28 = vsel %vm578_vm0, %v1101_v17, 0  ;;  %v1622_v18 = vld [vmem:[%s2026_s6] ss:$0 sm:$0xff] }
 0x502   : > { %1115 = vmatpush.bf16.xpose.msra.mxu0 %v1106_v28 }
 0x503   : > { %v1161_v54 = vpop.f32.mrf.mxu1 }
 0x508   : > { %v1185_v26 = vpop.permute.xlu0 %1184 }
 0x50a   : > { %1243 = vmatpush.bf16.msrb.mxu0 %v1572_v44 }
 0x510   : > { %v1226_v46 = vpop.permute.xlu0 %1225 }
 0x512   : > { %1098 = vrot.lane.b32.xlu2 %v1886_v27, %s1777_s25 }
 0x56d   : > { %v1044_v19 = vpop.xlane.xlu2 %1043 }
 0x56e   : > { %1647 = vrcp.f32 %v1044_v19 }
 0x574   : > { %v1648_v32 = vpop.eup %1647 }
 0x575   : > { %v1046_v20 = vmul.f32 %v1648_v32, %v1044_v19  ;;  %v1099_v21 = vpop.permute.xlu2 %1098 }
 0x576   : > { %1533 = vmatmul.msk.bf16.vlgmr.msra.gmra.mxu0 %vm578_vm0, %v1099_v21 }
 0x577   : > { %v1047_v22 = vsub.f32 2.0, %v1046_v20 }
 0x579   : > { %v1048_v23 = vmul.f32 %v1648_v32, %v1047_v22 }
 0x57b   : > { %v1049_v24 = vmul.f32 %v1646_v12, %v1048_v23 }
 0x57d   : > { %v1050_v25 = vpack.c.bf16 %v1049_v24, %v1049_v24 }
 0x57f   : > { %1532 = vmatmul.msk.bf16.vlgmr.msrb.gmra.mxu2 %vm599_vm2, %v1050_v25 }
 0x586   : > { %1545 = vmatmul.msk.bf16.vlgmr.msrb.gmra.mxu0 %vm578_vm0, %v1226_v46 }
 0x58f   : > { %1540 = vmatmul.msk.bf16.vlgmr.msra.gmra.mxu2 %vm578_vm0, %v1185_v26 }
 0x5f3   : > { %v1117_v29 = vpop.f32.mrf.mxu0 }
 0x5f4   : > { %v1118_v30 = vadd.f32 %v1117_v29, %v1912_v45 }
 0x5f6   : > { %v1121_v27 = vmul.f32 0.088388346, %v1118_v30 }
 0x5f8   : > { %v1122_v31 = vsel %vm599_vm2, %v1121_v27, -inf }
 0x5f9   : > { %1123 = vmax.xlane.f32.xlu2 %v1122_v31 }
 0x5fb   : > { %v1119_v34 = vpop.f32.mrf.mxu0 }
 0x602   : > { %v1093_v36 = vpop.f32.mrf.mxu2 }
 0x603   : > { %v1097_v37 = vadd.f32 %v1093_v36, %v1011_v14  ;;  %v1245_v60 = vpop.f32.mrf.mxu0 }
 0x604   : > { %v1249_v61 = vpack.c.bf16 %v1245_v60, %v1245_v60 }
 0x606   : > { %v1254_v62 = vsel %vm718_vm3, %v1249_v61, 0 }
 0x607   : > { %1263 = vmatpush.bf16.msrb.mxu1 %v1254_v62 }
 0x60a   : > { %v1095_v38 = vpop.f32.mrf.mxu2 }
 0x60b   : > { %v1247_v63 = vpop.f32.mrf.mxu0  ;;  %v1624_v38 = vld [vmem:[%s2028_s8] ss:$0 sm:$0xff] }
 0x612   : > { %v1203_v39 = vpop.f32.mrf.mxu2 }
 0x613   : > { %v1204_v40 = vadd.f32 %v1203_v39, %v1912_v45  ;;  %v1163_v45 = vpack.c.bf16 %v1159_v52, %v1159_v52 }
 0x615   : > { %v1207_v41 = vmul.f32 0.088388346, %v1204_v40  ;;  %v1168_v53 = vsel %vm718_vm3, %v1163_v45, 0 }
 0x616   : > { %1177 = vmatpush.bf16.msra.mxu3 %v1168_v53 }
 0x617   : > { %v1208_v42 = vsel %vm599_vm2, %v1207_v41, -inf }
 0x618   : > { %1209 = vmax.xlane.f32.xlu1 %v1208_v42 }
 0x61a   : > { %v1205_v43 = vpop.f32.mrf.mxu2 }
 0x66c   : > { %v1124_v47 = vpop.xlane.xlu2 %1123 }
 0x66d   : > { %v1125_v48 = vsub.f32 %v1121_v27, %v1124_v47 }
 0x66f   : > { %v1126_v49 = vmul.f32 1.442695, %v1125_v48 }
 0x671   : > { %1649 = vpow2.f32 %v1126_v49 }
 0x677   : > { %v1650_v50 = vpop.eup %1649 }
 0x678   : > { %v1128_v51 = vsel %vm599_vm2, %v1650_v50, 0.0 }
 0x679   : > { %1129 = vadd.xlane.f32.xlu0 %v1128_v51 }
 0x68b   : > { %v1210_v55 = vpop.xlane.xlu1 %1209 }
 0x68c   : > { %v1211_v56 = vsub.f32 %v1207_v41, %v1210_v55 }
 0x68e   : > { %v1212_v57 = vmul.f32 1.442695, %v1211_v56 }
 0x690   : > { %1651 = vpow2.f32 %v1212_v57 }
 0x696   : > { %v1652_v58 = vpop.eup %1651 }
 0x697   : > { %v1214_v59 = vsel %vm599_vm2, %v1652_v58, 0.0 }
 0x698   : > { %1215 = vadd.xlane.f32.xlu2 %v1214_v59 }
 0x6ec   : > { %v1130_v0 = vpop.xlane.xlu0 %1129 }
 0x6ed   : > { %1653 = vrcp.f32 %v1130_v0 }
 0x6f3   : > { %v1654_v1 = vpop.eup %1653 }
 0x6f4   : > { %v1132_v2 = vmul.f32 %v1654_v1, %v1130_v0 }
 0x6f6   : > { %v1133_v3 = vsub.f32 2.0, %v1132_v2 }
 0x6f8   : > { %v1134_v4 = vmul.f32 %v1654_v1, %v1133_v3 }
 0x6fa   : > { %v1135_v5 = vmul.f32 %v1650_v50, %v1134_v4 }
 0x6fc   : > { %v1136_v6 = vpack.c.bf16 %v1135_v5, %v1135_v5 }
 0x6fe   : > { %1539 = vmatmul.msk.bf16.vlgmr.msra.gmra.mxu3 %vm599_vm2, %v1136_v6 }
 0x70b   : > { %v1216_v7 = vpop.xlane.xlu2 %1215 }
 0x70c   : > { %1655 = vrcp.f32 %v1216_v7 }
 0x712   : > { %v1656_v8 = vpop.eup %1655 }
 0x713   : > { %v1218_v9 = vmul.f32 %v1656_v8, %v1216_v7 }
 0x715   : > { %v1219_v10 = vsub.f32 2.0, %v1218_v9 }
 0x717   : > { %v1220_v11 = vmul.f32 %v1656_v8, %v1219_v10 }
 0x719   : > { %v1221_v12 = vmul.f32 %v1652_v58, %v1220_v11 }
 0x71b   : > { %v1222_v13 = vpack.c.bf16 %v1221_v12, %v1221_v12 }
 0x71d   : > { %1546 = vmatmul.msk.bf16.vlgmr.msrb.gmra.mxu1 %vm599_vm2, %v1222_v13 }
 0x781   : > { %v1179_v14 = vpop.f32.mrf.mxu3 }
 0x782   : > { %v1183_v17 = vadd.f32 %v1179_v14, %v1097_v37 }
 0x789   : > { %v1181_v15 = vpop.f32.mrf.mxu3 }
 0x79a   : > { %v1265_v28 = vpop.f32.mrf.mxu1 }
 0x79b   : > { %v1269_v19 = vadd.f32 %v1265_v28, %v1183_v17 }
 0x79d   : > { %v1274_v32 = vadd.f32 %v1622_v18, %v1269_v19 }
 0x79f   : > { %v1275_v20 = vadd.f32 %v1274_v32, %v1881_v16  ;;  %v1623_v16 = vld [vmem:[%s2027_s7] ss:$0 sm:$0xff] }
 0x7a1   : > { %1278 = vadd.xlane.f32.xlu1 %v1275_v20 }
 0x7a2   : > { %v1267_v21 = vpop.f32.mrf.mxu1 }
 0x814   : > { %v1279_v22 = vpop.xlane.xlu1 %1278 }
 0x815   : > { %v1280_v23 = vmul.f32 0.0078125, %v1279_v22 }
 0x817   : > { %v1281_v24 = vsub.f32 %v1275_v20, %v1280_v23 }
 0x819   : > { %v1282_v25 = vmul.f32 %v1281_v24, %v1281_v24 }
 0x81b   : > { %1283 = vadd.xlane.f32.xlu0 %v1282_v25 }
 0x88e   : > { %v1284_v26 = vpop.xlane.xlu0 %1283 }
 0x88f   : > { %v1285_v29 = vmul.f32 0.0078125, %v1284_v26 }
 0x891   : > { %v1286_v30 = vadd.f32 1e-05, %v1285_v29 }
 0x893   : > { %1657 = vrsqrt.f32 %v1286_v30  ;;  %vm1293_vm5 = vweird.f32 %v1286_v30 }
 0x899   : > { %v1658_v27 = vpop.eup %1657 }
 0x89a   : > { %v1288_v31 = vmul.f32 %v1658_v27, %v1286_v30  ;;  %vm1294_vm4 = vweird.f32 %v1658_v27 }
 0x89b   : > { %vm1295_vm6 = vmor %vm1293_vm5, %vm1294_vm4 }
 0x89c   : > { %v1289_v33 = vmul.f32 %v1658_v27, %v1288_v31 }
 0x89e   : > { %v1290_v34 = vmul.f32 0.5, %v1289_v33 }
 0x8a0   : > { %v1291_v35 = vsub.f32 1.5, %v1290_v34 }
 0x8a2   : > { %v1292_v36 = vmul.f32 %v1658_v27, %v1291_v35 }
 0x8a4   : > { %v1296_v37 = vsel %vm1295_vm6, %v1658_v27, %v1292_v36 }
 0x8a5   : > { %v1297_v39 = vmul.f32 %v1296_v37, %v1281_v24 }
 0x8a7   : > { %v1301_v40 = vmul.f32 %v1623_v16, %v1297_v39 }
 0x8a9   : > { %v1305_v41 = vadd.f32 %v1624_v38, %v1301_v40 }
 0x8ab   : > { %1306 = vst [vmem:[%s408_s16] sm:$0xff] %v1305_v41 }
 0x8ac PF: > { %s21_s30 = sadd.s32 1, %s1763_s30  }
 0x8ad   : > { %p18_p7 = scmp.ge.s32.totalorder %s21_s30, 4  }
 0x8af   :  { %20 = sbr.rel (!%p18_p7) target bundleno = 2 (0x2), region = 105 }
 0x8b4   :  { %1326 = vsyncpa [#allocation3], 1 }
 0x8b5   :  { %1328 = vsyncpa [#allocation3 + $0x1], 1 }
 0x8b6   :  { %1329 = vsyncpa [#allocation5], 1 }

</bundles_post_ra>
